<compile_context>
chip_gen: v7x
topology: tpu7x:2x2x1
jax: 0.10.0
libtpu: 0.0.40
codegen_flags: <defaults>
</compile_context>

<pallas_src>
import numpy as np
import jax
import jax.numpy as jnp
from jax.experimental import pallas as pl
from jax.experimental.pallas import tpu as pltpu

# ----------------- small, module-consistent hyper-parameters -----------------
B = 2
H = W = 16
HW = H * W
SCALE = 3                                   # `scale`
PLANES = 8
BASE_WIDTH = 32
WIDTH = (PLANES * BASE_WIDTH) // 64         # int(floor(planes*baseWidth/64)) = 4
INPLANES = PLANES * 4                       # expansion=4 -> residual add works
MID = WIDTH * SCALE                         # 12
OUT_CH = PLANES * 4                         # 32
EPS = 1e-5


# ------------------------------ fused Pallas kernel ---------------------------
def _mspa_fused_kernel(x_ref, w1_ref, b1s_ref, b1b_ref,
                       wmsa_ref, ms_ref, mb_ref, sprm_ref,
                       b2s_ref, b2b_ref, w3_ref, b3s_ref, b3b_ref,
                       o_ref):
    """Entire MSPA block for one batch item; everything stays in VMEM."""
    x2d = x_ref[0]                                               # (HW, INPLANES)

    # ---- conv1 (1x1) + bn1 + relu ------------------------------------------
    hid = jnp.dot(x2d, w1_ref[...], preferred_element_type=jnp.float32)
    hid = jnp.maximum(hid * b1s_ref[...] + b1b_ref[...], 0.0)    # (HW, MID)

    # zero halo rows/cols for in-kernel 'same' padding (hoisted out of loop)
    zrow = jnp.zeros((1, W, WIDTH), jnp.float32)
    zcol = jnp.zeros((H + 2, 1, WIDTH), jnp.float32)

    feats = []
    logits = []
    prev = None
    for i in range(SCALE):                                       # chained splits
        spx = hid[:, i * WIDTH:(i + 1) * WIDTH]                  # (HW, WIDTH)
        inp = spx if i == 0 else prev + spx

        # halo padding built directly in VMEM
        xp = jnp.concatenate([zrow, inp.reshape(H, W, WIDTH), zrow], axis=0)
        xp = jnp.concatenate([zcol, xp, zcol], axis=1)           # (H+2, W+2, WIDTH)

        # im2col: one (HW, 9*WIDTH) x (9*WIDTH, WIDTH) MXU contraction
        patches = [xp[dy:dy + H, dx:dx + W, :].reshape(HW, WIDTH)
                   for dy in range(3) for dx in range(3)]
        pmat = jnp.concatenate(patches, axis=-1)                 # (HW, 9*WIDTH)
        feat = jnp.dot(pmat, wmsa_ref[i], preferred_element_type=jnp.float32)
        feat = feat * ms_ref[i] + mb_ref[i]                      # conv3x3 + bn
        feats.append(feat)
        prev = feat

        # SPR: pyramid pooling + depthwise FC collapsed into one weighted sum
        z = jnp.sum(feat * sprm_ref[...], axis=0, keepdims=True)  # (1, WIDTH)
        logits.append(jax.nn.sigmoid(z))

    attn = jax.nn.softmax(jnp.concatenate(logits, axis=0), axis=0)  # (SCALE, WIDTH)
    msa_out = jnp.concatenate(
        [feats[i] * attn[i:i + 1, :] for i in range(SCALE)], axis=-1)  # (HW, MID)

    # ---- bn2 + relu + conv3 (1x1) + bn3 + residual + relu ------------------
    hmid = jnp.maximum(msa_out * b2s_ref[...] + b2b_ref[...], 0.0)
    y = jnp.dot(hmid, w3_ref[...], preferred_element_type=jnp.float32)
    y = y * b3s_ref[...] + b3b_ref[...] + x2d
    o_ref[0] = jnp.maximum(y, 0.0)


# ------------------------------ forward wrapper --------------------------------
def mspa_block_forward(x_nchw, kp):
    b = x_nchw.shape[0]
    # NCHW -> (B, HW, C) channels-last (only layout op outside the kernel)
    x_cl = jnp.transpose(x_nchw, (0, 2, 3, 1)).reshape(b, HW, INPLANES)

    out = pl.pallas_call(
        _mspa_fused_kernel,
        out_shape=jax.ShapeDtypeStruct((b, HW, OUT_CH), jnp.float32),
        grid=(b,),
        in_specs=[
            pl.BlockSpec((1, HW, INPLANES), lambda i: (i, 0, 0)),          # x
            pl.BlockSpec((INPLANES, MID), lambda i: (0, 0)),               # w1
            pl.BlockSpec((1, MID), lambda i: (0, 0)),                      # bn1 scale
            pl.BlockSpec((1, MID), lambda i: (0, 0)),                      # bn1 bias
            pl.BlockSpec((SCALE, 9 * WIDTH, WIDTH), lambda i: (0, 0, 0)),  # msa weights
            pl.BlockSpec((SCALE, 1, WIDTH), lambda i: (0, 0, 0)),          # msa bn scale
            pl.BlockSpec((SCALE, 1, WIDTH), lambda i: (0, 0, 0)),          # msa bn bias
            pl.BlockSpec((HW, WIDTH), lambda i: (0, 0)),                   # SPR map M
            pl.BlockSpec((1, MID), lambda i: (0, 0)),                      # bn2 scale
            pl.BlockSpec((1, MID), lambda i: (0, 0)),                      # bn2 bias
            pl.BlockSpec((MID, OUT_CH), lambda i: (0, 0)),                 # w3
            pl.BlockSpec((1, OUT_CH), lambda i: (0, 0)),                   # bn3 scale
            pl.BlockSpec((1, OUT_CH), lambda i: (0, 0)),                   # bn3 bias
        ],
        out_specs=pl.BlockSpec((1, HW, OUT_CH), lambda i: (i, 0, 0)),
        compiler_params=pltpu.CompilerParams(dimension_semantics=("parallel",)),
    )(x_cl, kp['w1'], kp['bn1_s'], kp['bn1_b'],
      kp['msa_w'], kp['msa_s'], kp['msa_b'], kp['spr_m'],
      kp['bn2_s'], kp['bn2_b'], kp['w3'], kp['bn3_s'], kp['bn3_b'])

    out = out.reshape(b, H, W, OUT_CH)
    return jnp.transpose(out, (0, 3, 1, 2))                      # NHWC -> NCHW


# ------------------------------ params / reference -----------------------------
def _fold_bn(gamma, beta, mean, var):
    s = gamma / jnp.sqrt(var + EPS)
    return s[None, :].astype(jnp.float32), (beta - mean * s)[None, :].astype(jnp.float32)


def make_params(key):
    ks = jax.random.split(key, 16)

    def nrm(k, shape, sc=0.1):
        return (sc * jax.random.normal(k, shape)).astype(jnp.float32)

    def bn(k, c):
        k1, k2, k3, k4 = jax.random.split(k, 4)
        gamma = 1.0 + 0.1 * jax.random.normal(k1, (c,))
        beta = 0.1 * jax.random.normal(k2, (c,))
        mean = 0.05 * jax.random.normal(k3, (c,))
        var = 1.0 + 0.1 * jax.random.uniform(k4, (c,))
        return _fold_bn(gamma, beta, mean, var)

    p = {}
    p['w1'] = nrm(ks[0], (INPLANES, MID))
    p['bn1_s'], p['bn1_b'] = bn(ks[1], MID)
    p['msa_w'] = [nrm(ks[2 + i], (9, WIDTH, WIDTH)) for i in range(SCALE)]
    msa_bn = [bn(ks[5 + i], WIDTH) for i in range(SCALE)]
    p['msa_bn_s'] = [sb[0] for sb in msa_bn]
    p['msa_bn_b'] = [sb[1] for sb in msa_bn]
    p['spr_w'] = nrm(ks[8], (21, WIDTH), 0.3)
    p['bn2_s'], p['bn2_b'] = bn(ks[9], MID)
    p['w3'] = nrm(ks[10], (MID, OUT_CH))
    p['bn3_s'], p['bn3_b'] = bn(ks[11], OUT_CH)
    return p


def prepare_kernel_params(p):
    """One-time reshaping / folding of the raw params into kernel-ready arrays."""
    kp = {}
    kp['w1'] = p['w1']                                       # (INPLANES, MID)
    kp['bn1_s'], kp['bn1_b'] = p['bn1_s'], p['bn1_b']        # (1, MID)
    # im2col weight: (9, WIDTH, WIDTH) -> (9*WIDTH, WIDTH), row = k*WIDTH + cin
    kp['msa_w'] = jnp.stack([w.reshape(9 * WIDTH, WIDTH) for w in p['msa_w']])
    kp['msa_s'] = jnp.stack(p['msa_bn_s'])                   # (SCALE, 1, WIDTH)
    kp['msa_b'] = jnp.stack(p['msa_bn_b'])

    # Collapse SPR pyramid pooling (global + 2x2 + 4x4 adaptive avg = 21 bins)
    # and the depthwise FC into one (HW, WIDTH) map:  M = P^T @ W_fc.
    pool = np.zeros((21, HW), np.float32)
    pool[0, :] = 1.0 / HW
    row = 1
    for g in (2, 4):
        bh, bw = H // g, W // g
        for gi in range(g):
            for gj in range(g):
                blk = np.zeros((H, W), np.float32)
                blk[gi * bh:(gi + 1) * bh, gj * bw:(gj + 1) * bw] = 1.0 / (bh * bw)
                pool[row] = blk.reshape(-1)
                row += 1
    kp['spr_m'] = jnp.matmul(jnp.asarray(pool.T), p['spr_w'],
                             precision=jax.lax.Precision.HIGHEST)   # (HW, WIDTH)

    kp['bn2_s'], kp['bn2_b'] = p['bn2_s'], p['bn2_b']        # (1, MID)
    kp['w3'] = p['w3']                                       # (MID, OUT_CH)
    kp['bn3_s'], kp['bn3_b'] = p['bn3_s'], p['bn3_b']        # (1, OUT_CH)
    return kp


def ref_forward(x_nchw, p):
    hi_prec = jax.lax.Precision.HIGHEST
    x = jnp.transpose(x_nchw, (0, 2, 3, 1))
    hid = jnp.einsum('bhwc,cd->bhwd', x, p['w1'], precision=hi_prec)
    hid = jnp.maximum(hid * p['bn1_s'][0] + p['bn1_b'][0], 0.0)
    feats = []
    for i in range(SCALE):
        spx_i = hid[..., i * WIDTH:(i + 1) * WIDTH]
        inp = spx_i if i == 0 else feats[-1] + spx_i
        xp = jnp.pad(inp, ((0, 0), (1, 1), (1, 1), (0, 0)))
        acc = 0.0
        for dy in range(3):
            for dx in range(3):
                acc = acc + jnp.einsum('bhwc,cd->bhwd',
                                       xp[:, dy:dy + H, dx:dx + W, :],
                                       p['msa_w'][i][dy * 3 + dx], precision=hi_prec)
        feats.append(acc * p['msa_bn_s'][i][0] + p['msa_bn_b'][i][0])
    feats5 = jnp.stack(feats, axis=1)
    logits = []
    for i in range(SCALE):
        xs = feats[i]
        pools = [jnp.mean(xs, axis=(1, 2))[:, None, :]]
        for g in (2, 4):
            bh, bw = H // g, W // g
            r = xs.reshape(B, g, bh, g, bw, WIDTH).mean(axis=(2, 4))
            pools.append(r.reshape(B, g * g, WIDTH))
        y = jnp.concatenate(pools, axis=1)                    # (B, 21, C)
        z = jnp.sum(y * p['spr_w'][None], axis=1)
        logits.append(jax.nn.sigmoid(z))
    lg = jnp.stack(logits, axis=1)                            # (B, S, C)
    attn = jax.nn.softmax(lg, axis=1)
    weighted = feats5 * attn[:, :, None, None, :]
    msa_out = jnp.transpose(weighted, (0, 2, 3, 1, 4)).reshape(B, H, W, MID)
    hmid = jnp.maximum(msa_out * p['bn2_s'][0] + p['bn2_b'][0], 0.0)
    y = jnp.einsum('bhwc,cd->bhwd', hmid, p['w3'], precision=hi_prec)
    y = y * p['bn3_s'][0] + p['bn3_b'][0] + x
    return jnp.transpose(jnp.maximum(y, 0.0), (0, 3, 1, 2))


# ----------------------------------- main --------------------------------------
if __name__ == "__main__":
    key = jax.random.PRNGKey(0)
    kx, kparam = jax.random.split(key)
    x = jax.random.normal(kx, (B, INPLANES, H, W), jnp.float32)
    params = make_params(kparam)
    kparams = prepare_kernel_params(params)

    fwd = jax.jit(mspa_block_forward)
    out = jax.block_until_ready(fwd(x, kparams))
    assert out.shape == (B, OUT_CH, H, W)

    ref = ref_forward(x, params)
    np.testing.assert_allclose(np.asarray(out), np.asarray(ref), rtol=2e-3, atol=2e-3)
    print("KERNEL_OK")
</pallas_src>

<mosaic_0001>
module attributes {stable_mosaic.version = 11 : i64} {
  func.func @_mspa_fused_kernel(%arg0: i32, %arg1: memref<1x256x32xf32, #tpu.memory_space<vmem>>, %arg2: memref<32x12xf32, #tpu.memory_space<vmem>>, %arg3: memref<1x12xf32, #tpu.memory_space<vmem>>, %arg4: memref<1x12xf32, #tpu.memory_space<vmem>>, %arg5: memref<3x36x4xf32, #tpu.memory_space<vmem>>, %arg6: memref<3x1x4xf32, #tpu.memory_space<vmem>>, %arg7: memref<3x1x4xf32, #tpu.memory_space<vmem>>, %arg8: memref<256x4xf32, #tpu.memory_space<vmem>>, %arg9: memref<1x12xf32, #tpu.memory_space<vmem>>, %arg10: memref<1x12xf32, #tpu.memory_space<vmem>>, %arg11: memref<12x32xf32, #tpu.memory_space<vmem>>, %arg12: memref<1x32xf32, #tpu.memory_space<vmem>>, %arg13: memref<1x32xf32, #tpu.memory_space<vmem>>, %arg14: memref<1x256x32xf32, #tpu.memory_space<vmem>>) attributes {dimension_semantics = [#tpu.dimension_semantics<parallel>], iteration_bounds = array<i64: 2>, scalar_prefetch = 0 : i64, scratch_operands = 0 : i64, tpu.core_type = #tpu.core_type<tc>, window_params = [{transform_indices = @transform_0, window_bounds = array<i64: 1, 256, 32>}, {pipeline_mode = #tpu.pipeline_mode<synchronous>, transform_indices = @transform_1, window_bounds = array<i64: 32, 12>}, {pipeline_mode = #tpu.pipeline_mode<synchronous>, transform_indices = @transform_2, window_bounds = array<i64: 1, 12>}, {pipeline_mode = #tpu.pipeline_mode<synchronous>, transform_indices = @transform_3, window_bounds = array<i64: 1, 12>}, {pipeline_mode = #tpu.pipeline_mode<synchronous>, transform_indices = @transform_4, window_bounds = array<i64: 3, 36, 4>}, {pipeline_mode = #tpu.pipeline_mode<synchronous>, transform_indices = @transform_5, window_bounds = array<i64: 3, 1, 4>}, {pipeline_mode = #tpu.pipeline_mode<synchronous>, transform_indices = @transform_6, window_bounds = array<i64: 3, 1, 4>}, {pipeline_mode = #tpu.pipeline_mode<synchronous>, transform_indices = @transform_7, window_bounds = array<i64: 256, 4>}, {pipeline_mode = #tpu.pipeline_mode<synchronous>, transform_indices = @transform_8, window_bounds = array<i64: 1, 12>}, {pipeline_mode = #tpu.pipeline_mode<synchronous>, transform_indices = @transform_9, window_bounds = array<i64: 1, 12>}, {pipeline_mode = #tpu.pipeline_mode<synchronous>, transform_indices = @transform_10, window_bounds = array<i64: 12, 32>}, {pipeline_mode = #tpu.pipeline_mode<synchronous>, transform_indices = @transform_11, window_bounds = array<i64: 1, 32>}, {pipeline_mode = #tpu.pipeline_mode<synchronous>, transform_indices = @transform_12, window_bounds = array<i64: 1, 32>}, {transform_indices = @transform_13, window_bounds = array<i64: 1, 256, 32>}]} {
    %c0 = arith.constant 0 : index
    %c0_0 = arith.constant 0 : index
    %c0_1 = arith.constant 0 : index
    %0 = vector.load %arg1[%c0, %c0_0, %c0_1] : memref<1x256x32xf32, #tpu.memory_space<vmem>>, vector<1x256x32xf32>
    %1 = vector.shape_cast %0 : vector<1x256x32xf32> to vector<256x32xf32>
    %c0_2 = arith.constant 0 : index
    %c0_3 = arith.constant 0 : index
    %2 = vector.load %arg2[%c0_2, %c0_3] : memref<32x12xf32, #tpu.memory_space<vmem>>, vector<32x12xf32>
    %cst = arith.constant dense<0.000000e+00> : vector<256x12xf32>
    %3 = tpu.matmul %1, %2, %cst {dimension_numbers = #tpu.dot_dimension_numbers<[1], [0], [0], [1], [0, 0, 1, 1], [], []>} : vector<256x32xf32>, vector<32x12xf32>, vector<256x12xf32> -> vector<256x12xf32>
    %c0_4 = arith.constant 0 : index
    %c0_5 = arith.constant 0 : index
    %4 = vector.load %arg3[%c0_4, %c0_5] : memref<1x12xf32, #tpu.memory_space<vmem>>, vector<1x12xf32>
    %5 = vector.broadcast %4 : vector<1x12xf32> to vector<256x12xf32>
    %6 = arith.mulf %3, %5 : vector<256x12xf32>
    %c0_6 = arith.constant 0 : index
    %c0_7 = arith.constant 0 : index
    %7 = vector.load %arg4[%c0_6, %c0_7] : memref<1x12xf32, #tpu.memory_space<vmem>>, vector<1x12xf32>
    %8 = vector.broadcast %7 : vector<1x12xf32> to vector<256x12xf32>
    %9 = arith.addf %6, %8 : vector<256x12xf32>
    %cst_8 = arith.constant 0.000000e+00 : f32
    %10 = vector.broadcast %cst_8 : f32 to vector<256x12xf32>
    %11 = arith.maximumf %9, %10 : vector<256x12xf32>
    %cst_9 = arith.constant 0.000000e+00 : f32
    %12 = vector.broadcast %cst_9 : f32 to vector<1x16x4xf32>
    %cst_10 = arith.constant 0.000000e+00 : f32
    %13 = vector.broadcast %cst_10 : f32 to vector<18x1x4xf32>
    %14 = vector.extract_strided_slice %11 {offsets = [0, 0], sizes = [256, 4], strides = [1, 1]} : vector<256x12xf32> to vector<256x4xf32>
    %15 = vector.shape_cast %14 : vector<256x4xf32> to vector<16x16x4xf32>
    %16 = tpu.concatenate %12, %15, %12 in 0 : vector<1x16x4xf32>, vector<16x16x4xf32>, vector<1x16x4xf32> -> vector<18x16x4xf32>
    %17 = tpu.concatenate %13, %16, %13 in 1 : vector<18x1x4xf32>, vector<18x16x4xf32>, vector<18x1x4xf32> -> vector<18x18x4xf32>
    %18 = vector.extract_strided_slice %17 {offsets = [0, 0, 0], sizes = [16, 16, 4], strides = [1, 1, 1]} : vector<18x18x4xf32> to vector<16x16x4xf32>
    %19 = vector.shape_cast %18 : vector<16x16x4xf32> to vector<256x4xf32>
    %20 = vector.extract_strided_slice %17 {offsets = [0, 1, 0], sizes = [16, 16, 4], strides = [1, 1, 1]} : vector<18x18x4xf32> to vector<16x16x4xf32>
    %21 = vector.shape_cast %20 : vector<16x16x4xf32> to vector<256x4xf32>
    %22 = vector.extract_strided_slice %17 {offsets = [0, 2, 0], sizes = [16, 16, 4], strides = [1, 1, 1]} : vector<18x18x4xf32> to vector<16x16x4xf32>
    %23 = vector.shape_cast %22 : vector<16x16x4xf32> to vector<256x4xf32>
    %24 = vector.extract_strided_slice %17 {offsets = [1, 0, 0], sizes = [16, 16, 4], strides = [1, 1, 1]} : vector<18x18x4xf32> to vector<16x16x4xf32>
    %25 = vector.shape_cast %24 : vector<16x16x4xf32> to vector<256x4xf32>
    %26 = vector.extract_strided_slice %17 {offsets = [1, 1, 0], sizes = [16, 16, 4], strides = [1, 1, 1]} : vector<18x18x4xf32> to vector<16x16x4xf32>
    %27 = vector.shape_cast %26 : vector<16x16x4xf32> to vector<256x4xf32>
    %28 = vector.extract_strided_slice %17 {offsets = [1, 2, 0], sizes = [16, 16, 4], strides = [1, 1, 1]} : vector<18x18x4xf32> to vector<16x16x4xf32>
    %29 = vector.shape_cast %28 : vector<16x16x4xf32> to vector<256x4xf32>
    %30 = vector.extract_strided_slice %17 {offsets = [2, 0, 0], sizes = [16, 16, 4], strides = [1, 1, 1]} : vector<18x18x4xf32> to vector<16x16x4xf32>
    %31 = vector.shape_cast %30 : vector<16x16x4xf32> to vector<256x4xf32>
    %32 = vector.extract_strided_slice %17 {offsets = [2, 1, 0], sizes = [16, 16, 4], strides = [1, 1, 1]} : vector<18x18x4xf32> to vector<16x16x4xf32>
    %33 = vector.shape_cast %32 : vector<16x16x4xf32> to vector<256x4xf32>
    %34 = vector.extract_strided_slice %17 {offsets = [2, 2, 0], sizes = [16, 16, 4], strides = [1, 1, 1]} : vector<18x18x4xf32> to vector<16x16x4xf32>
    %35 = vector.shape_cast %34 : vector<16x16x4xf32> to vector<256x4xf32>
    %36 = tpu.concatenate %19, %21, %23, %25, %27, %29, %31, %33, %35 in 1 : vector<256x4xf32>, vector<256x4xf32>, vector<256x4xf32>, vector<256x4xf32>, vector<256x4xf32>, vector<256x4xf32>, vector<256x4xf32>, vector<256x4xf32>, vector<256x4xf32> -> vector<256x36xf32>
    %c0_11 = arith.constant 0 : index
    %c0_12 = arith.constant 0 : index
    %c0_13 = arith.constant 0 : index
    %37 = vector.load %arg5[%c0_11, %c0_12, %c0_13] : memref<3x36x4xf32, #tpu.memory_space<vmem>>, vector<1x36x4xf32>
    %38 = vector.shape_cast %37 : vector<1x36x4xf32> to vector<36x4xf32>
    %cst_14 = arith.constant dense<0.000000e+00> : vector<256x4xf32>
    %39 = tpu.matmul %36, %38, %cst_14 {dimension_numbers = #tpu.dot_dimension_numbers<[1], [0], [0], [1], [0, 0, 1, 1], [], []>} : vector<256x36xf32>, vector<36x4xf32>, vector<256x4xf32> -> vector<256x4xf32>
    %c0_15 = arith.constant 0 : index
    %c0_16 = arith.constant 0 : index
    %c0_17 = arith.constant 0 : index
    %40 = vector.load %arg6[%c0_15, %c0_16, %c0_17] : memref<3x1x4xf32, #tpu.memory_space<vmem>>, vector<1x1x4xf32>
    %41 = vector.shape_cast %40 : vector<1x1x4xf32> to vector<1x4xf32>
    %42 = vector.broadcast %41 : vector<1x4xf32> to vector<256x4xf32>
    %43 = arith.mulf %39, %42 : vector<256x4xf32>
    %c0_18 = arith.constant 0 : index
    %c0_19 = arith.constant 0 : index
    %c0_20 = arith.constant 0 : index
    %44 = vector.load %arg7[%c0_18, %c0_19, %c0_20] : memref<3x1x4xf32, #tpu.memory_space<vmem>>, vector<1x1x4xf32>
    %45 = vector.shape_cast %44 : vector<1x1x4xf32> to vector<1x4xf32>
    %46 = vector.broadcast %45 : vector<1x4xf32> to vector<256x4xf32>
    %47 = arith.addf %43, %46 : vector<256x4xf32>
    %c0_21 = arith.constant 0 : index
    %c0_22 = arith.constant 0 : index
    %48 = vector.load %arg8[%c0_21, %c0_22] : memref<256x4xf32, #tpu.memory_space<vmem>>, vector<256x4xf32>
    %49 = arith.mulf %47, %48 : vector<256x4xf32>
    %cst_23 = arith.constant dense<0.000000e+00> : vector<4xf32>
    %50 = vector.multi_reduction <add>, %49, %cst_23 [0] : vector<256x4xf32> to vector<4xf32>
    %51 = vector.shape_cast %50 : vector<4xf32> to vector<1x4xf32>
    %52 = arith.negf %51 : vector<1x4xf32>
    %53 = math.exp %52 : vector<1x4xf32>
    %cst_24 = arith.constant 1.000000e+00 : f32
    %54 = vector.broadcast %cst_24 : f32 to vector<1x4xf32>
    %55 = arith.addf %54, %53 : vector<1x4xf32>
    %56 = arith.divf %54, %55 : vector<1x4xf32>
    %57 = vector.extract_strided_slice %11 {offsets = [0, 4], sizes = [256, 4], strides = [1, 1]} : vector<256x12xf32> to vector<256x4xf32>
    %58 = arith.addf %47, %57 : vector<256x4xf32>
    %59 = vector.shape_cast %58 : vector<256x4xf32> to vector<16x16x4xf32>
    %60 = tpu.concatenate %12, %59, %12 in 0 : vector<1x16x4xf32>, vector<16x16x4xf32>, vector<1x16x4xf32> -> vector<18x16x4xf32>
    %61 = tpu.concatenate %13, %60, %13 in 1 : vector<18x1x4xf32>, vector<18x16x4xf32>, vector<18x1x4xf32> -> vector<18x18x4xf32>
    %62 = vector.extract_strided_slice %61 {offsets = [0, 0, 0], sizes = [16, 16, 4], strides = [1, 1, 1]} : vector<18x18x4xf32> to vector<16x16x4xf32>
    %63 = vector.shape_cast %62 : vector<16x16x4xf32> to vector<256x4xf32>
    %64 = vector.extract_strided_slice %61 {offsets = [0, 1, 0], sizes = [16, 16, 4], strides = [1, 1, 1]} : vector<18x18x4xf32> to vector<16x16x4xf32>
    %65 = vector.shape_cast %64 : vector<16x16x4xf32> to vector<256x4xf32>
    %66 = vector.extract_strided_slice %61 {offsets = [0, 2, 0], sizes = [16, 16, 4], strides = [1, 1, 1]} : vector<18x18x4xf32> to vector<16x16x4xf32>
    %67 = vector.shape_cast %66 : vector<16x16x4xf32> to vector<256x4xf32>
    %68 = vector.extract_strided_slice %61 {offsets = [1, 0, 0], sizes = [16, 16, 4], strides = [1, 1, 1]} : vector<18x18x4xf32> to vector<16x16x4xf32>
    %69 = vector.shape_cast %68 : vector<16x16x4xf32> to vector<256x4xf32>
    %70 = vector.extract_strided_slice %61 {offsets = [1, 1, 0], sizes = [16, 16, 4], strides = [1, 1, 1]} : vector<18x18x4xf32> to vector<16x16x4xf32>
    %71 = vector.shape_cast %70 : vector<16x16x4xf32> to vector<256x4xf32>
    %72 = vector.extract_strided_slice %61 {offsets = [1, 2, 0], sizes = [16, 16, 4], strides = [1, 1, 1]} : vector<18x18x4xf32> to vector<16x16x4xf32>
    %73 = vector.shape_cast %72 : vector<16x16x4xf32> to vector<256x4xf32>
    %74 = vector.extract_strided_slice %61 {offsets = [2, 0, 0], sizes = [16, 16, 4], strides = [1, 1, 1]} : vector<18x18x4xf32> to vector<16x16x4xf32>
    %75 = vector.shape_cast %74 : vector<16x16x4xf32> to vector<256x4xf32>
    %76 = vector.extract_strided_slice %61 {offsets = [2, 1, 0], sizes = [16, 16, 4], strides = [1, 1, 1]} : vector<18x18x4xf32> to vector<16x16x4xf32>
    %77 = vector.shape_cast %76 : vector<16x16x4xf32> to vector<256x4xf32>
    %78 = vector.extract_strided_slice %61 {offsets = [2, 2, 0], sizes = [16, 16, 4], strides = [1, 1, 1]} : vector<18x18x4xf32> to vector<16x16x4xf32>
    %79 = vector.shape_cast %78 : vector<16x16x4xf32> to vector<256x4xf32>
    %80 = tpu.concatenate %63, %65, %67, %69, %71, %73, %75, %77, %79 in 1 : vector<256x4xf32>, vector<256x4xf32>, vector<256x4xf32>, vector<256x4xf32>, vector<256x4xf32>, vector<256x4xf32>, vector<256x4xf32>, vector<256x4xf32>, vector<256x4xf32> -> vector<256x36xf32>
    %c1 = arith.constant 1 : index
    %c0_25 = arith.constant 0 : index
    %c0_26 = arith.constant 0 : index
    %81 = vector.load %arg5[%c1, %c0_25, %c0_26] : memref<3x36x4xf32, #tpu.memory_space<vmem>>, vector<1x36x4xf32>
    %82 = vector.shape_cast %81 : vector<1x36x4xf32> to vector<36x4xf32>
    %cst_27 = arith.constant dense<0.000000e+00> : vector<256x4xf32>
    %83 = tpu.matmul %80, %82, %cst_27 {dimension_numbers = #tpu.dot_dimension_numbers<[1], [0], [0], [1], [0, 0, 1, 1], [], []>} : vector<256x36xf32>, vector<36x4xf32>, vector<256x4xf32> -> vector<256x4xf32>
    %c1_28 = arith.constant 1 : index
    %c0_29 = arith.constant 0 : index
    %c0_30 = arith.constant 0 : index
    %84 = vector.load %arg6[%c1_28, %c0_29, %c0_30] : memref<3x1x4xf32, #tpu.memory_space<vmem>>, vector<1x1x4xf32>
    %85 = vector.shape_cast %84 : vector<1x1x4xf32> to vector<1x4xf32>
    %86 = vector.broadcast %85 : vector<1x4xf32> to vector<256x4xf32>
    %87 = arith.mulf %83, %86 : vector<256x4xf32>
    %c1_31 = arith.constant 1 : index
    %c0_32 = arith.constant 0 : index
    %c0_33 = arith.constant 0 : index
    %88 = vector.load %arg7[%c1_31, %c0_32, %c0_33] : memref<3x1x4xf32, #tpu.memory_space<vmem>>, vector<1x1x4xf32>
    %89 = vector.shape_cast %88 : vector<1x1x4xf32> to vector<1x4xf32>
    %90 = vector.broadcast %89 : vector<1x4xf32> to vector<256x4xf32>
    %91 = arith.addf %87, %90 : vector<256x4xf32>
    %c0_34 = arith.constant 0 : index
    %c0_35 = arith.constant 0 : index
    %92 = vector.load %arg8[%c0_34, %c0_35] : memref<256x4xf32, #tpu.memory_space<vmem>>, vector<256x4xf32>
    %93 = arith.mulf %91, %92 : vector<256x4xf32>
    %cst_36 = arith.constant dense<0.000000e+00> : vector<4xf32>
    %94 = vector.multi_reduction <add>, %93, %cst_36 [0] : vector<256x4xf32> to vector<4xf32>
    %95 = vector.shape_cast %94 : vector<4xf32> to vector<1x4xf32>
    %96 = arith.negf %95 : vector<1x4xf32>
    %97 = math.exp %96 : vector<1x4xf32>
    %cst_37 = arith.constant 1.000000e+00 : f32
    %98 = vector.broadcast %cst_37 : f32 to vector<1x4xf32>
    %99 = arith.addf %98, %97 : vector<1x4xf32>
    %100 = arith.divf %98, %99 : vector<1x4xf32>
    %101 = vector.extract_strided_slice %11 {offsets = [0, 8], sizes = [256, 4], strides = [1, 1]} : vector<256x12xf32> to vector<256x4xf32>
    %102 = arith.addf %91, %101 : vector<256x4xf32>
    %103 = vector.shape_cast %102 : vector<256x4xf32> to vector<16x16x4xf32>
    %104 = tpu.concatenate %12, %103, %12 in 0 : vector<1x16x4xf32>, vector<16x16x4xf32>, vector<1x16x4xf32> -> vector<18x16x4xf32>
    %105 = tpu.concatenate %13, %104, %13 in 1 : vector<18x1x4xf32>, vector<18x16x4xf32>, vector<18x1x4xf32> -> vector<18x18x4xf32>
    %106 = vector.extract_strided_slice %105 {offsets = [0, 0, 0], sizes = [16, 16, 4], strides = [1, 1, 1]} : vector<18x18x4xf32> to vector<16x16x4xf32>
    %107 = vector.shape_cast %106 : vector<16x16x4xf32> to vector<256x4xf32>
    %108 = vector.extract_strided_slice %105 {offsets = [0, 1, 0], sizes = [16, 16, 4], strides = [1, 1, 1]} : vector<18x18x4xf32> to vector<16x16x4xf32>
    %109 = vector.shape_cast %108 : vector<16x16x4xf32> to vector<256x4xf32>
    %110 = vector.extract_strided_slice %105 {offsets = [0, 2, 0], sizes = [16, 16, 4], strides = [1, 1, 1]} : vector<18x18x4xf32> to vector<16x16x4xf32>
    %111 = vector.shape_cast %110 : vector<16x16x4xf32> to vector<256x4xf32>
    %112 = vector.extract_strided_slice %105 {offsets = [1, 0, 0], sizes = [16, 16, 4], strides = [1, 1, 1]} : vector<18x18x4xf32> to vector<16x16x4xf32>
    %113 = vector.shape_cast %112 : vector<16x16x4xf32> to vector<256x4xf32>
    %114 = vector.extract_strided_slice %105 {offsets = [1, 1, 0], sizes = [16, 16, 4], strides = [1, 1, 1]} : vector<18x18x4xf32> to vector<16x16x4xf32>
    %115 = vector.shape_cast %114 : vector<16x16x4xf32> to vector<256x4xf32>
    %116 = vector.extract_strided_slice %105 {offsets = [1, 2, 0], sizes = [16, 16, 4], strides = [1, 1, 1]} : vector<18x18x4xf32> to vector<16x16x4xf32>
    %117 = vector.shape_cast %116 : vector<16x16x4xf32> to vector<256x4xf32>
    %118 = vector.extract_strided_slice %105 {offsets = [2, 0, 0], sizes = [16, 16, 4], strides = [1, 1, 1]} : vector<18x18x4xf32> to vector<16x16x4xf32>
    %119 = vector.shape_cast %118 : vector<16x16x4xf32> to vector<256x4xf32>
    %120 = vector.extract_strided_slice %105 {offsets = [2, 1, 0], sizes = [16, 16, 4], strides = [1, 1, 1]} : vector<18x18x4xf32> to vector<16x16x4xf32>
    %121 = vector.shape_cast %120 : vector<16x16x4xf32> to vector<256x4xf32>
    %122 = vector.extract_strided_slice %105 {offsets = [2, 2, 0], sizes = [16, 16, 4], strides = [1, 1, 1]} : vector<18x18x4xf32> to vector<16x16x4xf32>
    %123 = vector.shape_cast %122 : vector<16x16x4xf32> to vector<256x4xf32>
    %124 = tpu.concatenate %107, %109, %111, %113, %115, %117, %119, %121, %123 in 1 : vector<256x4xf32>, vector<256x4xf32>, vector<256x4xf32>, vector<256x4xf32>, vector<256x4xf32>, vector<256x4xf32>, vector<256x4xf32>, vector<256x4xf32>, vector<256x4xf32> -> vector<256x36xf32>
    %c2 = arith.constant 2 : index
    %c0_38 = arith.constant 0 : index
    %c0_39 = arith.constant 0 : index
    %125 = vector.load %arg5[%c2, %c0_38, %c0_39] : memref<3x36x4xf32, #tpu.memory_space<vmem>>, vector<1x36x4xf32>
    %126 = vector.shape_cast %125 : vector<1x36x4xf32> to vector<36x4xf32>
    %cst_40 = arith.constant dense<0.000000e+00> : vector<256x4xf32>
    %127 = tpu.matmul %124, %126, %cst_40 {dimension_numbers = #tpu.dot_dimension_numbers<[1], [0], [0], [1], [0, 0, 1, 1], [], []>} : vector<256x36xf32>, vector<36x4xf32>, vector<256x4xf32> -> vector<256x4xf32>
    %c2_41 = arith.constant 2 : index
    %c0_42 = arith.constant 0 : index
    %c0_43 = arith.constant 0 : index
    %128 = vector.load %arg6[%c2_41, %c0_42, %c0_43] : memref<3x1x4xf32, #tpu.memory_space<vmem>>, vector<1x1x4xf32>
    %129 = vector.shape_cast %128 : vector<1x1x4xf32> to vector<1x4xf32>
    %130 = vector.broadcast %129 : vector<1x4xf32> to vector<256x4xf32>
    %131 = arith.mulf %127, %130 : vector<256x4xf32>
    %c2_44 = arith.constant 2 : index
    %c0_45 = arith.constant 0 : index
    %c0_46 = arith.constant 0 : index
    %132 = vector.load %arg7[%c2_44, %c0_45, %c0_46] : memref<3x1x4xf32, #tpu.memory_space<vmem>>, vector<1x1x4xf32>
    %133 = vector.shape_cast %132 : vector<1x1x4xf32> to vector<1x4xf32>
    %134 = vector.broadcast %133 : vector<1x4xf32> to vector<256x4xf32>
    %135 = arith.addf %131, %134 : vector<256x4xf32>
    %c0_47 = arith.constant 0 : index
    %c0_48 = arith.constant 0 : index
    %136 = vector.load %arg8[%c0_47, %c0_48] : memref<256x4xf32, #tpu.memory_space<vmem>>, vector<256x4xf32>
    %137 = arith.mulf %135, %136 : vector<256x4xf32>
    %cst_49 = arith.constant dense<0.000000e+00> : vector<4xf32>
    %138 = vector.multi_reduction <add>, %137, %cst_49 [0] : vector<256x4xf32> to vector<4xf32>
    %139 = vector.shape_cast %138 : vector<4xf32> to vector<1x4xf32>
    %140 = arith.negf %139 : vector<1x4xf32>
    %141 = math.exp %140 : vector<1x4xf32>
    %cst_50 = arith.constant 1.000000e+00 : f32
    %142 = vector.broadcast %cst_50 : f32 to vector<1x4xf32>
    %143 = arith.addf %142, %141 : vector<1x4xf32>
    %144 = arith.divf %142, %143 : vector<1x4xf32>
    %145 = tpu.concatenate %56, %100, %144 in 0 : vector<1x4xf32>, vector<1x4xf32>, vector<1x4xf32> -> vector<3x4xf32>
    %cst_51 = arith.constant dense<0xFF800000> : vector<4xf32>
    %146 = vector.multi_reduction <maximumf>, %145, %cst_51 [0] : vector<3x4xf32> to vector<4xf32>
    %cst_52 = arith.constant 0xFF800000 : f32
    %147 = vector.broadcast %cst_52 : f32 to vector<4xf32>
    %148 = arith.maximumf %147, %146 : vector<4xf32>
    %149 = vector.shape_cast %148 : vector<4xf32> to vector<1x4xf32>
    %150 = vector.broadcast %149 : vector<1x4xf32> to vector<3x4xf32>
    %151 = arith.subf %145, %150 : vector<3x4xf32>
    %152 = math.exp %151 : vector<3x4xf32>
    %cst_53 = arith.constant dense<0.000000e+00> : vector<4xf32>
    %153 = vector.multi_reduction <add>, %152, %cst_53 [0] : vector<3x4xf32> to vector<4xf32>
    %154 = vector.shape_cast %153 : vector<4xf32> to vector<1x4xf32>
    %155 = vector.broadcast %154 : vector<1x4xf32> to vector<3x4xf32>
    %156 = arith.divf %152, %155 : vector<3x4xf32>
    %157 = vector.extract_strided_slice %156 {offsets = [0, 0], sizes = [1, 4], strides = [1, 1]} : vector<3x4xf32> to vector<1x4xf32>
    %158 = vector.broadcast %157 : vector<1x4xf32> to vector<256x4xf32>
    %159 = arith.mulf %47, %158 : vector<256x4xf32>
    %160 = vector.extract_strided_slice %156 {offsets = [1, 0], sizes = [1, 4], strides = [1, 1]} : vector<3x4xf32> to vector<1x4xf32>
    %161 = vector.broadcast %160 : vector<1x4xf32> to vector<256x4xf32>
    %162 = arith.mulf %91, %161 : vector<256x4xf32>
    %163 = vector.extract_strided_slice %156 {offsets = [2, 0], sizes = [1, 4], strides = [1, 1]} : vector<3x4xf32> to vector<1x4xf32>
    %164 = vector.broadcast %163 : vector<1x4xf32> to vector<256x4xf32>
    %165 = arith.mulf %135, %164 : vector<256x4xf32>
    %166 = tpu.concatenate %159, %162, %165 in 1 : vector<256x4xf32>, vector<256x4xf32>, vector<256x4xf32> -> vector<256x12xf32>
    %c0_54 = arith.constant 0 : index
    %c0_55 = arith.constant 0 : index
    %167 = vector.load %arg9[%c0_54, %c0_55] : memref<1x12xf32, #tpu.memory_space<vmem>>, vector<1x12xf32>
    %168 = vector.broadcast %167 : vector<1x12xf32> to vector<256x12xf32>
    %169 = arith.mulf %166, %168 : vector<256x12xf32>
    %c0_56 = arith.constant 0 : index
    %c0_57 = arith.constant 0 : index
    %170 = vector.load %arg10[%c0_56, %c0_57] : memref<1x12xf32, #tpu.memory_space<vmem>>, vector<1x12xf32>
    %171 = vector.broadcast %170 : vector<1x12xf32> to vector<256x12xf32>
    %172 = arith.addf %169, %171 : vector<256x12xf32>
    %cst_58 = arith.constant 0.000000e+00 : f32
    %173 = vector.broadcast %cst_58 : f32 to vector<256x12xf32>
    %174 = arith.maximumf %172, %173 : vector<256x12xf32>
    %c0_59 = arith.constant 0 : index
    %c0_60 = arith.constant 0 : index
    %175 = vector.load %arg11[%c0_59, %c0_60] : memref<12x32xf32, #tpu.memory_space<vmem>>, vector<12x32xf32>
    %cst_61 = arith.constant dense<0.000000e+00> : vector<256x32xf32>
    %176 = tpu.matmul %174, %175, %cst_61 {dimension_numbers = #tpu.dot_dimension_numbers<[1], [0], [0], [1], [0, 0, 1, 1], [], []>} : vector<256x12xf32>, vector<12x32xf32>, vector<256x32xf32> -> vector<256x32xf32>
    %c0_62 = arith.constant 0 : index
    %c0_63 = arith.constant 0 : index
    %177 = vector.load %arg12[%c0_62, %c0_63] : memref<1x32xf32, #tpu.memory_space<vmem>>, vector<1x32xf32>
    %178 = vector.broadcast %177 : vector<1x32xf32> to vector<256x32xf32>
    %179 = arith.mulf %176, %178 : vector<256x32xf32>
    %c0_64 = arith.constant 0 : index
    %c0_65 = arith.constant 0 : index
    %180 = vector.load %arg13[%c0_64, %c0_65] : memref<1x32xf32, #tpu.memory_space<vmem>>, vector<1x32xf32>
    %181 = vector.broadcast %180 : vector<1x32xf32> to vector<256x32xf32>
    %182 = arith.addf %179, %181 : vector<256x32xf32>
    %183 = arith.addf %182, %1 : vector<256x32xf32>
    %cst_66 = arith.constant 0.000000e+00 : f32
    %184 = vector.broadcast %cst_66 : f32 to vector<256x32xf32>
    %185 = arith.maximumf %183, %184 : vector<256x32xf32>
    %c0_67 = arith.constant 0 : index
    %c0_68 = arith.constant 0 : index
    %c0_69 = arith.constant 0 : index
    %186 = vector.load %arg14[%c0_67, %c0_68, %c0_69] : memref<1x256x32xf32, #tpu.memory_space<vmem>>, vector<1x256x32xf32>
    %187 = vector.shape_cast %186 : vector<1x256x32xf32> to vector<256x32xf32>
    %188 = vector.shape_cast %185 : vector<256x32xf32> to vector<1x256x32xf32>
    tpu.vector_store %arg14[%c0_67, %c0_68, %c0_69], %188 {strides = array<i32>} : memref<1x256x32xf32, #tpu.memory_space<vmem>>, vector<1x256x32xf32>,
    return
  }
  func.func @transform_0(%arg0: i32) -> (i32, i32, i32) {
    %c0_i32 = arith.constant 0 : i32
    %c0_i32_0 = arith.constant 0 : i32
    %c0_i32_1 = arith.constant 0 : i32
    return %arg0, %c0_i32, %c0_i32_0 : i32, i32, i32
  }
  func.func @transform_1(%arg0: i32) -> (i32, i32) {
    %c0_i32 = arith.constant 0 : i32
    %c0_i32_0 = arith.constant 0 : i32
    %c0_i32_1 = arith.constant 0 : i32
    return %c0_i32, %c0_i32_0 : i32, i32
  }
  func.func @transform_2(%arg0: i32) -> (i32, i32) {
    %c0_i32 = arith.constant 0 : i32
    %c0_i32_0 = arith.constant 0 : i32
    %c0_i32_1 = arith.constant 0 : i32
    return %c0_i32, %c0_i32_0 : i32, i32
  }
  func.func @transform_3(%arg0: i32) -> (i32, i32) {
    %c0_i32 = arith.constant 0 : i32
    %c0_i32_0 = arith.constant 0 : i32
    %c0_i32_1 = arith.constant 0 : i32
    return %c0_i32, %c0_i32_0 : i32, i32
  }
  func.func @transform_4(%arg0: i32) -> (i32, i32, i32) {
    %c0_i32 = arith.constant 0 : i32
    %c0_i32_0 = arith.constant 0 : i32
    %c0_i32_1 = arith.constant 0 : i32
    %c0_i32_2 = arith.constant 0 : i32
    return %c0_i32, %c0_i32_0, %c0_i32_1 : i32, i32, i32
  }
  func.func @transform_5(%arg0: i32) -> (i32, i32, i32) {
    %c0_i32 = arith.constant 0 : i32
    %c0_i32_0 = arith.constant 0 : i32
    %c0_i32_1 = arith.constant 0 : i32
    %c0_i32_2 = arith.constant 0 : i32
    return %c0_i32, %c0_i32_0, %c0_i32_1 : i32, i32, i32
  }
  func.func @transform_6(%arg0: i32) -> (i32, i32, i32) {
    %c0_i32 = arith.constant 0 : i32
    %c0_i32_0 = arith.constant 0 : i32
    %c0_i32_1 = arith.constant 0 : i32
    %c0_i32_2 = arith.constant 0 : i32
    return %c0_i32, %c0_i32_0, %c0_i32_1 : i32, i32, i32
  }
  func.func @transform_7(%arg0: i32) -> (i32, i32) {
    %c0_i32 = arith.constant 0 : i32
    %c0_i32_0 = arith.constant 0 : i32
    %c0_i32_1 = arith.constant 0 : i32
    return %c0_i32, %c0_i32_0 : i32, i32
  }
  func.func @transform_8(%arg0: i32) -> (i32, i32) {
    %c0_i32 = arith.constant 0 : i32
    %c0_i32_0 = arith.constant 0 : i32
    %c0_i32_1 = arith.constant 0 : i32
    return %c0_i32, %c0_i32_0 : i32, i32
  }
  func.func @transform_9(%arg0: i32) -> (i32, i32) {
    %c0_i32 = arith.constant 0 : i32
    %c0_i32_0 = arith.constant 0 : i32
    %c0_i32_1 = arith.constant 0 : i32
    return %c0_i32, %c0_i32_0 : i32, i32
  }
  func.func @transform_10(%arg0: i32) -> (i32, i32) {
    %c0_i32 = arith.constant 0 : i32
    %c0_i32_0 = arith.constant 0 : i32
    %c0_i32_1 = arith.constant 0 : i32
    return %c0_i32, %c0_i32_0 : i32, i32
  }
  func.func @transform_11(%arg0: i32) -> (i32, i32) {
    %c0_i32 = arith.constant 0 : i32
    %c0_i32_0 = arith.constant 0 : i32
    %c0_i32_1 = arith.constant 0 : i32
    return %c0_i32, %c0_i32_0 : i32, i32
  }
  func.func @transform_12(%arg0: i32) -> (i32, i32) {
    %c0_i32 = arith.constant 0 : i32
    %c0_i32_0 = arith.constant 0 : i32
    %c0_i32_1 = arith.constant 0 : i32
    return %c0_i32, %c0_i32_0 : i32, i32
  }
  func.func @transform_13(%arg0: i32) -> (i32, i32, i32) {
    %c0_i32 = arith.constant 0 : i32
    %c0_i32_0 = arith.constant 0 : i32
    %c0_i32_1 = arith.constant 0 : i32
    return %arg0, %c0_i32, %c0_i32_0 : i32, i32, i32
  }
}

</mosaic_0001>

<bundles_post_ra>
// kernel: mspa_block_forward.1
= control target key start
LH: loop header
LB: loop body
LE: loop exit
PB: predicated region body
PF: predicated region fallthrough
CT: control target
= control target key end

     0   :  { %s15778_s0 = inlined_call_operand.hbm [shape: f32[2,256,32], index: 0, kind: input, shape index: {}]   ;;  %s15779_s1 = inlined_call_operand.vmem [shape: f32[32,12], index: 1, kind: input, shape index: {}]   ;;  %s15780_s2 = inlined_call_operand.vmem [shape: f32[1,12], index: 2, kind: input, shape index: {}]   ;;  %s15781_s3 = inlined_call_operand.vmem [shape: f32[1,12], index: 3, kind: input, shape index: {}]   ;;  %s15782_s4 = inlined_call_operand.vmem [shape: f32[3,36,4], index: 4, kind: input, shape index: {}]   ;;  %s15783_s5 = inlined_call_operand.vmem [shape: f32[3,1,4], index: 5, kind: input, shape index: {}]   ;;  %s15784_s6 = inlined_call_operand.vmem [shape: f32[3,1,4], index: 6, kind: input, shape index: {}]   ;;  %s15785_s7 = inlined_call_operand.vmem [shape: f32[256,4], index: 7, kind: input, shape index: {}]   ;;  %s15786_s8 = inlined_call_operand.vmem [shape: f32[1,12], index: 8, kind: input, shape index: {}]   ;;  %s15787_s9 = inlined_call_operand.vmem [shape: f32[1,12], index: 9, kind: input, shape index: {}]   ;;  %s15788_s10 = inlined_call_operand.vmem [shape: f32[12,32], index: 10, kind: input, shape index: {}]   ;;  %s15789_s11 = inlined_call_operand.vmem [shape: f32[1,32], index: 11, kind: input, shape index: {}]   ;;  %s15790_s12 = inlined_call_operand.vmem [shape: f32[1,32], index: 12, kind: input, shape index: {}]   ;;  %s15791_s13 = inlined_call_operand.hbm [shape: f32[2,256,32], index: 13, kind: output, shape index: {}]  }
   0x1   :  { %16133 = sst [smem:[#allocation223_spill]] %s15778_s0 }
   0x2   :  { %16134 = sst [smem:[#allocation224_spill]] %s15779_s1 }
   0x3   :  { %16135 = sst [smem:[#allocation225_spill]] %s15780_s2 }
   0x4   :  { %16136 = sst [smem:[#allocation226_spill]] %s15781_s3 }
   0x5   :  { %18 = vsyncpa [#allocation3], 0 }
   0x6   :  { %20 = vsyncpa [#allocation3 + $0x1], 0 }
   0x7   :  { %21 = vsyncpa [#allocation4], 0 }
   0x8   :  { %23 = vsyncpa [#allocation4 + $0x1], 0  ;;  %s9037_s25 = smov 0   ;;  %s9039_s26 = smov 0  }
   0x9   :  { %s9041_s27 = smov 0   ;;  %s9043_s28 = smov 0  }
   0xa LB: > { %16137 = sst [smem:[#allocation8_spill]] %s8936_s25  ;;  %s9058_s29 = sadd.s32 4294967295, %s8948_s28   ;;  %s8948_s28 = sphi %s9043_s28, %s17040_s28   ;;  %s8944_s27 = sphi %s9041_s27, %s17043_s27   ;;  %s8940_s26 = sphi %s9039_s26, %s17042_s26   ;;  %s8936_s25 = sphi %s9037_s25, %s17041_s25  }
   0xb   : > { %16138 = sst [smem:[#allocation9_spill]] %s8940_s26  ;;  %s7999_s30 = sadd.s32 4294967294, %s8948_s28  }
   0xc   : > { %16139 = sst [smem:[#allocation10_spill]] %s8944_s27  ;;  %s9062_s14 = sadd.s32 1, %s8948_s28  }
   0xd   : > { %16140 = sst [smem:[#allocation11_spill]] %s9062_s14  ;;  %s36_s15 = sadd.s32 1, %s8944_s27 }
   0xe   : > { %s33_s16 = ssub.s32 %s8948_s28, %s9062_s14  ;;  %p43_p0 = scmp.ne.s32.totalorder %s8944_s27, %s8940_s26 }
   0xf   : > { %p34_p1 = scmp.eq.s32.totalorder %s33_s16, 0  ;;  %p44_p2 = scmp.eq.s32.totalorder %s8948_s28, 0 }
  0x10   : > { %p49_p3 = scmp.ne.s32.totalorder %s8940_s26, %s8936_s25  ;;  %p50_p4 = scmp.eq.s32.totalorder %s9058_s29, 0 }
  0x11   : > { %s9074_s17 = scalar_select %p34_p1, %s8944_s27, %s36_s15  }
  0x12   : > { %p9076_p5 = por %p44_p2, %p43_p0  ;;  %p9080_p6 = por %p50_p4, %p49_p3 }
  0x13   : > { %16141 = sst [smem:[#allocation12_spill]] %s9074_s17  ;;  %p325_p7 = scmp.eq.s32.totalorder %s9058_s29, 1 }
  0x14   : > { %p331_p8 = scmp.eq.s32.totalorder %s7999_s30, 1  ;;  %p8725_p10 = scmp.lt.s32.totalorder %s8948_s28, 2 }
  0x15   : > { %p9087_p11 = por %p325_p7, %p43_p0  ;;  %s387_s22 = sand.u32 1, %s8944_s27  }
  0x16   : > { %p9091_p12 = por %p331_p8, %p49_p3  ;;  %s8206_s23 = sshll.u32 %s8948_s28, 12 }
  0x17   : > { %s16144_s20 = scalar_select %p9087_p11, 1, 0 }
  0x18   : > { %s16145_s21 = scalar_select %p9091_p12, 1, 0 }
  0x19   : > { %s8002_s24 = sshll.u32 %s387_s22, 8  ;;  %s16146_s0 = sld [smem:[#allocation223_spill]] }
  0x1a   : > { %s391_s30 = scalar_lea.vmem [#allocation2], %s8002_s24  ;;  %p9104_p13 = pnand %p8725_p10, %p9076_p5 }
  0x1b   : > { %s398_s14 = sshll.u32 %s391_s30, 4  ;;  %s9110_s27 = scalar_lea.sflag [#allocation3], %s387_s22  ;;  %s9108_s14 = int_to_ptr.vmem [resolvable:$true] %s398_s14 }
  0x1c   : > { %p8854_p1 = pneg %p9104_p13 }
  0x1f   : > { %s9100_s17 = scalar_lea.hbm %s16146_s0, %s8206_s23  ;;  %s8857_s24 = scalar_lea.hbm %s16146_s0, 8192 }
  0x20   : > { %s8852_s15 = scalar_lea.hbm %s9100_s17, 4096  ;;  %p8858_p4 = scmp.lt.u32.totalorder %s9100_s17, %s16146_s0 }
  0x21   : > { %p8853_p0 = scmp.ne.s32.totalorder %s9100_s17, %s8852_s15  ;;  %p8859_p5 = scmp.lt.u32.totalorder %s8857_s24, %s8852_s15 }
  0x22   : > { %p8861_p8 = scmp.lt.u32.totalorder %s8852_s15, %s9100_s17 }
  0x23   : > { %p8855_p2 = pnand %p8854_p1, %p8853_p0  ;;  %p8860_p7 = por %p8859_p5, %p8858_p4 }
  0x25   : > { %p8856_p3 = pneg %p8855_p2  ;;  %p8862_p10 = por %p8861_p8, %p8860_p7 }
  0x27   : > { %p8863_p9 = pnand %p8862_p10, %p8856_p3 }
  0x29   : > { %8866 = shalt.err (!%p8863_p9)
}
  0x2a   : > { %s8867_s22 = scalar_lea.vmem %s9108_s14, 4096  ;;  %s8950_s23 = smov [#allocation2]  }
  0x2b   : > { %p8868_p0 = scmp.ne.s32.totalorder %s9108_s14, %s8867_s22  ;;  %s8872_s18 = sshll.u32 %s8950_s23, 4  ;;  %s8873_s18 = int_to_ptr.vmem [resolvable:$false] %s8872_s18 }
  0x2c   : > { %s8874_s16 = scalar_lea.vmem %s8873_s18, 8192  ;;  %p8875_p11 = scmp.lt.s32.totalorder %s9108_s14, %s8873_s18 }
  0x2d   : > { %p8870_p2 = pnand %p8868_p0, %p8854_p1  ;;  %p8876_p4 = scmp.lt.s32.totalorder %s8874_s16, %s8867_s22 }
  0x2f   : > { %p8871_p12 = pneg %p8870_p2  ;;  %p8877_p5 = por %p8876_p4, %p8875_p11 }
  0x31   : > { %p8878_p7 = pnand %p8877_p5, %p8871_p12 }
  0x33   : > { %8881 = shalt.err (!%p8878_p7)
}
  0x34   : > { %s8951_s15 = smov 128   ;;  %s8952_s24 = smov 8  }
  0x35   : > { %8720 = dma.hbm_to_vmem [thread:$0]  (!%p9104_p13), %s9100_s17, 4096, %s9108_s14, %s9110_s27, %s8951_s15, %s8951_s15, %s8952_s24  }
  0x36   : > { %p8005_p9 = scmp.ge.s32.totalorder %s8948_s28, 1  ;;  %p406_p1 = scmp.lt.s32.totalorder %s8948_s28, 3 }
  0x38   : > { %p407_p3 = pnand %p8005_p9, %p406_p1 }
  0x3a   : > { %410 = sbr.rel (%p407_p3) target bundleno = 3089 (0xc11), region = 72 }
  0x41   : > { %s9141_s30 = sand.u32 1, %s8940_s26  }
  0x42   : > { %s15907_s22 = sshll.u32 %s9141_s30, 8  ;;  %s413_s23 = scalar_lea.sflag [#allocation3], %s9141_s30 }
  0x43   : > { %s9147_s18 = scalar_lea.vmem [#allocation2], %s15907_s22 }
  0x44   : > { %8927 = dma.done.wait (%p9080_p6), %s413_s23, 4096  }
  0x45   : > { %8929 = vsyncadd (%p9080_p6), %s413_s23, 4294963200  ;;  %vm495_vm0 = vcmask 261120   ;;  %s16148_s1 = sld [smem:[#allocation224_spill]]  ;;  %v459_v5 = vld [vmem:[%s9147_s18] sm:$0xff]  ;;  %v460_v8 = vld [vmem:[%s9147_s18 + $0x8] sm:$0xff]  ;;  %v8953_v32 = vmov 0.0  }
  0x46   : > { %8397 = vmatprep.mubr.msk.f32.mxu0 %vm495_vm0, %v459_v5  ;;  %v475_v7 = vld [vmem:[%s9147_s18 + $0x80] sm:$0xff]  ;;  %v476_v9 = vld [vmem:[%s9147_s18 + $0x88] sm:$0xff]  ;;  %v461_v10 = vld [vmem:[%s9147_s18 + $0x10] sm:$0xff]  ;;  %v9216_v33 = vrot.slane %v8953_v32, 7  ;;  %vm960_vm1 = vcmask 1040384   ;;  %vm1207_vm2 = vcmask 1045504  }
  0x47   : > { %8421 = vmatprep.mubr.msk.f32.mxu1 %vm495_vm0, %v475_v7  ;;  %v477_v11 = vld [vmem:[%s9147_s18 + $0x90] sm:$0xff]  ;;  %v462_v12 = vld [vmem:[%s9147_s18 + $0x18] sm:$0xff]  ;;  %v463_v14 = vld [vmem:[%s9147_s18 + $0x20] sm:$0xff]  ;;  %vm1126_vm3 = vcmask 1046528   ;;  %s16050_s23 = smov 8   ;;  %s16048_s25 = smov 4  }
  0x48   : > { %v478_v13 = vld [vmem:[%s9147_s18 + $0x98] sm:$0xff]  ;;  %v479_v15 = vld [vmem:[%s9147_s18 + $0xa0] sm:$0xff]  ;;  %v464_v16 = vld [vmem:[%s9147_s18 + $0x28] sm:$0xff]  ;;  %16149 = vst [vmem:[#allocation13_spill] sm:$0xff] %v9216_v33  ;;  %v9221_v34 = vsel %vm960_vm1, 0.0, %v9216_v33  ;;  %v1077_v35 = vsel %vm960_vm1, %v9216_v33, 0.0 }
  0x49   : > { %v480_v17 = vld [vmem:[%s9147_s18 + $0xa8] sm:$0xff]  ;;  %v465_v18 = vld [vmem:[%s9147_s18 + $0x30] sm:$0xff]  ;;  %v466_v20 = vld [vmem:[%s9147_s18 + $0x38] sm:$0xff]  ;;  %v1208_v37 = vrot.slane %v9221_v34, 2  ;;  %v1209_v38 = vrot.slane %v9216_v33, 2  ;;  %v1211_v39 = vrot.slane %v1077_v35, 2 }
  0x4a   : > { %v481_v19 = vld [vmem:[%s9147_s18 + $0xb0] sm:$0xff]  ;;  %v482_v21 = vld [vmem:[%s9147_s18 + $0xb8] sm:$0xff]  ;;  %v467_v22 = vld [vmem:[%s9147_s18 + $0x40] sm:$0xff]  ;;  %v1127_v40 = vrot.slane %v9221_v34, 1  ;;  %v1128_v42 = vrot.slane %v9216_v33, 1  ;;  %v1130_v43 = vrot.slane %v1077_v35, 1 }
  0x4b   : > { %v491_v0 = vld [vmem:[%s16148_s1] sm:$0xff]  ;;  %v492_v1 = vld [vmem:[%s16148_s1 + $0x8] sm:$0xff]  ;;  %v493_v2 = vld [vmem:[%s16148_s1 + $0x10] sm:$0xff]  ;;  %v1210_v44 = vsel %vm1207_vm2, %v1208_v37, %v1209_v38  ;;  %v1212_v45 = vsel %vm1207_vm2, %v1209_v38, %v1211_v39  ;;  %s16152_s2 = sld [smem:[#allocation225_spill]]  ;;  %s16153_s3 = sld [smem:[#allocation226_spill]]  ;;  %vm2433_vm4 = vcmask 1043456  }
  0x4c   : > { %v8671_v3 = vpack.c.bf16 %v492_v1, %v491_v0  ;;  %v494_v4 = vld [vmem:[%s16148_s1 + $0x18] sm:$0xff]  ;;  %v483_v23 = vld [vmem:[%s9147_s18 + $0xc0] sm:$0xff]  ;;  %v468_v24 = vld [vmem:[%s9147_s18 + $0x48] sm:$0xff]  ;;  %v9235_v46 = vpack.i.bf16 %v1212_v45, %v1210_v44  ;;  %v1129_v47 = vsel %vm1126_vm3, %v1127_v40, %v1128_v42  ;;  %v1131_v48 = vsel %vm1126_vm3, %v1128_v42, %v1130_v43  ;;  %s16075_s15 = smov 12   ;;  %s15913_s24 = smov 16  }
  0x4d   : > { %v8675_v6 = vpack.c.bf16 %v494_v4, %v493_v2  ;;  %v484_v25 = vld [vmem:[%s9147_s18 + $0xc8] sm:$0xff]  ;;  %v469_v26 = vld [vmem:[%s9147_s18 + $0x50] sm:$0xff]  ;;  %v470_v28 = vld [vmem:[%s9147_s18 + $0x58] sm:$0xff]  ;;  %v9239_v49 = vpack.i.bf16 %v1131_v48, %v1129_v47  ;;  %s15911_s19 = smov 20   ;;  %s16073_s17 = smov 24   ;;  %vm2068_vm5 = vcmask 31744  }
  0x4e   : > { %8672 = vmatprep.subr.bf16.mxu0 %v8671_v3  ;;  %8709 = vmatprep.subr.bf16.mxu1 %v8671_v3  ;;  %v485_v27 = vld [vmem:[%s9147_s18 + $0xd0] sm:$0xff]  ;;  %v486_v29 = vld [vmem:[%s9147_s18 + $0xd8] sm:$0xff]  ;;  %v471_v30 = vld [vmem:[%s9147_s18 + $0x60] sm:$0xff]  ;;  %16150 = vst [vmem:[#allocation14_spill] sm:$0xff] %v9235_v46  ;;  %s16052_s14 = smov 32   ;;  %vm2101_vm6 = vcmask 64512  }
  0x4f   : > { %8674 = vmatpush3.bf16.msra.mxu0 %v8671_v3  ;;  %8711 = vmatpush3.bf16.msra.mxu1 %v8671_v3  ;;  %v472_v31 = vld [vmem:[%s9147_s18 + $0x68] sm:$0xff]  ;;  %v487_v36 = vld [vmem:[%s9147_s18 + $0xe0] sm:$0xff]  ;;  %16151 = vst [vmem:[#allocation15_spill] sm:$0xff] %v9239_v49  ;;  %v473_v50 = vld [vmem:[%s9147_s18 + $0x70] sm:$0xff]  ;;  %vm2134_vm7 = vcmask 97280   ;;  %vm2167_vm8 = vcmask 130048  }
  0x50   : > { %8676 = vmatprep.subr.bf16.mxu0 %v8675_v6  ;;  %8710 = vmatprep.subr.bf16.mxu1 %v8675_v6  ;;  %v488_v41 = vld [vmem:[%s9147_s18 + $0xe8] sm:$0xff]  ;;  %v474_v51 = vld [vmem:[%s9147_s18 + $0x78] sm:$0xff]  ;;  %v489_v52 = vld [vmem:[%s9147_s18 + $0xf0] sm:$0xff]  ;;  %vm2200_vm9 = vcmask 162816   ;;  %vm2233_vm10 = vcmask 195584   ;;  %vm2266_vm11 = vcmask 228352  }
  0x51   : > { %8780 = vrot.lane.b32.xlu1 %v9235_v46, %s16050_s23  ;;  %8775 = vrot.lane.b32.xlu0 %v9239_v49, %s16048_s25  ;;  %v490_v53 = vld [vmem:[%s9147_s18 + $0xf8] sm:$0xff]  ;;  %v9256_v54 = vld [vmem:[%s16152_s2] ss:$0 sm:$0xff]  ;;  %vm2336_vm12 = vcmask 293888   ;;  %s8962_s16 = smov 124   ;;  %s16712_s27 = smov 16  }
  0x52   : > { %v9261_v56 = vld [vmem:[%s16153_s3] ss:$0 sm:$0xff]  ;;  %s16713_s22 = smov 20   ;;  %s16856_s0 = smov 12   ;;  %vm6852_vm13 = vcmask 1041408   ;;  %vm6854_vm14 = vcmask 26624  }
  0x53   : > { %8678 = vmatpush3.bf16.msra.mxu0 %v8675_v6  ;;  %8712 = vmatpush3.bf16.msra.mxu1 %v8675_v6  ;;  %vm8964_vm15 = vmmov 1   ;;  %p17036_p11 = scmp.ne.s32.totalorder %s16144_s20, 0 }
  0x56   : > { %8398 = vmatmul.mubr.msk.f32.vlgmr.msra.gmra.mrb[0].mxu0 %vm495_vm0, %v460_v8  ;;  %8422 = vmatmul.mubr.msk.f32.vlgmr.msra.gmra.mrb[0].mxu1 %vm495_vm0, %v476_v9 }
  0x57   : > { %8400 = vmatprep.mubr.msk.f32.mxu0 %vm495_vm0, %v461_v10  ;;  %8424 = vmatprep.mubr.msk.f32.mxu1 %vm495_vm0, %v477_v11 }
  0x5a   : > { %8401 = vmatmul.mubr.msk.f32.gmra.mrb[2].mxu0 %vm495_vm0, %v462_v12  ;;  %8425 = vmatmul.mubr.msk.f32.gmra.mrb[2].mxu1 %vm495_vm0, %v478_v13 }
  0x5b   : > { %8403 = vmatprep.mubr.msk.f32.mxu0 %vm495_vm0, %v463_v14  ;;  %8427 = vmatprep.mubr.msk.f32.mxu1 %vm495_vm0, %v479_v15 }
  0x5e   : > { %8404 = vmatmul.mubr.msk.f32.gmra.mrb[4].mxu0 %vm495_vm0, %v464_v16  ;;  %8428 = vmatmul.mubr.msk.f32.gmra.mrb[4].mxu1 %vm495_vm0, %v480_v17 }
  0x5f   : > { %8406 = vmatprep.mubr.msk.f32.mxu0 %vm495_vm0, %v465_v18  ;;  %8430 = vmatprep.mubr.msk.f32.mxu1 %vm495_vm0, %v481_v19 }
  0x62   : > { %8407 = vmatmul.mubr.msk.f32.gmra.mrb[6].mxu0 %vm495_vm0, %v466_v20  ;;  %8431 = vmatmul.mubr.msk.f32.gmra.mrb[6].mxu1 %vm495_vm0, %v482_v21 }
  0x63   : > { %8409 = vmatprep.mubr.msk.f32.mxu0 %vm495_vm0, %v467_v22  ;;  %8433 = vmatprep.mubr.msk.f32.mxu1 %vm495_vm0, %v483_v23 }
  0x66   : > { %8410 = vmatmul.mubr.msk.f32.gmra.mrb[8].mxu0 %vm495_vm0, %v468_v24  ;;  %8434 = vmatmul.mubr.msk.f32.gmra.mrb[8].mxu1 %vm495_vm0, %v484_v25 }
  0x67   : > { %8412 = vmatprep.mubr.msk.f32.mxu0 %vm495_vm0, %v469_v26  ;;  %8436 = vmatprep.mubr.msk.f32.mxu1 %vm495_vm0, %v485_v27 }
  0x6a   : > { %8413 = vmatmul.mubr.msk.f32.gmra.mrb[10].mxu0 %vm495_vm0, %v470_v28  ;;  %8437 = vmatmul.mubr.msk.f32.gmra.mrb[10].mxu1 %vm495_vm0, %v486_v29 }
  0x6b   : > { %8415 = vmatprep.mubr.msk.f32.mxu0 %vm495_vm0, %v471_v30  ;;  %8439 = vmatprep.mubr.msk.f32.mxu1 %vm495_vm0, %v487_v36 }
  0x6e   : > { %8416 = vmatmul.mubr.msk.f32.gmra.mrb[12].mxu0 %vm495_vm0, %v472_v31  ;;  %8440 = vmatmul.mubr.msk.f32.gmra.mrb[12].mxu1 %vm495_vm0, %v488_v41 }
  0x6f   : > { %8418 = vmatprep.mubr.msk.f32.mxu0 %vm495_vm0, %v473_v50  ;;  %8442 = vmatprep.mubr.msk.f32.mxu1 %vm495_vm0, %v489_v52 }
  0x72   : > { %8419 = vmatmul.mubr.msk.f32.gmra.mrb[14].mxu0 %vm495_vm0, %v474_v51  ;;  %8443 = vmatmul.mubr.msk.f32.gmra.mrb[14].mxu1 %vm495_vm0, %v490_v53 }
 0x129   : > { %v8399_v55 = vpop.f32.mrb[0].mxu0  ;;  %v8423_v57 = vpop.f32.mrb[0].mxu1 }
 0x12a   : > { %v825_v58 = vmul.f32 %v8399_v55, %v9256_v54  ;;  %v658_v59 = vpop.f32.mrb[1].mxu0  ;;  %v841_v60 = vmul.f32 %v8423_v57, %v9256_v54  ;;  %v738_v61 = vpop.f32.mrb[1].mxu1 }
 0x12b   : > { %v824_v62 = vmul.f32 %v9256_v54, %v658_v59  ;;  %v840_v63 = vmul.f32 %v9256_v54, %v738_v61 }
 0x12c   : > { %v864_v0 = vadd.f32 %v9261_v56, %v825_v58  ;;  %v880_v1 = vadd.f32 %v9261_v56, %v841_v60 }
 0x12d   : > { %v863_v2 = vadd.f32 %v9261_v56, %v824_v62  ;;  %v879_v3 = vadd.f32 %v9261_v56, %v840_v63  ;;  %v8402_v4 = vpop.f32.mrb[2].mxu0  ;;  %v9271_v5 = vpop.f32.mrb[2].mxu1 }
 0x12e   : > { %v9273_v6 = vmax.f32 %v864_v0, 0.0  ;;  %v9275_v7 = vmax.f32 %v880_v1, 0.0  ;;  %v668_v8 = vpop.f32.mrb[3].mxu0  ;;  %v9277_v9 = vpop.f32.mrb[3].mxu1  ;;  %v827_v58 = vmul.f32 %v8402_v4, %v9256_v54  ;;  %v843_v0 = vmul.f32 %v9271_v5, %v9256_v54 }
 0x12f   : > { %v9279_v10 = vmax.f32 %v863_v2, 0.0  ;;  %v9281_v11 = vmax.f32 %v879_v3, 0.0  ;;  %v826_v59 = vmul.f32 %v9256_v54, %v668_v8  ;;  %v842_v1 = vmul.f32 %v9256_v54, %v9277_v9 }
 0x130   : > { %16154 = vst [vmem:[#allocation16_spill] sm:$0xff] %v9273_v6  ;;  %16155 = vst [vmem:[#allocation17_spill] sm:$0xff] %v9275_v7  ;;  %v964_v12 = vrot.slane %v9273_v6, 7  ;;  %v988_v13 = vrot.slane %v9275_v7, 7  ;;  %v866_v62 = vadd.f32 %v9261_v56, %v827_v58  ;;  %v882_v4 = vadd.f32 %v9261_v56, %v843_v0 }
 0x131   : > { %16156 = vst [vmem:[#allocation18_spill] sm:$0xff] %v9279_v10  ;;  %16157 = vst [vmem:[#allocation19_spill] sm:$0xff] %v9281_v11  ;;  %v987_v14 = vrot.slane %v9281_v11, 7  ;;  %v963_v15 = vrot.slane %v9279_v10, 7  ;;  %v9287_v16 = vpop.f32.mrb[4].mxu0  ;;  %v9289_v17 = vpop.f32.mrb[4].mxu1  ;;  %v865_v63 = vadd.f32 %v9261_v56, %v826_v59  ;;  %v881_v8 = vadd.f32 %v9261_v56, %v842_v1 }
 0x132   : > { %v9291_v18 = vpop.f32.mrb[5].mxu0  ;;  %v9293_v19 = vpop.f32.mrb[5].mxu1  ;;  %v1078_v22 = vsel %vm960_vm1, %v964_v12, 0.0  ;;  %v1086_v32 = vsel %vm960_vm1, %v988_v13, 0.0  ;;  %v9379_v2 = vmax.f32 %v866_v62, 0.0 }
 0x133   : > { %v9296_v20 = vsel %vm960_vm1, 0.0, %v963_v15  ;;  %v9299_v21 = vsel %vm960_vm1, %v963_v15, %v964_v12  ;;  %v9307_v23 = vsel %vm960_vm1, 0.0, %v987_v14  ;;  %v9310_v24 = vsel %vm960_vm1, %v987_v14, %v988_v13 }
 0x134   : > { %16158 = vst [vmem:[#allocation20_spill] sm:$0xff] %v9296_v20  ;;  %16159 = vst [vmem:[#allocation21_spill] sm:$0xff] %v9299_v21  ;;  %1492 = vrot.lane.b32.xlu0 %v9296_v20, %s16075_s15  ;;  %1494 = vrot.lane.b32.xlu1 %v9299_v21, %s16075_s15  ;;  %v1133_v29 = vrot.slane %v9299_v21, 1  ;;  %v1135_v30 = vrot.slane %v1078_v22, 1  ;;  %v1132_v31 = vrot.slane %v9296_v20, 1  ;;  %v1172_v36 = vrot.slane %v9307_v23, 1 }
 0x135   : > { %16160 = vst [vmem:[#allocation22_spill] sm:$0xff] %v9307_v23  ;;  %16161 = vst [vmem:[#allocation23_spill] sm:$0xff] %v9310_v24  ;;  %v9312_v25 = vpop.f32.mrb[6].mxu0  ;;  %v9314_v26 = vpop.f32.mrb[6].mxu1  ;;  %v1173_v40 = vrot.slane %v9310_v24, 1  ;;  %v1175_v41 = vrot.slane %v1086_v32, 1 }
 0x136   : > { %v9316_v27 = vpop.f32.mrb[7].mxu0  ;;  %v9318_v28 = vpop.f32.mrb[7].mxu1  ;;  %v1136_v38 = vsel %vm1126_vm3, %v1133_v29, %v1135_v30  ;;  %v1134_v39 = vsel %vm1126_vm3, %v1132_v31, %v1133_v29  ;;  %v1214_v44 = vrot.slane %v9299_v21, 2  ;;  %v1216_v48 = vrot.slane %v1078_v22, 2  ;;  %16164 = vst [vmem:[#allocation26_spill] sm:$0xff] %v9379_v2 }
 0x137   : > { %v9343_v45 = vsel %vm1126_vm3, %v1172_v36, %v1173_v40  ;;  %v9346_v47 = vsel %vm1126_vm3, %v1173_v40, %v1175_v41  ;;  %v1213_v50 = vrot.slane %v9296_v20, 2  ;;  %v1254_v51 = vrot.slane %v9310_v24, 2 }
 0x138   : > { %1524 = vrot.lane.b32.xlu0 %v9307_v23, %s16075_s15  ;;  %1526 = vrot.lane.b32.xlu1 %v9310_v24, %s16075_s15  ;;  %16162 = vst [vmem:[#allocation24_spill] sm:$0xff] %v9343_v45  ;;  %16163 = vst [vmem:[#allocation25_spill] sm:$0xff] %v9346_v47  ;;  %v1217_v52 = vsel %vm1207_vm2, %v1214_v44, %v1216_v48  ;;  %v1256_v55 = vrot.slane %v1086_v32, 2  ;;  %v1253_v57 = vrot.slane %v9307_v23, 2  ;;  %v9381_v3 = vmax.f32 %v865_v63, 0.0 }
 0x139   : > { %v9327_v35 = vpop.f32.mrb[8].mxu0  ;;  %v9335_v42 = vpop.f32.mrb[8].mxu1  ;;  %v1215_v53 = vsel %vm1207_vm2, %v1213_v50, %v1214_v44  ;;  %v967_v5 = vrot.slane %v9379_v2, 7  ;;  %v9391_v12 = vmax.f32 %v882_v4, 0.0  ;;  %v9393_v13 = vmax.f32 %v881_v8, 0.0 }
 0x13a   : > { %v9330_v37 = vpop.f32.mrb[9].mxu0  ;;  %v9339_v43 = vpop.f32.mrb[9].mxu1  ;;  %v9362_v60 = vsel %vm1207_vm2, %v1254_v51, %v1256_v55  ;;  %v9365_v61 = vsel %vm1207_vm2, %v1253_v57, %v1254_v51  ;;  %16165 = vst [vmem:[#allocation27_spill] sm:$0xff] %v9381_v3  ;;  %v966_v9 = vrot.slane %v9381_v3, 7 }
 0x13b   : > { %16166 = vst [vmem:[#allocation28_spill] sm:$0xff] %v9391_v12  ;;  %16167 = vst [vmem:[#allocation29_spill] sm:$0xff] %v9393_v13  ;;  %v991_v14 = vrot.slane %v9391_v12, 7  ;;  %v990_v15 = vrot.slane %v9393_v13, 7  ;;  %v1079_v30 = vsel %vm960_vm1, %v967_v5, 0.0 }
 0x13c   : > { %1306 = vrot.lane.b32.xlu1 %v1136_v38, %s16048_s25  ;;  %1304 = vrot.lane.b32.xlu0 %v1134_v39, %s16048_s25  ;;  %v9400_v22 = vsel %vm960_vm1, 0.0, %v966_v9  ;;  %v9403_v29 = vsel %vm960_vm1, %v966_v9, %v967_v5  ;;  %v1221_v58 = vrot.slane %v1079_v30, 2 }
 0x13d   : > { %v9411_v31 = vsel %vm960_vm1, 0.0, %v990_v15  ;;  %v9414_v32 = vsel %vm960_vm1, %v990_v15, %v991_v14  ;;  %v1138_v36 = vrot.slane %v9403_v29, 1  ;;  %v1087_v40 = vsel %vm960_vm1, %v991_v14, 0.0  ;;  %v9423_v41 = vpop.f32.mrb[10].mxu0  ;;  %v9435_v55 = vpop.f32.mrb[10].mxu1 }
 0x13e   : > { %16168 = vst [vmem:[#allocation30_spill] sm:$0xff] %v9411_v31  ;;  %16169 = vst [vmem:[#allocation31_spill] sm:$0xff] %v9414_v32  ;;  %v9425_v44 = vpop.f32.mrb[11].mxu0  ;;  %v1180_v48 = vrot.slane %v1087_v40, 1  ;;  %v9441_v57 = vpop.f32.mrb[11].mxu1  ;;  %v1218_v63 = vrot.slane %v9400_v22, 2  ;;  %v829_v14 = vmul.f32 %v9287_v16, %v9256_v54  ;;  %v828_v15 = vmul.f32 %v9256_v54, %v9291_v18 }
 0x13f   : > { %v1219_v0 = vrot.slane %v9403_v29, 2  ;;  %v1261_v1 = vrot.slane %v1087_v40, 2  ;;  %v1258_v5 = vrot.slane %v9411_v31, 2  ;;  %v1259_v9 = vrot.slane %v9414_v32, 2 }
 0x140   : > { %1336 = vrot.lane.b32.xlu1 %v9343_v45, %s16048_s25  ;;  %1338 = vrot.lane.b32.xlu0 %v9346_v47, %s16048_s25  ;;  %v845_v16 = vmul.f32 %v9289_v17, %v9256_v54  ;;  %v844_v18 = vmul.f32 %v9256_v54, %v9293_v19 }
 0x141   : > { %v9456_v4 = vsel %vm1207_vm2, %v1218_v63, %v1219_v0  ;;  %v9459_v8 = vsel %vm1207_vm2, %v1219_v0, %v1221_v58 }
 0x142   : > { %16174 = vst [vmem:[#allocation36_spill] sm:$0xff] %v9456_v4  ;;  %16175 = vst [vmem:[#allocation37_spill] sm:$0xff] %v9459_v8 }
 0x144   : > { %1402 = vrot.lane.b32.xlu1 %v1217_v52, %s16050_s23  ;;  %1400 = vrot.lane.b32.xlu0 %v1215_v53, %s16050_s23 }
 0x148   : > { %1434 = vrot.lane.b32.xlu1 %v9362_v60, %s16050_s23  ;;  %1432 = vrot.lane.b32.xlu0 %v9365_v61, %s16050_s23 }
 0x14c   : > { %1590 = vrot.lane.b32.xlu1 %v1136_v38, %s15913_s24  ;;  %1588 = vrot.lane.b32.xlu0 %v1134_v39, %s15913_s24  ;;  %v1140_v38 = vrot.slane %v1079_v30, 1  ;;  %v1137_v39 = vrot.slane %v9400_v22, 1  ;;  %v9472_v30 = vsel %vm1207_vm2, %v1258_v5, %v1259_v9 }
 0x14e   : > { %v9428_v50 = vsel %vm1126_vm3, %v1138_v36, %v1140_v38  ;;  %v9431_v51 = vsel %vm1126_vm3, %v1137_v39, %v1138_v36  ;;  %v9475_v36 = vsel %vm1207_vm2, %v1259_v9, %v1261_v1  ;;  %v868_v38 = vadd.f32 %v9261_v56, %v829_v14 }
 0x14f   : > { %16170 = vst [vmem:[#allocation32_spill] sm:$0xff] %v9428_v50  ;;  %16171 = vst [vmem:[#allocation33_spill] sm:$0xff] %v9431_v51  ;;  %v867_v39 = vadd.f32 %v9261_v56, %v828_v15  ;;  %v9524_v15 = vpop.f32.mrb[12].mxu0 }
 0x150   : > { %1622 = vrot.lane.b32.xlu1 %v9346_v47, %s15913_s24  ;;  %1620 = vrot.lane.b32.xlu0 %v9343_v45, %s15913_s24  ;;  %v9491_v40 = vmax.f32 %v868_v38, 0.0 }
 0x152   : > { %16176 = vst [vmem:[#allocation38_spill] sm:$0xff] %v9491_v40  ;;  %v970_v17 = vrot.slane %v9491_v40, 7 }
 0x154   : > { %1686 = vrot.lane.b32.xlu1 %v1217_v52, %s15911_s19  ;;  %1684 = vrot.lane.b32.xlu0 %v1215_v53, %s15911_s19  ;;  %v1178_v52 = vrot.slane %v9414_v32, 1  ;;  %v1177_v53 = vrot.slane %v9411_v31, 1  ;;  %v1080_v14 = vsel %vm960_vm1, %v970_v17, 0.0 }
 0x156   : > { %v9444_v59 = vsel %vm1126_vm3, %v1178_v52, %v1180_v48  ;;  %v9447_v62 = vsel %vm1126_vm3, %v1177_v53, %v1178_v52  ;;  %v9493_v48 = vmax.f32 %v867_v39, 0.0  ;;  %v884_v52 = vadd.f32 %v9261_v56, %v845_v16  ;;  %v9532_v16 = vpop.f32.mrb[13].mxu0 }
 0x157   : > { %16172 = vst [vmem:[#allocation34_spill] sm:$0xff] %v9444_v59  ;;  %16173 = vst [vmem:[#allocation35_spill] sm:$0xff] %v9447_v62  ;;  %v883_v53 = vadd.f32 %v9261_v56, %v844_v18 }
 0x158   : > { %1496 = vrot.lane.b32.xlu0 %v9400_v22, %s16075_s15  ;;  %1498 = vrot.lane.b32.xlu1 %v9403_v29, %s16075_s15  ;;  %16177 = vst [vmem:[#allocation39_spill] sm:$0xff] %v9493_v48  ;;  %v969_v19 = vrot.slane %v9493_v48, 7  ;;  %v9503_v58 = vmax.f32 %v884_v52, 0.0  ;;  %v1145_v52 = vrot.slane %v1080_v14, 1 }
 0x159   : > { %v9505_v63 = vmax.f32 %v883_v53, 0.0 }
 0x15a   : > { %16178 = vst [vmem:[#allocation40_spill] sm:$0xff] %v9503_v58  ;;  %v994_v0 = vrot.slane %v9503_v58, 7  ;;  %v9514_v5 = vsel %vm960_vm1, 0.0, %v969_v19  ;;  %v9517_v9 = vsel %vm960_vm1, %v969_v19, %v970_v17  ;;  %v9541_v19 = vpop.f32.mrb[12].mxu1 }
 0x15b   : > { %16179 = vst [vmem:[#allocation41_spill] sm:$0xff] %v9505_v63  ;;  %v993_v1 = vrot.slane %v9505_v63, 7  ;;  %v1143_v18 = vrot.slane %v9517_v9, 1  ;;  %v1142_v53 = vrot.slane %v9514_v5, 1  ;;  %v9543_v58 = vpop.f32.mrb[13].mxu1  ;;  %v1224_v11 = vrot.slane %v9517_v9, 2 }
 0x15c   : > { %1528 = vrot.lane.b32.xlu0 %v9411_v31, %s16075_s15  ;;  %1530 = vrot.lane.b32.xlu1 %v9414_v32, %s16075_s15  ;;  %v1088_v17 = vsel %vm960_vm1, %v994_v0, 0.0 }
 0x15d   : > { %v9527_v38 = vsel %vm960_vm1, 0.0, %v993_v1  ;;  %v9530_v39 = vsel %vm960_vm1, %v993_v1, %v994_v0  ;;  %v9546_v1 = vsel %vm1126_vm3, %v1143_v18, %v1145_v52  ;;  %v9549_v63 = vsel %vm1126_vm3, %v1142_v53, %v1143_v18 }
 0x15e   : > { %16180 = vst [vmem:[#allocation42_spill] sm:$0xff] %v9527_v38  ;;  %16181 = vst [vmem:[#allocation43_spill] sm:$0xff] %v9530_v39  ;;  %v1183_v12 = vrot.slane %v9530_v39, 1  ;;  %v1185_v13 = vrot.slane %v1088_v17, 1  ;;  %v1182_v7 = vrot.slane %v9527_v38, 1  ;;  %v1223_v0 = vrot.slane %v9514_v5, 2 }
 0x15f   : > { %16182 = vst [vmem:[#allocation44_spill] sm:$0xff] %v9546_v1  ;;  %16183 = vst [vmem:[#allocation45_spill] sm:$0xff] %v9549_v63  ;;  %v1226_v53 = vrot.slane %v1080_v14, 2  ;;  %v1263_v2 = vrot.slane %v9527_v38, 2  ;;  %v1266_v3 = vrot.slane %v1088_v17, 2 }
 0x160   : > { %1310 = vrot.lane.b32.xlu0 %v9428_v50, %s16048_s25  ;;  %1308 = vrot.lane.b32.xlu1 %v9431_v51, %s16048_s25  ;;  %v9560_v52 = vsel %vm1126_vm3, %v1183_v12, %v1185_v13  ;;  %v9563_v18 = vsel %vm1126_vm3, %v1182_v7, %v1183_v12  ;;  %v9570_v40 = vsel %vm1207_vm2, %v1223_v0, %v1224_v11  ;;  %v1264_v13 = vrot.slane %v9530_v39, 2 }
 0x161   : > { %16184 = vst [vmem:[#allocation46_spill] sm:$0xff] %v9560_v52  ;;  %16185 = vst [vmem:[#allocation47_spill] sm:$0xff] %v9563_v18  ;;  %v9573_v48 = vsel %vm1207_vm2, %v1224_v11, %v1226_v53  ;;  %v831_v7 = vmul.f32 %v9312_v25, %v9256_v54  ;;  %v830_v12 = vmul.f32 %v9256_v54, %v9316_v27 }
 0x162   : > { %16186 = vst [vmem:[#allocation48_spill] sm:$0xff] %v9570_v40  ;;  %16187 = vst [vmem:[#allocation49_spill] sm:$0xff] %v9573_v48  ;;  %v9586_v11 = vsel %vm1207_vm2, %v1263_v2, %v1264_v13  ;;  %v9589_v14 = vsel %vm1207_vm2, %v1264_v13, %v1266_v3  ;;  %v847_v25 = vmul.f32 %v9314_v26, %v9256_v54 }
 0x163   : > { %v870_v17 = vadd.f32 %v9261_v56, %v831_v7  ;;  %v869_v0 = vadd.f32 %v9261_v56, %v830_v12  ;;  %v846_v27 = vmul.f32 %v9256_v54, %v9318_v28 }
 0x164   : > { %1342 = vrot.lane.b32.xlu0 %v9444_v59, %s16048_s25  ;;  %1340 = vrot.lane.b32.xlu1 %v9447_v62, %s16048_s25  ;;  %v886_v53 = vadd.f32 %v9261_v56, %v847_v25 }
 0x165   : > { %v9605_v2 = vmax.f32 %v870_v17, 0.0  ;;  %v9607_v3 = vmax.f32 %v869_v0, 0.0  ;;  %v885_v13 = vadd.f32 %v9261_v56, %v846_v27  ;;  %v9625_v17 = vpop.f32.mrb[14].mxu0 }
 0x166   : > { %v9617_v7 = vmax.f32 %v886_v53, 0.0 }
 0x167   : > { %16188 = vst [vmem:[#allocation50_spill] sm:$0xff] %v9605_v2  ;;  %16189 = vst [vmem:[#allocation51_spill] sm:$0xff] %v9607_v3  ;;  %v973_v26 = vrot.slane %v9605_v2, 7  ;;  %v972_v28 = vrot.slane %v9607_v3, 7  ;;  %v9619_v12 = vmax.f32 %v885_v13, 0.0  ;;  %v9635_v13 = vpop.f32.mrb[15].mxu0  ;;  %v9637_v2 = vpop.permute.xlu1 %8780 }
 0x168   : > { %1404 = vrot.lane.b32.xlu0 %v9456_v4, %s16050_s23  ;;  %1406 = vrot.lane.b32.xlu1 %v9459_v8, %s16050_s23  ;;  %16190 = vst [vmem:[#allocation52_spill] sm:$0xff] %v9617_v7  ;;  %v997_v0 = vrot.slane %v9617_v7, 7  ;;  %16192 = vst [vmem:[#allocation54_spill] sm:$0xff] %v9637_v2  ;;  %v9643_v3 = vpop.permute.xlu0 %8775 }
 0x169   : > { %16191 = vst [vmem:[#allocation53_spill] sm:$0xff] %v9619_v12  ;;  %v996_v25 = vrot.slane %v9619_v12, 7  ;;  %v9630_v27 = vsel %vm960_vm1, 0.0, %v972_v28  ;;  %v9633_v53 = vsel %vm960_vm1, %v972_v28, %v973_v26  ;;  %16193 = vst [vmem:[#allocation55_spill] sm:$0xff] %v9643_v3  ;;  %v1081_v7 = vsel %vm960_vm1, %v973_v26, 0.0  ;;  %v9646_v12 = vpop.f32.mrb[14].mxu1 }
 0x16a   : > { %v9654_v10 = vpop.f32.mrb[15].mxu1  ;;  %v1148_v46 = vrot.slane %v9633_v53, 1  ;;  %v1150_v21 = vrot.slane %v1081_v7, 1  ;;  %v1147_v49 = vrot.slane %v9630_v27, 1  ;;  %v1089_v26 = vsel %vm960_vm1, %v997_v0, 0.0 }
 0x16b   : > { %v9649_v6 = vsel %vm960_vm1, 0.0, %v996_v25  ;;  %v9652_v28 = vsel %vm960_vm1, %v996_v25, %v997_v0 }
 0x16c   : > { %1436 = vrot.lane.b32.xlu0 %v9472_v30, %s16050_s23  ;;  %1438 = vrot.lane.b32.xlu1 %v9475_v36, %s16050_s23  ;;  %16194 = vst [vmem:[#allocation56_spill] sm:$0xff] %v9649_v6  ;;  %16195 = vst [vmem:[#allocation57_spill] sm:$0xff] %v9652_v28  ;;  %v1188_v25 = vrot.slane %v9652_v28, 1  ;;  %v9669_v3 = vsel %vm1126_vm3, %v1148_v46, %v1150_v21  ;;  %v1268_v47 = vrot.slane %v9649_v6, 2 }
 0x16d   : > { %16198 = vst [vmem:[#allocation60_spill] sm:$0xff] %v9669_v3 }
 0x170   : > { %1592 = vrot.lane.b32.xlu0 %v9431_v51, %s15913_s24  ;;  %1594 = vrot.lane.b32.xlu1 %v9428_v50, %s15913_s24 }
 0x174   : > { %1624 = vrot.lane.b32.xlu0 %v9447_v62, %s15913_s24  ;;  %1626 = vrot.lane.b32.xlu1 %v9444_v59, %s15913_s24  ;;  %v1187_v59 = vrot.slane %v9649_v6, 1  ;;  %v1231_v62 = vrot.slane %v1081_v7, 2  ;;  %v1269_v7 = vrot.slane %v9652_v28, 2 }
 0x178   : > { %1688 = vrot.lane.b32.xlu0 %v9456_v4, %s15911_s19  ;;  %1690 = vrot.lane.b32.xlu1 %v9459_v8, %s15911_s19 }
 0x17c   : > { %1500 = vrot.lane.b32.xlu0 %v9514_v5, %s16075_s15  ;;  %1502 = vrot.lane.b32.xlu1 %v9517_v9, %s16075_s15 }
 0x180   : > { %1532 = vrot.lane.b32.xlu0 %v9527_v38, %s16075_s15  ;;  %1534 = vrot.lane.b32.xlu1 %v9530_v39, %s16075_s15 }
 0x184   : > { %1314 = vrot.lane.b32.xlu0 %v9546_v1, %s16048_s25  ;;  %1312 = vrot.lane.b32.xlu1 %v9549_v63, %s16048_s25 }
 0x188   : > { %1346 = vrot.lane.b32.xlu0 %v9560_v52, %s16048_s25  ;;  %1344 = vrot.lane.b32.xlu1 %v9563_v18, %s16048_s25 }
 0x18c   : > { %1408 = vrot.lane.b32.xlu0 %v9570_v40, %s16050_s23  ;;  %1410 = vrot.lane.b32.xlu1 %v9573_v48, %s16050_s23 }
 0x190   : > { %1440 = vrot.lane.b32.xlu0 %v9586_v11, %s16050_s23  ;;  %1442 = vrot.lane.b32.xlu1 %v9589_v14, %s16050_s23 }
 0x194   : > { %1596 = vrot.lane.b32.xlu0 %v9549_v63, %s15913_s24  ;;  %1598 = vrot.lane.b32.xlu1 %v9546_v1, %s15913_s24 }
 0x198   : > { %1628 = vrot.lane.b32.xlu0 %v9563_v18, %s15913_s24  ;;  %1630 = vrot.lane.b32.xlu1 %v9560_v52, %s15913_s24  ;;  %v9672_v52 = vsel %vm1126_vm3, %v1147_v49, %v1148_v46  ;;  %v1190_v18 = vrot.slane %v1089_v26, 1  ;;  %v9688_v46 = vsel %vm1126_vm3, %v1187_v59, %v1188_v25  ;;  %v1229_v49 = vrot.slane %v9633_v53, 2 }
 0x199   : > { %16199 = vst [vmem:[#allocation61_spill] sm:$0xff] %v9672_v52  ;;  %16203 = vst [vmem:[#allocation65_spill] sm:$0xff] %v9688_v46 }
 0x19a   : > { %v9685_v21 = vsel %vm1126_vm3, %v1188_v25, %v1190_v18  ;;  %v9704_v59 = vsel %vm1207_vm2, %v1229_v49, %v1231_v62  ;;  %v1271_v25 = vrot.slane %v1089_v26, 2  ;;  %v9720_v62 = vsel %vm1207_vm2, %v1268_v47, %v1269_v7 }
 0x19b   : > { %16202 = vst [vmem:[#allocation64_spill] sm:$0xff] %v9685_v21  ;;  %16207 = vst [vmem:[#allocation69_spill] sm:$0xff] %v9704_v59  ;;  %v848_v47 = vmul.f32 %v9256_v54, %v9339_v43 }
 0x19c   : > { %1692 = vrot.lane.b32.xlu0 %v9570_v40, %s15911_s19  ;;  %1694 = vrot.lane.b32.xlu1 %v9573_v48, %s15911_s19  ;;  %v9723_v26 = vsel %vm1207_vm2, %v1269_v7, %v1271_v25 }
 0x1a0   : > { %1504 = vrot.lane.b32.xlu0 %v9630_v27, %s16075_s15  ;;  %1506 = vrot.lane.b32.xlu1 %v9633_v53, %s16075_s15 }
 0x1a4   : > { %1536 = vrot.lane.b32.xlu0 %v9649_v6, %s16075_s15  ;;  %1538 = vrot.lane.b32.xlu1 %v9652_v28, %s16075_s15 }
 0x1a6   : > { %v9663_v20 = vpop.permute.xlu0 %1492  ;;  %v9665_v2 = vpop.permute.xlu1 %1494 }
 0x1a7   : > { %16196 = vst [vmem:[#allocation58_spill] sm:$0xff] %v9663_v20  ;;  %16197 = vst [vmem:[#allocation59_spill] sm:$0xff] %v9665_v2  ;;  %v1228_v20 = vrot.slane %v9630_v27, 2 }
 0x1a8   : > { %1318 = vrot.lane.b32.xlu0 %v9669_v3, %s16048_s25  ;;  %1316 = vrot.lane.b32.xlu1 %v9672_v52, %s16048_s25 }
 0x1a9   : > { %v9701_v18 = vsel %vm1207_vm2, %v1228_v20, %v1229_v49  ;;  %v849_v49 = vmul.f32 %v9335_v42, %v9256_v54  ;;  %v887_v42 = vadd.f32 %v9261_v56, %v848_v47 }
 0x1aa   : > { %v9679_v0 = vpop.permute.xlu0 %1524  ;;  %v9681_v2 = vpop.permute.xlu1 %1526  ;;  %16206 = vst [vmem:[#allocation68_spill] sm:$0xff] %v9701_v18 }
 0x1ab   : > { %16200 = vst [vmem:[#allocation62_spill] sm:$0xff] %v9679_v0  ;;  %16201 = vst [vmem:[#allocation63_spill] sm:$0xff] %v9681_v2 }
 0x1ac   : > { %1350 = vrot.lane.b32.xlu0 %v9685_v21, %s16048_s25  ;;  %1348 = vrot.lane.b32.xlu1 %v9688_v46, %s16048_s25 }
 0x1ae   : > { %v9695_v0 = vpop.permute.xlu1 %1306  ;;  %v9697_v2 = vpop.permute.xlu0 %1304 }
 0x1af   : > { %16204 = vst [vmem:[#allocation66_spill] sm:$0xff] %v9695_v0  ;;  %16205 = vst [vmem:[#allocation67_spill] sm:$0xff] %v9697_v2  ;;  %v833_v0 = vmul.f32 %v9327_v35, %v9256_v54  ;;  %v832_v2 = vmul.f32 %v9256_v54, %v9330_v37 }
 0x1b0   : > { %1412 = vrot.lane.b32.xlu0 %v9701_v18, %s16050_s23  ;;  %1414 = vrot.lane.b32.xlu1 %v9704_v59, %s16050_s23 }
 0x1b1   : > { %v872_v35 = vadd.f32 %v9261_v56, %v833_v0  ;;  %v871_v37 = vadd.f32 %v9261_v56, %v832_v2  ;;  %v888_v2 = vadd.f32 %v9261_v56, %v849_v49 }
 0x1b2   : > { %v9715_v20 = vpop.permute.xlu1 %1336  ;;  %v9717_v45 = vpop.permute.xlu0 %1338 }
 0x1b3   : > { %16208 = vst [vmem:[#allocation70_spill] sm:$0xff] %v9715_v20  ;;  %16209 = vst [vmem:[#allocation71_spill] sm:$0xff] %v9717_v45  ;;  %v9743_v25 = vmax.f32 %v872_v35, 0.0  ;;  %v9745_v0 = vmax.f32 %v871_v37, 0.0  ;;  %v9759_v37 = vmax.f32 %v888_v2, 0.0 }
 0x1b4   : > { %1444 = vrot.lane.b32.xlu0 %v9720_v62, %s16050_s23  ;;  %1446 = vrot.lane.b32.xlu1 %v9723_v26, %s16050_s23 }
 0x1b5   : > { %16212 = vst [vmem:[#allocation74_spill] sm:$0xff] %v9743_v25  ;;  %16213 = vst [vmem:[#allocation75_spill] sm:$0xff] %v9745_v0  ;;  %v975_v35 = vrot.slane %v9745_v0, 7 }
 0x1b6   : > { %v9735_v45 = vpop.permute.xlu1 %1402  ;;  %v9737_v7 = vpop.permute.xlu0 %1400  ;;  %16216 = vst [vmem:[#allocation78_spill] sm:$0xff] %v9759_v37 }
 0x1b7   : > { %16210 = vst [vmem:[#allocation72_spill] sm:$0xff] %v9735_v45  ;;  %16211 = vst [vmem:[#allocation73_spill] sm:$0xff] %v9737_v7  ;;  %v976_v45 = vrot.slane %v9743_v25, 7  ;;  %v9761_v7 = vmax.f32 %v887_v42, 0.0  ;;  %v9774_v25 = vsel %vm960_vm1, 0.0, %v975_v35 }
 0x1b8   : > { %1600 = vrot.lane.b32.xlu0 %v9672_v52, %s15913_s24  ;;  %1602 = vrot.lane.b32.xlu1 %v9669_v3, %s15913_s24 }
 0x1b9   : > { %16217 = vst [vmem:[#allocation79_spill] sm:$0xff] %v9761_v7  ;;  %v9777_v2 = vsel %vm960_vm1, %v975_v35, %v976_v45 }
 0x1ba   : > { %v9749_v20 = vpop.permute.xlu1 %1434  ;;  %v9751_v43 = vpop.permute.xlu0 %1432 }
 0x1bb   : > { %16214 = vst [vmem:[#allocation76_spill] sm:$0xff] %v9749_v20  ;;  %16215 = vst [vmem:[#allocation77_spill] sm:$0xff] %v9751_v43  ;;  %v1000_v20 = vrot.slane %v9759_v37, 7  ;;  %v999_v43 = vrot.slane %v9761_v7, 7  ;;  %v1082_v37 = vsel %vm960_vm1, %v976_v45, 0.0 }
 0x1bc   : > { %1632 = vrot.lane.b32.xlu0 %v9688_v46, %s15913_s24  ;;  %1634 = vrot.lane.b32.xlu1 %v9685_v21, %s15913_s24  ;;  %v1152_v21 = vrot.slane %v9774_v25, 1  ;;  %v1236_v52 = vrot.slane %v1082_v37, 2 }
 0x1bd   : > { %v9789_v7 = vsel %vm960_vm1, 0.0, %v999_v43  ;;  %v1090_v45 = vsel %vm960_vm1, %v1000_v20, 0.0 }
 0x1be   : > { %v9763_v49 = vpop.permute.xlu1 %1590  ;;  %v9765_v47 = vpop.permute.xlu0 %1588  ;;  %16222 = vst [vmem:[#allocation84_spill] sm:$0xff] %v9789_v7  ;;  %v1192_v3 = vrot.slane %v9789_v7, 1  ;;  %v1273_v48 = vrot.slane %v9789_v7, 2 }
 0x1bf   : > { %16218 = vst [vmem:[#allocation80_spill] sm:$0xff] %v9763_v49  ;;  %16219 = vst [vmem:[#allocation81_spill] sm:$0xff] %v9765_v47  ;;  %v9792_v49 = vsel %vm960_vm1, %v999_v43, %v1000_v20 }
 0x1c0   : > { %1696 = vrot.lane.b32.xlu0 %v9701_v18, %s15911_s19  ;;  %1698 = vrot.lane.b32.xlu1 %v9704_v59, %s15911_s19  ;;  %16223 = vst [vmem:[#allocation85_spill] sm:$0xff] %v9792_v49  ;;  %v1195_v18 = vrot.slane %v1090_v45, 1 }
 0x1c2   : > { %v9779_v42 = vpop.permute.xlu1 %1622  ;;  %v9781_v0 = vpop.permute.xlu0 %1620 }
 0x1c3   : > { %16220 = vst [vmem:[#allocation82_spill] sm:$0xff] %v9779_v42  ;;  %16221 = vst [vmem:[#allocation83_spill] sm:$0xff] %v9781_v0  ;;  %v1153_v42 = vrot.slane %v9777_v2, 1  ;;  %v1155_v0 = vrot.slane %v1082_v37, 1  ;;  %v1274_v37 = vrot.slane %v9792_v49, 2 }
 0x1c4   : > { %1508 = vrot.lane.b32.xlu0 %v9774_v25, %s16075_s15  ;;  %1510 = vrot.lane.b32.xlu1 %v9777_v2, %s16075_s15 }
 0x1c5   : > { %v9814_v59 = vsel %vm1126_vm3, %v1152_v21, %v1153_v42 }
 0x1c6   : > { %v9794_v35 = vpop.permute.xlu1 %1686  ;;  %v9796_v47 = vpop.permute.xlu0 %1684  ;;  %16229 = vst [vmem:[#allocation91_spill] sm:$0xff] %v9814_v59 }
 0x1c7   : > { %16224 = vst [vmem:[#allocation86_spill] sm:$0xff] %v9794_v35  ;;  %16225 = vst [vmem:[#allocation87_spill] sm:$0xff] %v9796_v47  ;;  %v1193_v35 = vrot.slane %v9792_v49, 1  ;;  %v9811_v47 = vsel %vm1126_vm3, %v1153_v42, %v1155_v0  ;;  %v1234_v42 = vrot.slane %v9777_v2, 2 }
 0x1c8   : > { %1540 = vrot.lane.b32.xlu0 %v9789_v7, %s16075_s15  ;;  %1542 = vrot.lane.b32.xlu1 %v9792_v49, %s16075_s15  ;;  %16228 = vst [vmem:[#allocation90_spill] sm:$0xff] %v9811_v47 }
 0x1c9   : > { %v9827_v0 = vsel %vm1126_vm3, %v1193_v35, %v1195_v18  ;;  %v9830_v21 = vsel %vm1126_vm3, %v1192_v3, %v1193_v35  ;;  %v9846_v3 = vsel %vm1207_vm2, %v1234_v42, %v1236_v52  ;;  %v1276_v35 = vrot.slane %v1090_v45, 2 }
 0x1ca   : > { %v9805_v46 = vpop.permute.xlu0 %1496  ;;  %v9807_v43 = vpop.permute.xlu1 %1498  ;;  %16232 = vst [vmem:[#allocation94_spill] sm:$0xff] %v9827_v0  ;;  %16233 = vst [vmem:[#allocation95_spill] sm:$0xff] %v9830_v21  ;;  %v9862_v52 = vsel %vm1207_vm2, %v1273_v48, %v1274_v37  ;;  %v850_v48 = vmul.f32 %v9256_v54, %v9441_v57 }
 0x1cb   : > { %16226 = vst [vmem:[#allocation88_spill] sm:$0xff] %v9805_v46  ;;  %16227 = vst [vmem:[#allocation89_spill] sm:$0xff] %v9807_v43  ;;  %v1233_v46 = vrot.slane %v9774_v25, 2  ;;  %v9865_v45 = vsel %vm1207_vm2, %v1274_v37, %v1276_v35 }
 0x1cc   : > { %1322 = vrot.lane.b32.xlu0 %v9811_v47, %s16048_s25  ;;  %1320 = vrot.lane.b32.xlu1 %v9814_v59, %s16048_s25  ;;  %16237 = vst [vmem:[#allocation99_spill] sm:$0xff] %v9846_v3 }
 0x1cd   : > { %v9843_v18 = vsel %vm1207_vm2, %v1233_v46, %v1234_v42  ;;  %v851_v42 = vmul.f32 %v9435_v55, %v9256_v54  ;;  %v889_v55 = vadd.f32 %v9261_v56, %v850_v48 }
 0x1ce   : > { %v9821_v20 = vpop.permute.xlu0 %1528  ;;  %v9823_v43 = vpop.permute.xlu1 %1530  ;;  %16236 = vst [vmem:[#allocation98_spill] sm:$0xff] %v9843_v18 }
 0x1cf   : > { %16230 = vst [vmem:[#allocation92_spill] sm:$0xff] %v9821_v20  ;;  %16231 = vst [vmem:[#allocation93_spill] sm:$0xff] %v9823_v43 }
 0x1d0   : > { %1354 = vrot.lane.b32.xlu0 %v9827_v0, %s16048_s25  ;;  %1352 = vrot.lane.b32.xlu1 %v9830_v21, %s16048_s25 }
 0x1d2   : > { %v9837_v20 = vpop.permute.xlu0 %1310  ;;  %v9839_v43 = vpop.permute.xlu1 %1308 }
 0x1d3   : > { %16234 = vst [vmem:[#allocation96_spill] sm:$0xff] %v9837_v20  ;;  %16235 = vst [vmem:[#allocation97_spill] sm:$0xff] %v9839_v43  ;;  %v835_v20 = vmul.f32 %v9423_v41, %v9256_v54  ;;  %v834_v43 = vmul.f32 %v9256_v54, %v9425_v44 }
 0x1d4   : > { %1416 = vrot.lane.b32.xlu0 %v9843_v18, %s16050_s23  ;;  %1418 = vrot.lane.b32.xlu1 %v9846_v3, %s16050_s23 }
 0x1d5   : > { %v874_v41 = vadd.f32 %v9261_v56, %v835_v20  ;;  %v873_v44 = vadd.f32 %v9261_v56, %v834_v43  ;;  %v890_v43 = vadd.f32 %v9261_v56, %v851_v42 }
 0x1d6   : > { %v9857_v46 = vpop.permute.xlu0 %1342  ;;  %v9859_v40 = vpop.permute.xlu1 %1340 }
 0x1d7   : > { %16238 = vst [vmem:[#allocation100_spill] sm:$0xff] %v9857_v46  ;;  %16239 = vst [vmem:[#allocation101_spill] sm:$0xff] %v9859_v40  ;;  %v9885_v35 = vmax.f32 %v874_v41, 0.0  ;;  %v9887_v20 = vmax.f32 %v873_v44, 0.0  ;;  %v9901_v44 = vmax.f32 %v890_v43, 0.0 }
 0x1d8   : > { %1448 = vrot.lane.b32.xlu0 %v9862_v52, %s16050_s23  ;;  %1450 = vrot.lane.b32.xlu1 %v9865_v45, %s16050_s23 }
 0x1d9   : > { %16242 = vst [vmem:[#allocation104_spill] sm:$0xff] %v9885_v35  ;;  %16243 = vst [vmem:[#allocation105_spill] sm:$0xff] %v9887_v20  ;;  %v978_v41 = vrot.slane %v9887_v20, 7 }
 0x1da   : > { %v9877_v46 = vpop.permute.xlu0 %1404  ;;  %v9879_v37 = vpop.permute.xlu1 %1406  ;;  %16246 = vst [vmem:[#allocation108_spill] sm:$0xff] %v9901_v44 }
 0x1db   : > { %16240 = vst [vmem:[#allocation102_spill] sm:$0xff] %v9877_v46  ;;  %16241 = vst [vmem:[#allocation103_spill] sm:$0xff] %v9879_v37  ;;  %v979_v37 = vrot.slane %v9885_v35, 7  ;;  %v9903_v46 = vmax.f32 %v889_v55, 0.0  ;;  %v9916_v35 = vsel %vm960_vm1, 0.0, %v978_v41 }
 0x1dc   : > { %1604 = vrot.lane.b32.xlu0 %v9814_v59, %s15913_s24  ;;  %1606 = vrot.lane.b32.xlu1 %v9811_v47, %s15913_s24 }
 0x1dd   : > { %16247 = vst [vmem:[#allocation109_spill] sm:$0xff] %v9903_v46  ;;  %v9919_v43 = vsel %vm960_vm1, %v978_v41, %v979_v37 }
 0x1de   : > { %v9891_v40 = vpop.permute.xlu0 %1436  ;;  %v9893_v57 = vpop.permute.xlu1 %1438  ;;  %v1239_v59 = vrot.slane %v9919_v43, 2 }
 0x1df   : > { %16244 = vst [vmem:[#allocation106_spill] sm:$0xff] %v9891_v40  ;;  %16245 = vst [vmem:[#allocation107_spill] sm:$0xff] %v9893_v57  ;;  %v1003_v57 = vrot.slane %v9901_v44, 7  ;;  %v1002_v40 = vrot.slane %v9903_v46, 7  ;;  %v1083_v44 = vsel %vm960_vm1, %v979_v37, 0.0 }
 0x1e0   : > { %1636 = vrot.lane.b32.xlu0 %v9830_v21, %s15913_s24  ;;  %1638 = vrot.lane.b32.xlu1 %v9827_v0, %s15913_s24  ;;  %v1157_v0 = vrot.slane %v9916_v35, 1 }
 0x1e1   : > { %v9931_v46 = vsel %vm960_vm1, 0.0, %v1002_v40  ;;  %v1091_v37 = vsel %vm960_vm1, %v1003_v57, 0.0 }
 0x1e2   : > { %v9905_v42 = vpop.permute.xlu0 %1592  ;;  %v9907_v48 = vpop.permute.xlu1 %1594  ;;  %16252 = vst [vmem:[#allocation114_spill] sm:$0xff] %v9931_v46  ;;  %v1197_v47 = vrot.slane %v9931_v46, 1  ;;  %v1281_v8 = vrot.slane %v1091_v37, 2 }
 0x1e3   : > { %16248 = vst [vmem:[#allocation110_spill] sm:$0xff] %v9905_v42  ;;  %16249 = vst [vmem:[#allocation111_spill] sm:$0xff] %v9907_v48  ;;  %v9934_v48 = vsel %vm960_vm1, %v1002_v40, %v1003_v57 }
 0x1e4   : > { %1700 = vrot.lane.b32.xlu0 %v9843_v18, %s15911_s19  ;;  %1702 = vrot.lane.b32.xlu1 %v9846_v3, %s15911_s19  ;;  %16253 = vst [vmem:[#allocation115_spill] sm:$0xff] %v9934_v48  ;;  %v1200_v18 = vrot.slane %v1091_v37, 1  ;;  %v1279_v63 = vrot.slane %v9934_v48, 2 }
 0x1e6   : > { %v9921_v55 = vpop.permute.xlu0 %1624  ;;  %v9923_v20 = vpop.permute.xlu1 %1626 }
 0x1e7   : > { %16250 = vst [vmem:[#allocation112_spill] sm:$0xff] %v9921_v55  ;;  %16251 = vst [vmem:[#allocation113_spill] sm:$0xff] %v9923_v20  ;;  %v1158_v20 = vrot.slane %v9919_v43, 1  ;;  %v1160_v55 = vrot.slane %v1083_v44, 1 }
 0x1e8   : > { %1512 = vrot.lane.b32.xlu0 %v9916_v35, %s16075_s15  ;;  %1514 = vrot.lane.b32.xlu1 %v9919_v43, %s16075_s15 }
 0x1e9   : > { %v9956_v3 = vsel %vm1126_vm3, %v1157_v0, %v1158_v20 }
 0x1ea   : > { %v9936_v41 = vpop.permute.xlu0 %1688  ;;  %v9938_v42 = vpop.permute.xlu1 %1690  ;;  %16259 = vst [vmem:[#allocation121_spill] sm:$0xff] %v9956_v3 }
 0x1eb   : > { %16254 = vst [vmem:[#allocation116_spill] sm:$0xff] %v9936_v41  ;;  %16255 = vst [vmem:[#allocation117_spill] sm:$0xff] %v9938_v42  ;;  %v1198_v41 = vrot.slane %v9934_v48, 1  ;;  %v9953_v42 = vsel %vm1126_vm3, %v1158_v20, %v1160_v55  ;;  %v1238_v20 = vrot.slane %v9916_v35, 2 }
 0x1ec   : > { %1544 = vrot.lane.b32.xlu0 %v9931_v46, %s16075_s15  ;;  %1546 = vrot.lane.b32.xlu1 %v9934_v48, %s16075_s15  ;;  %16258 = vst [vmem:[#allocation120_spill] sm:$0xff] %v9953_v42 }
 0x1ed   : > { %v9968_v55 = vsel %vm1126_vm3, %v1198_v41, %v1200_v18  ;;  %v9971_v0 = vsel %vm1126_vm3, %v1197_v47, %v1198_v41  ;;  %v836_v18 = vmul.f32 %v9256_v54, %v9532_v16  ;;  %v1278_v41 = vrot.slane %v9931_v46, 2 }
 0x1ee   : > { %v9947_v21 = vpop.permute.xlu0 %1500  ;;  %v9949_v40 = vpop.permute.xlu1 %1502  ;;  %16262 = vst [vmem:[#allocation124_spill] sm:$0xff] %v9968_v55  ;;  %16263 = vst [vmem:[#allocation125_spill] sm:$0xff] %v9971_v0 }
 0x1ef   : > { %16256 = vst [vmem:[#allocation118_spill] sm:$0xff] %v9947_v21  ;;  %16257 = vst [vmem:[#allocation119_spill] sm:$0xff] %v9949_v40  ;;  %v1241_v21 = vrot.slane %v1083_v44, 2  ;;  %v875_v16 = vadd.f32 %v9261_v56, %v836_v18  ;;  %v10010_v37 = vsel %vm1207_vm2, %v1278_v41, %v1279_v63 }
 0x1f0   : > { %1326 = vrot.lane.b32.xlu0 %v9953_v42, %s16048_s25  ;;  %1324 = vrot.lane.b32.xlu1 %v9956_v3, %s16048_s25 }
 0x1f1   : > { %v9992_v1 = vsel %vm1207_vm2, %v1239_v59, %v1241_v21 }
 0x1f2   : > { %v9963_v57 = vpop.permute.xlu0 %1532  ;;  %v9965_v40 = vpop.permute.xlu1 %1534 }
 0x1f3   : > { %16260 = vst [vmem:[#allocation122_spill] sm:$0xff] %v9963_v57  ;;  %16261 = vst [vmem:[#allocation123_spill] sm:$0xff] %v9965_v40  ;;  %v837_v40 = vmul.f32 %v9524_v15, %v9256_v54  ;;  %v9989_v57 = vsel %vm1207_vm2, %v1238_v20, %v1239_v59  ;;  %v853_v20 = vmul.f32 %v9541_v19, %v9256_v54 }
 0x1f4   : > { %1358 = vrot.lane.b32.xlu0 %v9968_v55, %s16048_s25  ;;  %1356 = vrot.lane.b32.xlu1 %v9971_v0, %s16048_s25  ;;  %v852_v59 = vmul.f32 %v9256_v54, %v9543_v58 }
 0x1f5   : > { %v876_v15 = vadd.f32 %v9261_v56, %v837_v40  ;;  %v10021_v40 = vmax.f32 %v875_v16, 0.0  ;;  %v892_v58 = vadd.f32 %v9261_v56, %v853_v20 }
 0x1f6   : > { %v9983_v44 = vpop.permute.xlu0 %1314  ;;  %v9985_v47 = vpop.permute.xlu1 %1312  ;;  %v891_v18 = vadd.f32 %v9261_v56, %v852_v59 }
 0x1f7   : > { %16264 = vst [vmem:[#allocation126_spill] sm:$0xff] %v9983_v44  ;;  %16265 = vst [vmem:[#allocation127_spill] sm:$0xff] %v9985_v47  ;;  %v10013_v47 = vsel %vm1207_vm2, %v1279_v63, %v1281_v8  ;;  %v10019_v19 = vmax.f32 %v876_v15, 0.0  ;;  %v981_v63 = vrot.slane %v10021_v40, 7  ;;  %v10035_v15 = vmax.f32 %v892_v58, 0.0 }
 0x1f8   : > { %1420 = vrot.lane.b32.xlu0 %v9989_v57, %s16050_s23  ;;  %1422 = vrot.lane.b32.xlu1 %v9992_v1, %s16050_s23  ;;  %16269 = vst [vmem:[#allocation131_spill] sm:$0xff] %v10021_v40  ;;  %v10037_v16 = vmax.f32 %v891_v18, 0.0 }
 0x1f9   : > { %16268 = vst [vmem:[#allocation130_spill] sm:$0xff] %v10019_v19  ;;  %v982_v8 = vrot.slane %v10019_v19, 7  ;;  %16272 = vst [vmem:[#allocation134_spill] sm:$0xff] %v10035_v15  ;;  %v10050_v40 = vsel %vm960_vm1, 0.0, %v981_v63 }
 0x1fa   : > { %v10005_v21 = vpop.permute.xlu0 %1346  ;;  %v10007_v44 = vpop.permute.xlu1 %1344  ;;  %16273 = vst [vmem:[#allocation135_spill] sm:$0xff] %v10037_v16  ;;  %v1005_v19 = vrot.slane %v10037_v16, 7 }
 0x1fb   : > { %16266 = vst [vmem:[#allocation128_spill] sm:$0xff] %v10005_v21  ;;  %16267 = vst [vmem:[#allocation129_spill] sm:$0xff] %v10007_v44  ;;  %v1006_v44 = vrot.slane %v10035_v15, 7  ;;  %v10053_v58 = vsel %vm960_vm1, %v981_v63, %v982_v8 }
 0x1fc   : > { %1452 = vrot.lane.b32.xlu0 %v10010_v37, %s16050_s23  ;;  %1454 = vrot.lane.b32.xlu1 %v10013_v47, %s16050_s23  ;;  %16276 = vst [vmem:[#allocation138_spill] sm:$0xff] %v10053_v58  ;;  %v10065_v15 = vsel %vm960_vm1, 0.0, %v1005_v19 }
 0x1fd   : > { %16279 = vst [vmem:[#allocation141_spill] sm:$0xff] %v10065_v15  ;;  %v10068_v16 = vsel %vm960_vm1, %v1005_v19, %v1006_v44 }
 0x1fe   : > { %v10025_v21 = vpop.permute.xlu0 %1408  ;;  %v10027_v41 = vpop.permute.xlu1 %1410  ;;  %16280 = vst [vmem:[#allocation142_spill] sm:$0xff] %v10068_v16  ;;  %v1284_v51 = vrot.slane %v10068_v16, 2 }
 0x1ff   : > { %16270 = vst [vmem:[#allocation132_spill] sm:$0xff] %v10025_v21  ;;  %16271 = vst [vmem:[#allocation133_spill] sm:$0xff] %v10027_v41  ;;  %v1163_v21 = vrot.slane %v10053_v58, 1 }
 0x200   : > { %1608 = vrot.lane.b32.xlu0 %v9956_v3, %s15913_s24  ;;  %1610 = vrot.lane.b32.xlu1 %v9953_v42, %s15913_s24  ;;  %v1202_v3 = vrot.slane %v10065_v15, 1 }
 0x202   : > { %v10039_v20 = vpop.permute.xlu0 %1440  ;;  %v10041_v59 = vpop.permute.xlu1 %1442 }
 0x203   : > { %16274 = vst [vmem:[#allocation136_spill] sm:$0xff] %v10039_v20  ;;  %16275 = vst [vmem:[#allocation137_spill] sm:$0xff] %v10041_v59  ;;  %v1084_v59 = vsel %vm960_vm1, %v982_v8, 0.0  ;;  %v1162_v8 = vrot.slane %v10050_v40, 1 }
 0x204   : > { %1640 = vrot.lane.b32.xlu0 %v9971_v0, %s15913_s24  ;;  %1642 = vrot.lane.b32.xlu1 %v9968_v55, %s15913_s24  ;;  %v1203_v0 = vrot.slane %v10068_v16, 1  ;;  %v1246_v4 = vrot.slane %v1084_v59, 2 }
 0x206   : > { %v10055_v18 = vpop.permute.xlu0 %1596  ;;  %v10057_v20 = vpop.permute.xlu1 %1598 }
 0x207   : > { %16277 = vst [vmem:[#allocation139_spill] sm:$0xff] %v10055_v18  ;;  %16278 = vst [vmem:[#allocation140_spill] sm:$0xff] %v10057_v20  ;;  %v1165_v20 = vrot.slane %v1084_v59, 1  ;;  %v1092_v18 = vsel %vm960_vm1, %v1006_v44, 0.0  ;;  %v1283_v59 = vrot.slane %v10065_v15, 2 }
 0x208   : > { %1516 = vrot.lane.b32.xlu0 %v10050_v40, %s16075_s15  ;;  %1518 = vrot.lane.b32.xlu1 %v10053_v58, %s16075_s15  ;;  %v1205_v42 = vrot.slane %v1092_v18, 1  ;;  %v1286_v33 = vrot.slane %v1092_v18, 2 }
 0x209   : > { %v10144_v18 = vsel %vm1207_vm2, %v1283_v59, %v1284_v51 }
 0x20a   : > { %v10070_v63 = vpop.permute.xlu0 %1628  ;;  %v10072_v41 = vpop.permute.xlu1 %1630 }
 0x20b   : > { %16281 = vst [vmem:[#allocation143_spill] sm:$0xff] %v10070_v63  ;;  %16282 = vst [vmem:[#allocation144_spill] sm:$0xff] %v10072_v41  ;;  %v10086_v63 = vsel %vm1126_vm3, %v1163_v21, %v1165_v20  ;;  %v10089_v41 = vsel %vm1126_vm3, %v1162_v8, %v1163_v21  ;;  %v1243_v20 = vrot.slane %v10050_v40, 2  ;;  %v1244_v21 = vrot.slane %v10053_v58, 2 }
 0x20c   : > { %1548 = vrot.lane.b32.xlu0 %v10065_v15, %s16075_s15  ;;  %1550 = vrot.lane.b32.xlu1 %v10068_v16, %s16075_s15  ;;  %v10104_v8 = vsel %vm1126_vm3, %v1203_v0, %v1205_v42 }
 0x20d   : > { %16287 = vst [vmem:[#allocation149_spill] sm:$0xff] %v10104_v8 }
 0x20e   : > { %v10081_v55 = vpop.permute.xlu0 %1692  ;;  %v10083_v19 = vpop.permute.xlu1 %1694 }
 0x20f   : > { %16283 = vst [vmem:[#allocation145_spill] sm:$0xff] %v10081_v55  ;;  %16284 = vst [vmem:[#allocation146_spill] sm:$0xff] %v10083_v19  ;;  %v10107_v55 = vsel %vm1126_vm3, %v1202_v3, %v1203_v0  ;;  %v10122_v3 = vsel %vm1207_vm2, %v1243_v20, %v1244_v21  ;;  %v10125_v0 = vsel %vm1207_vm2, %v1244_v21, %v1246_v4 }
 0x210   : > { %1330 = vrot.lane.b32.xlu0 %v10086_v63, %s16048_s25  ;;  %1328 = vrot.lane.b32.xlu1 %v10089_v41, %s16048_s25  ;;  %16288 = vst [vmem:[#allocation150_spill] sm:$0xff] %v10107_v55  ;;  %v855_v20 = vmul.f32 %v9646_v12, %v9256_v54  ;;  %v854_v4 = vmul.f32 %v9256_v54, %v9654_v10 }
 0x212   : > { %v10097_v44 = vpop.permute.xlu0 %1504  ;;  %v10099_v19 = vpop.permute.xlu1 %1506 }
 0x213   : > { %16285 = vst [vmem:[#allocation147_spill] sm:$0xff] %v10097_v44  ;;  %16286 = vst [vmem:[#allocation148_spill] sm:$0xff] %v10099_v19  ;;  %v839_v19 = vmul.f32 %v9625_v17, %v9256_v54  ;;  %v838_v44 = vmul.f32 %v9256_v54, %v9635_v13  ;;  %v8815_v54 = vld [vmem:[%s16153_s3] ss:$0 sm:$0xff]  ;;  %s16855_s3 = smov 24  }
 0x214   : > { %1362 = vrot.lane.b32.xlu0 %v10104_v8, %s16048_s25  ;;  %1360 = vrot.lane.b32.xlu1 %v10107_v55, %s16048_s25  ;;  %v894_v10 = vadd.f32 %v8815_v54, %v855_v20 }
 0x215   : > { %v878_v17 = vadd.f32 %v9261_v56, %v839_v19  ;;  %v877_v13 = vadd.f32 %v9261_v56, %v838_v44  ;;  %v893_v19 = vadd.f32 %v8815_v54, %v854_v4 }
 0x216   : > { %v10117_v50 = vpop.permute.xlu0 %1536  ;;  %v10119_v42 = vpop.permute.xlu1 %1538 }
 0x217   : > { %16289 = vst [vmem:[#allocation151_spill] sm:$0xff] %v10117_v50  ;;  %16290 = vst [vmem:[#allocation152_spill] sm:$0xff] %v10119_v42  ;;  %v10147_v50 = vsel %vm1207_vm2, %v1284_v51, %v1286_v33  ;;  %v10153_v56 = vmax.f32 %v878_v17, 0.0  ;;  %v10155_v12 = vmax.f32 %v877_v13, 0.0  ;;  %v10170_v17 = vmax.f32 %v894_v10, 0.0 }
 0x218   : > { %1424 = vrot.lane.b32.xlu0 %v10122_v3, %s16050_s23  ;;  %1426 = vrot.lane.b32.xlu1 %v10125_v0, %s16050_s23  ;;  %v10172_v13 = vmax.f32 %v893_v19, 0.0 }
 0x219   : > { %16293 = vst [vmem:[#allocation155_spill] sm:$0xff] %v10153_v56  ;;  %16294 = vst [vmem:[#allocation156_spill] sm:$0xff] %v10155_v12  ;;  %v985_v51 = vrot.slane %v10153_v56, 7  ;;  %v984_v59 = vrot.slane %v10155_v12, 7  ;;  %v1009_v54 = vrot.slane %v10170_v17, 7 }
 0x21a   : > { %v10139_v21 = vpop.permute.xlu0 %1318  ;;  %v10141_v42 = vpop.permute.xlu1 %1316  ;;  %16297 = vst [vmem:[#allocation159_spill] sm:$0xff] %v10170_v17  ;;  %16298 = vst [vmem:[#allocation160_spill] sm:$0xff] %v10172_v13  ;;  %v1008_v19 = vrot.slane %v10172_v13, 7 }
 0x21b   : > { %16291 = vst [vmem:[#allocation153_spill] sm:$0xff] %v10139_v21  ;;  %16292 = vst [vmem:[#allocation154_spill] sm:$0xff] %v10141_v42  ;;  %v10187_v10 = vsel %vm960_vm1, %v984_v59, %v985_v51  ;;  %v1085_v17 = vsel %vm960_vm1, %v985_v51, 0.0 }
 0x21c   : > { %1456 = vrot.lane.b32.xlu0 %v10144_v18, %s16050_s23  ;;  %1458 = vrot.lane.b32.xlu1 %v10147_v50, %s16050_s23  ;;  %16301 = vst [vmem:[#allocation163_spill] sm:$0xff] %v10187_v10  ;;  %v10200_v12 = vsel %vm960_vm1, 0.0, %v1008_v19 }
 0x21e   : > { %v10160_v44 = vpop.permute.xlu0 %1350  ;;  %v10162_v33 = vpop.permute.xlu1 %1348 }
 0x21f   : > { %16295 = vst [vmem:[#allocation157_spill] sm:$0xff] %v10160_v44  ;;  %16296 = vst [vmem:[#allocation158_spill] sm:$0xff] %v10162_v33  ;;  %v10184_v44 = vsel %vm960_vm1, 0.0, %v984_v59  ;;  %v10203_v59 = vsel %vm960_vm1, %v1008_v19, %v1009_v54 }
 0x220   : > { %1612 = vrot.lane.b32.xlu0 %v10089_v41, %s15913_s24  ;;  %1614 = vrot.lane.b32.xlu1 %v10086_v63, %s15913_s24  ;;  %v1167_v21 = vrot.slane %v10184_v44, 1  ;;  %v1248_v19 = vrot.slane %v10184_v44, 2 }
 0x222   : > { %v10174_v20 = vpop.permute.xlu0 %1412  ;;  %v10176_v4 = vpop.permute.xlu1 %1414 }
 0x223   : > { %16299 = vst [vmem:[#allocation161_spill] sm:$0xff] %v10174_v20  ;;  %16300 = vst [vmem:[#allocation162_spill] sm:$0xff] %v10176_v4 }
 0x224   : > { %1644 = vrot.lane.b32.xlu0 %v10107_v55, %s15913_s24  ;;  %1646 = vrot.lane.b32.xlu1 %v10104_v8, %s15913_s24  ;;  %v1251_v8 = vrot.slane %v1085_v17, 2 }
 0x226   : > { %v10190_v33 = vpop.permute.xlu0 %1444  ;;  %v10192_v56 = vpop.permute.xlu1 %1446 }
 0x227   : > { %16302 = vst [vmem:[#allocation164_spill] sm:$0xff] %v10190_v33  ;;  %16303 = vst [vmem:[#allocation165_spill] sm:$0xff] %v10192_v56  ;;  %v1168_v56 = vrot.slane %v10187_v10, 1  ;;  %v1170_v33 = vrot.slane %v1085_v17, 1 }
 0x228   : > { %1520 = vrot.lane.b32.xlu0 %v10184_v44, %s16075_s15  ;;  %1522 = vrot.lane.b32.xlu1 %v10187_v10, %s16075_s15 }
 0x229   : > { %v10221_v42 = vsel %vm1126_vm3, %v1168_v56, %v1170_v33 }
 0x22a   : > { %v10205_v4 = vpop.permute.xlu0 %1600  ;;  %v10207_v13 = vpop.permute.xlu1 %1602 }
 0x22b   : > { %16304 = vst [vmem:[#allocation166_spill] sm:$0xff] %v10205_v4  ;;  %16305 = vst [vmem:[#allocation167_spill] sm:$0xff] %v10207_v13  ;;  %v10224_v13 = vsel %vm1126_vm3, %v1167_v21, %v1168_v56  ;;  %v1249_v4 = vrot.slane %v10187_v10, 2  ;;  %v1093_v21 = vsel %vm960_vm1, %v1009_v54, 0.0 }
 0x22c   : > { %1552 = vrot.lane.b32.xlu0 %v10200_v12, %s16075_s15  ;;  %1554 = vrot.lane.b32.xlu1 %v10203_v59, %s16075_s15  ;;  %16308 = vst [vmem:[#allocation170_spill] sm:$0xff] %v10224_v13 }
 0x22d   : > { %v10236_v55 = vsel %vm1207_vm2, %v1248_v19, %v1249_v4  ;;  %v10239_v33 = vsel %vm1207_vm2, %v1249_v4, %v1251_v8  ;;  %v1291_v19 = vrot.slane %v10203_v59, 1 }
 0x22e   : > { %v10215_v51 = vpop.permute.xlu0 %1632  ;;  %v10217_v20 = vpop.permute.xlu1 %1634 }
 0x22f   : > { %16306 = vst [vmem:[#allocation168_spill] sm:$0xff] %v10215_v51  ;;  %16307 = vst [vmem:[#allocation169_spill] sm:$0xff] %v10217_v20 }
 0x230   : > { %1334 = vrot.lane.b32.xlu0 %v10221_v42, %s16048_s25  ;;  %1332 = vrot.lane.b32.xlu1 %v10224_v13, %s16048_s25 }
 0x232   : > { %v10231_v51 = vpop.permute.xlu0 %1696  ;;  %v10233_v20 = vpop.permute.xlu1 %1698 }
 0x233   : > { %16309 = vst [vmem:[#allocation171_spill] sm:$0xff] %v10231_v51  ;;  %16310 = vst [vmem:[#allocation172_spill] sm:$0xff] %v10233_v20  ;;  %v1290_v20 = vrot.slane %v10200_v12, 1  ;;  %v1293_v51 = vrot.slane %v1093_v21, 1 }
 0x234   : > { %1428 = vrot.lane.b32.xlu0 %v10236_v55, %s16050_s23  ;;  %1430 = vrot.lane.b32.xlu1 %v10239_v33, %s16050_s23 }
 0x235   : > { %v10261_v54 = vsel %vm1126_vm3, %v1290_v20, %v1291_v19 }
 0x236   : > { %v10246_v56 = vpop.permute.xlu0 %1508  ;;  %v10248_v17 = vpop.permute.xlu1 %1510 }
 0x237   : > { %16311 = vst [vmem:[#allocation173_spill] sm:$0xff] %v10246_v56  ;;  %16312 = vst [vmem:[#allocation174_spill] sm:$0xff] %v10248_v17  ;;  %v10264_v17 = vsel %vm1126_vm3, %v1291_v19, %v1293_v51 }
 0x238   : > { %1616 = vrot.lane.b32.xlu0 %v10224_v13, %s15913_s24  ;;  %1618 = vrot.lane.b32.xlu1 %v10221_v42, %s15913_s24  ;;  %16315 = vst [vmem:[#allocation177_spill] sm:$0xff] %v10264_v17 }
 0x23a   : > { %v10256_v8 = vpop.permute.xlu0 %1540  ;;  %v10258_v4 = vpop.permute.xlu1 %1542 }
 0x23b   : > { %16313 = vst [vmem:[#allocation175_spill] sm:$0xff] %v10256_v8  ;;  %16314 = vst [vmem:[#allocation176_spill] sm:$0xff] %v10258_v4 }
 0x23c   : > { %1648 = vrot.lane.b32.xlu0 %v10261_v54, %s15913_s24  ;;  %1650 = vrot.lane.b32.xlu1 %v10264_v17, %s15913_s24  ;;  %s16747_s24 = smov 8  }
 0x23e   : > { %v10270_v56 = vpop.permute.xlu0 %1322  ;;  %v10272_v13 = vpop.permute.xlu1 %1320 }
 0x23f   : > { %16316 = vst [vmem:[#allocation178_spill] sm:$0xff] %v10270_v56  ;;  %16317 = vst [vmem:[#allocation179_spill] sm:$0xff] %v10272_v13 }
 0x240   : > { %1704 = vrot.lane.b32.xlu0 %v9989_v57, %s15911_s19  ;;  %1706 = vrot.lane.b32.xlu1 %v9992_v1, %s15911_s19 }
 0x242   : > { %v10278_v20 = vpop.permute.xlu0 %1354  ;;  %v10280_v51 = vpop.permute.xlu1 %1352 }
 0x243   : > { %16318 = vst [vmem:[#allocation180_spill] sm:$0xff] %v10278_v20  ;;  %16319 = vst [vmem:[#allocation181_spill] sm:$0xff] %v10280_v51 }
 0x244   : > { %1708 = vrot.lane.b32.xlu0 %v10122_v3, %s15911_s19  ;;  %1710 = vrot.lane.b32.xlu1 %v10125_v0, %s15911_s19 }
 0x246   : > { %v10286_v19 = vpop.permute.xlu0 %1416  ;;  %v10288_v4 = vpop.permute.xlu1 %1418 }
 0x247   : > { %16320 = vst [vmem:[#allocation182_spill] sm:$0xff] %v10286_v19  ;;  %16321 = vst [vmem:[#allocation183_spill] sm:$0xff] %v10288_v4 }
 0x248   : > { %1712 = vrot.lane.b32.xlu0 %v10236_v55, %s15911_s19  ;;  %1714 = vrot.lane.b32.xlu1 %v10239_v33, %s15911_s19 }
 0x24a   : > { %v10294_v8 = vpop.permute.xlu0 %1448  ;;  %v10296_v20 = vpop.permute.xlu1 %1450 }
 0x24b   : > { %16322 = vst [vmem:[#allocation184_spill] sm:$0xff] %v10294_v8  ;;  %16323 = vst [vmem:[#allocation185_spill] sm:$0xff] %v10296_v20 }
 0x24c   : > { %1716 = vrot.lane.b32.xlu0 %v9365_v61, %s15911_s19  ;;  %1718 = vrot.lane.b32.xlu1 %v9362_v60, %s15911_s19 }
 0x24e   : > { %v10302_v51 = vpop.permute.xlu0 %1604  ;;  %v10304_v56 = vpop.permute.xlu1 %1606 }
 0x24f   : > { %16324 = vst [vmem:[#allocation186_spill] sm:$0xff] %v10302_v51  ;;  %16325 = vst [vmem:[#allocation187_spill] sm:$0xff] %v10304_v56  ;;  %v1298_v51 = vrot.slane %v1093_v21, 2 }
 0x250   : > { %1720 = vrot.lane.b32.xlu0 %v9472_v30, %s15911_s19  ;;  %1722 = vrot.lane.b32.xlu1 %v9475_v36, %s15911_s19 }
 0x252   : > { %v10310_v4 = vpop.permute.xlu0 %1636  ;;  %v10312_v8 = vpop.permute.xlu1 %1638 }
 0x253   : > { %16326 = vst [vmem:[#allocation188_spill] sm:$0xff] %v10310_v4  ;;  %16327 = vst [vmem:[#allocation189_spill] sm:$0xff] %v10312_v8 }
 0x254   : > { %1724 = vrot.lane.b32.xlu0 %v9586_v11, %s15911_s19  ;;  %1726 = vrot.lane.b32.xlu1 %v9589_v14, %s15911_s19 }
 0x256   : > { %v10318_v20 = vpop.permute.xlu0 %1700  ;;  %v10320_v19 = vpop.permute.xlu1 %1702 }
 0x257   : > { %16328 = vst [vmem:[#allocation190_spill] sm:$0xff] %v10318_v20  ;;  %16329 = vst [vmem:[#allocation191_spill] sm:$0xff] %v10320_v19  ;;  %v1296_v20 = vrot.slane %v10203_v59, 2 }
 0x258   : > { %1728 = vrot.lane.b32.xlu0 %v9720_v62, %s15911_s19  ;;  %1730 = vrot.lane.b32.xlu1 %v9723_v26, %s15911_s19 }
 0x25a   : > { %v10326_v13 = vpop.permute.xlu0 %1512  ;;  %v10328_v4 = vpop.permute.xlu1 %1514 }
 0x25b   : > { %16330 = vst [vmem:[#allocation192_spill] sm:$0xff] %v10326_v13  ;;  %16331 = vst [vmem:[#allocation193_spill] sm:$0xff] %v10328_v4  ;;  %v1295_v4 = vrot.slane %v10200_v12, 2 }
 0x25c   : > { %1732 = vrot.lane.b32.xlu0 %v9862_v52, %s15911_s19  ;;  %1734 = vrot.lane.b32.xlu1 %v9865_v45, %s15911_s19 }
 0x25d   : > { %v10357_v17 = vsel %vm1207_vm2, %v1295_v4, %v1296_v20 }
 0x25e   : > { %v10334_v8 = vpop.permute.xlu0 %1544  ;;  %v10336_v56 = vpop.permute.xlu1 %1546 }
 0x25f   : > { %16332 = vst [vmem:[#allocation194_spill] sm:$0xff] %v10334_v8  ;;  %16333 = vst [vmem:[#allocation195_spill] sm:$0xff] %v10336_v56 }
 0x260   : > { %1736 = vrot.lane.b32.xlu0 %v10010_v37, %s15911_s19  ;;  %1738 = vrot.lane.b32.xlu1 %v10013_v47, %s15911_s19 }
 0x262   : > { %v10342_v19 = vpop.permute.xlu0 %1326  ;;  %v10344_v13 = vpop.permute.xlu1 %1324 }
 0x263   : > { %16334 = vst [vmem:[#allocation196_spill] sm:$0xff] %v10342_v19  ;;  %16335 = vst [vmem:[#allocation197_spill] sm:$0xff] %v10344_v13  ;;  %v10360_v19 = vsel %vm1207_vm2, %v1296_v20, %v1298_v51 }
 0x264   : > { %1740 = vrot.lane.b32.xlu0 %v10144_v18, %s15911_s19  ;;  %1742 = vrot.lane.b32.xlu1 %v10147_v50, %s15911_s19 }
 0x266   : > { %v10352_v56 = vpop.permute.xlu0 %1358  ;;  %v10354_v8 = vpop.permute.xlu1 %1356 }
 0x267   : > { %16336 = vst [vmem:[#allocation198_spill] sm:$0xff] %v10352_v56  ;;  %16337 = vst [vmem:[#allocation199_spill] sm:$0xff] %v10354_v8 }
 0x268   : > { %1744 = vrot.lane.b32.xlu0 %v10357_v17, %s15911_s19  ;;  %1746 = vrot.lane.b32.xlu1 %v10360_v19, %s15911_s19  ;;  %s16054_s19 = smov 28  }
 0x26a   : > { %v10366_v21 = vpop.permute.xlu0 %1420  ;;  %v10368_v13 = vpop.permute.xlu1 %1422 }
 0x26b   : > { %16338 = vst [vmem:[#allocation200_spill] sm:$0xff] %v10366_v21  ;;  %16339 = vst [vmem:[#allocation201_spill] sm:$0xff] %v10368_v13 }
 0x26c   : > { %1780 = vrot.lane.b32.xlu0 %v9400_v22, %s16073_s17  ;;  %1782 = vrot.lane.b32.xlu1 %v9403_v29, %s16073_s17 }
 0x26e   : > { %v10374_v4 = vpop.permute.xlu0 %1452  ;;  %v10376_v20 = vpop.permute.xlu1 %1454 }
 0x26f   : > { %16340 = vst [vmem:[#allocation202_spill] sm:$0xff] %v10374_v4  ;;  %16341 = vst [vmem:[#allocation203_spill] sm:$0xff] %v10376_v20 }
 0x270   : > { %1784 = vrot.lane.b32.xlu0 %v9514_v5, %s16073_s17  ;;  %1786 = vrot.lane.b32.xlu1 %v9517_v9, %s16073_s17 }
 0x272   : > { %v10382_v51 = vpop.permute.xlu0 %1608  ;;  %v10384_v56 = vpop.permute.xlu1 %1610 }
 0x274   : > { %1788 = vrot.lane.b32.xlu0 %v9630_v27, %s16073_s17  ;;  %1790 = vrot.lane.b32.xlu1 %v9633_v53, %s16073_s17 }
 0x276   : > { %v10390_v8 = vpop.permute.xlu0 %1640  ;;  %v10392_v4 = vpop.permute.xlu1 %1642 }
 0x277   : > { %16342 = vst [vmem:[#allocation204_spill] sm:$0xff] %v10390_v8  ;;  %16343 = vst [vmem:[#allocation205_spill] sm:$0xff] %v10392_v4 }
 0x278   : > { %1792 = vrot.lane.b32.xlu0 %v9774_v25, %s16073_s17  ;;  %1794 = vrot.lane.b32.xlu1 %v9777_v2, %s16073_s17 }
 0x27a   : > { %v10398_v20 = vpop.permute.xlu0 %1516  ;;  %v10400_v13 = vpop.permute.xlu1 %1518 }
 0x27b   : > { %16344 = vst [vmem:[#allocation206_spill] sm:$0xff] %v10398_v20  ;;  %16345 = vst [vmem:[#allocation207_spill] sm:$0xff] %v10400_v13 }
 0x27c   : > { %1796 = vrot.lane.b32.xlu0 %v9916_v35, %s16073_s17  ;;  %1798 = vrot.lane.b32.xlu1 %v9919_v43, %s16073_s17 }
 0x27e   : > { %v10406_v21 = vpop.permute.xlu0 %1548  ;;  %v10408_v8 = vpop.permute.xlu1 %1550 }
 0x27f   : > { %16346 = vst [vmem:[#allocation208_spill] sm:$0xff] %v10406_v21  ;;  %16347 = vst [vmem:[#allocation209_spill] sm:$0xff] %v10408_v8 }
 0x280   : > { %1800 = vrot.lane.b32.xlu0 %v10050_v40, %s16073_s17  ;;  %1802 = vrot.lane.b32.xlu1 %v10053_v58, %s16073_s17 }
 0x282   : > { %v10414_v4 = vpop.permute.xlu0 %1330  ;;  %v10416_v20 = vpop.permute.xlu1 %1328 }
 0x284   : > { %1804 = vrot.lane.b32.xlu0 %v10184_v44, %s16073_s17  ;;  %1806 = vrot.lane.b32.xlu1 %v10187_v10, %s16073_s17 }
 0x286   : > { %v10422_v13 = vpop.permute.xlu0 %1362  ;;  %v10424_v21 = vpop.permute.xlu1 %1360 }
 0x287   : > { %16348 = vst [vmem:[#allocation210_spill] sm:$0xff] %v10422_v13  ;;  %16349 = vst [vmem:[#allocation211_spill] sm:$0xff] %v10424_v21 }
 0x288   : > { %1808 = vrot.lane.b32.xlu0 %v9307_v23, %s16073_s17  ;;  %1810 = vrot.lane.b32.xlu1 %v9310_v24, %s16073_s17 }
 0x28a   : > { %v10430_v8 = vpop.permute.xlu0 %1424  ;;  %v10432_v58 = vpop.permute.xlu1 %1426 }
 0x28b   : > { %16350 = vst [vmem:[#allocation212_spill] sm:$0xff] %v10432_v58 }
 0x28c   : > { %1812 = vrot.lane.b32.xlu0 %v9411_v31, %s16073_s17  ;;  %1814 = vrot.lane.b32.xlu1 %v9414_v32, %s16073_s17 }
 0x28e   : > { %v10438_v10 = vpop.permute.xlu0 %1456  ;;  %v10440_v13 = vpop.permute.xlu1 %1458 }
 0x28f   : > { %16351 = vst [vmem:[#allocation213_spill] sm:$0xff] %v10438_v10  ;;  %16352 = vst [vmem:[#allocation214_spill] sm:$0xff] %v10440_v13  ;;  %v2331_v13 = vld [vmem:[%s15782_s4] sm:$0xff] }
 0x290   : > { %1816 = vrot.lane.b32.xlu0 %v9527_v38, %s16073_s17  ;;  %1818 = vrot.lane.b32.xlu1 %v9530_v39, %s16073_s17 }
 0x292   : > { %v10446_v21 = vpop.permute.xlu0 %1612  ;;  %v10448_v24 = vpop.permute.xlu1 %1614 }
 0x294   : > { %1820 = vrot.lane.b32.xlu0 %v9649_v6, %s16073_s17  ;;  %1822 = vrot.lane.b32.xlu1 %v9652_v28, %s16073_s17  ;;  %v2332_v6 = vld [vmem:[%s15782_s4 + $0x8] sm:$0xff] }
 0x295   : > { %v8679_v39 = vpack.c.bf16 %v2332_v6, %v2331_v13 }
 0x296   : > { %v10454_v32 = vpop.permute.xlu0 %1644  ;;  %v10456_v10 = vpop.permute.xlu1 %1646 }
 0x297   : > { %16353 = vst [vmem:[#allocation215_spill] sm:$0xff] %v10454_v32  ;;  %16354 = vst [vmem:[#allocation216_spill] sm:$0xff] %v10456_v10  ;;  %8680 = vmatprep.subr.bf16.mxu1 %v8679_v39  ;;  %v2333_v10 = vld [vmem:[%s15782_s4 + $0x10] sm:$0xff] }
 0x298   : > { %1824 = vrot.lane.b32.xlu0 %v9789_v7, %s16073_s17  ;;  %1826 = vrot.lane.b32.xlu1 %v9792_v49, %s16073_s17  ;;  %v2334_v49 = vld [vmem:[%s15782_s4 + $0x18] sm:$0xff] }
 0x299   : > { %8682 = vmatpush3.bf16.msra.mxu1 %v8679_v39  ;;  %v8683_v6 = vpack.c.bf16 %v2334_v49, %v2333_v10  ;;  %v16359_v49 = vld [vmem:[#allocation13_spill] sm:$0xff] }
 0x29a   : > { %v10468_v28 = vpop.permute.xlu0 %1520  ;;  %v10470_v32 = vpop.permute.xlu1 %1522  ;;  %v8784_v10 = vpack.i.bf16 %v16359_v49, %v9221_v34 }
 0x29b   : > { %16355 = vst [vmem:[#allocation217_spill] sm:$0xff] %v10470_v32  ;;  %8684 = vmatprep.subr.bf16.mxu1 %v8683_v6 }
 0x29c   : > { %1828 = vrot.lane.b32.xlu0 %v9931_v46, %s16073_s17  ;;  %1830 = vrot.lane.b32.xlu1 %v9934_v48, %s16073_s17  ;;  %v2335_v48 = vld [vmem:[%s15782_s4 + $0x20] sm:$0xf] }
 0x29d   : > { %8686 = vmatpush3.bf16.msra.mxu1 %v8683_v6 }
 0x29e   : > { %v10482_v13 = vpop.permute.xlu0 %1552  ;;  %v10484_v7 = vpop.permute.xlu1 %1554  ;;  %8453 = vmatprep.subr.msk.mxu1 %vm2433_vm4, %v2335_v48 }
 0x29f   : > { %16356 = vst [vmem:[#allocation218_spill] sm:$0xff] %v10482_v13  ;;  %16357 = vst [vmem:[#allocation219_spill] sm:$0xff] %v10484_v7  ;;  %v16362_v13 = vld [vmem:[#allocation33_spill] sm:$0xff] }
 0x2a0   : > { %1832 = vrot.lane.b32.xlu0 %v10065_v15, %s16073_s17  ;;  %1834 = vrot.lane.b32.xlu1 %v10068_v16, %s16073_s17 }
 0x2a1   : > { %8454 = vmatpush3.msk.msra.mxu1 %vm2433_vm4, %v2335_v48  ;;  %v16365_v48 = vld [vmem:[#allocation36_spill] sm:$0xff] }
 0x2a2   : > { %v10493_v46 = vpop.permute.xlu0 %1334  ;;  %v10495_v39 = vpop.permute.xlu1 %1332 }
 0x2a3   : > { %16358 = vst [vmem:[#allocation220_spill] sm:$0xff] %v10493_v46 }
 0x2a4   : > { %1836 = vrot.lane.b32.xlu0 %v10200_v12, %s16073_s17  ;;  %1838 = vrot.lane.b32.xlu1 %v10203_v59, %s16073_s17  ;;  %v16364_v59 = vld [vmem:[#allocation32_spill] sm:$0xff] }
 0x2a6   : > { %v10505_v6 = vpop.permute.xlu0 %1428  ;;  %v10507_v7 = vpop.permute.xlu1 %1430 }
 0x2a7   : > { %16360 = vst [vmem:[#allocation13_spill] sm:$0xff] %v10505_v6  ;;  %16361 = vst [vmem:[#allocation221_spill] sm:$0xff] %v10507_v7  ;;  %v16371_v7 = vld [vmem:[#allocation48_spill] sm:$0xff]  ;;  %v16379_v6 = vld [vmem:[#allocation69_spill] sm:$0xff] }
 0x2a8   : > { %8785 = vrot.lane.b32.xlu0 %v8784_v10, %s16073_s17  ;;  %1876 = vrot.lane.b32.xlu1 %v16362_v13, %s16054_s19  ;;  %v16368_v10 = vld [vmem:[#allocation37_spill] sm:$0xff] }
 0x2a9   : > { %v16369_v13 = vld [vmem:[#allocation45_spill] sm:$0xff] }
 0x2aa   : > { %v10512_v16 = vpop.permute.xlu0 %1616  ;;  %v10514_v12 = vpop.permute.xlu1 %1618 }
 0x2ab   : > { %16363 = vst [vmem:[#allocation33_spill] sm:$0xff] %v10514_v12  ;;  %v16375_v12 = vld [vmem:[#allocation60_spill] sm:$0xff] }
 0x2ac   : > { %1878 = vrot.lane.b32.xlu0 %v16364_v59, %s16054_s19  ;;  %1972 = vrot.lane.b32.xlu1 %v16365_v48, %s16052_s14  ;;  %v16370_v59 = vld [vmem:[#allocation44_spill] sm:$0xff] }
 0x2ae   : > { %v10520_v15 = vpop.permute.xlu0 %1648  ;;  %v10522_v38 = vpop.permute.xlu1 %1650 }
 0x2af   : > { %16366 = vst [vmem:[#allocation32_spill] sm:$0xff] %v10520_v15  ;;  %16367 = vst [vmem:[#allocation36_spill] sm:$0xff] %v10522_v38  ;;  %v16372_v38 = vld [vmem:[#allocation49_spill] sm:$0xff] }
 0x2b0   : > { %1974 = vrot.lane.b32.xlu0 %v16368_v10, %s16052_s14  ;;  %1880 = vrot.lane.b32.xlu1 %v16369_v13, %s16054_s19  ;;  %v16373_v10 = vld [vmem:[#allocation61_spill] sm:$0xff] }
 0x2b2   : > { %v10528_v31 = vpop.permute.xlu0 %1704  ;;  %v10530_v23 = vpop.permute.xlu1 %1706 }
 0x2b4   : > { %1882 = vrot.lane.b32.xlu0 %v16370_v59, %s16054_s19  ;;  %1976 = vrot.lane.b32.xlu1 %v16371_v7, %s16052_s14  ;;  %v16376_v59 = vld [vmem:[#allocation68_spill] sm:$0xff] }
 0x2b6   : > { %v10536_v48 = vpop.permute.xlu0 %1708  ;;  %v10538_v15 = vpop.permute.xlu1 %1710 }
 0x2b8   : > { %1978 = vrot.lane.b32.xlu0 %v16372_v38, %s16052_s14  ;;  %1884 = vrot.lane.b32.xlu1 %v16373_v10, %s16054_s19  ;;  %v16380_v38 = vld [vmem:[#allocation91_spill] sm:$0xff] }
 0x2ba   : > { %v10544_v13 = vpop.permute.xlu0 %1712  ;;  %v10546_v46 = vpop.permute.xlu1 %1714 }
 0x2bb   : > { %16374 = vst [vmem:[#allocation37_spill] sm:$0xff] %v10546_v46  ;;  %v16383_v46 = vld [vmem:[#allocation90_spill] sm:$0xff] }
 0x2bc   : > { %1886 = vrot.lane.b32.xlu0 %v16375_v12, %s16054_s19  ;;  %1980 = vrot.lane.b32.xlu1 %v16376_v59, %s16052_s14  ;;  %v16384_v12 = vld [vmem:[#allocation98_spill] sm:$0xff] }
 0x2be   : > { %v10552_v7 = vpop.permute.xlu0 %1716  ;;  %v10554_v32 = vpop.permute.xlu1 %1718 }
 0x2bf   : > { %16377 = vst [vmem:[#allocation45_spill] sm:$0xff] %v10552_v7  ;;  %16378 = vst [vmem:[#allocation44_spill] sm:$0xff] %v10554_v32  ;;  %v16387_v32 = vld [vmem:[#allocation99_spill] sm:$0xff] }
 0x2c0   : > { %1982 = vrot.lane.b32.xlu0 %v16379_v6, %s16052_s14  ;;  %1888 = vrot.lane.b32.xlu1 %v16380_v38, %s16054_s19  ;;  %v16388_v6 = vld [vmem:[#allocation121_spill] sm:$0xff] }
 0x2c2   : > { %v10560_v10 = vpop.permute.xlu0 %1720  ;;  %v10562_v58 = vpop.permute.xlu1 %1722 }
 0x2c3   : > { %16381 = vst [vmem:[#allocation48_spill] sm:$0xff] %v10560_v10  ;;  %16382 = vst [vmem:[#allocation49_spill] sm:$0xff] %v10562_v58  ;;  %v16391_v58 = vld [vmem:[#allocation120_spill] sm:$0xff] }
 0x2c4   : > { %1890 = vrot.lane.b32.xlu0 %v16383_v46, %s16054_s19  ;;  %1984 = vrot.lane.b32.xlu1 %v16384_v12, %s16052_s14 }
 0x2c6   : > { %v10568_v59 = vpop.permute.xlu0 %1724  ;;  %v10570_v7 = vpop.permute.xlu1 %1726 }
 0x2c7   : > { %16385 = vst [vmem:[#allocation61_spill] sm:$0xff] %v10568_v59  ;;  %16386 = vst [vmem:[#allocation60_spill] sm:$0xff] %v10570_v7  ;;  %v16411_v7 = vld [vmem:[#allocation94_spill] sm:$0xff] }
 0x2c8   : > { %1986 = vrot.lane.b32.xlu0 %v16387_v32, %s16052_s14  ;;  %1892 = vrot.lane.b32.xlu1 %v16388_v6, %s16054_s19 }
 0x2ca   : > { %v10576_v38 = vpop.permute.xlu0 %1728  ;;  %v10578_v10 = vpop.permute.xlu1 %1730 }
 0x2cb   : > { %16389 = vst [vmem:[#allocation68_spill] sm:$0xff] %v10576_v38  ;;  %16390 = vst [vmem:[#allocation69_spill] sm:$0xff] %v10578_v10  ;;  %v16408_v10 = vld [vmem:[#allocation64_spill] sm:$0xff] }
 0x2cc   : > { %1894 = vrot.lane.b32.xlu0 %v16391_v58, %s16054_s19  ;;  %1988 = vrot.lane.b32.xlu1 %v9989_v57, %s16052_s14 }
 0x2ce   : > { %v10584_v46 = vpop.permute.xlu0 %1732  ;;  %v10586_v12 = vpop.permute.xlu1 %1734 }
 0x2cf   : > { %16392 = vst [vmem:[#allocation91_spill] sm:$0xff] %v10584_v46  ;;  %16393 = vst [vmem:[#allocation90_spill] sm:$0xff] %v10586_v12  ;;  %v16406_v12 = vld [vmem:[#allocation46_spill] sm:$0xff] }
 0x2d0   : > { %1990 = vrot.lane.b32.xlu0 %v9992_v1, %s16052_s14  ;;  %1896 = vrot.lane.b32.xlu1 %v10089_v41, %s16054_s19  ;;  %v16398_v1 = vld [vmem:[#allocation170_spill] sm:$0xff] }
 0x2d2   : > { %v10592_v32 = vpop.permute.xlu0 %1736  ;;  %v10594_v6 = vpop.permute.xlu1 %1738 }
 0x2d3   : > { %16394 = vst [vmem:[#allocation98_spill] sm:$0xff] %v10592_v32  ;;  %16395 = vst [vmem:[#allocation99_spill] sm:$0xff] %v10594_v6 }
 0x2d4   : > { %1898 = vrot.lane.b32.xlu0 %v10086_v63, %s16054_s19  ;;  %1992 = vrot.lane.b32.xlu1 %v10122_v3, %s16052_s14 }
 0x2d6   : > { %v10600_v57 = vpop.permute.xlu0 %1740  ;;  %v10602_v58 = vpop.permute.xlu1 %1742 }
 0x2d7   : > { %16396 = vst [vmem:[#allocation121_spill] sm:$0xff] %v10600_v57  ;;  %16397 = vst [vmem:[#allocation120_spill] sm:$0xff] %v10602_v58  ;;  %v16404_v57 = vld [vmem:[#allocation34_spill] sm:$0xff] }
 0x2d8   : > { %1994 = vrot.lane.b32.xlu0 %v10125_v0, %s16052_s14  ;;  %1900 = vrot.lane.b32.xlu1 %v16398_v1, %s16054_s19  ;;  %v16401_v0 = vld [vmem:[#allocation24_spill] sm:$0xff] }
 0x2da   : > { %v10608_v41 = vpop.permute.xlu0 %1744  ;;  %v10610_v32 = vpop.permute.xlu1 %1746 }
 0x2db   : > { %16399 = vst [vmem:[#allocation170_spill] sm:$0xff] %v10608_v41  ;;  %16400 = vst [vmem:[#allocation222_spill] sm:$0xff] %v10610_v32  ;;  %v16402_v32 = vld [vmem:[#allocation25_spill] sm:$0xff] }
 0x2dc   : > { %1902 = vrot.lane.b32.xlu0 %v10221_v42, %s16054_s19  ;;  %1996 = vrot.lane.b32.xlu1 %v10236_v55, %s16052_s14 }
 0x2de   : > { %v10616_v63 = vpop.permute.xlu0 %1780  ;;  %v10618_v3 = vpop.permute.xlu1 %1782 }
 0x2e0   : > { %1998 = vrot.lane.b32.xlu0 %v10239_v33, %s16052_s14  ;;  %1904 = vrot.lane.b32.xlu1 %v16401_v0, %s16054_s19  ;;  %v16403_v33 = vld [vmem:[#allocation35_spill] sm:$0xff] }
 0x2e2   : > { %v10624_v1 = vpop.permute.xlu0 %1784  ;;  %v10626_v41 = vpop.permute.xlu1 %1786 }
 0x2e4   : > { %1906 = vrot.lane.b32.xlu0 %v16402_v32, %s16054_s19  ;;  %2000 = vrot.lane.b32.xlu1 %v9365_v61, %s16052_s14 }
 0x2e6   : > { %v10632_v55 = vpop.permute.xlu0 %1788  ;;  %v10634_v42 = vpop.permute.xlu1 %1790 }
 0x2e8   : > { %2002 = vrot.lane.b32.xlu0 %v9362_v60, %s16052_s14  ;;  %1908 = vrot.lane.b32.xlu1 %v16403_v33, %s16054_s19  ;;  %v16405_v60 = vld [vmem:[#allocation47_spill] sm:$0xff] }
 0x2ea   : > { %v10640_v0 = vpop.permute.xlu0 %1792  ;;  %v10642_v58 = vpop.permute.xlu1 %1794 }
 0x2ec   : > { %1910 = vrot.lane.b32.xlu0 %v16404_v57, %s16054_s19  ;;  %2004 = vrot.lane.b32.xlu1 %v9472_v30, %s16052_s14 }
 0x2ee   : > { %v10648_v61 = vpop.permute.xlu0 %1796  ;;  %v10650_v32 = vpop.permute.xlu1 %1798 }
 0x2f0   : > { %2006 = vrot.lane.b32.xlu0 %v9475_v36, %s16052_s14  ;;  %1912 = vrot.lane.b32.xlu1 %v16405_v60, %s16054_s19  ;;  %v16407_v36 = vld [vmem:[#allocation65_spill] sm:$0xff] }
 0x2f2   : > { %v10656_v33 = vpop.permute.xlu0 %1800  ;;  %v10658_v6 = vpop.permute.xlu1 %1802 }
 0x2f4   : > { %1914 = vrot.lane.b32.xlu0 %v16406_v12, %s16054_s19  ;;  %2008 = vrot.lane.b32.xlu1 %v9586_v11, %s16052_s14 }
 0x2f6   : > { %v10664_v30 = vpop.permute.xlu0 %1804  ;;  %v10666_v57 = vpop.permute.xlu1 %1806 }
 0x2f8   : > { %2010 = vrot.lane.b32.xlu0 %v9589_v14, %s16052_s14  ;;  %1916 = vrot.lane.b32.xlu1 %v16407_v36, %s16054_s19  ;;  %v16409_v14 = vld [vmem:[#allocation95_spill] sm:$0xff] }
 0x2fa   : > { %v10672_v60 = vpop.permute.xlu0 %1808  ;;  %v10674_v46 = vpop.permute.xlu1 %1810 }
 0x2fc   : > { %1918 = vrot.lane.b32.xlu0 %v16408_v10, %s16054_s19  ;;  %2012 = vrot.lane.b32.xlu1 %v9720_v62, %s16052_s14 }
 0x2fe   : > { %v10680_v11 = vpop.permute.xlu0 %1812  ;;  %v10682_v12 = vpop.permute.xlu1 %1814 }
 0x300   : > { %2014 = vrot.lane.b32.xlu0 %v9723_v26, %s16052_s14  ;;  %1920 = vrot.lane.b32.xlu1 %v16409_v14, %s16054_s19  ;;  %v16414_v26 = vld [vmem:[#allocation125_spill] sm:$0xff] }
 0x302   : > { %v10688_v36 = vpop.permute.xlu0 %1816  ;;  %v10690_v38 = vpop.permute.xlu1 %1818 }
 0x303   : > { %16410 = vst [vmem:[#allocation24_spill] sm:$0xff] %v10690_v38  ;;  %v16417_v38 = vld [vmem:[#allocation124_spill] sm:$0xff] }
 0x304   : > { %1922 = vrot.lane.b32.xlu0 %v16411_v7, %s16054_s19  ;;  %2016 = vrot.lane.b32.xlu1 %v9862_v52, %s16052_s14 }
 0x306   : > { %v10696_v62 = vpop.permute.xlu0 %1820  ;;  %v10698_v10 = vpop.permute.xlu1 %1822 }
 0x307   : > { %16412 = vst [vmem:[#allocation25_spill] sm:$0xff] %v10696_v62  ;;  %16413 = vst [vmem:[#allocation35_spill] sm:$0xff] %v10698_v10  ;;  %v16420_v10 = vld [vmem:[#allocation55_spill] sm:$0xff] }
 0x308   : > { %2018 = vrot.lane.b32.xlu0 %v9865_v45, %s16052_s14  ;;  %1924 = vrot.lane.b32.xlu1 %v16414_v26, %s16054_s19  ;;  %v8777_v62 = vunpack.i.l.bf16 %v16420_v10  ;;  %v16421_v45 = vld [vmem:[#allocation150_spill] sm:$0xff] }
 0x30a   : > { %v10704_v14 = vpop.permute.xlu0 %1824  ;;  %v10706_v59 = vpop.permute.xlu1 %1826 }
 0x30b   : > { %16415 = vst [vmem:[#allocation34_spill] sm:$0xff] %v10704_v14  ;;  %16416 = vst [vmem:[#allocation47_spill] sm:$0xff] %v10706_v59 }
 0x30c   : > { %1926 = vrot.lane.b32.xlu0 %v16417_v38, %s16054_s19  ;;  %2020 = vrot.lane.b32.xlu1 %v10010_v37, %s16052_s14  ;;  %v16424_v38 = vld [vmem:[#allocation54_spill] sm:$0xff]  ;;  %v8778_v37 = vunpack.i.h.bf16 %v16420_v10 }
 0x30d   : > { %v8782_v14 = vunpack.i.l.bf16 %v16424_v38 }
 0x30e   : > { %v10712_v52 = vpop.permute.xlu0 %1828  ;;  %v10714_v7 = vpop.permute.xlu1 %1830 }
 0x30f   : > { %16418 = vst [vmem:[#allocation46_spill] sm:$0xff] %v10712_v52  ;;  %16419 = vst [vmem:[#allocation65_spill] sm:$0xff] %v10714_v7  ;;  %v2069_v7 = vsel %vm2068_vm5, %v9221_v34, %v8777_v62  ;;  %v16425_v52 = vld [vmem:[#allocation149_spill] sm:$0xff]  ;;  %v2070_v34 = vsel %vm2068_vm5, %v16359_v49, %v8778_v37 }
 0x310   : > { %2022 = vrot.lane.b32.xlu0 %v10013_v47, %s16052_s14  ;;  %1928 = vrot.lane.b32.xlu1 %v16421_v45, %s16054_s19  ;;  %v16430_v49 = vld [vmem:[#allocation81_spill] sm:$0xff] }
 0x312   : > { %v10721_v26 = vpop.permute.xlu0 %1832  ;;  %v10723_v59 = vpop.permute.xlu1 %1834 }
 0x313   : > { %16422 = vst [vmem:[#allocation64_spill] sm:$0xff] %v10721_v26  ;;  %16423 = vst [vmem:[#allocation95_spill] sm:$0xff] %v10723_v59  ;;  %v8783_v59 = vunpack.i.h.bf16 %v16424_v38  ;;  %v10739_v26 = vsel %vm2101_vm6, %v2069_v7, %v8782_v14 }
 0x314   : > { %1930 = vrot.lane.b32.xlu0 %v16425_v52, %s16054_s19  ;;  %2024 = vrot.lane.b32.xlu1 %v10144_v18, %s16052_s14  ;;  %16427 = vst [vmem:[#allocation125_spill] sm:$0xff] %v10739_v26  ;;  %v16428_v18 = vld [vmem:[#allocation58_spill] sm:$0xff] }
 0x315   : > { %v2135_v62 = vsel %vm2134_vm7, %v10739_v26, %v16428_v18  ;;  %v10753_v52 = vsel %vm2101_vm6, %v2070_v34, %v8783_v59  ;;  %v16433_v18 = vld [vmem:[#allocation59_spill] sm:$0xff]  ;;  %v16434_v26 = vld [vmem:[#allocation80_spill] sm:$0xff] }
 0x316   : > { %v10733_v47 = vpop.permute.xlu0 %1836  ;;  %v10735_v45 = vpop.permute.xlu1 %1838  ;;  %v2168_v7 = vsel %vm2167_vm8, %v2135_v62, %v16430_v49  ;;  %v2136_v59 = vsel %vm2134_vm7, %v10753_v52, %v16433_v18  ;;  %v16440_v18 = vld [vmem:[#allocation88_spill] sm:$0xff] }
 0x317   : > { %16426 = vst [vmem:[#allocation94_spill] sm:$0xff] %v10735_v45  ;;  %v16437_v45 = vld [vmem:[#allocation86_spill] sm:$0xff] }
 0x318   : > { %2026 = vrot.lane.b32.xlu0 %v10147_v50, %s16052_s14  ;;  %1932 = vrot.lane.b32.xlu1 %v10261_v54, %s16054_s19  ;;  %v16431_v50 = vld [vmem:[#allocation87_spill] sm:$0xff]  ;;  %v16432_v54 = vld [vmem:[#allocation177_spill] sm:$0xff] }
 0x319   : > { %v2201_v38 = vsel %vm2200_vm9, %v2168_v7, %v16431_v50  ;;  %v2169_v7 = vsel %vm2167_vm8, %v2136_v59, %v16434_v26 }
 0x31a   : > { %v10750_v10 = vpop.permute.xlu0 %8785  ;;  %v1877_v14 = vpop.permute.xlu1 %1876  ;;  %v2234_v37 = vsel %vm2233_vm10, %v2201_v38, %v10616_v63  ;;  %v2202_v63 = vsel %vm2200_vm9, %v2169_v7, %v16437_v45  ;;  %v16439_v38 = vld [vmem:[#allocation73_spill] sm:$0xff] }
 0x31b   : > { %16429 = vst [vmem:[#allocation124_spill] sm:$0xff] %v10750_v10  ;;  %v2267_v34 = vsel %vm2266_vm11, %v2234_v37, %v1877_v14  ;;  %v16436_v10 = vld [vmem:[#allocation20_spill] sm:$0xff]  ;;  %v16438_v14 = vld [vmem:[#allocation15_spill] sm:$0xff]  ;;  %v2235_v26 = vsel %vm2233_vm10, %v2202_v63, %v10618_v3 }
 0x31c   : > { %1934 = vrot.lane.b32.xlu0 %v16432_v54, %s16054_s19  ;;  %2028 = vrot.lane.b32.xlu1 %v10357_v17, %s16052_s14  ;;  %v16435_v54 = vld [vmem:[#allocation67_spill] sm:$0xff]  ;;  %v16447_v63 = vld [vmem:[#allocation72_spill] sm:$0xff] }
 0x31d   : > { %v2071_v17 = vsel %vm2068_vm5, %v16436_v10, %v16435_v54  ;;  %v16442_v54 = vld [vmem:[#allocation66_spill] sm:$0xff] }
 0x31e   : > { %v1879_v62 = vpop.permute.xlu0 %1878  ;;  %v1973_v49 = vpop.permute.xlu1 %1972  ;;  %v2104_v37 = vsel %vm2101_vm6, %v2071_v17, %v16439_v38  ;;  %v16444_v38 = vld [vmem:[#allocation116_spill] sm:$0xff] }
 0x31f   : > { %v2299_v50 = vsel %vm495_vm0, %v2267_v34, %v1973_v49  ;;  %v2137_v10 = vsel %vm2134_vm7, %v2104_v37, %v16440_v18  ;;  %v2268_v59 = vsel %vm2266_vm11, %v2235_v26, %v1879_v62  ;;  %v16441_v49 = vld [vmem:[#allocation110_spill] sm:$0xff]  ;;  %v16448_v18 = vld [vmem:[#allocation89_spill] sm:$0xff] }
 0x320   : > { %2030 = vrot.lane.b32.xlu0 %v10360_v19, %s16052_s14  ;;  %8790 = vrot.lane.b32.xlu1 %v16438_v14, %s16054_s19  ;;  %v2170_v19 = vsel %vm2167_vm8, %v2137_v10, %v16441_v49  ;;  %v16443_v14 = vld [vmem:[#allocation21_spill] sm:$0xff]  ;;  %v16446_v62 = vld [vmem:[#allocation18_spill] sm:$0xff]  ;;  %s16714_s19 = smov 28  }
 0x321   : > { %8455 = vmatprep.mubr.msk.f32.mxu1 %vm2336_vm12, %v2299_v50  ;;  %v2072_v17 = vsel %vm2068_vm5, %v16443_v14, %v16442_v54  ;;  %v2203_v3 = vsel %vm2200_vm9, %v2170_v19, %v16444_v38  ;;  %v16445_v50 = vld [vmem:[#allocation14_spill] sm:$0xff]  ;;  %v16449_v19 = vld [vmem:[#allocation111_spill] sm:$0xff]  ;;  %v16450_v38 = vld [vmem:[#allocation97_spill] sm:$0xff] }
 0x322   : > { %v1975_v45 = vpop.permute.xlu0 %1974  ;;  %v1881_v34 = vpop.permute.xlu1 %1880  ;;  %v2105_v37 = vsel %vm2101_vm6, %v2072_v17, %v16447_v63  ;;  %v2236_v26 = vsel %vm2233_vm10, %v2203_v3, %v10624_v1  ;;  %v2073_v17 = vsel %vm2068_vm5, %v9400_v22, %v16450_v38  ;;  %v16453_v3 = vld [vmem:[#allocation27_spill] sm:$0xff]  ;;  %v16457_v38 = vld [vmem:[#allocation96_spill] sm:$0xff] }
 0x323   : > { %v2300_v7 = vsel %vm495_vm0, %v2268_v59, %v1975_v45  ;;  %v2138_v10 = vsel %vm2134_vm7, %v2105_v37, %v16448_v18  ;;  %v2269_v59 = vsel %vm2266_vm11, %v2236_v26, %v1881_v34  ;;  %v16454_v34 = vld [vmem:[#allocation102_spill] sm:$0xff] }
 0x324   : > { %8795 = vrot.lane.b32.xlu0 %v16445_v50, %s16052_s14  ;;  %2879 = vrot.lane.b32.xlu1 %v16446_v62, %s8962_s16  ;;  %v2171_v54 = vsel %vm2167_vm8, %v2138_v10, %v16449_v19  ;;  %v16451_v50 = vld [vmem:[#allocation117_spill] sm:$0xff]  ;;  %v2106_v63 = vsel %vm2101_vm6, %v2073_v17, %v16454_v34  ;;  %v16455_v26 = vld [vmem:[#allocation118_spill] sm:$0xff]  ;;  %v2074_v17 = vsel %vm2068_vm5, %v9403_v29, %v16457_v38  ;;  %v16464_v38 = vld [vmem:[#allocation127_spill] sm:$0xff]  ;;  %s16715_s14 = smov 32  }
 0x325   : > { %8456 = vmatmul.mubr.msk.f32.vlgmr.msra.gmra.mrb[16].mxu1 %vm2336_vm12, %v2300_v7  ;;  %v2204_v1 = vsel %vm2200_vm9, %v2171_v54, %v16451_v50  ;;  %v16452_v7 = vld [vmem:[#allocation16_spill] sm:$0xff]  ;;  %v2139_v22 = vsel %vm2134_vm7, %v2106_v63, %v16455_v26  ;;  %v16458_v50 = vld [vmem:[#allocation145_spill] sm:$0xff] }
 0x326   : > { %v1883_v45 = vpop.permute.xlu0 %1882  ;;  %v1977_v49 = vpop.permute.xlu1 %1976  ;;  %v2237_v37 = vsel %vm2233_vm10, %v2204_v1, %v10626_v41  ;;  %v16460_v1 = vld [vmem:[#allocation39_spill] sm:$0xff] }
 0x327   : > { %v2301_v14 = vsel %vm495_vm0, %v2269_v59, %v1977_v49  ;;  %v2270_v18 = vsel %vm2266_vm11, %v2237_v37, %v1883_v45  ;;  %v16456_v49 = vld [vmem:[#allocation139_spill] sm:$0xff] }
 0x328   : > { %2881 = vrot.lane.b32.xlu0 %v16452_v7, %s8962_s16  ;;  %2883 = vrot.lane.b32.xlu1 %v16453_v3, %s8962_s16  ;;  %v2172_v19 = vsel %vm2167_vm8, %v2139_v22, %v16456_v49  ;;  %v16461_v45 = vld [vmem:[#allocation103_spill] sm:$0xff] }
 0x329   : > { %8458 = vmatprep.mubr.msk.f32.mxu1 %vm2336_vm12, %v2301_v14  ;;  %v2205_v41 = vsel %vm2200_vm9, %v2172_v19, %v16458_v50  ;;  %v16459_v14 = vld [vmem:[#allocation26_spill] sm:$0xff]  ;;  %v2107_v34 = vsel %vm2101_vm6, %v2074_v17, %v16461_v45  ;;  %v16462_v37 = vld [vmem:[#allocation119_spill] sm:$0xff]  ;;  %v2075_v17 = vsel %vm2068_vm5, %v9514_v5, %v16464_v38 }
 0x32a   : > { %v1979_v10 = vpop.permute.xlu0 %1978  ;;  %v1885_v59 = vpop.permute.xlu1 %1884  ;;  %v2238_v63 = vsel %vm2233_vm10, %v2205_v41, %v10632_v55  ;;  %v2140_v29 = vsel %vm2134_vm7, %v2107_v34, %v16462_v37  ;;  %v16465_v50 = vld [vmem:[#allocation146_spill] sm:$0xff]  ;;  %v16467_v41 = vld [vmem:[#allocation51_spill] sm:$0xff] }
 0x32b   : > { %v2302_v54 = vsel %vm495_vm0, %v2270_v18, %v1979_v10  ;;  %v2271_v26 = vsel %vm2266_vm11, %v2238_v63, %v1885_v59  ;;  %v16463_v10 = vld [vmem:[#allocation140_spill] sm:$0xff]  ;;  %v16469_v63 = vld [vmem:[#allocation147_spill] sm:$0xff]  ;;  %v16471_v38 = vld [vmem:[#allocation126_spill] sm:$0xff] }
 0x32c   : > { %2885 = vrot.lane.b32.xlu0 %v16459_v14, %s8962_s16  ;;  %2887 = vrot.lane.b32.xlu1 %v16460_v1, %s8962_s16  ;;  %v2173_v49 = vsel %vm2167_vm8, %v2140_v29, %v16463_v10  ;;  %v16468_v59 = vld [vmem:[#allocation132_spill] sm:$0xff] }
 0x32d   : > { %8459 = vmatmul.mubr.msk.f32.gmra.mrb[18].mxu1 %vm2336_vm12, %v2302_v54  ;;  %v2206_v55 = vsel %vm2200_vm9, %v2173_v49, %v16465_v50  ;;  %v16466_v54 = vld [vmem:[#allocation38_spill] sm:$0xff]  ;;  %v2108_v45 = vsel %vm2101_vm6, %v2075_v17, %v16468_v59  ;;  %v2076_v17 = vsel %vm2068_vm5, %v9517_v9, %v16471_v38  ;;  %v16472_v50 = vld [vmem:[#allocation171_spill] sm:$0xff] }
 0x32e   : > { %v1887_v22 = vpop.permute.xlu0 %1886  ;;  %v1981_v18 = vpop.permute.xlu1 %1980  ;;  %v2239_v34 = vsel %vm2233_vm10, %v2206_v55, %v10634_v42  ;;  %v2141_v5 = vsel %vm2134_vm7, %v2108_v45, %v16469_v63  ;;  %v16474_v55 = vld [vmem:[#allocation75_spill] sm:$0xff]  ;;  %v16478_v38 = vld [vmem:[#allocation154_spill] sm:$0xff] }
 0x32f   : > { %v2303_v19 = vsel %vm495_vm0, %v2271_v26, %v1981_v18  ;;  %v2272_v37 = vsel %vm2266_vm11, %v2239_v34, %v1887_v22  ;;  %v16470_v18 = vld [vmem:[#allocation166_spill] sm:$0xff]  ;;  %v16475_v22 = vld [vmem:[#allocation133_spill] sm:$0xff]  ;;  %v16476_v34 = vld [vmem:[#allocation148_spill] sm:$0xff] }
 0x330   : > { %2889 = vrot.lane.b32.xlu0 %v16466_v54, %s8962_s16  ;;  %2891 = vrot.lane.b32.xlu1 %v16467_v41, %s8962_s16  ;;  %v2174_v10 = vsel %vm2167_vm8, %v2141_v5, %v16470_v18  ;;  %v2109_v59 = vsel %vm2101_vm6, %v2076_v17, %v16475_v22  ;;  %v2077_v17 = vsel %vm2068_vm5, %v9630_v27, %v16478_v38  ;;  %v16485_v38 = vld [vmem:[#allocation153_spill] sm:$0xff] }
 0x331   : > { %8461 = vmatprep.mubr.msk.f32.mxu1 %vm2336_vm12, %v2303_v19  ;;  %v2207_v42 = vsel %vm2200_vm9, %v2174_v10, %v16472_v50  ;;  %v16473_v19 = vld [vmem:[#allocation50_spill] sm:$0xff]  ;;  %v2142_v9 = vsel %vm2134_vm7, %v2109_v59, %v16476_v34  ;;  %v16479_v50 = vld [vmem:[#allocation172_spill] sm:$0xff] }
 0x332   : > { %v1983_v29 = vpop.permute.xlu0 %1982  ;;  %v1889_v26 = vpop.permute.xlu1 %1888  ;;  %v2240_v45 = vsel %vm2233_vm10, %v2207_v42, %v10640_v0  ;;  %v16481_v42 = vld [vmem:[#allocation105_spill] sm:$0xff] }
 0x333   : > { %v2304_v49 = vsel %vm495_vm0, %v2272_v37, %v1983_v29  ;;  %v2273_v63 = vsel %vm2266_vm11, %v2240_v45, %v1889_v26  ;;  %v16477_v29 = vld [vmem:[#allocation167_spill] sm:$0xff]  ;;  %v16482_v26 = vld [vmem:[#allocation161_spill] sm:$0xff] }
 0x334   : > { %2893 = vrot.lane.b32.xlu0 %v16473_v19, %s8962_s16  ;;  %2895 = vrot.lane.b32.xlu1 %v16474_v55, %s8962_s16  ;;  %v2175_v18 = vsel %vm2167_vm8, %v2142_v9, %v16477_v29  ;;  %v2110_v22 = vsel %vm2101_vm6, %v2077_v17, %v16482_v26  ;;  %v16483_v45 = vld [vmem:[#allocation173_spill] sm:$0xff]  ;;  %v2078_v17 = vsel %vm2068_vm5, %v9633_v53, %v16485_v38  ;;  %v16492_v38 = vld [vmem:[#allocation179_spill] sm:$0xff] }
 0x335   : > { %8462 = vmatmul.mubr.msk.f32.gmra.mrb[20].mxu1 %vm2336_vm12, %v2304_v49  ;;  %v2208_v0 = vsel %vm2200_vm9, %v2175_v18, %v16479_v50  ;;  %v16480_v49 = vld [vmem:[#allocation74_spill] sm:$0xff]  ;;  %v2143_v27 = vsel %vm2134_vm7, %v2110_v22, %v16483_v45 }
 0x336   : > { %v1891_v5 = vpop.permute.xlu0 %1890  ;;  %v1985_v37 = vpop.permute.xlu1 %1984  ;;  %v2241_v59 = vsel %vm2233_vm10, %v2208_v0, %v10642_v58  ;;  %v16486_v50 = vld [vmem:[#allocation190_spill] sm:$0xff]  ;;  %v16488_v0 = vld [vmem:[#allocation131_spill] sm:$0xff] }
 0x337   : > { %v2305_v10 = vsel %vm495_vm0, %v2273_v63, %v1985_v37  ;;  %v2274_v34 = vsel %vm2266_vm11, %v2241_v59, %v1891_v5  ;;  %v16484_v37 = vld [vmem:[#allocation186_spill] sm:$0xff] }
 0x338   : > { %2897 = vrot.lane.b32.xlu0 %v16480_v49, %s8962_s16  ;;  %2899 = vrot.lane.b32.xlu1 %v16481_v42, %s8962_s16  ;;  %v2176_v29 = vsel %vm2167_vm8, %v2143_v27, %v16484_v37  ;;  %v16489_v5 = vld [vmem:[#allocation162_spill] sm:$0xff] }
 0x339   : > { %8464 = vmatprep.mubr.msk.f32.mxu1 %vm2336_vm12, %v2305_v10  ;;  %v2209_v58 = vsel %vm2200_vm9, %v2176_v29, %v16486_v50  ;;  %v16487_v10 = vld [vmem:[#allocation104_spill] sm:$0xff]  ;;  %v2111_v26 = vsel %vm2101_vm6, %v2078_v17, %v16489_v5  ;;  %v16490_v59 = vld [vmem:[#allocation174_spill] sm:$0xff]  ;;  %v2079_v17 = vsel %vm2068_vm5, %v9774_v25, %v16492_v38  ;;  %v16493_v50 = vld [vmem:[#allocation191_spill] sm:$0xff] }
 0x33a   : > { %v1987_v9 = vpop.permute.xlu0 %1986  ;;  %v1893_v63 = vpop.permute.xlu1 %1892  ;;  %v2242_v22 = vsel %vm2233_vm10, %v2209_v58, %v10648_v61  ;;  %v2144_v53 = vsel %vm2134_vm7, %v2111_v26, %v16490_v59  ;;  %v16495_v58 = vld [vmem:[#allocation156_spill] sm:$0xff] }
 0x33b   : > { %v2306_v18 = vsel %vm495_vm0, %v2274_v34, %v1987_v9  ;;  %v2275_v45 = vsel %vm2266_vm11, %v2242_v22, %v1893_v63  ;;  %v16491_v9 = vld [vmem:[#allocation187_spill] sm:$0xff]  ;;  %v16496_v63 = vld [vmem:[#allocation182_spill] sm:$0xff]  ;;  %v16497_v22 = vld [vmem:[#allocation192_spill] sm:$0xff] }
 0x33c   : > { %2901 = vrot.lane.b32.xlu0 %v16487_v10, %s8962_s16  ;;  %2903 = vrot.lane.b32.xlu1 %v16488_v0, %s8962_s16  ;;  %v2177_v37 = vsel %vm2167_vm8, %v2144_v53, %v16491_v9  ;;  %v2112_v5 = vsel %vm2101_vm6, %v2079_v17, %v16496_v63  ;;  %v16500_v17 = vld [vmem:[#allocation19_spill] sm:$0xff] }
 0x33d   : > { %8465 = vmatmul.mubr.msk.f32.gmra.mrb[22].mxu1 %vm2336_vm12, %v2306_v18  ;;  %v2210_v61 = vsel %vm2200_vm9, %v2177_v37, %v16493_v50  ;;  %v16494_v18 = vld [vmem:[#allocation130_spill] sm:$0xff]  ;;  %v2145_v25 = vsel %vm2134_vm7, %v2112_v5, %v16497_v22 }
 0x33e   : > { %v1895_v27 = vpop.permute.xlu0 %1894  ;;  %v1989_v34 = vpop.permute.xlu1 %1988  ;;  %v2243_v26 = vsel %vm2233_vm10, %v2210_v61, %v10650_v32  ;;  %v16498_v37 = vld [vmem:[#allocation178_spill] sm:$0xff]  ;;  %v16502_v61 = vld [vmem:[#allocation193_spill] sm:$0xff] }
 0x33f   : > { %v2307_v29 = vsel %vm495_vm0, %v2275_v45, %v1989_v34  ;;  %v2276_v59 = vsel %vm2266_vm11, %v2243_v26, %v1895_v27  ;;  %v2178_v34 = vsel %vm2167_vm8, %v2145_v25, %v10382_v51  ;;  %v2080_v38 = vsel %vm2068_vm5, %v9777_v2, %v16498_v37  ;;  %v16501_v27 = vld [vmem:[#allocation183_spill] sm:$0xff]  ;;  %v16503_v25 = vld [vmem:[#allocation197_spill] sm:$0xff]  ;;  %v16507_v37 = vld [vmem:[#allocation206_spill] sm:$0xff] }
 0x340   : > { %2905 = vrot.lane.b32.xlu0 %v16494_v18, %s8962_s16  ;;  %2907 = vrot.lane.b32.xlu1 %v16495_v58, %s8962_s16  ;;  %v2211_v32 = vsel %vm2200_vm9, %v2178_v34, %v10528_v31  ;;  %v2113_v50 = vsel %vm2101_vm6, %v2080_v38, %v16501_v27  ;;  %v16505_v34 = vld [vmem:[#allocation29_spill] sm:$0xff] }
 0x341   : > { %8467 = vmatprep.mubr.msk.f32.mxu1 %vm2336_vm12, %v2307_v29  ;;  %v16499_v29 = vld [vmem:[#allocation155_spill] sm:$0xff]  ;;  %v2244_v51 = vsel %vm2233_vm10, %v2211_v32, %v10656_v33  ;;  %v2146_v2 = vsel %vm2134_vm7, %v2113_v50, %v16502_v61 }
 0x342   : > { %v1991_v53 = vpop.permute.xlu0 %1990  ;;  %v1897_v45 = vpop.permute.xlu1 %1896  ;;  %v2179_v26 = vsel %vm2167_vm8, %v2146_v2, %v10384_v56  ;;  %v16509_v2 = vld [vmem:[#allocation28_spill] sm:$0xff] }
 0x343   : > { %v2308_v9 = vsel %vm495_vm0, %v2276_v59, %v1991_v53  ;;  %v2277_v63 = vsel %vm2266_vm11, %v2244_v51, %v1897_v45  ;;  %v2081_v59 = vsel %vm2068_vm5, %v9916_v35, %v16503_v25  ;;  %v2212_v33 = vsel %vm2200_vm9, %v2179_v26, %v10530_v23  ;;  %v16504_v53 = vld [vmem:[#allocation17_spill] sm:$0xff]  ;;  %v16506_v45 = vld [vmem:[#allocation200_spill] sm:$0xff]  ;;  %v16512_v26 = vld [vmem:[#allocation207_spill] sm:$0xff] }
 0x344   : > { %2909 = vrot.lane.b32.xlu0 %v16499_v29, %s8962_s16  ;;  %2911 = vrot.lane.b32.xlu1 %v16500_v17, %s8962_s16  ;;  %v2245_v56 = vsel %vm2233_vm10, %v2212_v33, %v10658_v6  ;;  %v16508_v51 = vld [vmem:[#allocation196_spill] sm:$0xff] }
 0x345   : > { %8468 = vmatmul.mubr.msk.f32.gmra.mrb[24].mxu1 %vm2336_vm12, %v2308_v9  ;;  %v2114_v9 = vsel %vm2101_vm6, %v2081_v59, %v16506_v45  ;;  %v2082_v61 = vsel %vm2068_vm5, %v9919_v43, %v16508_v51  ;;  %v2083_v45 = vsel %vm2068_vm5, %v10050_v40, %v10416_v20 }
 0x346   : > { %v1899_v31 = vpop.permute.xlu0 %1898  ;;  %v1993_v5 = vpop.permute.xlu1 %1992  ;;  %v2147_v35 = vsel %vm2134_vm7, %v2114_v9, %v16507_v37  ;;  %v16513_v9 = vld [vmem:[#allocation40_spill] sm:$0xff]  ;;  %v2116_v37 = vsel %vm2101_vm6, %v2083_v45, %v10430_v8 }
 0x347   : > { %v2309_v22 = vsel %vm495_vm0, %v2277_v63, %v1993_v5  ;;  %v2278_v38 = vsel %vm2266_vm11, %v2245_v56, %v1899_v31  ;;  %v2180_v27 = vsel %vm2167_vm8, %v2147_v35, %v10446_v21  ;;  %v16510_v63 = vld [vmem:[#allocation41_spill] sm:$0xff]  ;;  %v2149_v40 = vsel %vm2134_vm7, %v2116_v37, %v10468_v28 }
 0x348   : > { %2913 = vrot.lane.b32.xlu0 %v16504_v53, %s8962_s16  ;;  %2915 = vrot.lane.b32.xlu1 %v16505_v34, %s8962_s16  ;;  %v2213_v6 = vsel %vm2200_vm9, %v2180_v27, %v10536_v48  ;;  %v16511_v31 = vld [vmem:[#allocation201_spill] sm:$0xff]  ;;  %v16516_v27 = vld [vmem:[#allocation52_spill] sm:$0xff] }
 0x349   : > { %8470 = vmatprep.mubr.msk.f32.mxu1 %vm2336_vm12, %v2309_v22  ;;  %v2115_v5 = vsel %vm2101_vm6, %v2082_v61, %v16511_v31  ;;  %v2246_v21 = vsel %vm2233_vm10, %v2213_v6, %v10664_v30  ;;  %v16514_v56 = vld [vmem:[#allocation53_spill] sm:$0xff] }
 0x34a   : > { %v1995_v23 = vpop.permute.xlu0 %1994  ;;  %v1901_v32 = vpop.permute.xlu1 %1900  ;;  %v2148_v43 = vsel %vm2134_vm7, %v2115_v5, %v16512_v26  ;;  %v16519_v61 = vld [vmem:[#allocation13_spill] sm:$0xff] }
 0x34b   : > { %v2310_v50 = vsel %vm495_vm0, %v2278_v38, %v1995_v23  ;;  %v2279_v22 = vsel %vm2266_vm11, %v2246_v21, %v1901_v32  ;;  %v2181_v59 = vsel %vm2167_vm8, %v2148_v43, %v10448_v24  ;;  %v2182_v38 = vsel %vm2167_vm8, %v2149_v40, %v10512_v16  ;;  %v16515_v32 = vld [vmem:[#allocation138_spill] sm:$0xff]  ;;  %v16518_v16 = vld [vmem:[#allocation212_spill] sm:$0xff]  ;;  %v16521_v21 = vld [vmem:[#allocation33_spill] sm:$0xff] }
 0x34c   : > { %2917 = vrot.lane.b32.xlu0 %v16509_v2, %s8962_s16  ;;  %2919 = vrot.lane.b32.xlu1 %v16510_v63, %s8962_s16  ;;  %v2214_v30 = vsel %vm2200_vm9, %v2181_v59, %v10538_v15  ;;  %v2084_v8 = vsel %vm2068_vm5, %v16515_v32, %v10414_v4  ;;  %v2215_v28 = vsel %vm2200_vm9, %v2182_v38, %v10544_v13  ;;  %v16524_v59 = vld [vmem:[#allocation62_spill] sm:$0xff]  ;;  %v16527_v37 = vld [vmem:[#allocation109_spill] sm:$0xff] }
 0x34d   : > { %8471 = vmatmul.mubr.msk.f32.gmra.mrb[26].mxu1 %vm2336_vm12, %v2310_v50  ;;  %v2247_v24 = vsel %vm2233_vm10, %v2214_v30, %v10666_v57  ;;  %v2085_v57 = vsel %vm2068_vm5, %v10184_v44, %v10495_v39  ;;  %v16517_v50 = vld [vmem:[#allocation79_spill] sm:$0xff]  ;;  %v2117_v51 = vsel %vm2101_vm6, %v2084_v8, %v16518_v16  ;;  %v2248_v4 = vsel %vm2233_vm10, %v2215_v28, %v10672_v60  ;;  %v16520_v44 = vld [vmem:[#allocation217_spill] sm:$0xff]  ;;  %v16526_v30 = vld [vmem:[#allocation78_spill] sm:$0xff] }
 0x34e   : > { %v1903_v48 = vpop.permute.xlu0 %1902  ;;  %v1997_v25 = vpop.permute.xlu1 %1996  ;;  %v2118_v6 = vsel %vm2101_vm6, %v2085_v57, %v16519_v61  ;;  %v2150_v39 = vsel %vm2134_vm7, %v2117_v51, %v16520_v44  ;;  %v16530_v57 = vld [vmem:[#allocation63_spill] sm:$0xff]  ;;  %v16531_v16 = vld [vmem:[#allocation45_spill] sm:$0xff]  ;;  %v16532_v61 = vld [vmem:[#allocation108_spill] sm:$0xff] }
 0x34f   : > { %v2311_v33 = vsel %vm495_vm0, %v2279_v22, %v1997_v25  ;;  %v2280_v20 = vsel %vm2266_vm11, %v2247_v24, %v1903_v48  ;;  %v2183_v26 = vsel %vm2167_vm8, %v2150_v39, %v16521_v21  ;;  %v16522_v22 = vld [vmem:[#allocation220_spill] sm:$0xff]  ;;  %v16523_v48 = vld [vmem:[#allocation163_spill] sm:$0xff]  ;;  %v2151_v60 = vsel %vm2134_vm7, %v2118_v6, %v16524_v59  ;;  %v16528_v24 = vld [vmem:[#allocation221_spill] sm:$0xff] }
 0x350   : > { %2921 = vrot.lane.b32.xlu0 %v16513_v9, %s8962_s16  ;;  %2923 = vrot.lane.b32.xlu1 %v16514_v56, %s8962_s16  ;;  %v2086_v25 = vsel %vm2068_vm5, %v16523_v48, %v16522_v22  ;;  %v16535_v21 = vld [vmem:[#allocation70_spill] sm:$0xff]  ;;  %v16537_v22 = vld [vmem:[#allocation44_spill] sm:$0xff]  ;;  %v16540_v59 = vld [vmem:[#allocation77_spill] sm:$0xff] }
 0x351   : > { %8473 = vmatprep.mubr.msk.f32.mxu1 %vm2336_vm12, %v2311_v33  ;;  %v16525_v33 = vld [vmem:[#allocation37_spill] sm:$0xff]  ;;  %v2119_v40 = vsel %vm2101_vm6, %v2086_v25, %v16528_v24  ;;  %v16539_v25 = vld [vmem:[#allocation160_spill] sm:$0xff] }
 0x352   : > { %v1999_v15 = vpop.permute.xlu0 %1998  ;;  %v1905_v35 = vpop.permute.xlu1 %1904  ;;  %v2216_v45 = vsel %vm2200_vm9, %v2183_v26, %v16525_v33  ;;  %v2152_v28 = vsel %vm2134_vm7, %v2119_v40, %v16530_v57  ;;  %v16536_v26 = vld [vmem:[#allocation22_spill] sm:$0xff] }
 0x353   : > { %v2312_v23 = vsel %vm495_vm0, %v2280_v20, %v1999_v15  ;;  %v2281_v13 = vsel %vm2266_vm11, %v2248_v4, %v1905_v35  ;;  %v2249_v20 = vsel %vm2233_vm10, %v2216_v45, %v10674_v46  ;;  %v16533_v46 = vld [vmem:[#allocation135_spill] sm:$0xff]  ;;  %v16541_v45 = vld [vmem:[#allocation92_spill] sm:$0xff] }
 0x354   : > { %2925 = vrot.lane.b32.xlu0 %v16516_v27, %s8962_s16  ;;  %2927 = vrot.lane.b32.xlu1 %v16517_v50, %s8962_s16 }
 0x355   : > { %8474 = vmatmul.mubr.msk.f32.gmra.mrb[28].mxu1 %vm2336_vm12, %v2312_v23  ;;  %v16529_v23 = vld [vmem:[#allocation83_spill] sm:$0xff] }
 0x356   : > { %v1907_v31 = vpop.permute.xlu0 %1906  ;;  %v2001_v5 = vpop.permute.xlu1 %2000  ;;  %v2184_v32 = vsel %vm2167_vm8, %v2151_v60, %v16529_v23 }
 0x357   : > { %v2313_v43 = vsel %vm495_vm0, %v2281_v13, %v2001_v5  ;;  %v2282_v15 = vsel %vm2266_vm11, %v2249_v20, %v1907_v31  ;;  %v2217_v51 = vsel %vm2200_vm9, %v2184_v32, %v16531_v16  ;;  %v16534_v13 = vld [vmem:[#allocation82_spill] sm:$0xff]  ;;  %v16543_v32 = vld [vmem:[#allocation71_spill] sm:$0xff] }
 0x358   : > { %2929 = vrot.lane.b32.xlu0 %v16526_v30, %s8962_s16  ;;  %2931 = vrot.lane.b32.xlu1 %v16527_v37, %s8962_s16  ;;  %v2250_v6 = vsel %vm2233_vm10, %v2217_v51, %v10680_v11  ;;  %v2185_v31 = vsel %vm2167_vm8, %v2152_v28, %v16534_v13  ;;  %v16538_v11 = vld [vmem:[#allocation134_spill] sm:$0xff]  ;;  %v16545_v28 = vld [vmem:[#allocation48_spill] sm:$0xff]  ;;  %v16546_v16 = vld [vmem:[#allocation159_spill] sm:$0xff] }
 0x359   : > { %8476 = vmatprep.mubr.msk.f32.mxu1 %vm2336_vm12, %v2313_v43  ;;  %v2087_v43 = vsel %vm2068_vm5, %v16536_v26, %v16535_v21  ;;  %v2218_v48 = vsel %vm2200_vm9, %v2185_v31, %v16537_v22  ;;  %v16547_v51 = vld [vmem:[#allocation76_spill] sm:$0xff]  ;;  %v16549_v21 = vld [vmem:[#allocation113_spill] sm:$0xff] }
 0x35a   : > { %v2003_v35 = vpop.permute.xlu0 %2002  ;;  %v1909_v38 = vpop.permute.xlu1 %1908  ;;  %v2120_v60 = vsel %vm2101_vm6, %v2087_v43, %v16540_v59  ;;  %v2251_v33 = vsel %vm2233_vm10, %v2218_v48, %v10682_v12  ;;  %v16550_v22 = vld [vmem:[#allocation101_spill] sm:$0xff]  ;;  %v16551_v48 = vld [vmem:[#allocation30_spill] sm:$0xff] }
 0x35b   : > { %v2314_v8 = vsel %vm495_vm0, %v2282_v15, %v2003_v35  ;;  %v2283_v4 = vsel %vm2266_vm11, %v2250_v6, %v1909_v38  ;;  %v2153_v24 = vsel %vm2134_vm7, %v2120_v60, %v16541_v45  ;;  %v16542_v35 = vld [vmem:[#allocation112_spill] sm:$0xff]  ;;  %v2089_v59 = vsel %vm2068_vm5, %v16551_v48, %v16550_v22  ;;  %v16552_v60 = vld [vmem:[#allocation49_spill] sm:$0xff] }
 0x35c   : > { %2933 = vrot.lane.b32.xlu0 %v16532_v61, %s8962_s16  ;;  %2935 = vrot.lane.b32.xlu1 %v16533_v46, %s8962_s16  ;;  %v2186_v38 = vsel %vm2167_vm8, %v2153_v24, %v16542_v35  ;;  %v16554_v24 = vld [vmem:[#allocation24_spill] sm:$0xff] }
 0x35d   : > { %8477 = vmatmul.mubr.msk.f32.gmra.mrb[30].mxu1 %vm2336_vm12, %v2314_v8  ;;  %v16544_v8 = vld [vmem:[#allocation23_spill] sm:$0xff]  ;;  %v2219_v12 = vsel %vm2200_vm9, %v2186_v38, %v16545_v28  ;;  %v16557_v28 = vld [vmem:[#allocation100_spill] sm:$0xff] }
 0x35e   : > { %v1911_v44 = vpop.permute.xlu0 %1910  ;;  %v2005_v39 = vpop.permute.xlu1 %2004  ;;  %v2088_v57 = vsel %vm2068_vm5, %v16544_v8, %v16543_v32  ;;  %v16556_v32 = vld [vmem:[#allocation143_spill] sm:$0xff]  ;;  %v16563_v48 = vld [vmem:[#allocation144_spill] sm:$0xff] }
 0x35f   : > { %v2315_v5 = vsel %vm495_vm0, %v2283_v4, %v2005_v39  ;;  %v2284_v40 = vsel %vm2266_vm11, %v2251_v33, %v1911_v44  ;;  %v2121_v6 = vsel %vm2101_vm6, %v2088_v57, %v16547_v51  ;;  %v2252_v4 = vsel %vm2233_vm10, %v2219_v12, %v10688_v36  ;;  %v16548_v44 = vld [vmem:[#allocation93_spill] sm:$0xff]  ;;  %v16553_v36 = vld [vmem:[#allocation106_spill] sm:$0xff]  ;;  %v16558_v12 = vld [vmem:[#allocation31_spill] sm:$0xff] }
 0x360   : > { %2937 = vrot.lane.b32.xlu0 %v16538_v11, %s8962_s16  ;;  %2939 = vrot.lane.b32.xlu1 %v16539_v25, %s8962_s16  ;;  %v2154_v39 = vsel %vm2134_vm7, %v2121_v6, %v16548_v44  ;;  %v2122_v45 = vsel %vm2101_vm6, %v2089_v59, %v16553_v36  ;;  %v2090_v51 = vsel %vm2068_vm5, %v16558_v12, %v16557_v28  ;;  %v16559_v6 = vld [vmem:[#allocation61_spill] sm:$0xff]  ;;  %v16560_v44 = vld [vmem:[#allocation107_spill] sm:$0xff]  ;;  %v16565_v36 = vld [vmem:[#allocation42_spill] sm:$0xff] }
 0x361   : > { %8479 = vmatprep.mubr.msk.f32.mxu1 %vm2336_vm12, %v2315_v5  ;;  %v2187_v26 = vsel %vm2167_vm8, %v2154_v39, %v16549_v21  ;;  %v2123_v39 = vsel %vm2101_vm6, %v2090_v51, %v16560_v44  ;;  %v16570_v12 = vld [vmem:[#allocation168_spill] sm:$0xff]  ;;  %v16572_v44 = vld [vmem:[#allocation43_spill] sm:$0xff] }
 0x362   : > { %v2007_v20 = vpop.permute.xlu0 %2006  ;;  %v1913_v15 = vpop.permute.xlu1 %1912  ;;  %v2220_v33 = vsel %vm2200_vm9, %v2187_v26, %v16552_v60 }
 0x363   : > { %v2316_v23 = vsel %vm495_vm0, %v2284_v40, %v2007_v20  ;;  %v2285_v13 = vsel %vm2266_vm11, %v2252_v4, %v1913_v15  ;;  %v2253_v40 = vsel %vm2233_vm10, %v2220_v33, %v16554_v24  ;;  %v16555_v20 = vld [vmem:[#allocation122_spill] sm:$0xff]  ;;  %v16564_v33 = vld [vmem:[#allocation129_spill] sm:$0xff]  ;;  %v16566_v24 = vld [vmem:[#allocation60_spill] sm:$0xff] }
 0x364   : > { %2941 = vrot.lane.b32.xlu0 %v16546_v16, %s8962_s16  ;;  %8480 = vmatmul.mubr.msk.f32.gmra.mrb[32].mxu1 %vm2336_vm12, %v2316_v23  ;;  %v2155_v15 = vsel %vm2134_vm7, %v2122_v45, %v16555_v20  ;;  %v2091_v45 = vsel %vm2068_vm5, %v16565_v36, %v16564_v33  ;;  %v16567_v20 = vld [vmem:[#allocation136_spill] sm:$0xff]  ;;  %v16577_v36 = vld [vmem:[#allocation169_spill] sm:$0xff]  ;;  %s16852_s16 = smov 4  }
 0x365   : > { %v2188_v8 = vsel %vm2167_vm8, %v2155_v15, %v16556_v32  ;;  %v2124_v15 = vsel %vm2101_vm6, %v2091_v45, %v16567_v20  ;;  %v16579_v20 = vld [vmem:[#allocation56_spill] sm:$0xff] }
 0x366   : > { %v1915_v31 = vpop.permute.xlu0 %1914  ;;  %v2009_v5 = vpop.permute.xlu1 %2008  ;;  %v2221_v4 = vsel %vm2200_vm9, %v2188_v8, %v16559_v6 }
 0x367   : > { %v2317_v43 = vsel %vm495_vm0, %v2285_v13, %v2009_v5  ;;  %v2286_v35 = vsel %vm2266_vm11, %v2253_v40, %v1915_v31  ;;  %v16561_v13 = vld [vmem:[#allocation25_spill] sm:$0xff]  ;;  %v16562_v5 = vld [vmem:[#allocation123_spill] sm:$0xff] }
 0x368   : > { %8482 = vmatprep.mubr.msk.f32.mxu1 %vm2336_vm12, %v2317_v43  ;;  %v2254_v31 = vsel %vm2233_vm10, %v2221_v4, %v16561_v13  ;;  %v2156_v21 = vsel %vm2134_vm7, %v2123_v39, %v16562_v5  ;;  %v16571_v4 = vld [vmem:[#allocation128_spill] sm:$0xff]  ;;  %v16574_v5 = vld [vmem:[#allocation137_spill] sm:$0xff] }
 0x369   : > { %v2189_v59 = vsel %vm2167_vm8, %v2156_v21, %v16563_v48  ;;  %v2092_v39 = vsel %vm2068_vm5, %v16572_v44, %v16571_v4  ;;  %v16573_v13 = vld [vmem:[#allocation68_spill] sm:$0xff] }
 0x36a   : > { %v2011_v38 = vpop.permute.xlu0 %2010  ;;  %v1917_v23 = vpop.permute.xlu1 %1916  ;;  %v2222_v40 = vsel %vm2200_vm9, %v2189_v59, %v16566_v24  ;;  %v2125_v21 = vsel %vm2101_vm6, %v2092_v39, %v16574_v5  ;;  %v16584_v44 = vld [vmem:[#allocation188_spill] sm:$0xff]  ;;  %v16586_v5 = vld [vmem:[#allocation57_spill] sm:$0xff] }
 0x36b   : > { %v2318_v57 = vsel %vm495_vm0, %v2286_v35, %v2011_v38  ;;  %v2287_v26 = vsel %vm2266_vm11, %v2254_v31, %v1917_v23  ;;  %v16568_v35 = vld [vmem:[#allocation35_spill] sm:$0xff] }
 0x36c   : > { %8483 = vmatmul.mubr.msk.f32.gmra.mrb[34].mxu1 %vm2336_vm12, %v2318_v57  ;;  %v2255_v38 = vsel %vm2233_vm10, %v2222_v40, %v16568_v35  ;;  %v16569_v23 = vld [vmem:[#allocation151_spill] sm:$0xff]  ;;  %v16578_v40 = vld [vmem:[#allocation158_spill] sm:$0xff]  ;;  %v16580_v35 = vld [vmem:[#allocation69_spill] sm:$0xff] }
 0x36d   : > { %v2157_v32 = vsel %vm2134_vm7, %v2124_v15, %v16569_v23  ;;  %v2093_v15 = vsel %vm2068_vm5, %v16579_v20, %v16578_v40  ;;  %v16581_v23 = vld [vmem:[#allocation164_spill] sm:$0xff]  ;;  %v16591_v20 = vld [vmem:[#allocation189_spill] sm:$0xff] }
 0x36e   : > { %v1919_v43 = vpop.permute.xlu0 %1918  ;;  %v2013_v22 = vpop.permute.xlu1 %2012  ;;  %v2190_v51 = vsel %vm2167_vm8, %v2157_v32, %v16570_v12  ;;  %v2126_v32 = vsel %vm2101_vm6, %v2093_v15, %v16581_v23  ;;  %v16593_v23 = vld [vmem:[#allocation84_spill] sm:$0xff] }
 0x36f   : > { %v2319_v60 = vsel %vm495_vm0, %v2287_v26, %v2013_v22  ;;  %v2288_v8 = vsel %vm2266_vm11, %v2255_v38, %v1919_v43  ;;  %v2223_v31 = vsel %vm2200_vm9, %v2190_v51, %v16573_v13  ;;  %v16575_v26 = vld [vmem:[#allocation34_spill] sm:$0xff]  ;;  %v16576_v22 = vld [vmem:[#allocation152_spill] sm:$0xff] }
 0x370   : > { %8485 = vmatprep.mubr.msk.f32.mxu1 %vm2336_vm12, %v2319_v60  ;;  %v2256_v43 = vsel %vm2233_vm10, %v2223_v31, %v16575_v26  ;;  %v2158_v48 = vsel %vm2134_vm7, %v2125_v21, %v16576_v22  ;;  %v16585_v31 = vld [vmem:[#allocation157_spill] sm:$0xff]  ;;  %v16587_v26 = vld [vmem:[#allocation91_spill] sm:$0xff] }
 0x371   : > { %v2191_v45 = vsel %vm2167_vm8, %v2158_v48, %v16577_v36  ;;  %v2094_v21 = vsel %vm2068_vm5, %v16586_v5, %v16585_v31  ;;  %v16588_v22 = vld [vmem:[#allocation165_spill] sm:$0xff]  ;;  %v16598_v5 = vld [vmem:[#allocation204_spill] sm:$0xff] }
 0x372   : > { %v2015_v57 = vpop.permute.xlu0 %2014  ;;  %v1921_v28 = vpop.permute.xlu1 %1920  ;;  %v2224_v38 = vsel %vm2200_vm9, %v2191_v45, %v16580_v35  ;;  %v2127_v48 = vsel %vm2101_vm6, %v2094_v21, %v16588_v22  ;;  %v16600_v22 = vld [vmem:[#allocation85_spill] sm:$0xff] }
 0x373   : > { %v2320_v6 = vsel %vm495_vm0, %v2288_v8, %v2015_v57  ;;  %v2289_v59 = vsel %vm2266_vm11, %v2256_v43, %v1921_v28  ;;  %v16582_v8 = vld [vmem:[#allocation47_spill] sm:$0xff] }
 0x374   : > { %8486 = vmatmul.mubr.msk.f32.gmra.mrb[36].mxu1 %vm2336_vm12, %v2320_v6  ;;  %v2257_v57 = vsel %vm2233_vm10, %v2224_v38, %v16582_v8  ;;  %v16583_v28 = vld [vmem:[#allocation175_spill] sm:$0xff]  ;;  %v16592_v38 = vld [vmem:[#allocation181_spill] sm:$0xff]  ;;  %v16594_v8 = vld [vmem:[#allocation90_spill] sm:$0xff] }
 0x375   : > { %v2159_v12 = vsel %vm2134_vm7, %v2126_v32, %v16583_v28  ;;  %v2095_v32 = vsel %vm2068_vm5, %v16593_v23, %v16592_v38  ;;  %v16595_v28 = vld [vmem:[#allocation184_spill] sm:$0xff]  ;;  %v16605_v23 = vld [vmem:[#allocation205_spill] sm:$0xff] }
 0x376   : > { %v1923_v60 = vpop.permute.xlu0 %1922  ;;  %v2017_v33 = vpop.permute.xlu1 %2016  ;;  %v2192_v39 = vsel %vm2167_vm8, %v2159_v12, %v16584_v44  ;;  %v2128_v12 = vsel %vm2101_vm6, %v2095_v32, %v16595_v28  ;;  %v16607_v28 = vld [vmem:[#allocation114_spill] sm:$0xff] }
 0x377   : > { %v2321_v24 = vsel %vm495_vm0, %v2289_v59, %v2017_v33  ;;  %v2290_v51 = vsel %vm2266_vm11, %v2257_v57, %v1923_v60  ;;  %v2225_v43 = vsel %vm2200_vm9, %v2192_v39, %v16587_v26  ;;  %v16589_v59 = vld [vmem:[#allocation46_spill] sm:$0xff]  ;;  %v16590_v33 = vld [vmem:[#allocation176_spill] sm:$0xff] }
 0x378   : > { %8488 = vmatprep.mubr.msk.f32.mxu1 %vm2336_vm12, %v2321_v24  ;;  %v2258_v60 = vsel %vm2233_vm10, %v2225_v43, %v16589_v59  ;;  %v2160_v36 = vsel %vm2134_vm7, %v2127_v48, %v16590_v33  ;;  %v16599_v43 = vld [vmem:[#allocation180_spill] sm:$0xff]  ;;  %v16601_v59 = vld [vmem:[#allocation98_spill] sm:$0xff]  ;;  %v16602_v33 = vld [vmem:[#allocation185_spill] sm:$0xff] }
 0x379   : > { %v2193_v15 = vsel %vm2167_vm8, %v2160_v36, %v16591_v20  ;;  %v2096_v48 = vsel %vm2068_vm5, %v16600_v22, %v16599_v43  ;;  %v16612_v22 = vld [vmem:[#allocation215_spill] sm:$0xff] }
 0x37a   : > { %v2019_v6 = vpop.permute.xlu0 %2018  ;;  %v1925_v4 = vpop.permute.xlu1 %1924  ;;  %v2226_v57 = vsel %vm2200_vm9, %v2193_v15, %v16594_v8  ;;  %v2129_v36 = vsel %vm2101_vm6, %v2096_v48, %v16602_v33  ;;  %v16614_v33 = vld [vmem:[#allocation115_spill] sm:$0xff] }
 0x37b   : > { %v2322_v13 = vsel %vm495_vm0, %v2290_v51, %v2019_v6  ;;  %v2291_v45 = vsel %vm2266_vm11, %v2258_v60, %v1925_v4  ;;  %v16596_v51 = vld [vmem:[#allocation65_spill] sm:$0xff]  ;;  %v16597_v4 = vld [vmem:[#allocation194_spill] sm:$0xff] }
 0x37c   : > { %8489 = vmatmul.mubr.msk.f32.gmra.mrb[38].mxu1 %vm2336_vm12, %v2322_v13  ;;  %v2259_v6 = vsel %vm2233_vm10, %v2226_v57, %v16596_v51  ;;  %v2161_v44 = vsel %vm2134_vm7, %v2128_v12, %v16597_v4  ;;  %v16606_v57 = vld [vmem:[#allocation199_spill] sm:$0xff]  ;;  %v16609_v4 = vld [vmem:[#allocation202_spill] sm:$0xff] }
 0x37d   : > { %v2194_v21 = vsel %vm2167_vm8, %v2161_v44, %v16598_v5  ;;  %v2097_v12 = vsel %vm2068_vm5, %v16607_v28, %v16606_v57  ;;  %v16608_v51 = vld [vmem:[#allocation99_spill] sm:$0xff]  ;;  %v16618_v57 = vld [vmem:[#allocation216_spill] sm:$0xff] }
 0x37e   : > { %v1927_v24 = vpop.permute.xlu0 %1926  ;;  %v2021_v40 = vpop.permute.xlu1 %2020  ;;  %v2227_v60 = vsel %vm2200_vm9, %v2194_v21, %v16601_v59  ;;  %v2130_v44 = vsel %vm2101_vm6, %v2097_v12, %v16609_v4  ;;  %v16620_v4 = vld [vmem:[#allocation211_spill] sm:$0xff] }
 0x37f   : > { %v2323_v35 = vsel %vm495_vm0, %v2291_v45, %v2021_v40  ;;  %v2292_v39 = vsel %vm2266_vm11, %v2259_v6, %v1927_v24  ;;  %v16603_v45 = vld [vmem:[#allocation64_spill] sm:$0xff]  ;;  %v16604_v40 = vld [vmem:[#allocation195_spill] sm:$0xff] }
 0x380   : > { %8491 = vmatprep.mubr.msk.f32.mxu1 %vm2336_vm12, %v2323_v35  ;;  %v2260_v24 = vsel %vm2233_vm10, %v2227_v60, %v16603_v45  ;;  %v2162_v20 = vsel %vm2134_vm7, %v2129_v36, %v16604_v40  ;;  %v16613_v60 = vld [vmem:[#allocation198_spill] sm:$0xff]  ;;  %v16615_v45 = vld [vmem:[#allocation121_spill] sm:$0xff]  ;;  %v16616_v40 = vld [vmem:[#allocation203_spill] sm:$0xff] }
 0x381   : > { %v2195_v32 = vsel %vm2167_vm8, %v2162_v20, %v16605_v23  ;;  %v2098_v36 = vsel %vm2068_vm5, %v16614_v33, %v16613_v60  ;;  %v16626_v60 = vld [vmem:[#allocation214_spill] sm:$0xff] }
 0x382   : > { %v2023_v13 = vpop.permute.xlu0 %2022  ;;  %v1929_v31 = vpop.permute.xlu1 %1928  ;;  %v2228_v6 = vsel %vm2200_vm9, %v2195_v32, %v16608_v51  ;;  %v2131_v20 = vsel %vm2101_vm6, %v2098_v36, %v16616_v40  ;;  %v16619_v51 = vld [vmem:[#allocation120_spill] sm:$0xff] }
 0x383   : > { %v2324_v26 = vsel %vm495_vm0, %v2292_v39, %v2023_v13  ;;  %v2293_v15 = vsel %vm2266_vm11, %v2260_v24, %v1929_v31  ;;  %v16610_v39 = vld [vmem:[#allocation95_spill] sm:$0xff]  ;;  %v16611_v31 = vld [vmem:[#allocation208_spill] sm:$0xff] }
 0x384   : > { %8492 = vmatmul.mubr.msk.f32.gmra.mrb[40].mxu1 %vm2336_vm12, %v2324_v26  ;;  %v2261_v13 = vsel %vm2233_vm10, %v2228_v6, %v16610_v39  ;;  %v2163_v5 = vsel %vm2134_vm7, %v2130_v44, %v16611_v31  ;;  %v16621_v44 = vld [vmem:[#allocation141_spill] sm:$0xff]  ;;  %v16622_v39 = vld [vmem:[#allocation94_spill] sm:$0xff]  ;;  %v16627_v36 = vld [vmem:[#allocation124_spill] sm:$0xff] }
 0x385   : > { %v2196_v48 = vsel %vm2167_vm8, %v2163_v5, %v16612_v22  ;;  %v16623_v31 = vld [vmem:[#allocation210_spill] sm:$0xff] }
 0x386   : > { %v1931_v35 = vpop.permute.xlu0 %1930  ;;  %v2025_v38 = vpop.permute.xlu1 %2024  ;;  %v2229_v24 = vsel %vm2200_vm9, %v2196_v48, %v16615_v45  ;;  %v16624_v5 = vld [vmem:[#allocation142_spill] sm:$0xff]  ;;  %v11307_v45 = vunpack.i.h.bf16 %v16627_v36 }
 0x387   : > { %v2325_v8 = vsel %vm495_vm0, %v2293_v15, %v2025_v38  ;;  %v2294_v21 = vsel %vm2266_vm11, %v2261_v13, %v1931_v35  ;;  %v2262_v15 = vsel %vm2233_vm10, %v2229_v24, %v10733_v47  ;;  %v16617_v35 = vld [vmem:[#allocation209_spill] sm:$0xff]  ;;  %v2099_v47 = vsel %vm2068_vm5, %v16621_v44, %v16620_v4  ;;  %v16637_v4 = vld [vmem:[#allocation222_spill] sm:$0xff] }
 0x388   : > { %8494 = vmatprep.mubr.msk.f32.mxu1 %vm2336_vm12, %v2325_v8  ;;  %v2164_v38 = vsel %vm2134_vm7, %v2131_v20, %v16617_v35  ;;  %16628 = vst [vmem:[#allocation55_spill] sm:$0xff] %v11307_v45  ;;  %v11310_v24 = vunpack.i.l.bf16 %v16627_v36  ;;  %v16630_v20 = vld [vmem:[#allocation218_spill] sm:$0xff]  ;;  %v16631_v35 = vld [vmem:[#allocation219_spill] sm:$0xff] }
 0x389   : > { %v2197_v28 = vsel %vm2167_vm8, %v2164_v38, %v16618_v57 }
 0x38a   : > { %v2027_v26 = vpop.permute.xlu0 %2026  ;;  %v1933_v43 = vpop.permute.xlu1 %1932  ;;  %v2230_v6 = vsel %vm2200_vm9, %v2197_v28, %v16619_v51  ;;  %16629 = vst [vmem:[#allocation150_spill] sm:$0xff] %v11310_v24  ;;  %v16635_v28 = vld [vmem:[#allocation36_spill] sm:$0xff]  ;;  %v16636_v51 = vld [vmem:[#allocation170_spill] sm:$0xff] }
 0x38b   : > { %v2326_v59 = vsel %vm495_vm0, %v2294_v21, %v2027_v26  ;;  %v2295_v23 = vsel %vm2266_vm11, %v2262_v15, %v1933_v43  ;;  %v2263_v13 = vsel %vm2233_vm10, %v2230_v6, %v16622_v39  ;;  %v2100_v21 = vsel %vm2068_vm5, %v16624_v5, %v16623_v31  ;;  %v16625_v26 = vld [vmem:[#allocation213_spill] sm:$0xff] }
 0x38c   : > { %8495 = vmatmul.mubr.msk.f32.gmra.mrb[42].mxu1 %vm2336_vm12, %v2326_v59  ;;  %v2132_v43 = vsel %vm2101_vm6, %v2099_v47, %v16625_v26  ;;  %v2133_v33 = vsel %vm2101_vm6, %v2100_v21, %v16626_v60  ;;  %v11356_v60 = vld [vmem:[%s15784_s6] ss:$0 sm:$0xff] }
 0x38d   : > { %v2165_v15 = vsel %vm2134_vm7, %v2132_v43, %v16630_v20  ;;  %v2166_v38 = vsel %vm2134_vm7, %v2133_v33, %v16631_v35 }
 0x38e   : > { %v1935_v32 = vpop.permute.xlu0 %1934  ;;  %v2029_v8 = vpop.permute.xlu1 %2028 }
 0x38f   : > { %v2327_v12 = vsel %vm495_vm0, %v2295_v23, %v2029_v8  ;;  %v2296_v22 = vsel %vm2266_vm11, %v2263_v13, %v1935_v32  ;;  %v16634_v8 = vld [vmem:[#allocation32_spill] sm:$0xff] }
 0x390   : > { %8497 = vmatprep.mubr.msk.f32.mxu1 %vm2336_vm12, %v2327_v12  ;;  %v2198_v57 = vsel %vm2167_vm8, %v2165_v15, %v16634_v8  ;;  %v2199_v12 = vsel %vm2167_vm8, %v2166_v38, %v16635_v28 }
 0x391   : > { %v2231_v6 = vsel %vm2200_vm9, %v2198_v57, %v16636_v51  ;;  %v2232_v44 = vsel %vm2200_vm9, %v2199_v12, %v16637_v4 }
 0x392   : > { %v2031_v48 = vpop.permute.xlu0 %2030  ;;  %v8791_v59 = vpop.permute.xlu1 %8790  ;;  %v2264_v31 = vsel %vm2233_vm10, %v2231_v6, %v11310_v24  ;;  %v2265_v5 = vsel %vm2233_vm10, %v2232_v44, %v11307_v45 }
 0x393   : > { %v2328_v40 = vsel %vm495_vm0, %v2296_v22, %v2031_v48  ;;  %v11317_v23 = vunpack.i.h.bf16 %v8791_v59  ;;  %v11319_v32 = vunpack.i.l.bf16 %v8791_v59  ;;  %v11351_v48 = vld [vmem:[%s15783_s5] ss:$0 sm:$0xff] }
 0x394   : > { %8498 = vmatmul.mubr.msk.f32.gmra.mrb[44].mxu1 %vm2336_vm12, %v2328_v40 }
 0x395   : > { %16632 = vst [vmem:[#allocation54_spill] sm:$0xff] %v11317_v23  ;;  %16633 = vst [vmem:[#allocation149_spill] sm:$0xff] %v11319_v32  ;;  %v2297_v21 = vsel %vm2266_vm11, %v2264_v31, %v11319_v32  ;;  %v2298_v26 = vsel %vm2266_vm11, %v2265_v5, %v11317_v23 }
 0x396   : > { %v8796_v47 = vpop.permute.xlu0 %8795  ;;  %v2880_v38 = vpop.permute.xlu1 %2879 }
 0x397   : > { %v11330_v39 = vunpack.i.h.bf16 %v8796_v47  ;;  %v11332_v13 = vunpack.i.l.bf16 %v8796_v47 }
 0x399   : > { %16638 = vst [vmem:[#allocation58_spill] sm:$0xff] %v11330_v39  ;;  %16639 = vst [vmem:[#allocation81_spill] sm:$0xff] %v11332_v13  ;;  %v2329_v43 = vsel %vm495_vm0, %v2297_v21, %v11332_v13  ;;  %v2330_v22 = vsel %vm495_vm0, %v2298_v26, %v11330_v39 }
 0x39a   : > { %8500 = vmatprep.mubr.msk.f32.mxu1 %vm2336_vm12, %v2329_v43  ;;  %v2882_v15 = vpop.permute.xlu0 %2881 }
 0x39b   : > { %8501 = vmatmul.mubr.msk.f32.gmra.mrb[46].mxu1 %vm2336_vm12, %v2330_v22 }
 0x3f8   : > { %v8457_v59 = vpop.f32.mrb[16].mxu1 }
 0x3f9   : > { %v2670_v33 = vmul.f32 %v8457_v59, %v11351_v48  ;;  %v2503_v36 = vpop.f32.mrb[17].mxu1  ;;  %v2886_v59 = vpop.permute.xlu0 %2885 }
 0x3fa   : > { %v2669_v40 = vmul.f32 %v11351_v48, %v2503_v36 }
 0x3fb   : > { %v11361_v20 = vadd.f32 %v11356_v60, %v2670_v33 }
 0x3fc   : > { %v11364_v35 = vadd.f32 %v11356_v60, %v2669_v40 }
 0x3fd   : > { %16640 = vst [vmem:[#allocation87_spill] sm:$0xff] %v11361_v20  ;;  %v2976_v8 = vadd.f32 %v2882_v15, %v11361_v20  ;;  %v2884_v15 = vpop.permute.xlu1 %2883 }
 0x3fe   : > { %16641 = vst [vmem:[#allocation177_spill] sm:$0xff] %v11364_v35  ;;  %v2975_v57 = vadd.f32 %v2880_v38, %v11364_v35 }
 0x3ff   : > { %v3040_v28 = vrot.slane %v2976_v8, 7 }
 0x400   : > { %v3039_v12 = vrot.slane %v2975_v57, 7  ;;  %v8460_v51 = vpop.f32.mrb[18].mxu1 }
 0x401   : > { %v2672_v6 = vmul.f32 %v8460_v51, %v11351_v48  ;;  %v2513_v4 = vpop.f32.mrb[19].mxu1  ;;  %v3150_v44 = vsel %vm960_vm1, %v3040_v28, 0.0 }
 0x402   : > { %v11371_v47 = vsel %vm960_vm1, 0.0, %v3039_v12  ;;  %v2671_v31 = vmul.f32 %v11351_v48, %v2513_v4  ;;  %v11375_v5 = vsel %vm960_vm1, %v3039_v12, %v3040_v28  ;;  %v3199_v21 = vrot.slane %v3150_v44, 1 }
 0x403   : > { %v11378_v26 = vadd.f32 %v11356_v60, %v2672_v6  ;;  %v3197_v43 = vrot.slane %v11375_v5, 1  ;;  %v3196_v22 = vrot.slane %v11371_v47, 1  ;;  %v3272_v36 = vrot.slane %v11375_v5, 2 }
 0x404   : > { %v11383_v33 = vadd.f32 %v11356_v60, %v2671_v31  ;;  %v3274_v40 = vrot.slane %v3150_v44, 2  ;;  %v3271_v28 = vrot.slane %v11371_v47, 2 }
 0x405   : > { %16642 = vst [vmem:[#allocation59_spill] sm:$0xff] %v11378_v26  ;;  %v2978_v38 = vadd.f32 %v2886_v59, %v11378_v26  ;;  %v11388_v8 = vsel %vm1126_vm3, %v3197_v43, %v3199_v21  ;;  %v11391_v57 = vsel %vm1126_vm3, %v3196_v22, %v3197_v43  ;;  %v2888_v26 = vpop.permute.xlu1 %2887 }
 0x406   : > { %16643 = vst [vmem:[#allocation80_spill] sm:$0xff] %v11383_v33  ;;  %v2977_v12 = vadd.f32 %v2884_v15, %v11383_v33  ;;  %3360 = vrot.lane.b32.xlu0 %v11388_v8, %s16048_s25  ;;  %3358 = vrot.lane.b32.xlu1 %v11391_v57, %s16048_s25  ;;  %v11401_v21 = vsel %vm1207_vm2, %v3272_v36, %v3274_v40 }
 0x407   : > { %v3043_v51 = vrot.slane %v2978_v38, 7  ;;  %v11404_v43 = vsel %vm1207_vm2, %v3271_v28, %v3272_v36 }
 0x408   : > { %v3042_v6 = vrot.slane %v2977_v12, 7  ;;  %v8463_v4 = vpop.f32.mrb[20].mxu1 }
 0x409   : > { %v2674_v44 = vmul.f32 %v8463_v4, %v11351_v48  ;;  %v2523_v31 = vpop.f32.mrb[21].mxu1  ;;  %v3151_v22 = vsel %vm960_vm1, %v3043_v51, 0.0  ;;  %v2892_v45 = vpop.permute.xlu1 %2891 }
 0x40a   : > { %v11408_v59 = vsel %vm960_vm1, %v3042_v6, %v3043_v51  ;;  %v11411_v15 = vsel %vm960_vm1, 0.0, %v3042_v6  ;;  %v2673_v38 = vmul.f32 %v11351_v48, %v2523_v31  ;;  %3450 = vrot.lane.b32.xlu0 %v11401_v21, %s16050_s23  ;;  %3448 = vrot.lane.b32.xlu1 %v11404_v43, %s16050_s23  ;;  %v3204_v40 = vrot.slane %v3151_v22, 1  ;;  %v2890_v51 = vpop.permute.xlu0 %2889 }
 0x40b   : > { %v11419_v36 = vadd.f32 %v11356_v60, %v2674_v44  ;;  %v3202_v28 = vrot.slane %v11408_v59, 1  ;;  %v3201_v12 = vrot.slane %v11411_v15, 1  ;;  %v3277_v4 = vrot.slane %v11408_v59, 2 }
 0x40c   : > { %v11424_v6 = vadd.f32 %v11356_v60, %v2673_v38  ;;  %v3279_v31 = vrot.slane %v3151_v22, 2  ;;  %v3276_v20 = vrot.slane %v11411_v15, 2 }
 0x40d   : > { %16644 = vst [vmem:[#allocation67_spill] sm:$0xff] %v11419_v36  ;;  %v2980_v33 = vadd.f32 %v2890_v51, %v11419_v36  ;;  %v11429_v35 = vsel %vm1126_vm3, %v3202_v28, %v3204_v40  ;;  %v11432_v44 = vsel %vm1126_vm3, %v3201_v12, %v3202_v28  ;;  %v2896_v25 = vpop.permute.xlu1 %2895 }
 0x40e   : > { %16645 = vst [vmem:[#allocation20_spill] sm:$0xff] %v11424_v6  ;;  %v2979_v39 = vadd.f32 %v2888_v26, %v11424_v6  ;;  %3364 = vrot.lane.b32.xlu0 %v11429_v35, %s16048_s25  ;;  %3362 = vrot.lane.b32.xlu1 %v11432_v44, %s16048_s25  ;;  %v11442_v36 = vsel %vm1207_vm2, %v3277_v4, %v3279_v31  ;;  %v2894_v31 = vpop.permute.xlu0 %2893 }
 0x40f   : > { %v3046_v22 = vrot.slane %v2980_v33, 7  ;;  %v11445_v28 = vsel %vm1207_vm2, %v3276_v20, %v3277_v4 }
 0x410   : > { %v3045_v38 = vrot.slane %v2979_v39, 7  ;;  %v8466_v23 = vpop.f32.mrb[22].mxu1 }
 0x411   : > { %v2676_v51 = vmul.f32 %v8466_v23, %v11351_v48  ;;  %v2533_v40 = vpop.f32.mrb[23].mxu1  ;;  %v3152_v26 = vsel %vm960_vm1, %v3046_v22, 0.0  ;;  %v2900_v50 = vpop.permute.xlu1 %2899 }
 0x412   : > { %v11449_v12 = vsel %vm960_vm1, %v3045_v38, %v3046_v22  ;;  %v11452_v6 = vsel %vm960_vm1, 0.0, %v3045_v38  ;;  %v2675_v39 = vmul.f32 %v11351_v48, %v2533_v40  ;;  %3454 = vrot.lane.b32.xlu0 %v11442_v36, %s16050_s23  ;;  %3452 = vrot.lane.b32.xlu1 %v11445_v28, %s16050_s23  ;;  %v3209_v23 = vrot.slane %v3152_v26, 1 }
 0x413   : > { %v11460_v20 = vadd.f32 %v11356_v60, %v2676_v51  ;;  %v3207_v33 = vrot.slane %v11449_v12, 1  ;;  %v3206_v4 = vrot.slane %v11452_v6, 1  ;;  %v3282_v38 = vrot.slane %v11449_v12, 2 }
 0x414   : > { %v11465_v22 = vadd.f32 %v11356_v60, %v2675_v39  ;;  %v3284_v40 = vrot.slane %v3152_v26, 2  ;;  %v3281_v24 = vrot.slane %v11452_v6, 2 }
 0x415   : > { %16646 = vst [vmem:[#allocation86_spill] sm:$0xff] %v11460_v20  ;;  %v2982_v13 = vadd.f32 %v2894_v31, %v11460_v20  ;;  %v11470_v32 = vsel %vm1126_vm3, %v3207_v33, %v3209_v23  ;;  %v11473_v51 = vsel %vm1126_vm3, %v3206_v4, %v3207_v33  ;;  %v2904_v34 = vpop.permute.xlu1 %2903 }
 0x416   : > { %16647 = vst [vmem:[#allocation15_spill] sm:$0xff] %v11465_v22  ;;  %v2981_v16 = vadd.f32 %v2892_v45, %v11465_v22  ;;  %3368 = vrot.lane.b32.xlu0 %v11470_v32, %s16048_s25  ;;  %3366 = vrot.lane.b32.xlu1 %v11473_v51, %s16048_s25  ;;  %v11483_v20 = vsel %vm1207_vm2, %v3282_v38, %v3284_v40  ;;  %v2898_v40 = vpop.permute.xlu0 %2897 }
 0x417   : > { %v3049_v26 = vrot.slane %v2982_v13, 7  ;;  %v11486_v33 = vsel %vm1207_vm2, %v3281_v24, %v3282_v38 }
 0x418   : > { %v3048_v39 = vrot.slane %v2981_v16, 7  ;;  %v8469_v11 = vpop.f32.mrb[24].mxu1 }
 0x419   : > { %v2678_v31 = vmul.f32 %v8469_v11, %v11351_v48  ;;  %v2543_v23 = vpop.f32.mrb[25].mxu1  ;;  %v3153_v45 = vsel %vm960_vm1, %v3049_v26, 0.0 }
 0x41a   : > { %v11490_v4 = vsel %vm960_vm1, %v3048_v39, %v3049_v26  ;;  %v11493_v22 = vsel %vm960_vm1, 0.0, %v3048_v39  ;;  %v2677_v16 = vmul.f32 %v11351_v48, %v2543_v23  ;;  %3458 = vrot.lane.b32.xlu0 %v11483_v20, %s16050_s23  ;;  %3456 = vrot.lane.b32.xlu1 %v11486_v33, %s16050_s23  ;;  %v3214_v11 = vrot.slane %v3153_v45, 1 }
 0x41b   : > { %v11501_v24 = vadd.f32 %v11356_v60, %v2678_v31  ;;  %v3212_v13 = vrot.slane %v11490_v4, 1  ;;  %v3211_v38 = vrot.slane %v11493_v22, 1  ;;  %v3287_v39 = vrot.slane %v11490_v4, 2 }
 0x41c   : > { %v11506_v26 = vadd.f32 %v11356_v60, %v2677_v16  ;;  %v3289_v23 = vrot.slane %v3153_v45, 2  ;;  %v3286_v30 = vrot.slane %v11493_v22, 2 }
 0x41d   : > { %16648 = vst [vmem:[#allocation73_spill] sm:$0xff] %v11501_v24  ;;  %v2984_v61 = vadd.f32 %v2898_v40, %v11501_v24  ;;  %v11511_v46 = vsel %vm1126_vm3, %v3212_v13, %v3214_v11  ;;  %v11514_v31 = vsel %vm1126_vm3, %v3211_v38, %v3212_v13 }
 0x41e   : > { %16649 = vst [vmem:[#allocation88_spill] sm:$0xff] %v11506_v26  ;;  %v2983_v37 = vadd.f32 %v2896_v25, %v11506_v26  ;;  %3372 = vrot.lane.b32.xlu0 %v11511_v46, %s16048_s25  ;;  %3370 = vrot.lane.b32.xlu1 %v11514_v31, %s16048_s25  ;;  %v11524_v24 = vsel %vm1207_vm2, %v3287_v39, %v3289_v23  ;;  %v2902_v23 = vpop.permute.xlu0 %2901 }
 0x41f   : > { %v3052_v45 = vrot.slane %v2984_v61, 7  ;;  %v11527_v13 = vsel %vm1207_vm2, %v3286_v30, %v3287_v39 }
 0x420   : > { %v3051_v16 = vrot.slane %v2983_v37, 7  ;;  %v8472_v27 = vpop.f32.mrb[26].mxu1 }
 0x421   : > { %v2680_v40 = vmul.f32 %v8472_v27, %v11351_v48  ;;  %v2553_v11 = vpop.f32.mrb[27].mxu1  ;;  %v3154_v25 = vsel %vm960_vm1, %v3052_v45, 0.0 }
 0x422   : > { %v11531_v38 = vsel %vm960_vm1, %v3051_v16, %v3052_v45  ;;  %v11534_v26 = vsel %vm960_vm1, 0.0, %v3051_v16  ;;  %v2679_v37 = vmul.f32 %v11351_v48, %v2553_v11  ;;  %3462 = vrot.lane.b32.xlu0 %v11524_v24, %s16050_s23  ;;  %3460 = vrot.lane.b32.xlu1 %v11527_v13, %s16050_s23  ;;  %v3219_v27 = vrot.slane %v3154_v25, 1 }
 0x423   : > { %v11542_v30 = vadd.f32 %v11356_v60, %v2680_v40  ;;  %v3217_v61 = vrot.slane %v11531_v38, 1  ;;  %v3216_v39 = vrot.slane %v11534_v26, 1  ;;  %v3292_v16 = vrot.slane %v11531_v38, 2 }
 0x424   : > { %v11547_v45 = vadd.f32 %v11356_v60, %v2679_v37  ;;  %v3294_v11 = vrot.slane %v3154_v25, 2  ;;  %v3291_v2 = vrot.slane %v11534_v26, 2 }
 0x425   : > { %16650 = vst [vmem:[#allocation110_spill] sm:$0xff] %v11542_v30  ;;  %v2986_v9 = vadd.f32 %v2902_v23, %v11542_v30  ;;  %v11552_v56 = vsel %vm1126_vm3, %v3217_v61, %v3219_v27  ;;  %v11555_v40 = vsel %vm1126_vm3, %v3216_v39, %v3217_v61 }
 0x426   : > { %16651 = vst [vmem:[#allocation66_spill] sm:$0xff] %v11547_v45  ;;  %v2985_v63 = vadd.f32 %v2900_v50, %v11547_v45  ;;  %3376 = vrot.lane.b32.xlu0 %v11552_v56, %s16048_s25  ;;  %3374 = vrot.lane.b32.xlu1 %v11555_v40, %s16048_s25  ;;  %v11565_v30 = vsel %vm1207_vm2, %v3292_v16, %v3294_v11  ;;  %v2906_v11 = vpop.permute.xlu0 %2905 }
 0x427   : > { %v3055_v25 = vrot.slane %v2986_v9, 7  ;;  %v11568_v61 = vsel %vm1207_vm2, %v3291_v2, %v3292_v16 }
 0x428   : > { %v3054_v37 = vrot.slane %v2985_v63, 7  ;;  %v8475_v53 = vpop.f32.mrb[28].mxu1 }
 0x429   : > { %v2682_v23 = vmul.f32 %v8475_v53, %v11351_v48  ;;  %v2563_v27 = vpop.f32.mrb[29].mxu1  ;;  %v3155_v50 = vsel %vm960_vm1, %v3055_v25, 0.0 }
 0x42a   : > { %v11572_v39 = vsel %vm960_vm1, %v3054_v37, %v3055_v25  ;;  %v11575_v45 = vsel %vm960_vm1, 0.0, %v3054_v37  ;;  %v2681_v63 = vmul.f32 %v11351_v48, %v2563_v27  ;;  %3466 = vrot.lane.b32.xlu0 %v11565_v30, %s16050_s23  ;;  %3464 = vrot.lane.b32.xlu1 %v11568_v61, %s16050_s23  ;;  %v3224_v53 = vrot.slane %v3155_v50, 1 }
 0x42b   : > { %16652 = vst [vmem:[#allocation21_spill] sm:$0xff] %v11572_v39  ;;  %16653 = vst [vmem:[#allocation116_spill] sm:$0xff] %v11575_v45  ;;  %v11583_v2 = vadd.f32 %v11356_v60, %v2682_v23  ;;  %v3222_v9 = vrot.slane %v11572_v39, 1  ;;  %v3221_v16 = vrot.slane %v11575_v45, 1  ;;  %v3297_v37 = vrot.slane %v11572_v39, 2 }
 0x42c   : > { %v11588_v25 = vadd.f32 %v11356_v60, %v2681_v63  ;;  %v3299_v27 = vrot.slane %v3155_v50, 2  ;;  %v3296_v18 = vrot.slane %v11575_v45, 2 }
 0x42d   : > { %16654 = vst [vmem:[#allocation14_spill] sm:$0xff] %v11583_v2  ;;  %v2988_v29 = vadd.f32 %v2906_v11, %v11583_v2  ;;  %v11593_v17 = vsel %vm1126_vm3, %v3222_v9, %v3224_v53  ;;  %v11596_v23 = vsel %vm1126_vm3, %v3221_v16, %v3222_v9 }
 0x42e   : > { %16655 = vst [vmem:[#allocation72_spill] sm:$0xff] %v11588_v25  ;;  %v2987_v58 = vadd.f32 %v2904_v34, %v11588_v25  ;;  %3380 = vrot.lane.b32.xlu0 %v11593_v17, %s16048_s25  ;;  %3378 = vrot.lane.b32.xlu1 %v11596_v23, %s16048_s25  ;;  %v11605_v50 = vsel %vm1207_vm2, %v3297_v37, %v3299_v27 }
 0x42f   : > { %v3058_v63 = vrot.slane %v2988_v29, 7  ;;  %v11609_v16 = vsel %vm1207_vm2, %v3296_v18, %v3297_v37 }
 0x430   : > { %v3057_v11 = vrot.slane %v2987_v58, 7  ;;  %v8478_v53 = vpop.f32.mrb[30].mxu1 }
 0x431   : > { %v2684_v2 = vmul.f32 %v8478_v53, %v11351_v48  ;;  %v2573_v9 = vpop.f32.mrb[31].mxu1  ;;  %v11612_v34 = vsel %vm960_vm1, %v3058_v63, 0.0  ;;  %v2910_v53 = vpop.permute.xlu0 %2909 }
 0x432   : > { %v11615_v25 = vsel %vm960_vm1, %v3057_v11, %v3058_v63  ;;  %v11618_v10 = vsel %vm960_vm1, 0.0, %v3057_v11  ;;  %v2683_v27 = vmul.f32 %v11351_v48, %v2573_v9  ;;  %3468 = vrot.lane.b32.xlu1 %v11609_v16, %s16050_s23  ;;  %v3229_v58 = vrot.slane %v11612_v34, 1  ;;  %v2908_v11 = vpop.permute.xlu1 %2907 }
 0x433   : > { %16656 = vst [vmem:[#allocation89_spill] sm:$0xff] %v11618_v10  ;;  %v11625_v29 = vadd.f32 %v11356_v60, %v2684_v2  ;;  %v3227_v18 = vrot.slane %v11615_v25, 1  ;;  %v3226_v37 = vrot.slane %v11618_v10, 1 }
 0x434   : > { %v11630_v63 = vadd.f32 %v11356_v60, %v2683_v27 }
 0x435   : > { %16657 = vst [vmem:[#allocation111_spill] sm:$0xff] %v11625_v29  ;;  %v2990_v0 = vadd.f32 %v2910_v53, %v11625_v29  ;;  %v11634_v9 = vsel %vm1126_vm3, %v3227_v18, %v3229_v58  ;;  %v11637_v49 = vsel %vm1126_vm3, %v3226_v37, %v3227_v18 }
 0x436   : > { %16658 = vst [vmem:[#allocation97_spill] sm:$0xff] %v11630_v63  ;;  %v2989_v2 = vadd.f32 %v2908_v11, %v11630_v63  ;;  %3384 = vrot.lane.b32.xlu0 %v11634_v9, %s16048_s25  ;;  %3382 = vrot.lane.b32.xlu1 %v11637_v49, %s16048_s25  ;;  %v2912_v54 = vpop.permute.xlu1 %2911 }
 0x437   : > { %v3061_v42 = vrot.slane %v2990_v0, 7  ;;  %v8481_v27 = vpop.f32.mrb[32].mxu1 }
 0x438   : > { %v3060_v19 = vrot.slane %v2989_v2, 7  ;;  %v2686_v55 = vmul.f32 %v8481_v27, %v11351_v48  ;;  %v2583_v53 = vpop.f32.mrb[33].mxu1  ;;  %v2914_v2 = vpop.permute.xlu0 %2913 }
 0x439   : > { %v2685_v58 = vmul.f32 %v11351_v48, %v2583_v53  ;;  %v11647_v29 = vsel %vm960_vm1, %v3061_v42, 0.0 }
 0x43a   : > { %v11650_v18 = vsel %vm960_vm1, %v3060_v19, %v3061_v42  ;;  %v11653_v37 = vsel %vm960_vm1, 0.0, %v3060_v19  ;;  %v11656_v11 = vadd.f32 %v11356_v60, %v2686_v55  ;;  %v3234_v0 = vrot.slane %v11647_v29, 1 }
 0x43b   : > { %v11660_v27 = vadd.f32 %v11356_v60, %v2685_v58  ;;  %v3232_v53 = vrot.slane %v11650_v18, 1  ;;  %v3231_v63 = vrot.slane %v11653_v37, 1 }
 0x43c   : > { %16659 = vst [vmem:[#allocation117_spill] sm:$0xff] %v11656_v11  ;;  %v2992_v42 = vadd.f32 %v2914_v2, %v11656_v11 }
 0x43d   : > { %16660 = vst [vmem:[#allocation102_spill] sm:$0xff] %v11660_v27  ;;  %v2991_v41 = vadd.f32 %v2912_v54, %v11660_v27  ;;  %v11667_v19 = vsel %vm1126_vm3, %v3232_v53, %v3234_v0  ;;  %v11670_v55 = vsel %vm1126_vm3, %v3231_v63, %v3232_v53  ;;  %v2918_v27 = vpop.permute.xlu0 %2917 }
 0x43e   : > { %v3064_v14 = vrot.slane %v2992_v42, 7  ;;  %3388 = vrot.lane.b32.xlu0 %v11667_v19, %s16048_s25  ;;  %3386 = vrot.lane.b32.xlu1 %v11670_v55, %s16048_s25 }
 0x43f   : > { %v3063_v58 = vrot.slane %v2991_v41, 7  ;;  %v8484_v1 = vpop.f32.mrb[34].mxu1 }
 0x440   : > { %v2688_v7 = vmul.f32 %v8484_v1, %v11351_v48  ;;  %v2593_v2 = vpop.f32.mrb[35].mxu1  ;;  %v11678_v54 = vsel %vm960_vm1, %v3064_v14, 0.0 }
 0x441   : > { %16661 = vst [vmem:[#allocation118_spill] sm:$0xff] %v11678_v54  ;;  %v11681_v0 = vsel %vm960_vm1, %v3063_v58, %v3064_v14  ;;  %v11684_v63 = vsel %vm960_vm1, 0.0, %v3063_v58  ;;  %v2687_v53 = vmul.f32 %v11351_v48, %v2593_v2  ;;  %v3239_v42 = vrot.slane %v11678_v54, 1  ;;  %v2916_v14 = vpop.permute.xlu1 %2915 }
 0x442   : > { %16662 = vst [vmem:[#allocation139_spill] sm:$0xff] %v11681_v0  ;;  %16663 = vst [vmem:[#allocation96_spill] sm:$0xff] %v11684_v63  ;;  %v11689_v11 = vadd.f32 %v11356_v60, %v2688_v7  ;;  %v3237_v41 = vrot.slane %v11681_v0, 1  ;;  %v3236_v1 = vrot.slane %v11684_v63, 1 }
 0x443   : > { %v11694_v3 = vadd.f32 %v11356_v60, %v2687_v53 }
 0x444   : > { %16664 = vst [vmem:[#allocation145_spill] sm:$0xff] %v11689_v11  ;;  %v2994_v62 = vadd.f32 %v2918_v27, %v11689_v11  ;;  %v11698_v58 = vsel %vm1126_vm3, %v3237_v41, %v3239_v42  ;;  %v11701_v2 = vsel %vm1126_vm3, %v3236_v1, %v3237_v41 }
 0x445   : > { %16665 = vst [vmem:[#allocation103_spill] sm:$0xff] %v11694_v3  ;;  %16666 = vst [vmem:[#allocation119_spill] sm:$0xff] %v11698_v58  ;;  %v2993_v7 = vadd.f32 %v2916_v14, %v11694_v3  ;;  %3392 = vrot.lane.b32.xlu0 %v11698_v58, %s16048_s25  ;;  %3390 = vrot.lane.b32.xlu1 %v11701_v2, %s16048_s25  ;;  %v2922_v3 = vpop.permute.xlu0 %2921 }
 0x446   : > { %16667 = vst [vmem:[#allocation140_spill] sm:$0xff] %v11701_v2  ;;  %v3067_v54 = vrot.slane %v2994_v62, 7 }
 0x447   : > { %v3066_v53 = vrot.slane %v2993_v7, 7  ;;  %v8487_v0 = vpop.f32.mrb[36].mxu1 }
 0x448   : > { %v2690_v63 = vmul.f32 %v8487_v0, %v11351_v48  ;;  %v2603_v27 = vpop.f32.mrb[37].mxu1  ;;  %v11710_v42 = vsel %vm960_vm1, %v3067_v54, 0.0 }
 0x449   : > { %16668 = vst [vmem:[#allocation127_spill] sm:$0xff] %v11710_v42  ;;  %v11713_v41 = vsel %vm960_vm1, %v3066_v53, %v3067_v54  ;;  %v11716_v1 = vsel %vm960_vm1, 0.0, %v3066_v53  ;;  %v2689_v14 = vmul.f32 %v11351_v48, %v2603_v27  ;;  %v3244_v11 = vrot.slane %v11710_v42, 1  ;;  %v2920_v54 = vpop.permute.xlu1 %2919 }
 0x44a   : > { %16669 = vst [vmem:[#allocation146_spill] sm:$0xff] %v11713_v41  ;;  %16670 = vst [vmem:[#allocation132_spill] sm:$0xff] %v11716_v1  ;;  %v11721_v62 = vadd.f32 %v11356_v60, %v2690_v63  ;;  %v3242_v7 = vrot.slane %v11713_v41, 1  ;;  %v3241_v0 = vrot.slane %v11716_v1, 1 }
 0x44b   : > { %v11726_v58 = vadd.f32 %v11356_v60, %v2689_v14 }
 0x44c   : > { %16671 = vst [vmem:[#allocation147_spill] sm:$0xff] %v11721_v62  ;;  %v2996_v2 = vadd.f32 %v2922_v3, %v11721_v62  ;;  %v11730_v53 = vsel %vm1126_vm3, %v3242_v7, %v3244_v11  ;;  %v11733_v27 = vsel %vm1126_vm3, %v3241_v0, %v3242_v7 }
 0x44d   : > { %16672 = vst [vmem:[#allocation166_spill] sm:$0xff] %v11726_v58  ;;  %16673 = vst [vmem:[#allocation126_spill] sm:$0xff] %v11730_v53  ;;  %v2995_v63 = vadd.f32 %v2920_v54, %v11726_v58  ;;  %3396 = vrot.lane.b32.xlu0 %v11730_v53, %s16048_s25  ;;  %3394 = vrot.lane.b32.xlu1 %v11733_v27, %s16048_s25  ;;  %v2926_v58 = vpop.permute.xlu0 %2925 }
 0x44e   : > { %16674 = vst [vmem:[#allocation171_spill] sm:$0xff] %v11733_v27  ;;  %v3070_v42 = vrot.slane %v2996_v2, 7 }
 0x44f   : > { %v3069_v14 = vrot.slane %v2995_v63, 7  ;;  %v8490_v41 = vpop.f32.mrb[38].mxu1 }
 0x450   : > { %v2692_v1 = vmul.f32 %v8490_v41, %v11351_v48  ;;  %v2613_v3 = vpop.f32.mrb[39].mxu1  ;;  %v11742_v11 = vsel %vm960_vm1, %v3070_v42, 0.0 }
 0x451   : > { %16675 = vst [vmem:[#allocation133_spill] sm:$0xff] %v11742_v11  ;;  %v11745_v7 = vsel %vm960_vm1, %v3069_v14, %v3070_v42  ;;  %v11748_v0 = vsel %vm960_vm1, 0.0, %v3069_v14  ;;  %v2691_v54 = vmul.f32 %v11351_v48, %v2613_v3  ;;  %v3249_v62 = vrot.slane %v11742_v11, 1  ;;  %v2924_v42 = vpop.permute.xlu1 %2923 }
 0x452   : > { %16676 = vst [vmem:[#allocation148_spill] sm:$0xff] %v11745_v7  ;;  %16677 = vst [vmem:[#allocation167_spill] sm:$0xff] %v11748_v0  ;;  %v11753_v2 = vadd.f32 %v11356_v60, %v2692_v1  ;;  %v3247_v63 = vrot.slane %v11745_v7, 1  ;;  %v3246_v41 = vrot.slane %v11748_v0, 1 }
 0x453   : > { %v11758_v53 = vadd.f32 %v11356_v60, %v2691_v54 }
 0x454   : > { %16678 = vst [vmem:[#allocation154_spill] sm:$0xff] %v11753_v2  ;;  %v2998_v27 = vadd.f32 %v2926_v58, %v11753_v2  ;;  %v11762_v14 = vsel %vm1126_vm3, %v3247_v63, %v3249_v62  ;;  %v11765_v3 = vsel %vm1126_vm3, %v3246_v41, %v3247_v63 }
 0x455   : > { %16679 = vst [vmem:[#allocation172_spill] sm:$0xff] %v11758_v53  ;;  %16680 = vst [vmem:[#allocation161_spill] sm:$0xff] %v11762_v14  ;;  %v2997_v1 = vadd.f32 %v2924_v42, %v11758_v53  ;;  %3400 = vrot.lane.b32.xlu0 %v11762_v14, %s16048_s25  ;;  %3398 = vrot.lane.b32.xlu1 %v11765_v3, %s16048_s25  ;;  %v2930_v53 = vpop.permute.xlu0 %2929 }
 0x456   : > { %16681 = vst [vmem:[#allocation173_spill] sm:$0xff] %v11765_v3  ;;  %v3073_v11 = vrot.slane %v2998_v27, 7 }
 0x457   : > { %v3072_v54 = vrot.slane %v2997_v1, 7  ;;  %v8493_v7 = vpop.f32.mrb[40].mxu1 }
 0x458   : > { %v2694_v0 = vmul.f32 %v8493_v7, %v11351_v48  ;;  %v2623_v58 = vpop.f32.mrb[41].mxu1  ;;  %v11774_v62 = vsel %vm960_vm1, %v3073_v11, 0.0 }
 0x459   : > { %16682 = vst [vmem:[#allocation186_spill] sm:$0xff] %v11774_v62  ;;  %v11777_v63 = vsel %vm960_vm1, %v3072_v54, %v3073_v11  ;;  %v11780_v41 = vsel %vm960_vm1, 0.0, %v3072_v54  ;;  %v2693_v42 = vmul.f32 %v11351_v48, %v2623_v58  ;;  %v3254_v2 = vrot.slane %v11774_v62, 1  ;;  %v2928_v11 = vpop.permute.xlu1 %2927 }
 0x45a   : > { %16683 = vst [vmem:[#allocation153_spill] sm:$0xff] %v11777_v63  ;;  %16684 = vst [vmem:[#allocation190_spill] sm:$0xff] %v11780_v41  ;;  %v11785_v27 = vadd.f32 %v11356_v60, %v2694_v0  ;;  %v3252_v1 = vrot.slane %v11777_v63, 1  ;;  %v3251_v7 = vrot.slane %v11780_v41, 1 }
 0x45b   : > { %v11790_v14 = vadd.f32 %v11356_v60, %v2693_v42 }
 0x45c   : > { %16685 = vst [vmem:[#allocation162_spill] sm:$0xff] %v11785_v27  ;;  %v3000_v3 = vadd.f32 %v2930_v53, %v11785_v27  ;;  %v11794_v54 = vsel %vm1126_vm3, %v3252_v1, %v3254_v2  ;;  %v11797_v58 = vsel %vm1126_vm3, %v3251_v7, %v3252_v1 }
 0x45d   : > { %16686 = vst [vmem:[#allocation174_spill] sm:$0xff] %v11790_v14  ;;  %16687 = vst [vmem:[#allocation187_spill] sm:$0xff] %v11794_v54  ;;  %v2999_v0 = vadd.f32 %v2928_v11, %v11790_v14  ;;  %3404 = vrot.lane.b32.xlu0 %v11794_v54, %s16048_s25  ;;  %3402 = vrot.lane.b32.xlu1 %v11797_v58, %s16048_s25  ;;  %v2934_v14 = vpop.permute.xlu0 %2933 }
 0x45e   : > { %16688 = vst [vmem:[#allocation179_spill] sm:$0xff] %v11797_v58  ;;  %v3076_v62 = vrot.slane %v3000_v3, 7 }
 0x45f   : > { %v3075_v42 = vrot.slane %v2999_v0, 7  ;;  %v8496_v63 = vpop.f32.mrb[42].mxu1 }
 0x460   : > { %v2696_v41 = vmul.f32 %v8496_v63, %v11351_v48  ;;  %v2633_v53 = vpop.f32.mrb[43].mxu1  ;;  %v11806_v2 = vsel %vm960_vm1, %v3076_v62, 0.0 }
 0x461   : > { %16689 = vst [vmem:[#allocation191_spill] sm:$0xff] %v11806_v2  ;;  %v11809_v1 = vsel %vm960_vm1, %v3075_v42, %v3076_v62  ;;  %v11812_v7 = vsel %vm960_vm1, 0.0, %v3075_v42  ;;  %v2695_v11 = vmul.f32 %v11351_v48, %v2633_v53  ;;  %v3259_v27 = vrot.slane %v11806_v2, 1  ;;  %v2932_v62 = vpop.permute.xlu1 %2931 }
 0x462   : > { %16690 = vst [vmem:[#allocation182_spill] sm:$0xff] %v11809_v1  ;;  %16691 = vst [vmem:[#allocation192_spill] sm:$0xff] %v11812_v7  ;;  %v11817_v3 = vadd.f32 %v11356_v60, %v2696_v41  ;;  %v3257_v0 = vrot.slane %v11809_v1, 1  ;;  %v3256_v63 = vrot.slane %v11812_v7, 1 }
 0x463   : > { %v11822_v54 = vadd.f32 %v11356_v60, %v2695_v11 }
 0x464   : > { %16692 = vst [vmem:[#allocation178_spill] sm:$0xff] %v11817_v3  ;;  %v3002_v58 = vadd.f32 %v2934_v14, %v11817_v3  ;;  %v11826_v42 = vsel %vm1126_vm3, %v3257_v0, %v3259_v27  ;;  %v11829_v53 = vsel %vm1126_vm3, %v3256_v63, %v3257_v0 }
 0x465   : > { %16693 = vst [vmem:[#allocation183_spill] sm:$0xff] %v11822_v54  ;;  %16694 = vst [vmem:[#allocation193_spill] sm:$0xff] %v11826_v42  ;;  %v3001_v41 = vadd.f32 %v2932_v62, %v11822_v54  ;;  %3408 = vrot.lane.b32.xlu0 %v11826_v42, %s16048_s25  ;;  %3406 = vrot.lane.b32.xlu1 %v11829_v53, %s16048_s25  ;;  %v2938_v54 = vpop.permute.xlu0 %2937 }
 0x466   : > { %16695 = vst [vmem:[#allocation197_spill] sm:$0xff] %v11829_v53  ;;  %v3079_v2 = vrot.slane %v3002_v58, 7 }
 0x467   : > { %v3078_v11 = vrot.slane %v3001_v41, 7  ;;  %v8499_v1 = vpop.f32.mrb[44].mxu1 }
 0x468   : > { %v2698_v7 = vmul.f32 %v8499_v1, %v11351_v48  ;;  %v2643_v14 = vpop.f32.mrb[45].mxu1  ;;  %v11838_v27 = vsel %vm960_vm1, %v3079_v2, 0.0 }
 0x469   : > { %16696 = vst [vmem:[#allocation200_spill] sm:$0xff] %v11838_v27  ;;  %v11841_v0 = vsel %vm960_vm1, %v3078_v11, %v3079_v2  ;;  %v11844_v63 = vsel %vm960_vm1, 0.0, %v3078_v11  ;;  %v2697_v62 = vmul.f32 %v11351_v48, %v2643_v14  ;;  %v3264_v3 = vrot.slane %v11838_v27, 1  ;;  %v2936_v2 = vpop.permute.xlu1 %2935 }
 0x46a   : > { %16697 = vst [vmem:[#allocation206_spill] sm:$0xff] %v11841_v0  ;;  %16698 = vst [vmem:[#allocation196_spill] sm:$0xff] %v11844_v63  ;;  %v11849_v58 = vadd.f32 %v11356_v60, %v2698_v7  ;;  %v3262_v41 = vrot.slane %v11841_v0, 1  ;;  %v3261_v1 = vrot.slane %v11844_v63, 1 }
 0x46b   : > { %v11854_v42 = vadd.f32 %v11356_v60, %v2697_v62 }
 0x46c   : > { %16699 = vst [vmem:[#allocation201_spill] sm:$0xff] %v11849_v58  ;;  %v3004_v53 = vadd.f32 %v2938_v54, %v11849_v58  ;;  %v11858_v11 = vsel %vm1126_vm3, %v3262_v41, %v3264_v3  ;;  %v11861_v48 = vsel %vm1126_vm3, %v3261_v1, %v3262_v41 }
 0x46d   : > { %16700 = vst [vmem:[#allocation207_spill] sm:$0xff] %v11854_v42  ;;  %16701 = vst [vmem:[#allocation138_spill] sm:$0xff] %v11858_v11  ;;  %v3003_v7 = vadd.f32 %v2936_v2, %v11854_v42  ;;  %3412 = vrot.lane.b32.xlu0 %v11858_v11, %s16048_s25  ;;  %3410 = vrot.lane.b32.xlu1 %v11861_v48, %s16048_s25  ;;  %v3301_v42 = vrot.slane %v11618_v10, 2 }
 0x46e   : > { %16702 = vst [vmem:[#allocation212_spill] sm:$0xff] %v11861_v48  ;;  %v3082_v14 = vrot.slane %v3004_v53, 7  ;;  %v11868_v60 = vpop.f32.mrb[46].mxu1 }
 0x46f   : > { %16703 = vst [vmem:[#allocation13_spill] sm:$0xff] %v11868_v60  ;;  %v3081_v62 = vrot.slane %v3003_v7, 7  ;;  %v11870_v27 = vpop.f32.mrb[47].mxu1 }
 0x470   : > { %16704 = vst [vmem:[#allocation217_spill] sm:$0xff] %v11870_v27  ;;  %v11873_v54 = vsel %vm960_vm1, %v3082_v14, 0.0 }
 0x471   : > { %16705 = vst [vmem:[#allocation33_spill] sm:$0xff] %v11873_v54  ;;  %v11876_v3 = vsel %vm960_vm1, %v3081_v62, %v3082_v14  ;;  %v11879_v41 = vsel %vm960_vm1, 0.0, %v3081_v62  ;;  %v3269_v1 = vrot.slane %v11873_v54, 1  ;;  %v3302_v14 = vrot.slane %v11615_v25, 2 }
 0x472   : > { %16706 = vst [vmem:[#allocation220_spill] sm:$0xff] %v11876_v3  ;;  %16707 = vst [vmem:[#allocation163_spill] sm:$0xff] %v11879_v41  ;;  %v3267_v2 = vrot.slane %v11876_v3, 1  ;;  %v3266_v53 = vrot.slane %v11879_v41, 1  ;;  %v3304_v54 = vrot.slane %v11612_v34, 2  ;;  %v3309_v34 = vrot.slane %v11647_v29, 2 }
 0x473   : > { %v11897_v62 = vsel %vm1207_vm2, %v3301_v42, %v3302_v14 }
 0x474   : > { %v11885_v58 = vsel %vm1126_vm3, %v3267_v2, %v3269_v1  ;;  %v11888_v7 = vsel %vm1126_vm3, %v3266_v53, %v3267_v2  ;;  %v3306_v1 = vrot.slane %v11653_v37, 2  ;;  %v3307_v2 = vrot.slane %v11650_v18, 2  ;;  %v11906_v53 = vpop.permute.xlu1 %2939 }
 0x475   : > { %16708 = vst [vmem:[#allocation62_spill] sm:$0xff] %v11885_v58  ;;  %16709 = vst [vmem:[#allocation37_spill] sm:$0xff] %v11888_v7  ;;  %3416 = vrot.lane.b32.xlu0 %v11885_v58, %s16048_s25  ;;  %3414 = vrot.lane.b32.xlu1 %v11888_v7, %s16048_s25  ;;  %v11909_v58 = vsel %vm1207_vm2, %v3302_v14, %v3304_v54  ;;  %v11928_v54 = vpop.permute.xlu0 %2941 }
 0x476   : > { %16710 = vst [vmem:[#allocation221_spill] sm:$0xff] %v11906_v53  ;;  %v11912_v42 = vsel %vm1207_vm2, %v3306_v1, %v3307_v2  ;;  %v11922_v27 = vsel %vm1207_vm2, %v3307_v2, %v3309_v34  ;;  %16711 = vst [vmem:[#allocation83_spill] sm:$0xff] %v11928_v54  ;;  %v8078_v1 = vld [vmem:[%s15782_s4 + $0x28] sm:$0xff]  ;;  %v8079_v2 = vld [vmem:[%s15782_s4 + $0x30] sm:$0xff] }
 0x477   : > { %v8687_v34 = vpack.c.bf16 %v8079_v2, %v8078_v1 }
 0x478   : > { %v11919_v60 = vpop.permute.xlu1 %3358 }
 0x479   : > { %3470 = vrot.lane.b32.xlu0 %v11605_v50, %s16050_s23  ;;  %3472 = vrot.lane.b32.xlu1 %v11897_v62, %s16050_s23  ;;  %v11936_v14 = vpop.permute.xlu0 %3360 }
 0x47a   : > { %8688 = vmatprep.subr.bf16.mxu0 %v8687_v34 }
 0x47b   : > { %8690 = vmatpush3.bf16.msra.mxu0 %v8687_v34 }
 0x47c   : > { %v11930_v29 = vpop.permute.xlu1 %3448 }
 0x47d   : > { %3474 = vrot.lane.b32.xlu0 %v11909_v58, %s16050_s23  ;;  %3476 = vrot.lane.b32.xlu1 %v11912_v42, %s16050_s23 }
 0x480   : > { %v11948_v54 = vpop.permute.xlu1 %3362 }
 0x481   : > { %3478 = vrot.lane.b32.xlu0 %v11922_v27, %s16050_s23  ;;  %3538 = vrot.lane.b32.xlu1 %v11371_v47, %s16075_s15  ;;  %s8963_s23 = smov 120  }
 0x484   : > { %v11962_v2 = vpop.permute.xlu1 %3452 }
 0x485   : > { %3540 = vrot.lane.b32.xlu0 %v11375_v5, %s16075_s15  ;;  %3634 = vrot.lane.b32.xlu1 %v11391_v57, %s16712_s27  ;;  %v11950_v57 = vpop.permute.xlu0 %3450 }
 0x488   : > { %v11979_v34 = vpop.permute.xlu1 %3366 }
 0x489   : > { %3636 = vrot.lane.b32.xlu0 %v11388_v8, %s16712_s27  ;;  %3730 = vrot.lane.b32.xlu1 %v11404_v43, %s16713_s22  ;;  %v8080_v8 = vld [vmem:[%s15782_s4 + $0x38] sm:$0xff]  ;;  %v8081_v43 = vld [vmem:[%s15782_s4 + $0x40] sm:$0xff]  ;;  %v11971_v53 = vpop.permute.xlu0 %3364 }
 0x48a   : > { %v8691_v1 = vpack.c.bf16 %v8081_v43, %v8080_v8 }
 0x48c   : > { %8692 = vmatprep.subr.bf16.mxu0 %v8691_v1  ;;  %v11987_v43 = vpop.permute.xlu1 %3456 }
 0x48d   : > { %3732 = vrot.lane.b32.xlu0 %v11401_v21, %s16713_s22  ;;  %3826 = vrot.lane.b32.xlu1 %v11411_v15, %s16073_s17  ;;  %v8082_v21 = vld [vmem:[%s15782_s4 + $0x48] sm:$0xf]  ;;  %v11981_v8 = vpop.permute.xlu0 %3454 }
 0x48e   : > { %8694 = vmatpush3.bf16.msra.mxu0 %v8691_v1 }
 0x48f   : > { %8511 = vmatprep.subr.msk.mxu0 %vm2433_vm4, %v8082_v21 }
 0x491   : > { %3542 = vrot.lane.b32.xlu0 %v11411_v15, %s16075_s15  ;;  %3828 = vrot.lane.b32.xlu1 %v11408_v59, %s16073_s17  ;;  %v11993_v1 = vpop.permute.xlu0 %3368 }
 0x492   : > { %8512 = vmatpush3.msk.msra.mxu0 %vm2433_vm4, %v8082_v21 }
 0x495   : > { %3916 = vrot.lane.b32.xlu0 %v11432_v44, %s16714_s19  ;;  %3544 = vrot.lane.b32.xlu1 %v11408_v59, %s16075_s15  ;;  %v12001_v21 = vpop.permute.xlu0 %3458 }
 0x499   : > { %3638 = vrot.lane.b32.xlu0 %v11432_v44, %s16712_s27  ;;  %3918 = vrot.lane.b32.xlu1 %v11429_v35, %s16714_s19  ;;  %v11999_v44 = vpop.permute.xlu1 %3370 }
 0x49d   : > { %4006 = vrot.lane.b32.xlu0 %v11445_v28, %s16715_s14  ;;  %3640 = vrot.lane.b32.xlu1 %v11429_v35, %s16712_s27  ;;  %v12007_v7 = vpop.permute.xlu1 %3460  ;;  %v12013_v35 = vpop.permute.xlu0 %3372 }
 0x4a1   : > { %3734 = vrot.lane.b32.xlu0 %v11445_v28, %s16713_s22  ;;  %4008 = vrot.lane.b32.xlu1 %v11442_v36, %s16715_s14  ;;  %v12021_v28 = vpop.permute.xlu0 %3462 }
 0x4a5   : > { %3736 = vrot.lane.b32.xlu0 %v11442_v36, %s16713_s22  ;;  %3830 = vrot.lane.b32.xlu1 %v11452_v6, %s16073_s17  ;;  %v12019_v36 = vpop.permute.xlu1 %3374  ;;  %v12033_v41 = vpop.permute.xlu0 %3376 }
 0x4a9   : > { %3546 = vrot.lane.b32.xlu0 %v11452_v6, %s16075_s15  ;;  %3832 = vrot.lane.b32.xlu1 %v11449_v12, %s16073_s17  ;;  %v12027_v3 = vpop.permute.xlu1 %3464  ;;  %v12041_v11 = vpop.permute.xlu0 %3466 }
 0x4ad   : > { %3920 = vrot.lane.b32.xlu0 %v11473_v51, %s16714_s19  ;;  %3548 = vrot.lane.b32.xlu1 %v11449_v12, %s16075_s15 }
 0x4b1   : > { %3642 = vrot.lane.b32.xlu0 %v11473_v51, %s16712_s27  ;;  %3922 = vrot.lane.b32.xlu1 %v11470_v32, %s16714_s19  ;;  %v12039_v51 = vpop.permute.xlu1 %3378 }
 0x4b5   : > { %4010 = vrot.lane.b32.xlu0 %v11486_v33, %s16715_s14  ;;  %3644 = vrot.lane.b32.xlu1 %v11470_v32, %s16712_s27  ;;  %v12047_v48 = vpop.permute.xlu1 %3468  ;;  %v12053_v32 = vpop.permute.xlu0 %3380 }
 0x4b6   : > { %16716 = vst [vmem:[#allocation63_spill] sm:$0xff] %v12047_v48  ;;  %16717 = vst [vmem:[#allocation45_spill] sm:$0xff] %v12053_v32 }
 0x4b9   : > { %3738 = vrot.lane.b32.xlu0 %v11486_v33, %s16713_s22  ;;  %4012 = vrot.lane.b32.xlu1 %v11483_v20, %s16715_s14  ;;  %v12061_v33 = vpop.permute.xlu1 %3382 }
 0x4ba   : > { %16719 = vst [vmem:[#allocation70_spill] sm:$0xff] %v12061_v33 }
 0x4bd   : > { %3740 = vrot.lane.b32.xlu0 %v11483_v20, %s16713_s22  ;;  %3834 = vrot.lane.b32.xlu1 %v11493_v22, %s16073_s17  ;;  %v12059_v20 = vpop.permute.xlu0 %3384  ;;  %v12069_v63 = vpop.permute.xlu1 %3386 }
 0x4be   : > { %16718 = vst [vmem:[#allocation82_spill] sm:$0xff] %v12059_v20  ;;  %16721 = vst [vmem:[#allocation44_spill] sm:$0xff] %v12069_v63 }
 0x4c1   : > { %3550 = vrot.lane.b32.xlu0 %v11493_v22, %s16075_s15  ;;  %3836 = vrot.lane.b32.xlu1 %v11490_v4, %s16073_s17  ;;  %v12067_v0 = vpop.permute.xlu0 %3388  ;;  %v12077_v20 = vpop.permute.xlu1 %3390 }
 0x4c2   : > { %16720 = vst [vmem:[#allocation22_spill] sm:$0xff] %v12067_v0  ;;  %16723 = vst [vmem:[#allocation92_spill] sm:$0xff] %v12077_v20 }
 0x4c5   : > { %3924 = vrot.lane.b32.xlu0 %v11514_v31, %s16714_s19  ;;  %3552 = vrot.lane.b32.xlu1 %v11490_v4, %s16075_s15  ;;  %v12075_v32 = vpop.permute.xlu0 %3392  ;;  %v12085_v0 = vpop.permute.xlu1 %3394 }
 0x4c6   : > { %16722 = vst [vmem:[#allocation77_spill] sm:$0xff] %v12075_v32  ;;  %16725 = vst [vmem:[#allocation71_spill] sm:$0xff] %v12085_v0 }
 0x4c9   : > { %3646 = vrot.lane.b32.xlu0 %v11514_v31, %s16712_s27  ;;  %3926 = vrot.lane.b32.xlu1 %v11511_v46, %s16714_s19  ;;  %v12083_v31 = vpop.permute.xlu0 %3396  ;;  %v12093_v32 = vpop.permute.xlu1 %3398 }
 0x4ca   : > { %16724 = vst [vmem:[#allocation112_spill] sm:$0xff] %v12083_v31  ;;  %16727 = vst [vmem:[#allocation48_spill] sm:$0xff] %v12093_v32 }
 0x4cd   : > { %4014 = vrot.lane.b32.xlu0 %v11527_v13, %s16715_s14  ;;  %3648 = vrot.lane.b32.xlu1 %v11511_v46, %s16712_s27  ;;  %v12091_v46 = vpop.permute.xlu0 %3400 }
 0x4ce   : > { %16726 = vst [vmem:[#allocation23_spill] sm:$0xff] %v12091_v46 }
 0x4cf   : > { %v12101_v31 = vpop.permute.xlu1 %3402 }
 0x4d0   : > { %16729 = vst [vmem:[#allocation93_spill] sm:$0xff] %v12101_v31 }
 0x4d1   : > { %3742 = vrot.lane.b32.xlu0 %v11527_v13, %s16713_s22  ;;  %4016 = vrot.lane.b32.xlu1 %v11524_v24, %s16715_s14  ;;  %v12099_v13 = vpop.permute.xlu0 %3404 }
 0x4d2   : > { %16728 = vst [vmem:[#allocation76_spill] sm:$0xff] %v12099_v13 }
 0x4d5   : > { %3744 = vrot.lane.b32.xlu0 %v11524_v24, %s16713_s22  ;;  %3838 = vrot.lane.b32.xlu1 %v11534_v26, %s16073_s17 }
 0x4d7   : > { %v12107_v24 = vpop.permute.xlu0 %3408  ;;  %v12109_v46 = vpop.permute.xlu1 %3406 }
 0x4d8   : > { %16730 = vst [vmem:[#allocation113_spill] sm:$0xff] %v12107_v24  ;;  %16731 = vst [vmem:[#allocation101_spill] sm:$0xff] %v12109_v46 }
 0x4d9   : > { %3554 = vrot.lane.b32.xlu0 %v11534_v26, %s16075_s15  ;;  %3840 = vrot.lane.b32.xlu1 %v11531_v38, %s16073_s17 }
 0x4dd   : > { %3928 = vrot.lane.b32.xlu0 %v11555_v40, %s16714_s19  ;;  %3556 = vrot.lane.b32.xlu1 %v11531_v38, %s16075_s15 }
 0x4df   : > { %v12115_v32 = vpop.permute.xlu0 %3412  ;;  %v12117_v13 = vpop.permute.xlu1 %3410 }
 0x4e0   : > { %16732 = vst [vmem:[#allocation30_spill] sm:$0xff] %v12115_v32  ;;  %16733 = vst [vmem:[#allocation49_spill] sm:$0xff] %v12117_v13 }
 0x4e1   : > { %3650 = vrot.lane.b32.xlu0 %v11555_v40, %s16712_s27  ;;  %3930 = vrot.lane.b32.xlu1 %v11552_v56, %s16714_s19 }
 0x4e5   : > { %4018 = vrot.lane.b32.xlu0 %v11568_v61, %s16715_s14  ;;  %3652 = vrot.lane.b32.xlu1 %v11552_v56, %s16712_s27 }
 0x4e7   : > { %v12123_v31 = vpop.permute.xlu0 %3416  ;;  %v12125_v24 = vpop.permute.xlu1 %3414 }
 0x4e8   : > { %16734 = vst [vmem:[#allocation106_spill] sm:$0xff] %v12123_v31  ;;  %16735 = vst [vmem:[#allocation24_spill] sm:$0xff] %v12125_v24 }
 0x4e9   : > { %3746 = vrot.lane.b32.xlu0 %v11568_v61, %s16713_s22  ;;  %4020 = vrot.lane.b32.xlu1 %v11565_v30, %s16715_s14 }
 0x4eb   : > { %v12131_v40 = vpop.permute.xlu0 %3470  ;;  %v12133_v32 = vpop.permute.xlu1 %3472 }
 0x4ec   : > { %16736 = vst [vmem:[#allocation122_spill] sm:$0xff] %v12131_v40  ;;  %16737 = vst [vmem:[#allocation143_spill] sm:$0xff] %v12133_v32 }
 0x4ed   : > { %3748 = vrot.lane.b32.xlu0 %v11565_v30, %s16713_s22  ;;  %3842 = vrot.lane.b32.xlu1 %v11575_v45, %s16073_s17 }
 0x4ef   : > { %v12139_v56 = vpop.permute.xlu0 %3474  ;;  %v12141_v31 = vpop.permute.xlu1 %3476 }
 0x4f0   : > { %16738 = vst [vmem:[#allocation100_spill] sm:$0xff] %v12139_v56  ;;  %16739 = vst [vmem:[#allocation31_spill] sm:$0xff] %v12141_v31 }
 0x4f1   : > { %3558 = vrot.lane.b32.xlu0 %v11575_v45, %s16075_s15  ;;  %3844 = vrot.lane.b32.xlu1 %v11572_v39, %s16073_s17 }
 0x4f3   : > { %v12147_v61 = vpop.permute.xlu0 %3478  ;;  %v3539_v24 = vpop.permute.xlu1 %3538 }
 0x4f4   : > { %16740 = vst [vmem:[#allocation61_spill] sm:$0xff] %v12147_v61 }
 0x4f5   : > { %3932 = vrot.lane.b32.xlu0 %v11596_v23, %s16714_s19  ;;  %3560 = vrot.lane.b32.xlu1 %v11572_v39, %s16075_s15 }
 0x4f7   : > { %v3541_v30 = vpop.permute.xlu0 %3540  ;;  %v3635_v13 = vpop.permute.xlu1 %3634 }
 0x4f8   : > { %v4157_v39 = vsel %vm2134_vm7, %v10753_v52, %v3541_v30 }
 0x4f9   : > { %3654 = vrot.lane.b32.xlu0 %v11596_v23, %s16712_s27  ;;  %3934 = vrot.lane.b32.xlu1 %v11593_v17, %s16714_s19 }
 0x4fb   : > { %v3637_v46 = vpop.permute.xlu0 %3636  ;;  %v3731_v0 = vpop.permute.xlu1 %3730 }
 0x4fc   : > { %v4189_v45 = vsel %vm2167_vm8, %v4157_v39, %v3637_v46 }
 0x4fd   : > { %4022 = vrot.lane.b32.xlu0 %v11609_v16, %s16715_s14  ;;  %3656 = vrot.lane.b32.xlu1 %v11593_v17, %s16712_s27  ;;  %v16741_v17 = vld [vmem:[#allocation125_spill] sm:$0xff] }
 0x4ff   : > { %v3733_v20 = vpop.permute.xlu0 %3732  ;;  %v3827_v61 = vpop.permute.xlu1 %3826 }
 0x501   : > { %3750 = vrot.lane.b32.xlu0 %v11609_v16, %s16713_s22  ;;  %4024 = vrot.lane.b32.xlu1 %v11605_v50, %s16715_s14  ;;  %v4156_v16 = vsel %vm2134_vm7, %v16741_v17, %v3539_v24 }
 0x502   : > { %v4188_v40 = vsel %vm2167_vm8, %v4156_v16, %v3635_v13 }
 0x503   : > { %v3543_v23 = vpop.permute.xlu0 %3542  ;;  %v3829_v31 = vpop.permute.xlu1 %3828 }
 0x505   : > { %3752 = vrot.lane.b32.xlu0 %v11605_v50, %s16713_s22  ;;  %3846 = vrot.lane.b32.xlu1 %v11618_v10, %s16073_s17  ;;  %v4220_v50 = vsel %vm2200_vm9, %v4188_v40, %v3731_v0  ;;  %v4221_v0 = vsel %vm2200_vm9, %v4189_v45, %v3733_v20 }
 0x506   : > { %v4253_v40 = vsel %vm2233_vm10, %v4221_v0, %v3829_v31  ;;  %v4096_v31 = vsel %vm2068_vm5, %v11371_v47, %v11919_v60 }
 0x507   : > { %v3917_v63 = vpop.permute.xlu0 %3916  ;;  %v3545_v56 = vpop.permute.xlu1 %3544 }
 0x509   : > { %3562 = vrot.lane.b32.xlu0 %v11618_v10, %s16075_s15  ;;  %3848 = vrot.lane.b32.xlu1 %v11615_v25, %s16073_s17  ;;  %v4252_v10 = vsel %vm2233_vm10, %v4220_v50, %v3827_v61  ;;  %v4097_v50 = vsel %vm2068_vm5, %v11375_v5, %v11936_v14 }
 0x50a   : > { %v4284_v48 = vsel %vm2266_vm11, %v4252_v10, %v3917_v63  ;;  %v4127_v60 = vsel %vm2101_vm6, %v4097_v50, %v11950_v57 }
 0x50b   : > { %v3639_v32 = vpop.permute.xlu0 %3638  ;;  %v3919_v33 = vpop.permute.xlu1 %3918 }
 0x50c   : > { %v4285_v10 = vsel %vm2266_vm11, %v4253_v40, %v3919_v33 }
 0x50d   : > { %3936 = vrot.lane.b32.xlu0 %v11637_v49, %s16714_s19  ;;  %3564 = vrot.lane.b32.xlu1 %v11615_v25, %s16075_s15 }
 0x50f   : > { %v4007_v24 = vpop.permute.xlu0 %4006  ;;  %v3641_v17 = vpop.permute.xlu1 %3640 }
 0x510   : > { %v4316_v13 = vsel %vm495_vm0, %v4284_v48, %v4007_v24 }
 0x511   : > { %3658 = vrot.lane.b32.xlu0 %v11637_v49, %s16712_s27  ;;  %3938 = vrot.lane.b32.xlu1 %v11634_v9, %s16714_s19 }
 0x512   : > { %8513 = vmatprep.mubr.msk.f32.mxu0 %vm2336_vm12, %v4316_v13 }
 0x513   : > { %v3735_v63 = vpop.permute.xlu0 %3734  ;;  %v4009_v61 = vpop.permute.xlu1 %4008 }
 0x514   : > { %v4317_v39 = vsel %vm495_vm0, %v4285_v10, %v4009_v61 }
 0x515   : > { %4026 = vrot.lane.b32.xlu0 %v11897_v62, %s16715_s14  ;;  %3660 = vrot.lane.b32.xlu1 %v11634_v9, %s16712_s27 }
 0x516   : > { %8514 = vmatmul.mubr.msk.f32.vlgmr.msra.gmra.mrb[16].mxu0 %vm2336_vm12, %v4317_v39 }
 0x517   : > { %v3737_v49 = vpop.permute.xlu0 %3736  ;;  %v3831_v45 = vpop.permute.xlu1 %3830 }
 0x519   : > { %3754 = vrot.lane.b32.xlu0 %v11897_v62, %s16713_s22  ;;  %4028 = vrot.lane.b32.xlu1 %v11909_v58, %s16715_s14  ;;  %v4126_v62 = vsel %vm2101_vm6, %v4096_v31, %v11930_v29 }
 0x51b   : > { %v3547_v48 = vpop.permute.xlu0 %3546  ;;  %v3833_v20 = vpop.permute.xlu1 %3832 }
 0x51d   : > { %3756 = vrot.lane.b32.xlu0 %v11909_v58, %s16713_s22  ;;  %3850 = vrot.lane.b32.xlu1 %v11653_v37, %s16073_s17  ;;  %v4158_v58 = vsel %vm2134_vm7, %v4126_v62, %v3543_v23  ;;  %v4159_v23 = vsel %vm2134_vm7, %v4127_v60, %v3545_v56 }
 0x51e   : > { %v4190_v16 = vsel %vm2167_vm8, %v4158_v58, %v3639_v32  ;;  %v4191_v5 = vsel %vm2167_vm8, %v4159_v23, %v3641_v17 }
 0x51f   : > { %v3921_v33 = vpop.permute.xlu0 %3920  ;;  %v3549_v9 = vpop.permute.xlu1 %3548  ;;  %v4222_v47 = vsel %vm2200_vm9, %v4190_v16, %v3735_v63  ;;  %v4223_v0 = vsel %vm2200_vm9, %v4191_v5, %v3737_v49  ;;  %v16742_v49 = vld [vmem:[#allocation96_spill] sm:$0xff] }
 0x520   : > { %v4254_v29 = vsel %vm2233_vm10, %v4222_v47, %v3831_v45  ;;  %v4255_v57 = vsel %vm2233_vm10, %v4223_v0, %v3833_v20  ;;  %v4098_v20 = vsel %vm2068_vm5, %v11411_v15, %v11948_v54  ;;  %v16744_v54 = vld [vmem:[#allocation140_spill] sm:$0xff]  ;;  %v3311_v60 = vrot.slane %v16742_v49, 2  ;;  %v16746_v0 = vld [vmem:[#allocation118_spill] sm:$0xff] }
 0x521   : > { %3566 = vrot.lane.b32.xlu0 %v11653_v37, %s16075_s15  ;;  %3852 = vrot.lane.b32.xlu1 %v11650_v18, %s16073_s17  ;;  %v4286_v32 = vsel %vm2266_vm11, %v4254_v29, %v3921_v33  ;;  %v4128_v33 = vsel %vm2101_vm6, %v4098_v20, %v11962_v2  ;;  %v16748_v20 = vld [vmem:[#allocation132_spill] sm:$0xff] }
 0x523   : > { %v3643_v46 = vpop.permute.xlu0 %3642  ;;  %v3923_v30 = vpop.permute.xlu1 %3922 }
 0x524   : > { %v4287_v56 = vsel %vm2266_vm11, %v4255_v57, %v3923_v30  ;;  %v4099_v30 = vsel %vm2068_vm5, %v11408_v59, %v11971_v53  ;;  %v3314_v57 = vrot.slane %v16746_v0, 2 }
 0x525   : > { %3940 = vrot.lane.b32.xlu0 %v11670_v55, %s16714_s19  ;;  %3568 = vrot.lane.b32.xlu1 %v11650_v18, %s16075_s15  ;;  %v4129_v2 = vsel %vm2101_vm6, %v4099_v30, %v11981_v8  ;;  %v16745_v8 = vld [vmem:[#allocation119_spill] sm:$0xff] }
 0x526   : > { %v4161_v16 = vsel %vm2134_vm7, %v4129_v2, %v3549_v9 }
 0x527   : > { %v4011_v24 = vpop.permute.xlu0 %4010  ;;  %v3645_v13 = vpop.permute.xlu1 %3644 }
 0x528   : > { %v4318_v14 = vsel %vm495_vm0, %v4286_v32, %v4011_v24  ;;  %v4193_v59 = vsel %vm2167_vm8, %v4161_v16, %v3645_v13 }
 0x529   : > { %3662 = vrot.lane.b32.xlu0 %v11670_v55, %s16712_s27  ;;  %3942 = vrot.lane.b32.xlu1 %v11667_v19, %s16714_s19 }
 0x52a   : > { %8516 = vmatprep.mubr.msk.f32.mxu0 %vm2336_vm12, %v4318_v14 }
 0x52b   : > { %v3739_v40 = vpop.permute.xlu0 %3738  ;;  %v4013_v10 = vpop.permute.xlu1 %4012 }
 0x52c   : > { %v4319_v17 = vsel %vm495_vm0, %v4287_v56, %v4013_v10 }
 0x52d   : > { %4030 = vrot.lane.b32.xlu0 %v11912_v42, %s16715_s14  ;;  %3664 = vrot.lane.b32.xlu1 %v11667_v19, %s16712_s27 }
 0x52e   : > { %8517 = vmatmul.mubr.msk.f32.gmra.mrb[18].mxu0 %vm2336_vm12, %v4319_v17 }
 0x52f   : > { %v3741_v55 = vpop.permute.xlu0 %3740  ;;  %v3835_v63 = vpop.permute.xlu1 %3834 }
 0x530   : > { %v4225_v23 = vsel %vm2200_vm9, %v4193_v59, %v3741_v55 }
 0x531   : > { %3758 = vrot.lane.b32.xlu0 %v11912_v42, %s16713_s22  ;;  %4032 = vrot.lane.b32.xlu1 %v11922_v27, %s16715_s14  ;;  %v16743_v42 = vld [vmem:[#allocation139_spill] sm:$0xff] }
 0x532   : > { %v3312_v29 = vrot.slane %v16743_v42, 2 }
 0x533   : > { %v3551_v61 = vpop.permute.xlu0 %3550  ;;  %v3837_v39 = vpop.permute.xlu1 %3836 }
 0x534   : > { %v4257_v9 = vsel %vm2233_vm10, %v4225_v23, %v3837_v39  ;;  %v3313_v14 = vsel %vm1207_vm2, %v3311_v60, %v3312_v29  ;;  %v3315_v10 = vsel %vm1207_vm2, %v3312_v29, %v3314_v57  ;;  %v16751_v29 = vld [vmem:[#allocation126_spill] sm:$0xff] }
 0x535   : > { %3760 = vrot.lane.b32.xlu0 %v11922_v27, %s16713_s22  ;;  %3854 = vrot.lane.b32.xlu1 %v16742_v49, %s16073_s17  ;;  %v4160_v27 = vsel %vm2134_vm7, %v4128_v33, %v3547_v48 }
 0x536   : > { %v4192_v58 = vsel %vm2167_vm8, %v4160_v27, %v3643_v46 }
 0x537   : > { %v3925_v45 = vpop.permute.xlu0 %3924  ;;  %v12257_v19 = vpop.permute.xlu1 %3552  ;;  %v4224_v15 = vsel %vm2200_vm9, %v4192_v58, %v3739_v40 }
 0x538   : > { %v4256_v48 = vsel %vm2233_vm10, %v4224_v15, %v3835_v63  ;;  %v4101_v15 = vsel %vm2068_vm5, %v11449_v12, %v11993_v1 }
 0x539   : > { %3570 = vrot.lane.b32.xlu0 %v16742_v49, %s16075_s15  ;;  %3856 = vrot.lane.b32.xlu1 %v16743_v42, %s16073_s17  ;;  %v4288_v46 = vsel %vm2266_vm11, %v4256_v48, %v3925_v45  ;;  %v4100_v45 = vsel %vm2068_vm5, %v11452_v6, %v11979_v34  ;;  %v16749_v34 = vld [vmem:[#allocation146_spill] sm:$0xff] }
 0x53a   : > { %v4130_v33 = vsel %vm2101_vm6, %v4100_v45, %v11987_v43  ;;  %v4131_v43 = vsel %vm2101_vm6, %v4101_v15, %v12001_v21  ;;  %v3317_v60 = vrot.slane %v16749_v34, 2 }
 0x53b   : > { %v3647_v31 = vpop.permute.xlu0 %3646  ;;  %v3927_v62 = vpop.permute.xlu1 %3926  ;;  %v4162_v27 = vsel %vm2134_vm7, %v4130_v33, %v3551_v61  ;;  %v4103_v33 = vsel %vm2068_vm5, %v11490_v4, %v12013_v35 }
 0x53c   : > { %v4289_v32 = vsel %vm2266_vm11, %v4257_v9, %v3927_v62  ;;  %v4194_v30 = vsel %vm2167_vm8, %v4162_v27, %v3647_v31  ;;  %v4163_v31 = vsel %vm2134_vm7, %v4131_v43, %v12257_v19 }
 0x53d   : > { %3944 = vrot.lane.b32.xlu0 %v16744_v54, %s16714_s19  ;;  %3572 = vrot.lane.b32.xlu1 %v16743_v42, %s16075_s15 }
 0x53f   : > { %v4015_v50 = vpop.permute.xlu0 %4014  ;;  %v3649_v47 = vpop.permute.xlu1 %3648 }
 0x540   : > { %v4320_v53 = vsel %vm495_vm0, %v4288_v46, %v4015_v50  ;;  %v4195_v1 = vsel %vm2167_vm8, %v4163_v31, %v3649_v47  ;;  %v16750_v46 = vld [vmem:[#allocation171_spill] sm:$0xff] }
 0x541   : > { %3666 = vrot.lane.b32.xlu0 %v16744_v54, %s16712_s27  ;;  %3946 = vrot.lane.b32.xlu1 %v16745_v8, %s16714_s19 }
 0x542   : > { %8519 = vmatprep.mubr.msk.f32.mxu0 %vm2336_vm12, %v4320_v53  ;;  %v3316_v53 = vrot.slane %v16748_v20, 2 }
 0x543   : > { %v3743_v24 = vpop.permute.xlu0 %3742  ;;  %v4017_v13 = vpop.permute.xlu1 %4016 }
 0x544   : > { %v4321_v5 = vsel %vm495_vm0, %v4289_v32, %v4017_v13  ;;  %v4226_v6 = vsel %vm2200_vm9, %v4194_v30, %v3743_v24  ;;  %v3318_v9 = vsel %vm1207_vm2, %v3316_v53, %v3317_v60  ;;  %v16752_v32 = vld [vmem:[#allocation127_spill] sm:$0xff] }
 0x545   : > { %4034 = vrot.lane.b32.xlu0 %v3313_v14, %s16715_s14  ;;  %3668 = vrot.lane.b32.xlu1 %v16745_v8, %s16712_s27  ;;  %v3319_v24 = vrot.slane %v16752_v32, 2 }
 0x546   : > { %8520 = vmatmul.mubr.msk.f32.gmra.mrb[20].mxu0 %vm2336_vm12, %v4321_v5 }
 0x547   : > { %v3745_v56 = vpop.permute.xlu0 %3744  ;;  %v3839_v40 = vpop.permute.xlu1 %3838 }
 0x548   : > { %v4258_v61 = vsel %vm2233_vm10, %v4226_v6, %v3839_v40  ;;  %v4227_v16 = vsel %vm2200_vm9, %v4195_v1, %v3745_v56  ;;  %v4102_v56 = vsel %vm2068_vm5, %v11493_v22, %v11999_v44  ;;  %v16753_v22 = vld [vmem:[#allocation167_spill] sm:$0xff] }
 0x549   : > { %3762 = vrot.lane.b32.xlu0 %v3313_v14, %s16713_s22  ;;  %4036 = vrot.lane.b32.xlu1 %v3315_v10, %s16715_s14  ;;  %v4132_v40 = vsel %vm2101_vm6, %v4102_v56, %v12007_v7  ;;  %v4133_v7 = vsel %vm2101_vm6, %v4103_v33, %v12021_v28  ;;  %v16754_v28 = vld [vmem:[#allocation148_spill] sm:$0xff]  ;;  %v3321_v1 = vrot.slane %v16753_v22, 2  ;;  %v16759_v33 = vld [vmem:[#allocation153_spill] sm:$0xff] }
 0x54b   : > { %v3555_v17 = vpop.permute.xlu0 %3554  ;;  %v3841_v55 = vpop.permute.xlu1 %3840 }
 0x54c   : > { %v4259_v21 = vsel %vm2233_vm10, %v4227_v16, %v3841_v55  ;;  %v16756_v16 = vld [vmem:[#allocation161_spill] sm:$0xff] }
 0x54d   : > { %3480 = vrot.lane.b32.xlu0 %v3313_v14, %s16747_s24  ;;  %3764 = vrot.lane.b32.xlu1 %v3315_v10, %s16713_s22  ;;  %v3320_v14 = vsel %vm1207_vm2, %v3317_v60, %v3319_v24 }
 0x54f   : > { %v3929_v63 = vpop.permute.xlu0 %3928  ;;  %v12307_v39 = vpop.permute.xlu1 %3556 }
 0x550   : > { %v4290_v54 = vsel %vm2266_vm11, %v4258_v61, %v3929_v63 }
 0x551   : > { %3858 = vrot.lane.b32.xlu0 %v16748_v20, %s16073_s17  ;;  %3482 = vrot.lane.b32.xlu1 %v3315_v10, %s16747_s24  ;;  %v4164_v10 = vsel %vm2134_vm7, %v4132_v40, %v3555_v17  ;;  %v4165_v17 = vsel %vm2134_vm7, %v4133_v7, %v12307_v39 }
 0x553   : > { %v3651_v62 = vpop.permute.xlu0 %3650  ;;  %v3931_v58 = vpop.permute.xlu1 %3930 }
 0x554   : > { %v4291_v19 = vsel %vm2266_vm11, %v4259_v21, %v3931_v58  ;;  %v4196_v45 = vsel %vm2167_vm8, %v4164_v10, %v3651_v62  ;;  %v16758_v10 = vld [vmem:[#allocation190_spill] sm:$0xff] }
 0x555   : > { %3574 = vrot.lane.b32.xlu0 %v16748_v20, %s16075_s15  ;;  %3860 = vrot.lane.b32.xlu1 %v16749_v34, %s16073_s17 }
 0x557   : > { %v4019_v2 = vpop.permute.xlu0 %4018  ;;  %v3653_v12 = vpop.permute.xlu1 %3652 }
 0x558   : > { %v4322_v48 = vsel %vm495_vm0, %v4290_v54, %v4019_v2  ;;  %v4197_v4 = vsel %vm2167_vm8, %v4165_v17, %v3653_v12  ;;  %v16755_v54 = vld [vmem:[#allocation173_spill] sm:$0xff] }
 0x559   : > { %3948 = vrot.lane.b32.xlu0 %v16750_v46, %s16714_s19  ;;  %3576 = vrot.lane.b32.xlu1 %v16749_v34, %s16075_s15 }
 0x55a   : > { %8522 = vmatprep.mubr.msk.f32.mxu0 %vm2336_vm12, %v4322_v48  ;;  %v3322_v48 = vrot.slane %v16754_v28, 2 }
 0x55b   : > { %v3747_v50 = vpop.permute.xlu0 %3746  ;;  %v4021_v59 = vpop.permute.xlu1 %4020 }
 0x55c   : > { %v4323_v47 = vsel %vm495_vm0, %v4291_v19, %v4021_v59  ;;  %v4228_v27 = vsel %vm2200_vm9, %v4196_v45, %v3747_v50  ;;  %v3323_v19 = vsel %vm1207_vm2, %v3321_v1, %v3322_v48  ;;  %v16757_v50 = vld [vmem:[#allocation133_spill] sm:$0xff] }
 0x55d   : > { %3670 = vrot.lane.b32.xlu0 %v16750_v46, %s16712_s27  ;;  %3950 = vrot.lane.b32.xlu1 %v16751_v29, %s16714_s19  ;;  %v3324_v59 = vrot.slane %v16757_v50, 2  ;;  %v16766_v50 = vld [vmem:[#allocation21_spill] sm:$0xff] }
 0x55e   : > { %8523 = vmatmul.mubr.msk.f32.gmra.mrb[22].mxu0 %vm2336_vm12, %v4323_v47 }
 0x55f   : > { %v3749_v23 = vpop.permute.xlu0 %3748  ;;  %v3843_v8 = vpop.permute.xlu1 %3842  ;;  %v3325_v60 = vsel %vm1207_vm2, %v3322_v48, %v3324_v59 }
 0x560   : > { %v4260_v44 = vsel %vm2233_vm10, %v4228_v27, %v3843_v8  ;;  %v4229_v15 = vsel %vm2200_vm9, %v4197_v4, %v3749_v23  ;;  %v16761_v4 = vld [vmem:[#allocation187_spill] sm:$0xff] }
 0x561   : > { %4038 = vrot.lane.b32.xlu0 %v3318_v9, %s16715_s14  ;;  %3672 = vrot.lane.b32.xlu1 %v16751_v29, %s16712_s27  ;;  %v4104_v29 = vsel %vm2068_vm5, %v11534_v26, %v12019_v36 }
 0x562   : > { %v4134_v23 = vsel %vm2101_vm6, %v4104_v29, %v12027_v3 }
 0x563   : > { %v3559_v13 = vpop.permute.xlu0 %3558  ;;  %v3845_v5 = vpop.permute.xlu1 %3844 }
 0x564   : > { %v4261_v6 = vsel %vm2233_vm10, %v4229_v15, %v3845_v5  ;;  %v4166_v8 = vsel %vm2134_vm7, %v4134_v23, %v3559_v13  ;;  %v4105_v5 = vsel %vm2068_vm5, %v11531_v38, %v12033_v41 }
 0x565   : > { %3766 = vrot.lane.b32.xlu0 %v3318_v9, %s16713_s22  ;;  %4040 = vrot.lane.b32.xlu1 %v3320_v14, %s16715_s14  ;;  %v4135_v26 = vsel %vm2101_vm6, %v4105_v5, %v12041_v11 }
 0x567   : > { %v3933_v0 = vpop.permute.xlu0 %3932  ;;  %v12359_v57 = vpop.permute.xlu1 %3560 }
 0x568   : > { %v4292_v62 = vsel %vm2266_vm11, %v4260_v44, %v3933_v0  ;;  %v4167_v36 = vsel %vm2134_vm7, %v4135_v26, %v12359_v57  ;;  %v16760_v44 = vld [vmem:[#allocation179_spill] sm:$0xff] }
 0x569   : > { %3484 = vrot.lane.b32.xlu0 %v3318_v9, %s16747_s24  ;;  %3768 = vrot.lane.b32.xlu1 %v3320_v14, %s16713_s22 }
 0x56b   : > { %v3655_v55 = vpop.permute.xlu0 %3654  ;;  %v3935_v63 = vpop.permute.xlu1 %3934 }
 0x56c   : > { %v4293_v39 = vsel %vm2266_vm11, %v4261_v6, %v3935_v63  ;;  %v4198_v24 = vsel %vm2167_vm8, %v4166_v8, %v3655_v55 }
 0x56d   : > { %3862 = vrot.lane.b32.xlu0 %v16753_v22, %s16073_s17  ;;  %3486 = vrot.lane.b32.xlu1 %v3320_v14, %s16747_s24 }
 0x56f   : > { %v4023_v58 = vpop.permute.xlu0 %4022  ;;  %v3657_v30 = vpop.permute.xlu1 %3656 }
 0x570   : > { %v4324_v35 = vsel %vm495_vm0, %v4292_v62, %v4023_v58  ;;  %v4199_v38 = vsel %vm2167_vm8, %v4167_v36, %v3657_v30  ;;  %v3326_v58 = vrot.slane %v16758_v10, 2  ;;  %v3327_v30 = vrot.slane %v16759_v33, 2 }
 0x571   : > { %3578 = vrot.lane.b32.xlu0 %v16753_v22, %s16075_s15  ;;  %3864 = vrot.lane.b32.xlu1 %v16754_v28, %s16073_s17 }
 0x572   : > { %8525 = vmatprep.mubr.msk.f32.mxu0 %vm2336_vm12, %v4324_v35  ;;  %v3328_v6 = vsel %vm1207_vm2, %v3326_v58, %v3327_v30  ;;  %v16774_v58 = vld [vmem:[#allocation143_spill] sm:$0xff] }
 0x573   : > { %v3751_v43 = vpop.permute.xlu0 %3750  ;;  %v4025_v61 = vpop.permute.xlu1 %4024 }
 0x574   : > { %v4325_v31 = vsel %vm495_vm0, %v4293_v39, %v4025_v61  ;;  %v4230_v14 = vsel %vm2200_vm9, %v4198_v24, %v3751_v43  ;;  %v16762_v39 = vld [vmem:[#allocation186_spill] sm:$0xff]  ;;  %v16763_v61 = vld [vmem:[#allocation116_spill] sm:$0xff] }
 0x575   : > { %3952 = vrot.lane.b32.xlu0 %v16755_v54, %s16714_s19  ;;  %3580 = vrot.lane.b32.xlu1 %v16754_v28, %s16075_s15  ;;  %v3329_v43 = vrot.slane %v16762_v39, 2 }
 0x576   : > { %8526 = vmatmul.mubr.msk.f32.gmra.mrb[24].mxu0 %vm2336_vm12, %v4325_v31  ;;  %v4106_v31 = vsel %vm2068_vm5, %v16763_v61, %v12039_v51  ;;  %v16775_v61 = vld [vmem:[#allocation191_spill] sm:$0xff] }
 0x577   : > { %v3753_v2 = vpop.permute.xlu0 %3752  ;;  %v3847_v12 = vpop.permute.xlu1 %3846 }
 0x578   : > { %v4262_v3 = vsel %vm2233_vm10, %v4230_v14, %v3847_v12  ;;  %v4231_v40 = vsel %vm2200_vm9, %v4199_v38, %v3753_v2  ;;  %v16769_v38 = vld [vmem:[#allocation182_spill] sm:$0xff] }
 0x579   : > { %3674 = vrot.lane.b32.xlu0 %v16755_v54, %s16712_s27  ;;  %3954 = vrot.lane.b32.xlu1 %v16756_v16, %s16714_s19  ;;  %v16764_v54 = vld [vmem:[#allocation63_spill] sm:$0xff] }
 0x57a   : > { %v4136_v2 = vsel %vm2101_vm6, %v4106_v31, %v16764_v54  ;;  %v3334_v31 = vrot.slane %v16775_v61, 2  ;;  %v16776_v54 = vld [vmem:[#allocation82_spill] sm:$0xff] }
 0x57b   : > { %v3563_v46 = vpop.permute.xlu0 %3562  ;;  %v3849_v21 = vpop.permute.xlu1 %3848 }
 0x57c   : > { %v4263_v11 = vsel %vm2233_vm10, %v4231_v40, %v3849_v21  ;;  %v4168_v12 = vsel %vm2134_vm7, %v4136_v2, %v3563_v46  ;;  %v3330_v21 = vsel %vm1207_vm2, %v3327_v30, %v3329_v43  ;;  %v4109_v2 = vsel %vm2068_vm5, %v11615_v25, %v16776_v54 }
 0x57d   : > { %4042 = vrot.lane.b32.xlu0 %v3323_v19, %s16715_s14  ;;  %3676 = vrot.lane.b32.xlu1 %v16756_v16, %s16712_s27 }
 0x57f   : > { %v3937_v47 = vpop.permute.xlu0 %3936  ;;  %v12410_v53 = vpop.permute.xlu1 %3564 }
 0x580   : > { %v4294_v13 = vsel %vm2266_vm11, %v4262_v3, %v3937_v47  ;;  %v16767_v47 = vld [vmem:[#allocation122_spill] sm:$0xff] }
 0x581   : > { %3770 = vrot.lane.b32.xlu0 %v3323_v19, %s16713_s22  ;;  %4044 = vrot.lane.b32.xlu1 %v3325_v60, %s16715_s14 }
 0x583   : > { %v3659_v9 = vpop.permute.xlu0 %3658  ;;  %v3939_v32 = vpop.permute.xlu1 %3938 }
 0x584   : > { %v4295_v57 = vsel %vm2266_vm11, %v4263_v11, %v3939_v32  ;;  %v4200_v16 = vsel %vm2167_vm8, %v4168_v12, %v3659_v9  ;;  %v16770_v11 = vld [vmem:[#allocation197_spill] sm:$0xff] }
 0x585   : > { %3488 = vrot.lane.b32.xlu0 %v3323_v19, %s16747_s24  ;;  %3772 = vrot.lane.b32.xlu1 %v3325_v60, %s16713_s22  ;;  %v16765_v19 = vld [vmem:[#allocation45_spill] sm:$0xff] }
 0x586   : > { %v4107_v51 = vsel %vm2068_vm5, %v16766_v50, %v16765_v19 }
 0x587   : > { %v4027_v0 = vpop.permute.xlu0 %4026  ;;  %v3661_v56 = vpop.permute.xlu1 %3660 }
 0x588   : > { %v4326_v41 = vsel %vm495_vm0, %v4294_v13, %v4027_v0  ;;  %v16768_v13 = vld [vmem:[#allocation192_spill] sm:$0xff] }
 0x589   : > { %3866 = vrot.lane.b32.xlu0 %v16758_v10, %s16073_s17  ;;  %3490 = vrot.lane.b32.xlu1 %v3325_v60, %s16747_s24  ;;  %v4137_v60 = vsel %vm2101_vm6, %v4107_v51, %v16767_v47 }
 0x58a   : > { %8528 = vmatprep.mubr.msk.f32.mxu0 %vm2336_vm12, %v4326_v41  ;;  %v4169_v29 = vsel %vm2134_vm7, %v4137_v60, %v12410_v53 }
 0x58b   : > { %v3755_v55 = vpop.permute.xlu0 %3754  ;;  %v4029_v63 = vpop.permute.xlu1 %4028  ;;  %v4201_v32 = vsel %vm2167_vm8, %v4169_v29, %v3661_v56 }
 0x58c   : > { %v4327_v45 = vsel %vm495_vm0, %v4295_v57, %v4029_v63  ;;  %v4232_v59 = vsel %vm2200_vm9, %v4200_v16, %v3755_v55  ;;  %v3331_v63 = vrot.slane %v16768_v13, 2 }
 0x58d   : > { %3582 = vrot.lane.b32.xlu0 %v16758_v10, %s16075_s15  ;;  %3868 = vrot.lane.b32.xlu1 %v16759_v33, %s16073_s17 }
 0x58e   : > { %8529 = vmatmul.mubr.msk.f32.gmra.mrb[26].mxu0 %vm2336_vm12, %v4327_v45  ;;  %v3332_v45 = vrot.slane %v16769_v38, 2 }
 0x58f   : > { %v3757_v27 = vpop.permute.xlu0 %3756  ;;  %v3851_v7 = vpop.permute.xlu1 %3850 }
 0x590   : > { %v4264_v46 = vsel %vm2233_vm10, %v4232_v59, %v3851_v7  ;;  %v4233_v5 = vsel %vm2200_vm9, %v4201_v32, %v3757_v27  ;;  %v16771_v27 = vld [vmem:[#allocation70_spill] sm:$0xff]  ;;  %v16772_v7 = vld [vmem:[#allocation89_spill] sm:$0xff]  ;;  %v3333_v43 = vsel %vm1207_vm2, %v3331_v63, %v3332_v45  ;;  %v3335_v59 = vsel %vm1207_vm2, %v3332_v45, %v3334_v31  ;;  %v16778_v32 = vld [vmem:[#allocation196_spill] sm:$0xff] }
 0x591   : > { %3956 = vrot.lane.b32.xlu0 %v16760_v44, %s16714_s19  ;;  %3584 = vrot.lane.b32.xlu1 %v16759_v33, %s16075_s15  ;;  %v16782_v63 = vld [vmem:[#allocation138_spill] sm:$0xff]  ;;  %v16783_v45 = vld [vmem:[#allocation31_spill] sm:$0xff] }
 0x593   : > { %v3567_v17 = vpop.permute.xlu0 %3566  ;;  %v3853_v62 = vpop.permute.xlu1 %3852 }
 0x594   : > { %v4265_v14 = vsel %vm2233_vm10, %v4233_v5, %v3853_v62  ;;  %v16773_v62 = vld [vmem:[#allocation193_spill] sm:$0xff] }
 0x595   : > { %3678 = vrot.lane.b32.xlu0 %v16760_v44, %s16712_s27  ;;  %3958 = vrot.lane.b32.xlu1 %v16761_v4, %s16714_s19  ;;  %v4108_v44 = vsel %vm2068_vm5, %v16772_v7, %v16771_v27 }
 0x596   : > { %v4138_v30 = vsel %vm2101_vm6, %v4108_v44, %v16774_v58 }
 0x597   : > { %v3941_v35 = vpop.permute.xlu0 %3940  ;;  %v12459_v15 = vpop.permute.xlu1 %3568 }
 0x598   : > { %v4296_v23 = vsel %vm2266_vm11, %v4264_v46, %v3941_v35 }
 0x599   : > { %4046 = vrot.lane.b32.xlu0 %v3328_v6, %s16715_s14  ;;  %3680 = vrot.lane.b32.xlu1 %v16761_v4, %s16712_s27  ;;  %v4170_v4 = vsel %vm2134_vm7, %v4138_v30, %v3567_v17  ;;  %v16777_v17 = vld [vmem:[#allocation100_spill] sm:$0xff] }
 0x59b   : > { %v3663_v1 = vpop.permute.xlu0 %3662  ;;  %v3943_v48 = vpop.permute.xlu1 %3942 }
 0x59c   : > { %v4297_v53 = vsel %vm2266_vm11, %v4265_v14, %v3943_v48  ;;  %v4202_v39 = vsel %vm2167_vm8, %v4170_v4, %v3663_v1  ;;  %v4139_v48 = vsel %vm2101_vm6, %v4109_v2, %v16777_v17  ;;  %v16779_v14 = vld [vmem:[#allocation206_spill] sm:$0xff]  ;;  %v16784_v4 = vld [vmem:[#allocation200_spill] sm:$0xff] }
 0x59d   : > { %3774 = vrot.lane.b32.xlu0 %v3328_v6, %s16713_s22  ;;  %4048 = vrot.lane.b32.xlu1 %v3330_v21, %s16715_s14  ;;  %v4171_v16 = vsel %vm2134_vm7, %v4139_v48, %v12459_v15 }
 0x59f   : > { %v4031_v8 = vpop.permute.xlu0 %4030  ;;  %v3665_v9 = vpop.permute.xlu1 %3664 }
 0x5a0   : > { %v4328_v24 = vsel %vm495_vm0, %v4296_v23, %v4031_v8  ;;  %v4203_v25 = vsel %vm2167_vm8, %v4171_v16, %v3665_v9 }
 0x5a1   : > { %3492 = vrot.lane.b32.xlu0 %v3328_v6, %s16747_s24  ;;  %3776 = vrot.lane.b32.xlu1 %v3330_v21, %s16713_s22 }
 0x5a2   : > { %8531 = vmatprep.mubr.msk.f32.mxu0 %vm2336_vm12, %v4328_v24 }
 0x5a3   : > { %v3759_v26 = vpop.permute.xlu0 %3758  ;;  %v4033_v3 = vpop.permute.xlu1 %4032 }
 0x5a4   : > { %v4329_v36 = vsel %vm495_vm0, %v4297_v53, %v4033_v3  ;;  %v4234_v12 = vsel %vm2200_vm9, %v4202_v39, %v3759_v26  ;;  %v16780_v3 = vld [vmem:[#allocation212_spill] sm:$0xff] }
 0x5a5   : > { %3870 = vrot.lane.b32.xlu0 %v16768_v13, %s16073_s17  ;;  %3494 = vrot.lane.b32.xlu1 %v3330_v21, %s16747_s24 }
 0x5a6   : > { %8532 = vmatmul.mubr.msk.f32.gmra.mrb[28].mxu0 %vm2336_vm12, %v4329_v36 }
 0x5a7   : > { %v3761_v0 = vpop.permute.xlu0 %3760  ;;  %v3855_v56 = vpop.permute.xlu1 %3854 }
 0x5a8   : > { %v4266_v1 = vsel %vm2233_vm10, %v4234_v12, %v3855_v56  ;;  %v4235_v47 = vsel %vm2200_vm9, %v4203_v25, %v3761_v0  ;;  %v3336_v56 = vrot.slane %v16778_v32, 2 }
 0x5a9   : > { %3586 = vrot.lane.b32.xlu0 %v16768_v13, %s16075_s15  ;;  %3872 = vrot.lane.b32.xlu1 %v16769_v38, %s16073_s17 }
 0x5ab   : > { %v12503_v41 = vpop.permute.xlu0 %3570  ;;  %v3857_v40 = vpop.permute.xlu1 %3856 }
 0x5ac   : > { %v4267_v60 = vsel %vm2233_vm10, %v4235_v47, %v3857_v40  ;;  %v3337_v40 = vrot.slane %v16779_v14, 2 }
 0x5ad   : > { %3960 = vrot.lane.b32.xlu0 %v16770_v11, %s16714_s19  ;;  %3588 = vrot.lane.b32.xlu1 %v16769_v38, %s16075_s15 }
 0x5ae   : > { %v3338_v30 = vsel %vm1207_vm2, %v3336_v56, %v3337_v40 }
 0x5af   : > { %v3945_v57 = vpop.permute.xlu0 %3944  ;;  %v12509_v55 = vpop.permute.xlu1 %3572 }
 0x5b0   : > { %v4298_v21 = vsel %vm2266_vm11, %v4266_v1, %v3945_v57 }
 0x5b1   : > { %3682 = vrot.lane.b32.xlu0 %v16770_v11, %s16712_s27  ;;  %3962 = vrot.lane.b32.xlu1 %v16773_v62, %s16714_s19  ;;  %v16781_v11 = vld [vmem:[#allocation44_spill] sm:$0xff] }
 0x5b2   : > { %v4110_v57 = vsel %vm2068_vm5, %v11653_v37, %v16781_v11  ;;  %v3339_v37 = vrot.slane %v16784_v4, 2  ;;  %v16791_v11 = vld [vmem:[#allocation13_spill] sm:$0xff] }
 0x5b3   : > { %v3667_v35 = vpop.permute.xlu0 %3666  ;;  %v3947_v6 = vpop.permute.xlu1 %3946  ;;  %v4140_v27 = vsel %vm2101_vm6, %v4110_v57, %v16783_v45 }
 0x5b4   : > { %v4299_v15 = vsel %vm2266_vm11, %v4267_v60, %v3947_v6  ;;  %v4172_v7 = vsel %vm2134_vm7, %v4140_v27, %v12503_v41  ;;  %v16785_v6 = vld [vmem:[#allocation22_spill] sm:$0xff]  ;;  %v16786_v41 = vld [vmem:[#allocation61_spill] sm:$0xff]  ;;  %v3340_v48 = vsel %vm1207_vm2, %v3337_v40, %v3339_v37 }
 0x5b5   : > { %4050 = vrot.lane.b32.xlu0 %v3333_v43, %s16715_s14  ;;  %3684 = vrot.lane.b32.xlu1 %v16773_v62, %s16712_s27  ;;  %v4204_v58 = vsel %vm2167_vm8, %v4172_v7, %v3667_v35  ;;  %v4111_v39 = vsel %vm2068_vm5, %v11650_v18, %v16785_v6  ;;  %v16793_v7 = vld [vmem:[#allocation62_spill] sm:$0xff] }
 0x5b6   : > { %v4141_v61 = vsel %vm2101_vm6, %v4111_v39, %v16786_v41  ;;  %v16795_v41 = vld [vmem:[#allocation33_spill] sm:$0xff] }
 0x5b7   : > { %v4035_v19 = vpop.permute.xlu0 %4034  ;;  %v3669_v50 = vpop.permute.xlu1 %3668  ;;  %v4173_v31 = vsel %vm2134_vm7, %v4141_v61, %v12509_v55 }
 0x5b8   : > { %v4330_v51 = vsel %vm495_vm0, %v4298_v21, %v4035_v19  ;;  %v4205_v18 = vsel %vm2167_vm8, %v4173_v31, %v3669_v50 }
 0x5b9   : > { %3778 = vrot.lane.b32.xlu0 %v3333_v43, %s16713_s22  ;;  %4052 = vrot.lane.b32.xlu1 %v3335_v59, %s16715_s14 }
 0x5ba   : > { %8534 = vmatprep.mubr.msk.f32.mxu0 %vm2336_vm12, %v4330_v51 }
 0x5bb   : > { %v3763_v46 = vpop.permute.xlu0 %3762  ;;  %v4037_v29 = vpop.permute.xlu1 %4036 }
 0x5bc   : > { %v4331_v23 = vsel %vm495_vm0, %v4299_v15, %v4037_v29  ;;  %v16788_v15 = vld [vmem:[#allocation220_spill] sm:$0xff] }
 0x5bd   : > { %3496 = vrot.lane.b32.xlu0 %v3333_v43, %s16747_s24  ;;  %3780 = vrot.lane.b32.xlu1 %v3335_v59, %s16713_s22  ;;  %v4236_v43 = vsel %vm2200_vm9, %v4204_v58, %v3763_v46  ;;  %v3342_v40 = vrot.slane %v16788_v15, 2 }
 0x5be   : > { %8535 = vmatmul.mubr.msk.f32.gmra.mrb[30].mxu0 %vm2336_vm12, %v4331_v23  ;;  %v16789_v23 = vld [vmem:[#allocation37_spill] sm:$0xff] }
 0x5bf   : > { %v12552_v8 = vpop.permute.xlu0 %3480  ;;  %v3765_v9 = vpop.permute.xlu1 %3764 }
 0x5c0   : > { %v4237_v1 = vsel %vm2200_vm9, %v4205_v18, %v3765_v9 }
 0x5c1   : > { %3874 = vrot.lane.b32.xlu0 %v16778_v32, %s16073_s17  ;;  %3498 = vrot.lane.b32.xlu1 %v3335_v59, %s16747_s24  ;;  %v16787_v59 = vld [vmem:[#allocation163_spill] sm:$0xff] }
 0x5c2   : > { %v3341_v56 = vrot.slane %v16787_v59, 2 }
 0x5c3   : > { %v3859_v24 = vpop.permute.xlu0 %3858  ;;  %v12557_v5 = vpop.permute.xlu1 %3482 }
 0x5c4   : > { %v4268_v35 = vsel %vm2233_vm10, %v4236_v43, %v3859_v24  ;;  %v3343_v43 = vsel %vm1207_vm2, %v3341_v56, %v3342_v40 }
 0x5c5   : > { %3590 = vrot.lane.b32.xlu0 %v16778_v32, %s16075_s15  ;;  %3876 = vrot.lane.b32.xlu1 %v16779_v14, %s16073_s17 }
 0x5c7   : > { %v12563_v53 = vpop.permute.xlu0 %3574  ;;  %v3861_v26 = vpop.permute.xlu1 %3860 }
 0x5c8   : > { %v4269_v16 = vsel %vm2233_vm10, %v4237_v1, %v3861_v26  ;;  %v8816_v26 = vld [vmem:[%s15783_s5] ss:$0 sm:$0xff] }
 0x5c9   : > { %3964 = vrot.lane.b32.xlu0 %v16780_v3, %s16714_s19  ;;  %3592 = vrot.lane.b32.xlu1 %v16779_v14, %s16075_s15  ;;  %v2700_v57 = vmul.f32 %v8816_v26, %v16791_v11 }
 0x5cb   : > { %v3949_v36 = vpop.permute.xlu0 %3948  ;;  %v12569_v0 = vpop.permute.xlu1 %3576 }
 0x5cc   : > { %v4300_v54 = vsel %vm2266_vm11, %v4268_v35, %v3949_v36  ;;  %v16797_v35 = vld [vmem:[#allocation77_spill] sm:$0xff] }
 0x5cd   : > { %3686 = vrot.lane.b32.xlu0 %v16780_v3, %s16712_s27  ;;  %3966 = vrot.lane.b32.xlu1 %v16782_v63, %s16714_s19  ;;  %v16790_v3 = vld [vmem:[#allocation217_spill] sm:$0xff] }
 0x5ce   : > { %v2699_v36 = vmul.f32 %v8816_v26, %v16790_v3 }
 0x5cf   : > { %v3671_v44 = vpop.permute.xlu0 %3670  ;;  %v3951_v62 = vpop.permute.xlu1 %3950 }
 0x5d0   : > { %v4301_v55 = vsel %vm2266_vm11, %v4269_v16, %v3951_v62 }
 0x5d1   : > { %4054 = vrot.lane.b32.xlu0 %v3338_v30, %s16715_s14  ;;  %3688 = vrot.lane.b32.xlu1 %v16782_v63, %s16712_s27  ;;  %v16792_v63 = vld [vmem:[#allocation92_spill] sm:$0xff] }
 0x5d2   : > { %v4112_v45 = vsel %vm2068_vm5, %v16742_v49, %v16792_v63  ;;  %v8817_v49 = vld [vmem:[%s15784_s6] ss:$0 sm:$0xff] }
 0x5d3   : > { %v4039_v2 = vpop.permute.xlu0 %4038  ;;  %v3673_v12 = vpop.permute.xlu1 %3672  ;;  %v4142_v62 = vsel %vm2101_vm6, %v4112_v45, %v12552_v8  ;;  %v12659_v6 = vadd.f32 %v8817_v49, %v2699_v36  ;;  %v3344_v8 = vrot.slane %v16795_v41, 2  ;;  %v12664_v61 = vadd.f32 %v8817_v49, %v2700_v57 }
 0x5d4   : > { %v4332_v17 = vsel %vm495_vm0, %v4300_v54, %v4039_v2 }
 0x5d5   : > { %3782 = vrot.lane.b32.xlu0 %v3338_v30, %s16713_s22  ;;  %4056 = vrot.lane.b32.xlu1 %v3340_v48, %s16715_s14  ;;  %16794 = vst [vmem:[#allocation107_spill] sm:$0xff] %v12659_v6  ;;  %16796 = vst [vmem:[#allocation25_spill] sm:$0xff] %v12664_v61  ;;  %v3345_v16 = vsel %vm1207_vm2, %v3342_v40, %v3344_v8 }
 0x5d6   : > { %8537 = vmatprep.mubr.msk.f32.mxu0 %vm2336_vm12, %v4332_v17 }
 0x5d7   : > { %v3767_v21 = vpop.permute.xlu0 %3766  ;;  %v4041_v19 = vpop.permute.xlu1 %4040 }
 0x5d8   : > { %v4333_v50 = vsel %vm495_vm0, %v4301_v55, %v4041_v19  ;;  %v16798_v55 = vld [vmem:[#allocation221_spill] sm:$0xff] }
 0x5d9   : > { %3500 = vrot.lane.b32.xlu0 %v3338_v30, %s16747_s24  ;;  %3784 = vrot.lane.b32.xlu1 %v3340_v48, %s16713_s22  ;;  %v4174_v30 = vsel %vm2134_vm7, %v4142_v62, %v12563_v53  ;;  %v4113_v53 = vsel %vm2068_vm5, %v16743_v42, %v16797_v35 }
 0x5da   : > { %8538 = vmatmul.mubr.msk.f32.gmra.mrb[32].mxu0 %vm2336_vm12, %v4333_v50  ;;  %v4206_v39 = vsel %vm2167_vm8, %v4174_v30, %v3671_v44  ;;  %v4143_v44 = vsel %vm2101_vm6, %v4113_v53, %v12557_v5  ;;  %v16799_v5 = vld [vmem:[#allocation83_spill] sm:$0xff] }
 0x5db   : > { %v12613_v25 = vpop.permute.xlu0 %3484  ;;  %v3769_v51 = vpop.permute.xlu1 %3768  ;;  %v4238_v31 = vsel %vm2200_vm9, %v4206_v39, %v3767_v21  ;;  %v4175_v2 = vsel %vm2134_vm7, %v4143_v44, %v12569_v0  ;;  %v3005_v21 = vadd.f32 %v16798_v55, %v12659_v6  ;;  %v3006_v19 = vadd.f32 %v16799_v5, %v12664_v61  ;;  %v16801_v55 = vld [vmem:[#allocation112_spill] sm:$0xff] }
 0x5dc   : > { %v4207_v42 = vsel %vm2167_vm8, %v4175_v2, %v3673_v12 }
 0x5dd   : > { %3878 = vrot.lane.b32.xlu0 %v16787_v59, %s16073_s17  ;;  %3502 = vrot.lane.b32.xlu1 %v3340_v48, %s16747_s24  ;;  %v4239_v50 = vsel %vm2200_vm9, %v4207_v42, %v3769_v51  ;;  %v3084_v26 = vrot.slane %v3005_v21, 7  ;;  %v3085_v3 = vrot.slane %v3006_v19, 7 }
 0x5df   : > { %v3863_v47 = vpop.permute.xlu0 %3862  ;;  %v12618_v60 = vpop.permute.xlu1 %3486  ;;  %v3086_v56 = vsel %vm960_vm1, %v3084_v26, %v3085_v3  ;;  %v3165_v45 = vsel %vm960_vm1, %v3085_v3, 0.0 }
 0x5e0   : > { %v4270_v54 = vsel %vm2233_vm10, %v4238_v31, %v3863_v47  ;;  %v3349_v63 = vrot.slane %v3086_v56, 1  ;;  %v3354_v35 = vrot.slane %v3086_v56, 2  ;;  %v16800_v31 = vld [vmem:[#allocation71_spill] sm:$0xff] }
 0x5e1   : > { %3594 = vrot.lane.b32.xlu0 %v16787_v59, %s16075_s15  ;;  %3880 = vrot.lane.b32.xlu1 %v16788_v15, %s16073_s17  ;;  %v4114_v44 = vsel %vm2068_vm5, %v16748_v20, %v16800_v31  ;;  %v4115_v20 = vsel %vm2068_vm5, %v16749_v34, %v16801_v55 }
 0x5e3   : > { %v12624_v46 = vpop.permute.xlu0 %3578  ;;  %v3865_v29 = vpop.permute.xlu1 %3864 }
 0x5e4   : > { %v4271_v0 = vsel %vm2233_vm10, %v4239_v50, %v3865_v29  ;;  %v3149_v29 = vsel %vm960_vm1, 0.0, %v3084_v26  ;;  %v16802_v26 = vld [vmem:[#allocation18_spill] sm:$0xff] }
 0x5e5   : > { %3968 = vrot.lane.b32.xlu0 %v16789_v23, %s16714_s19  ;;  %3596 = vrot.lane.b32.xlu1 %v16788_v15, %s16075_s15  ;;  %v3348_v57 = vrot.slane %v3149_v29, 1  ;;  %v3353_v8 = vrot.slane %v3149_v29, 2 }
 0x5e7   : > { %v3953_v9 = vpop.permute.xlu0 %3952  ;;  %v12630_v24 = vpop.permute.xlu1 %3580  ;;  %v3350_v30 = vsel %vm1126_vm3, %v3348_v57, %v3349_v63 }
 0x5e8   : > { %v4302_v18 = vsel %vm2266_vm11, %v4270_v54, %v3953_v9  ;;  %v4144_v54 = vsel %vm2101_vm6, %v4114_v44, %v12613_v25  ;;  %v4145_v25 = vsel %vm2101_vm6, %v4115_v20, %v12618_v60  ;;  %v16809_v44 = vld [vmem:[#allocation48_spill] sm:$0xff] }
 0x5e9   : > { %v12642_v27 = vpop.f32.mrb[16].mxu0  ;;  %3690 = vrot.lane.b32.xlu0 %v16789_v23, %s16712_s27  ;;  %3970 = vrot.lane.b32.xlu1 %v16793_v7, %s16714_s19  ;;  %v4176_v2 = vsel %vm2134_vm7, %v4144_v54, %v12624_v46  ;;  %v4116_v54 = vsel %vm2068_vm5, %v16753_v22, %v16809_v44 }
 0x5ea   : > { %v12650_v58 = vpop.f32.mrb[17].mxu0 }
 0x5eb   : > { %v12654_v4 = vpop.permute.xlu0 %3674  ;;  %v3955_v37 = vpop.permute.xlu1 %3954 }
 0x5ec   : > { %v4303_v12 = vsel %vm2266_vm11, %v4271_v0, %v3955_v37  ;;  %v3351_v37 = vrot.slane %v3165_v45, 1  ;;  %v4208_v42 = vsel %vm2167_vm8, %v4176_v2, %v12654_v4  ;;  %v4177_v4 = vsel %vm2134_vm7, %v4145_v25, %v12630_v24  ;;  %v16810_v2 = vld [vmem:[#allocation75_spill] sm:$0xff] }
 0x5ed   : > { %4058 = vrot.lane.b32.xlu0 %v3343_v43, %s16715_s14  ;;  %3692 = vrot.lane.b32.xlu1 %v16793_v7, %s16712_s27 }
 0x5ee   : > { %v3352_v53 = vsel %vm1126_vm3, %v3349_v63, %v3351_v37 }
 0x5ef   : > { %v4043_v17 = vpop.permute.xlu0 %4042  ;;  %v12679_v48 = vpop.permute.xlu1 %3676 }
 0x5f0   : > { %v4334_v1 = vsel %vm495_vm0, %v4302_v18, %v4043_v17  ;;  %v4209_v34 = vsel %vm2167_vm8, %v4177_v4, %v12679_v48 }
 0x5f1   : > { %3786 = vrot.lane.b32.xlu0 %v3343_v43, %s16713_s22  ;;  %4060 = vrot.lane.b32.xlu1 %v3345_v16, %s16715_s14 }
 0x5f2   : > { %8540 = vmatprep.mubr.msk.f32.mxu0 %vm2336_vm12, %v4334_v1  ;;  %v3355_v1 = vsel %vm1207_vm2, %v3353_v8, %v3354_v35  ;;  %v16807_v8 = vld [vmem:[#allocation51_spill] sm:$0xff] }
 0x5f3   : > { %v3771_v47 = vpop.permute.xlu0 %3770  ;;  %v4045_v23 = vpop.permute.xlu1 %4044 }
 0x5f4   : > { %v4335_v9 = vsel %vm495_vm0, %v4303_v12, %v4045_v23  ;;  %v4240_v21 = vsel %vm2200_vm9, %v4208_v42, %v3771_v47  ;;  %v16811_v42 = vld [vmem:[#allocation50_spill] sm:$0xff] }
 0x5f5   : > { %3504 = vrot.lane.b32.xlu0 %v3343_v43, %s16747_s24  ;;  %3788 = vrot.lane.b32.xlu1 %v3345_v16, %s16713_s22 }
 0x5f6   : > { %8541 = vmatmul.mubr.msk.f32.gmra.mrb[34].mxu0 %vm2336_vm12, %v4335_v9 }
 0x5f7   : > { %v12698_v51 = vpop.permute.xlu0 %3488  ;;  %v3773_v36 = vpop.permute.xlu1 %3772 }
 0x5f8   : > { %v4241_v47 = vsel %vm2200_vm9, %v4209_v34, %v3773_v36 }
 0x5f9   : > { %3506 = vrot.lane.b32.xlu1 %v3345_v16, %s16747_s24  ;;  %3882 = vrot.lane.b32.xlu0 %v3149_v29, %s16073_s17  ;;  %v3356_v16 = vrot.slane %v3165_v45, 2  ;;  %v16805_v45 = vld [vmem:[#allocation39_spill] sm:$0xff] }
 0x5fb   : > { %v3867_v40 = vpop.permute.xlu0 %3866  ;;  %v12704_v11 = vpop.permute.xlu1 %3490  ;;  %v3357_v12 = vsel %vm1207_vm2, %v3354_v35, %v3356_v16  ;;  %v16808_v35 = vld [vmem:[#allocation38_spill] sm:$0xff] }
 0x5fc   : > { %v4272_v46 = vsel %vm2233_vm10, %v4240_v21, %v3867_v40  ;;  %v16812_v21 = vld [vmem:[#allocation23_spill] sm:$0xff] }
 0x5fd   : > { %3598 = vrot.lane.b32.xlu0 %v3149_v29, %s16075_s15  ;;  %3884 = vrot.lane.b32.xlu1 %v3086_v56, %s16073_s17  ;;  %v16803_v29 = vld [vmem:[#allocation27_spill] sm:$0xff]  ;;  %v4117_v22 = vsel %vm2068_vm5, %v16754_v28, %v16812_v21 }
 0x5ff   : > { %v12709_v7 = vpop.permute.xlu0 %3582  ;;  %v3869_v62 = vpop.permute.xlu1 %3868 }
 0x600   : > { %v4273_v60 = vsel %vm2233_vm10, %v4241_v47, %v3869_v62 }
 0x601   : > { %v12712_v49 = vpop.f32.mrb[18].mxu0  ;;  %3600 = vrot.lane.b32.xlu1 %v3086_v56, %s16075_s15  ;;  %3972 = vrot.lane.b32.xlu0 %v3350_v30, %s16714_s19  ;;  %v16804_v56 = vld [vmem:[#allocation16_spill] sm:$0xff] }
 0x602   : > { %v12716_v39 = vpop.f32.mrb[19].mxu0 }
 0x603   : > { %v3957_v43 = vpop.permute.xlu0 %3956  ;;  %v12718_v41 = vpop.permute.xlu1 %3584 }
 0x604   : > { %v4304_v5 = vsel %vm2266_vm11, %v4272_v46, %v3957_v43  ;;  %v16813_v46 = vld [vmem:[#allocation105_spill] sm:$0xff] }
 0x605   : > { %3974 = vrot.lane.b32.xlu1 %v3352_v53, %s16714_s19  ;;  %3694 = vrot.lane.b32.xlu0 %v3350_v30, %s16712_s27  ;;  %v16806_v30 = vld [vmem:[#allocation26_spill] sm:$0xff] }
 0x607   : > { %v3679_v18 = vpop.permute.xlu0 %3678  ;;  %v3959_v17 = vpop.permute.xlu1 %3958 }
 0x608   : > { %v4305_v24 = vsel %vm2266_vm11, %v4273_v60, %v3959_v17  ;;  %v4146_v17 = vsel %vm2101_vm6, %v4116_v54, %v12698_v51  ;;  %v4147_v51 = vsel %vm2101_vm6, %v4117_v22, %v12704_v11  ;;  %v16815_v11 = vld [vmem:[#allocation131_spill] sm:$0xff]  ;;  %v16816_v60 = vld [vmem:[#allocation104_spill] sm:$0xff]  ;;  %v16823_v54 = vld [vmem:[#allocation41_spill] sm:$0xff] }
 0x609   : > { %3696 = vrot.lane.b32.xlu1 %v3352_v53, %s16712_s27  ;;  %4062 = vrot.lane.b32.xlu0 %v3355_v1, %s16715_s14  ;;  %v16827_v22 = vld [vmem:[#allocation40_spill] sm:$0xff] }
 0x60b   : > { %v4047_v19 = vpop.permute.xlu0 %4046  ;;  %v3681_v50 = vpop.permute.xlu1 %3680 }
 0x60c   : > { %v4336_v0 = vsel %vm495_vm0, %v4304_v5, %v4047_v19 }
 0x60d   : > { %8543 = vmatprep.mubr.msk.f32.mxu0 %vm2336_vm12, %v4336_v0  ;;  %4064 = vrot.lane.b32.xlu1 %v3357_v12, %s16715_s14 }
 0x60e   : > { %3790 = vrot.lane.b32.xlu0 %v3355_v1, %s16713_s22  ;;  %v4178_v1 = vsel %vm2134_vm7, %v4146_v17, %v12709_v7  ;;  %v16814_v7 = vld [vmem:[#allocation74_spill] sm:$0xff] }
 0x60f   : > { %v3775_v23 = vpop.permute.xlu0 %3774  ;;  %v4049_v9 = vpop.permute.xlu1 %4048  ;;  %v4210_v20 = vsel %vm2167_vm8, %v4178_v1, %v3679_v18  ;;  %v4179_v18 = vsel %vm2134_vm7, %v4147_v51, %v12718_v41  ;;  %v16825_v1 = vld [vmem:[#allocation93_spill] sm:$0xff] }
 0x610   : > { %v4337_v48 = vsel %vm495_vm0, %v4305_v24, %v4049_v9  ;;  %v4242_v25 = vsel %vm2200_vm9, %v4210_v20, %v3775_v23  ;;  %v4211_v34 = vsel %vm2167_vm8, %v4179_v18, %v3681_v50  ;;  %v16817_v9 = vld [vmem:[#allocation156_spill] sm:$0xff]  ;;  %v16826_v20 = vld [vmem:[#allocation53_spill] sm:$0xff] }
 0x611   : > { %8544 = vmatmul.mubr.msk.f32.gmra.mrb[36].mxu0 %vm2336_vm12, %v4337_v48  ;;  %4865 = vrot.lane.b32.xlu1 %v16802_v26, %s8963_s23  ;;  %v16818_v48 = vld [vmem:[#allocation130_spill] sm:$0xff] }
 0x612   : > { %3792 = vrot.lane.b32.xlu0 %v3357_v12, %s16713_s22 }
 0x613   : > { %v12760_v3 = vpop.permute.xlu0 %3492  ;;  %v3777_v36 = vpop.permute.xlu1 %3776 }
 0x614   : > { %v4243_v12 = vsel %vm2200_vm9, %v4211_v34, %v3777_v36 }
 0x615   : > { %4869 = vrot.lane.b32.xlu1 %v16803_v29, %s8963_s23 }
 0x616   : > { %4867 = vrot.lane.b32.xlu0 %v16804_v56, %s8963_s23  ;;  %v16819_v56 = vld [vmem:[#allocation19_spill] sm:$0xff] }
 0x617   : > { %v3871_v40 = vpop.permute.xlu0 %3870  ;;  %v12766_v57 = vpop.permute.xlu1 %3494 }
 0x618   : > { %v4274_v4 = vsel %vm2233_vm10, %v4242_v25, %v3871_v40 }
 0x619   : > { %v12768_v63 = vpop.f32.mrb[20].mxu0  ;;  %4873 = vrot.lane.b32.xlu1 %v16805_v45, %s8963_s23  ;;  %v16820_v45 = vld [vmem:[#allocation155_spill] sm:$0xff] }
 0x61a   : > { %v12772_v62 = vpop.f32.mrb[21].mxu0  ;;  %4871 = vrot.lane.b32.xlu0 %v16806_v30, %s8963_s23 }
 0x61b   : > { %v3587_v37 = vpop.permute.xlu0 %3586  ;;  %v3873_v43 = vpop.permute.xlu1 %3872 }
 0x61c   : > { %v4275_v47 = vsel %vm2233_vm10, %v4243_v12, %v3873_v43 }
 0x61d   : > { %4877 = vrot.lane.b32.xlu1 %v16807_v8, %s8963_s23  ;;  %v16821_v8 = vld [vmem:[#allocation29_spill] sm:$0xff] }
 0x61e   : > { %4875 = vrot.lane.b32.xlu0 %v16808_v35, %s8963_s23  ;;  %v16822_v35 = vld [vmem:[#allocation17_spill] sm:$0xff] }
 0x61f   : > { %v3961_v53 = vpop.permute.xlu0 %3960  ;;  %v12780_v31 = vpop.permute.xlu1 %3588 }
 0x620   : > { %v4306_v5 = vsel %vm2266_vm11, %v4274_v4, %v3961_v53 }
 0x621   : > { %4881 = vrot.lane.b32.xlu1 %v16810_v2, %s8963_s23  ;;  %v16824_v2 = vld [vmem:[#allocation28_spill] sm:$0xff] }
 0x622   : > { %4879 = vrot.lane.b32.xlu0 %v16811_v42, %s8963_s23 }
 0x623   : > { %v3683_v16 = vpop.permute.xlu0 %3682  ;;  %v3963_v55 = vpop.permute.xlu1 %3962 }
 0x624   : > { %v4307_v41 = vsel %vm2266_vm11, %v4275_v47, %v3963_v55  ;;  %v4118_v55 = vsel %vm2068_vm5, %v16758_v10, %v16825_v1 }
 0x625   : > { %4885 = vrot.lane.b32.xlu1 %v16813_v46, %s8963_s23  ;;  %v4148_v21 = vsel %vm2101_vm6, %v4118_v55, %v12760_v3 }
 0x626   : > { %4883 = vrot.lane.b32.xlu0 %v16814_v7, %s8963_s23  ;;  %v4180_v25 = vsel %vm2134_vm7, %v4148_v21, %v3587_v37  ;;  %v16828_v7 = vld [vmem:[#allocation76_spill] sm:$0xff] }
 0x627   : > { %v4051_v19 = vpop.permute.xlu0 %4050  ;;  %v3685_v28 = vpop.permute.xlu1 %3684  ;;  %v4212_v4 = vsel %vm2167_vm8, %v4180_v25, %v3683_v16  ;;  %v4119_v18 = vsel %vm2068_vm5, %v16759_v33, %v16828_v7  ;;  %v16830_v37 = vld [vmem:[#allocation52_spill] sm:$0xff] }
 0x628   : > { %v4338_v0 = vsel %vm495_vm0, %v4306_v5, %v4051_v19  ;;  %v16829_v5 = vld [vmem:[#allocation79_spill] sm:$0xff]  ;;  %v4149_v3 = vsel %vm2101_vm6, %v4119_v18, %v12766_v57  ;;  %v16831_v57 = vld [vmem:[#allocation109_spill] sm:$0xff] }
 0x629   : > { %8546 = vmatprep.mubr.msk.f32.mxu0 %vm2336_vm12, %v4338_v0  ;;  %4889 = vrot.lane.b32.xlu1 %v16815_v11, %s8963_s23  ;;  %v4181_v16 = vsel %vm2134_vm7, %v4149_v3, %v12780_v31  ;;  %v16839_v18 = vld [vmem:[#allocation113_spill] sm:$0xff] }
 0x62a   : > { %4887 = vrot.lane.b32.xlu0 %v16816_v60, %s8963_s23  ;;  %v4213_v12 = vsel %vm2167_vm8, %v4181_v16, %v3685_v28 }
 0x62b   : > { %v3779_v24 = vpop.permute.xlu0 %3778  ;;  %v4053_v23 = vpop.permute.xlu1 %4052 }
 0x62c   : > { %v4339_v50 = vsel %vm495_vm0, %v4307_v41, %v4053_v23  ;;  %v4244_v10 = vsel %vm2200_vm9, %v4212_v4, %v3779_v24  ;;  %v16832_v41 = vld [vmem:[#allocation78_spill] sm:$0xff] }
 0x62d   : > { %8547 = vmatmul.mubr.msk.f32.gmra.mrb[38].mxu0 %vm2336_vm12, %v4339_v50  ;;  %4893 = vrot.lane.b32.xlu1 %v16817_v9, %s8963_s23  ;;  %v16833_v9 = vld [vmem:[#allocation135_spill] sm:$0xff] }
 0x62e   : > { %4891 = vrot.lane.b32.xlu0 %v16818_v48, %s8963_s23 }
 0x62f   : > { %v12824_v26 = vpop.permute.xlu0 %3496  ;;  %v3781_v36 = vpop.permute.xlu1 %3780 }
 0x630   : > { %v4245_v47 = vsel %vm2200_vm9, %v4213_v12, %v3781_v36  ;;  %v16834_v36 = vld [vmem:[#allocation108_spill] sm:$0xff] }
 0x631   : > { %v12826_v29 = vpop.f32.mrb[22].mxu0  ;;  %4897 = vrot.lane.b32.xlu1 %v16819_v56, %s8963_s23 }
 0x632   : > { %v12830_v40 = vpop.f32.mrb[23].mxu0  ;;  %4895 = vrot.lane.b32.xlu0 %v16820_v45, %s8963_s23 }
 0x633   : > { %v3875_v30 = vpop.permute.xlu0 %3874  ;;  %v12834_v43 = vpop.permute.xlu1 %3498 }
 0x634   : > { %v4276_v19 = vsel %vm2233_vm10, %v4244_v10, %v3875_v30  ;;  %v16835_v30 = vld [vmem:[#allocation160_spill] sm:$0xff]  ;;  %v4121_v10 = vsel %vm2068_vm5, %v16769_v38, %v16839_v18 }
 0x635   : > { %4901 = vrot.lane.b32.xlu1 %v16821_v8, %s8963_s23  ;;  %v16836_v8 = vld [vmem:[#allocation134_spill] sm:$0xff]  ;;  %v4151_v3 = vsel %vm2101_vm6, %v4121_v10, %v12834_v43 }
 0x636   : > { %4899 = vrot.lane.b32.xlu0 %v16822_v35, %s8963_s23 }
 0x637   : > { %v3591_v53 = vpop.permute.xlu0 %3590  ;;  %v3877_v44 = vpop.permute.xlu1 %3876 }
 0x638   : > { %v4277_v60 = vsel %vm2233_vm10, %v4245_v47, %v3877_v44 }
 0x639   : > { %4905 = vrot.lane.b32.xlu1 %v16823_v54, %s8963_s23  ;;  %v16837_v54 = vld [vmem:[#allocation159_spill] sm:$0xff] }
 0x63a   : > { %4903 = vrot.lane.b32.xlu0 %v16824_v2, %s8963_s23 }
 0x63b   : > { %v3965_v17 = vpop.permute.xlu0 %3964  ;;  %v3593_v42 = vpop.permute.xlu1 %3592 }
 0x63c   : > { %v4308_v34 = vsel %vm2266_vm11, %v4276_v19, %v3965_v17  ;;  %v4183_v19 = vsel %vm2134_vm7, %v4151_v3, %v3593_v42 }
 0x63d   : > { %4909 = vrot.lane.b32.xlu1 %v16826_v20, %s8963_s23  ;;  %v16838_v20 = vld [vmem:[#allocation101_spill] sm:$0xff] }
 0x63e   : > { %4907 = vrot.lane.b32.xlu0 %v16827_v22, %s8963_s23  ;;  %v4120_v21 = vsel %vm2068_vm5, %v16768_v13, %v16838_v20 }
 0x63f   : > { %v3687_v46 = vpop.permute.xlu0 %3686  ;;  %v3967_v51 = vpop.permute.xlu1 %3966  ;;  %v4150_v22 = vsel %vm2101_vm6, %v4120_v21, %v12824_v26 }
 0x640   : > { %v4309_v31 = vsel %vm2266_vm11, %v4277_v60, %v3967_v51  ;;  %v4182_v25 = vsel %vm2134_vm7, %v4150_v22, %v3591_v53 }
 0x641   : > { %4913 = vrot.lane.b32.xlu1 %v16829_v5, %s8963_s23  ;;  %v4214_v7 = vsel %vm2167_vm8, %v4182_v25, %v3687_v46 }
 0x642   : > { %4911 = vrot.lane.b32.xlu0 %v16830_v37, %s8963_s23 }
 0x643   : > { %v4055_v0 = vpop.permute.xlu0 %4054  ;;  %v3689_v33 = vpop.permute.xlu1 %3688 }
 0x644   : > { %v4340_v11 = vsel %vm495_vm0, %v4308_v34, %v4055_v0  ;;  %v4215_v16 = vsel %vm2167_vm8, %v4183_v19, %v3689_v33  ;;  %v12960_v19 = vld [vmem:[%s15784_s6 + $0x1] ss:$0 sm:$0xff] }
 0x645   : > { %8549 = vmatprep.mubr.msk.f32.mxu0 %vm2336_vm12, %v4340_v11  ;;  %4917 = vrot.lane.b32.xlu1 %v16831_v57, %s8963_s23 }
 0x646   : > { %4915 = vrot.lane.b32.xlu0 %v16832_v41, %s8963_s23 }
 0x647   : > { %v3783_v24 = vpop.permute.xlu0 %3782  ;;  %v4057_v23 = vpop.permute.xlu1 %4056 }
 0x648   : > { %v4341_v28 = vsel %vm495_vm0, %v4309_v31, %v4057_v23  ;;  %v4246_v5 = vsel %vm2200_vm9, %v4214_v7, %v3783_v24 }
 0x649   : > { %v12880_v50 = vpop.f32.mrb[24].mxu0  ;;  %8550 = vmatmul.mubr.msk.f32.gmra.mrb[40].mxu0 %vm2336_vm12, %v4341_v28  ;;  %4921 = vrot.lane.b32.xlu1 %v16833_v9, %s8963_s23  ;;  %v16840_v9 = vld [vmem:[#allocation49_spill] sm:$0xff] }
 0x64a   : > { %v12885_v48 = vpop.f32.mrb[25].mxu0  ;;  %4919 = vrot.lane.b32.xlu0 %v16834_v36, %s8963_s23  ;;  %v4122_v36 = vsel %vm2068_vm5, %v16778_v32, %v16840_v9 }
 0x64b   : > { %v3501_v56 = vpop.permute.xlu0 %3500  ;;  %v3785_v45 = vpop.permute.xlu1 %3784 }
 0x64c   : > { %v4247_v34 = vsel %vm2200_vm9, %v4215_v16, %v3785_v45  ;;  %v4152_v45 = vsel %vm2101_vm6, %v4122_v36, %v3501_v56  ;;  %v12942_v56 = vld [vmem:[%s15783_s5 + $0x1] ss:$0 sm:$0xff] }
 0x64d   : > { %4925 = vrot.lane.b32.xlu1 %v16835_v30, %s8963_s23  ;;  %v4686_v3 = vmul.f32 %v12942_v56, %v12650_v58  ;;  %v16843_v58 = vld [vmem:[#allocation106_spill] sm:$0xff]  ;;  %v16847_v36 = vld [vmem:[#allocation81_spill] sm:$0xff] }
 0x64e   : > { %4923 = vrot.lane.b32.xlu0 %v16836_v8, %s8963_s23 }
 0x64f   : > { %v3879_v35 = vpop.permute.xlu0 %3878  ;;  %v3503_v44 = vpop.permute.xlu1 %3502 }
 0x650   : > { %v4278_v13 = vsel %vm2233_vm10, %v4246_v5, %v3879_v35 }
 0x652   : > { %4927 = vrot.lane.b32.xlu0 %v16837_v54, %s8963_s23 }
 0x653   : > { %v3595_v2 = vpop.permute.xlu0 %3594  ;;  %v3881_v17 = vpop.permute.xlu1 %3880 }
 0x654   : > { %v4279_v43 = vsel %vm2233_vm10, %v4247_v34, %v3881_v17  ;;  %v4184_v30 = vsel %vm2134_vm7, %v4152_v45, %v3595_v2  ;;  %v16841_v17 = vld [vmem:[#allocation30_spill] sm:$0xff]  ;;  %v4125_v34 = vsel %vm2068_vm5, %v16788_v15, %v16843_v58 }
 0x657   : > { %v3969_v1 = vpop.permute.xlu0 %3968  ;;  %v3597_v55 = vpop.permute.xlu1 %3596 }
 0x658   : > { %v4310_v26 = vsel %vm2266_vm11, %v4278_v13, %v3969_v1  ;;  %v4123_v1 = vsel %vm2068_vm5, %v16779_v14, %v16841_v17 }
 0x659   : > { %v4153_v22 = vsel %vm2101_vm6, %v4123_v1, %v3503_v44  ;;  %v16842_v44 = vld [vmem:[#allocation24_spill] sm:$0xff]  ;;  %v16851_v1 = vld [vmem:[#allocation58_spill] sm:$0xff] }
 0x65a   : > { %v4185_v2 = vsel %vm2134_vm7, %v4153_v22, %v3597_v55  ;;  %v4124_v10 = vsel %vm2068_vm5, %v16787_v59, %v16842_v44  ;;  %v4689_v44 = vmul.f32 %v12712_v49, %v12942_v56 }
 0x65b   : > { %v3691_v51 = vpop.permute.xlu0 %3690  ;;  %v3971_v4 = vpop.permute.xlu1 %3970 }
 0x65c   : > { %v4311_v42 = vsel %vm2266_vm11, %v4279_v43, %v3971_v4  ;;  %v4216_v54 = vsel %vm2167_vm8, %v4184_v30, %v3691_v51 }
 0x65f   : > { %v4059_v53 = vpop.permute.xlu0 %4058  ;;  %v3693_v37 = vpop.permute.xlu1 %3692 }
 0x660   : > { %v4342_v46 = vsel %vm495_vm0, %v4310_v26, %v4059_v53  ;;  %v4217_v7 = vsel %vm2167_vm8, %v4185_v2, %v3693_v37 }
 0x661   : > { %v12914_v38 = vpop.f32.mrb[26].mxu0  ;;  %8552 = vmatprep.mubr.msk.f32.mxu0 %vm2336_vm12, %v4342_v46 }
 0x662   : > { %v12918_v0 = vpop.f32.mrb[27].mxu0 }
 0x663   : > { %v3787_v12 = vpop.permute.xlu0 %3786  ;;  %v4061_v11 = vpop.permute.xlu1 %4060 }
 0x664   : > { %v4343_v47 = vsel %vm495_vm0, %v4311_v42, %v4061_v11  ;;  %v4248_v20 = vsel %vm2200_vm9, %v4216_v54, %v3787_v12  ;;  %v12972_v42 = vadd.f32 %v12960_v19, %v4686_v3  ;;  %v16845_v11 = vld [vmem:[#allocation150_spill] sm:$0xff] }
 0x665   : > { %8553 = vmatmul.mubr.msk.f32.gmra.mrb[42].mxu0 %vm2336_vm12, %v4343_v47 }
 0x666   : > { %16844 = vst [vmem:[#allocation123_spill] sm:$0xff] %v12972_v42 }
 0x667   : > { %v3505_v33 = vpop.permute.xlu0 %3504  ;;  %v3789_v57 = vpop.permute.xlu1 %3788 }
 0x668   : > { %v4249_v5 = vsel %vm2200_vm9, %v4217_v7, %v3789_v57  ;;  %v4154_v55 = vsel %vm2101_vm6, %v4124_v10, %v3505_v33  ;;  %v4687_v33 = vmul.f32 %v12642_v27, %v12942_v56  ;;  %v16848_v27 = vld [vmem:[#allocation55_spill] sm:$0xff] }
 0x66b   : > { %v3507_v60 = vpop.permute.xlu1 %3506  ;;  %v3883_v41 = vpop.permute.xlu0 %3882 }
 0x66c   : > { %v4280_v32 = vsel %vm2233_vm10, %v4248_v20, %v3883_v41  ;;  %v4155_v12 = vsel %vm2101_vm6, %v4125_v34, %v3507_v60 }
 0x66f   : > { %v3599_v31 = vpop.permute.xlu0 %3598  ;;  %v3885_v24 = vpop.permute.xlu1 %3884 }
 0x670   : > { %v4281_v13 = vsel %vm2233_vm10, %v4249_v5, %v3885_v24  ;;  %v4186_v26 = vsel %vm2134_vm7, %v4154_v55, %v3599_v31  ;;  %v16846_v31 = vld [vmem:[#allocation149_spill] sm:$0xff] }
 0x673   : > { %v3601_v23 = vpop.permute.xlu1 %3600  ;;  %v3973_v28 = vpop.permute.xlu0 %3972 }
 0x674   : > { %v4312_v51 = vsel %vm2266_vm11, %v4280_v32, %v3973_v28  ;;  %v4187_v57 = vsel %vm2134_vm7, %v4155_v12, %v3601_v23 }
 0x677   : > { %v3975_v8 = vpop.permute.xlu1 %3974  ;;  %v3695_v35 = vpop.permute.xlu0 %3694 }
 0x678   : > { %v4313_v59 = vsel %vm2266_vm11, %v4281_v13, %v3975_v8  ;;  %v4218_v37 = vsel %vm2167_vm8, %v4186_v26, %v3695_v35  ;;  %v12991_v8 = vadd.f32 %v12960_v19, %v4687_v33  ;;  %v16850_v35 = vld [vmem:[#allocation54_spill] sm:$0xff] }
 0x679   : > { %v12933_v21 = vpop.f32.mrb[28].mxu0 }
 0x67a   : > { %v12937_v25 = vpop.f32.mrb[29].mxu0  ;;  %16849 = vst [vmem:[#allocation144_spill] sm:$0xff] %v12991_v8 }
 0x67b   : > { %v3697_v14 = vpop.permute.xlu1 %3696  ;;  %v4063_v4 = vpop.permute.xlu0 %4062 }
 0x67c   : > { %v4344_v18 = vsel %vm495_vm0, %v4312_v51, %v4063_v4  ;;  %v4219_v24 = vsel %vm2167_vm8, %v4187_v57, %v3697_v14 }
 0x67d   : > { %8555 = vmatprep.mubr.msk.f32.mxu0 %vm2336_vm12, %v4344_v18  ;;  %v4688_v18 = vmul.f32 %v12942_v56, %v12716_v39 }
 0x67f   : > { %v4065_v53 = vpop.permute.xlu1 %4064 }
 0x680   : > { %v4345_v16 = vsel %vm495_vm0, %v4313_v59, %v4065_v53  ;;  %v3791_v46 = vpop.permute.xlu0 %3790  ;;  %v13025_v59 = vadd.f32 %v12960_v19, %v4688_v18  ;;  %v13029_v53 = vadd.f32 %v12960_v19, %v4689_v44 }
 0x681   : > { %v4250_v43 = vsel %vm2200_vm9, %v4218_v37, %v3791_v46  ;;  %8556 = vmatmul.mubr.msk.f32.gmra.mrb[44].mxu0 %vm2336_vm12, %v4345_v16 }
 0x682   : > { %v4282_v47 = vsel %vm2233_vm10, %v4250_v43, %v16845_v11  ;;  %16853 = vst [vmem:[#allocation129_spill] sm:$0xff] %v13025_v59  ;;  %16854 = vst [vmem:[#allocation42_spill] sm:$0xff] %v13029_v53 }
 0x683   : > { %v4866_v41 = vpop.permute.xlu1 %4865  ;;  %v4314_v15 = vsel %vm2266_vm11, %v4282_v47, %v16846_v31 }
 0x684   : > { %v4961_v28 = vadd.f32 %v4866_v41, %v12972_v42  ;;  %v3793_v9 = vpop.permute.xlu0 %3792  ;;  %v4346_v60 = vsel %vm495_vm0, %v4314_v15, %v16847_v36 }
 0x685   : > { %v4251_v45 = vsel %vm2200_vm9, %v4219_v24, %v3793_v9  ;;  %8558 = vmatprep.mubr.msk.f32.mxu0 %vm2336_vm12, %v4346_v60  ;;  %v8121_v24 = vld [vmem:[%s15782_s4 + $0x50] sm:$0xff]  ;;  %v8123_v9 = vld [vmem:[%s15782_s4 + $0x60] sm:$0xff] }
 0x686   : > { %v5025_v30 = vrot.slane %v4961_v28, 7  ;;  %v4283_v23 = vsel %vm2233_vm10, %v4251_v45, %v16848_v27  ;;  %v8122_v28 = vld [vmem:[%s15782_s4 + $0x58] sm:$0xff] }
 0x687   : > { %v4315_v54 = vsel %vm2266_vm11, %v4283_v23, %v16850_v35  ;;  %v4870_v13 = vpop.permute.xlu1 %4869  ;;  %v8695_v23 = vpack.c.bf16 %v8122_v28, %v8121_v24 }
 0x688   : > { %v4868_v17 = vpop.permute.xlu0 %4867  ;;  %v4347_v20 = vsel %vm495_vm0, %v4315_v54, %v16851_v1  ;;  %v12998_v22 = vsel %vm960_vm1, 0.0, %v5025_v30  ;;  %v4963_v16 = vadd.f32 %v4870_v13, %v13025_v59 }
 0x689   : > { %v4962_v32 = vadd.f32 %v4868_v17, %v12991_v8  ;;  %8559 = vmatmul.mubr.msk.f32.gmra.mrb[46].mxu0 %vm2336_vm12, %v4347_v20  ;;  %5524 = vrot.lane.b32.xlu1 %v12998_v22, %s16075_s15  ;;  %v5182_v4 = vrot.slane %v12998_v22, 1  ;;  %v5257_v39 = vrot.slane %v12998_v22, 2 }
 0x68a   : > { %v5028_v43 = vrot.slane %v4963_v16, 7  ;;  %8696 = vmatprep.subr.bf16.mxu1 %v8695_v23 }
 0x68b   : > { %v5026_v2 = vrot.slane %v4962_v32, 7  ;;  %8698 = vmatpush3.bf16.msra.mxu1 %v8695_v23 }
 0x68c   : > { %v4872_v49 = vpop.permute.xlu0 %4871  ;;  %v13041_v33 = vsel %vm960_vm1, 0.0, %v5028_v43 }
 0x68d   : > { %v5136_v51 = vsel %vm960_vm1, %v5026_v2, 0.0  ;;  %v13006_v14 = vsel %vm960_vm1, %v5025_v30, %v5026_v2  ;;  %v4964_v58 = vadd.f32 %v4872_v49, %v13029_v53  ;;  %v5187_v15 = vrot.slane %v13041_v33, 1  ;;  %v8124_v30 = vld [vmem:[%s15782_s4 + $0x68] sm:$0xff]  ;;  %v8125_v2 = vld [vmem:[%s15782_s4 + $0x70] sm:$0xf] }
 0x68e   : > { %5526 = vrot.lane.b32.xlu0 %v13006_v14, %s16075_s15  ;;  %v5183_v7 = vrot.slane %v13006_v14, 1  ;;  %v5185_v10 = vrot.slane %v5136_v51, 1  ;;  %v5258_v3 = vrot.slane %v13006_v14, 2  ;;  %v5260_v34 = vrot.slane %v5136_v51, 2 }
 0x68f   : > { %v5029_v12 = vrot.slane %v4964_v58, 7  ;;  %v8699_v54 = vpack.c.bf16 %v8124_v30, %v8123_v9  ;;  %v5262_v32 = vrot.slane %v13041_v33, 2 }
 0x690   : > { %v5184_v5 = vsel %vm1126_vm3, %v5182_v4, %v5183_v7  ;;  %v5186_v37 = vsel %vm1126_vm3, %v5183_v7, %v5185_v10  ;;  %v5259_v46 = vsel %vm1207_vm2, %v5257_v39, %v5258_v3  ;;  %v5261_v47 = vsel %vm1207_vm2, %v5258_v3, %v5260_v34  ;;  %v4874_v4 = vpop.permute.xlu1 %4873  ;;  %v4876_v44 = vpop.permute.xlu0 %4875 }
 0x691   : > { %v13018_v55 = vpop.f32.mrb[30].mxu0  ;;  %5620 = vrot.lane.b32.xlu1 %v5184_v5, %s16712_s27  ;;  %v13047_v57 = vsel %vm960_vm1, %v5028_v43, %v5029_v12  ;;  %v5137_v60 = vsel %vm960_vm1, %v5029_v12, 0.0  ;;  %8700 = vmatprep.subr.bf16.mxu1 %v8699_v54  ;;  %v4691_v3 = vmul.f32 %v12768_v63, %v12942_v56 }
 0x692   : > { %v13021_v26 = vpop.f32.mrb[31].mxu0  ;;  %5344 = vrot.lane.b32.xlu0 %v5184_v5, %s16852_s16  ;;  %v5188_v41 = vrot.slane %v13047_v57, 1  ;;  %v5190_v17 = vrot.slane %v5137_v60, 1  ;;  %v5263_v20 = vrot.slane %v13047_v57, 2  ;;  %8702 = vmatpush3.bf16.msra.mxu1 %v8699_v54  ;;  %v4690_v5 = vmul.f32 %v12942_v56, %v12772_v62 }
 0x693   : > { %8569 = vmatprep.subr.msk.mxu1 %vm2433_vm4, %v8125_v2  ;;  %v5265_v13 = vrot.slane %v5137_v60, 2 }
 0x694   : > { %v5189_v45 = vsel %vm1126_vm3, %v5187_v15, %v5188_v41  ;;  %v5191_v51 = vsel %vm1126_vm3, %v5188_v41, %v5190_v17  ;;  %v5264_v18 = vsel %vm1207_vm2, %v5262_v32, %v5263_v20  ;;  %v13096_v39 = vadd.f32 %v12960_v19, %v4690_v5  ;;  %v4878_v49 = vpop.permute.xlu1 %4877  ;;  %v4880_v16 = vpop.permute.xlu0 %4879 }
 0x695   : > { %5622 = vrot.lane.b32.xlu1 %v5186_v37, %s16712_s27  ;;  %v5266_v63 = vsel %vm1207_vm2, %v5263_v20, %v5265_v13  ;;  %v4692_v5 = vmul.f32 %v12942_v56, %v12830_v40 }
 0x696   : > { %5716 = vrot.lane.b32.xlu0 %v5259_v46, %s16713_s22  ;;  %8570 = vmatpush3.msk.msra.mxu1 %vm2433_vm4, %v8125_v2  ;;  %16857 = vst [vmem:[#allocation60_spill] sm:$0xff] %v13096_v39  ;;  %v4965_v62 = vadd.f32 %v4874_v4, %v13096_v39  ;;  %v4695_v39 = vmul.f32 %v12880_v50, %v12942_v56 }
 0x698   : > { %v5031_v58 = vrot.slane %v4965_v62, 7  ;;  %v13106_v34 = vpop.permute.xlu1 %4881  ;;  %v13109_v12 = vpop.permute.xlu0 %4883 }
 0x699   : > { %5346 = vrot.lane.b32.xlu1 %v5186_v37, %s16852_s16  ;;  %v13099_v37 = vadd.f32 %v12960_v19, %v4691_v3  ;;  %v4693_v3 = vmul.f32 %v12826_v29, %v12942_v56 }
 0x69a   : > { %5434 = vrot.lane.b32.xlu0 %v5259_v46, %s16747_s24 }
 0x69b   : > { %16858 = vst [vmem:[#allocation136_spill] sm:$0xff] %v13099_v37  ;;  %v4966_v46 = vadd.f32 %v4876_v44, %v13099_v37 }
 0x69c   : > { %v13121_v15 = vpop.permute.xlu1 %4885  ;;  %v13123_v24 = vpop.permute.xlu0 %4887 }
 0x69d   : > { %5718 = vrot.lane.b32.xlu1 %v5261_v47, %s16713_s22  ;;  %v5032_v43 = vrot.slane %v4966_v46, 7  ;;  %v13167_v46 = vadd.f32 %v12960_v19, %v4692_v5 }
 0x69e   : > { %5812 = vrot.lane.b32.xlu0 %v13041_v33, %s16073_s17 }
 0x69f   : > { %v13119_v41 = vsel %vm960_vm1, %v5031_v58, %v5032_v43  ;;  %v5138_v60 = vsel %vm960_vm1, %v5032_v43, 0.0  ;;  %16859 = vst [vmem:[#allocation35_spill] sm:$0xff] %v13167_v46  ;;  %v4967_v40 = vadd.f32 %v4878_v49, %v13167_v46  ;;  %v4694_v46 = vmul.f32 %v12942_v56, %v12885_v48 }
 0x6a0   : > { %v5193_v28 = vrot.slane %v13119_v41, 1  ;;  %v13136_v23 = vpop.permute.xlu0 %4891  ;;  %v5195_v54 = vrot.slane %v5138_v60, 1  ;;  %v5268_v20 = vrot.slane %v13119_v41, 2  ;;  %v5270_v13 = vrot.slane %v5138_v60, 2 }
 0x6a1   : > { %5436 = vrot.lane.b32.xlu1 %v5261_v47, %s16747_s24  ;;  %v13113_v47 = vsel %vm960_vm1, 0.0, %v5031_v58  ;;  %v13170_v58 = vadd.f32 %v12960_v19, %v4693_v3  ;;  %v5034_v60 = vrot.slane %v4967_v40, 7 }
 0x6a2   : > { %5528 = vrot.lane.b32.xlu0 %v13041_v33, %s16075_s15  ;;  %v5192_v9 = vrot.slane %v13113_v47, 1  ;;  %v5271_v29 = vsel %vm1207_vm2, %v5268_v20, %v5270_v13 }
 0x6a3   : > { %16860 = vst [vmem:[#allocation151_spill] sm:$0xff] %v13170_v58  ;;  %v4968_v43 = vadd.f32 %v4880_v16, %v13170_v58  ;;  %v13184_v49 = vsel %vm960_vm1, 0.0, %v5034_v60 }
 0x6a4   : > { %v5194_v30 = vsel %vm1126_vm3, %v5192_v9, %v5193_v28  ;;  %v13150_v4 = vpop.permute.xlu0 %4895 }
 0x6a5   : > { %5814 = vrot.lane.b32.xlu1 %v13047_v57, %s16855_s3 }
 0x6a6   : > { %5902 = vrot.lane.b32.xlu0 %v5189_v45, %s16714_s19 }
 0x6a9   : > { %5530 = vrot.lane.b32.xlu1 %v13047_v57, %s16856_s0 }
 0x6aa   : > { %5624 = vrot.lane.b32.xlu0 %v5189_v45, %s16712_s27 }
 0x6ad   : > { %v13080_v7 = vpop.f32.mrb[32].mxu0  ;;  %5904 = vrot.lane.b32.xlu1 %v5191_v51, %s16714_s19 }
 0x6ae   : > { %v13084_v10 = vpop.f32.mrb[33].mxu0  ;;  %5992 = vrot.lane.b32.xlu0 %v5264_v18, %s16715_s14 }
 0x6b1   : > { %5348 = vrot.lane.b32.xlu1 %v5189_v45, %s16852_s16  ;;  %v13131_v45 = vpop.permute.xlu1 %4889 }
 0x6b2   : > { %5626 = vrot.lane.b32.xlu0 %v5191_v51, %s16712_s27 }
 0x6b5   : > { %5720 = vrot.lane.b32.xlu1 %v5264_v18, %s16713_s22  ;;  %v13147_v2 = vpop.permute.xlu1 %4893 }
 0x6b6   : > { %5994 = vrot.lane.b32.xlu0 %v5266_v63, %s16715_s14 }
 0x6b9   : > { %5350 = vrot.lane.b32.xlu1 %v5191_v51, %s16852_s16  ;;  %v5267_v51 = vrot.slane %v13113_v47, 2  ;;  %v13160_v62 = vpop.permute.xlu1 %4897 }
 0x6ba   : > { %5438 = vrot.lane.b32.xlu0 %v5264_v18, %s16747_s24  ;;  %v5196_v18 = vsel %vm1126_vm3, %v5193_v28, %v5195_v54 }
 0x6bb   : > { %v5269_v44 = vsel %vm1207_vm2, %v5267_v51, %v5268_v20 }
 0x6bd   : > { %5722 = vrot.lane.b32.xlu1 %v5266_v63, %s16713_s22  ;;  %v13177_v28 = vpop.permute.xlu1 %4901 }
 0x6be   : > { %5816 = vrot.lane.b32.xlu0 %v13113_v47, %s16855_s3 }
 0x6c1   : > { %5440 = vrot.lane.b32.xlu1 %v5266_v63, %s16747_s24  ;;  %v13163_v63 = vpop.permute.xlu0 %4899  ;;  %v13186_v54 = vpop.permute.xlu1 %4905 }
 0x6c2   : > { %5532 = vrot.lane.b32.xlu0 %v13113_v47, %s16856_s0 }
 0x6c5   : > { %5818 = vrot.lane.b32.xlu1 %v13119_v41, %s16855_s3  ;;  %v13179_v9 = vpop.permute.xlu0 %4903 }
 0x6c6   : > { %5906 = vrot.lane.b32.xlu0 %v5194_v30, %s16714_s19 }
 0x6c9   : > { %v13139_v17 = vpop.f32.mrb[34].mxu0  ;;  %5534 = vrot.lane.b32.xlu1 %v13119_v41, %s16856_s0  ;;  %v13189_v16 = vpop.permute.xlu0 %4907 }
 0x6ca   : > { %v13144_v32 = vpop.f32.mrb[35].mxu0  ;;  %5628 = vrot.lane.b32.xlu0 %v5194_v30, %s16712_s27 }
 0x6cd   : > { %5908 = vrot.lane.b32.xlu1 %v5196_v18, %s16714_s19  ;;  %v13203_v5 = vpop.permute.xlu0 %4911 }
 0x6ce   : > { %5996 = vrot.lane.b32.xlu0 %v5269_v44, %s16715_s14  ;;  %16862 = vst [vmem:[#allocation128_spill] sm:$0xff] %v13203_v5 }
 0x6d1   : > { %5352 = vrot.lane.b32.xlu1 %v5194_v30, %s16852_s16  ;;  %v5035_v30 = vrot.slane %v4968_v43, 7  ;;  %v13219_v6 = vpop.permute.xlu0 %4915 }
 0x6d2   : > { %5630 = vrot.lane.b32.xlu0 %v5196_v18, %s16712_s27  ;;  %16864 = vst [vmem:[#allocation68_spill] sm:$0xff] %v13219_v6 }
 0x6d3   : > { %v13194_v20 = vsel %vm960_vm1, %v5034_v60, %v5035_v30  ;;  %v5139_v13 = vsel %vm960_vm1, %v5035_v30, 0.0  ;;  %v5272_v30 = vrot.slane %v13184_v49, 2 }
 0x6d4   : > { %v5198_v51 = vrot.slane %v13194_v20, 1  ;;  %v5200_v43 = vrot.slane %v5139_v13, 1  ;;  %v5273_v61 = vrot.slane %v13194_v20, 2  ;;  %v5275_v59 = vrot.slane %v5139_v13, 2 }
 0x6d5   : > { %5724 = vrot.lane.b32.xlu1 %v5269_v44, %s16713_s22  ;;  %v13233_v53 = vpop.permute.xlu0 %4919 }
 0x6d6   : > { %5998 = vrot.lane.b32.xlu0 %v5271_v29, %s16715_s14  ;;  %v5201_v58 = vsel %vm1126_vm3, %v5198_v51, %v5200_v43  ;;  %16866 = vst [vmem:[#allocation34_spill] sm:$0xff] %v13233_v53  ;;  %v13241_v43 = vadd.f32 %v12960_v19, %v4695_v39  ;;  %v5276_v50 = vsel %vm1207_vm2, %v5273_v61, %v5275_v59 }
 0x6d8   : > { %16868 = vst [vmem:[#allocation169_spill] sm:$0xff] %v13241_v43  ;;  %v4970_v13 = vadd.f32 %v13109_v12, %v13241_v43 }
 0x6d9   : > { %5354 = vrot.lane.b32.xlu1 %v5196_v18, %s16852_s16  ;;  %v13200_v18 = vpop.permute.xlu1 %4909 }
 0x6da   : > { %5442 = vrot.lane.b32.xlu0 %v5269_v44, %s16747_s24  ;;  %16861 = vst [vmem:[#allocation168_spill] sm:$0xff] %v13200_v18  ;;  %v5197_v44 = vrot.slane %v13184_v49, 1  ;;  %v5038_v39 = vrot.slane %v4970_v13, 7 }
 0x6dd   : > { %5726 = vrot.lane.b32.xlu1 %v5271_v29, %s16713_s22  ;;  %v13214_v60 = vpop.permute.xlu1 %4913 }
 0x6de   : > { %5820 = vrot.lane.b32.xlu0 %v13184_v49, %s16855_s3  ;;  %16863 = vst [vmem:[#allocation43_spill] sm:$0xff] %v13214_v60 }
 0x6e1   : > { %5444 = vrot.lane.b32.xlu1 %v5271_v29, %s16747_s24  ;;  %v5199_v29 = vsel %vm1126_vm3, %v5197_v44, %v5198_v51  ;;  %v5274_v44 = vsel %vm1207_vm2, %v5272_v30, %v5273_v61  ;;  %v13229_v37 = vpop.permute.xlu1 %4917  ;;  %v13238_v51 = vadd.f32 %v12960_v19, %v4694_v46 }
 0x6e2   : > { %5536 = vrot.lane.b32.xlu0 %v13184_v49, %s16856_s0  ;;  %16865 = vst [vmem:[#allocation137_spill] sm:$0xff] %v13229_v37 }
 0x6e3   : > { %16867 = vst [vmem:[#allocation152_spill] sm:$0xff] %v13238_v51  ;;  %v4969_v48 = vadd.f32 %v13106_v34, %v13238_v51 }
 0x6e4   : > { %v13205_v3 = vpop.f32.mrb[36].mxu0 }
 0x6e5   : > { %5822 = vrot.lane.b32.xlu1 %v13194_v20, %s16855_s3  ;;  %v13210_v40 = vpop.f32.mrb[37].mxu0  ;;  %v13245_v30 = vpop.permute.xlu1 %4921  ;;  %v5037_v46 = vrot.slane %v4969_v48, 7 }
 0x6e6   : > { %5910 = vrot.lane.b32.xlu0 %v5199_v29, %s16714_s19  ;;  %16869 = vst [vmem:[#allocation158_spill] sm:$0xff] %v13245_v30  ;;  %v4697_v30 = vmul.f32 %v12914_v38, %v12942_v56 }
 0x6e7   : > { %v13261_v42 = vsel %vm960_vm1, 0.0, %v5037_v46  ;;  %v13267_v61 = vsel %vm960_vm1, %v5037_v46, %v5038_v39  ;;  %v5140_v46 = vsel %vm960_vm1, %v5038_v39, 0.0 }
 0x6e8   : > { %v5203_v48 = vrot.slane %v13267_v61, 1  ;;  %v5202_v43 = vrot.slane %v13261_v42, 1  ;;  %v5205_v35 = vrot.slane %v5140_v46, 1  ;;  %v5278_v36 = vrot.slane %v13267_v61, 2 }
 0x6e9   : > { %5538 = vrot.lane.b32.xlu1 %v13194_v20, %s16856_s0  ;;  %v13256_v34 = vpop.permute.xlu1 %4925  ;;  %v5277_v39 = vrot.slane %v13261_v42, 2  ;;  %v5280_v37 = vrot.slane %v5140_v46, 2 }
 0x6ea   : > { %5632 = vrot.lane.b32.xlu0 %v5199_v29, %s16712_s27  ;;  %16871 = vst [vmem:[#allocation69_spill] sm:$0xff] %v13256_v34  ;;  %v5204_v1 = vsel %vm1126_vm3, %v5202_v43, %v5203_v48  ;;  %v5206_v43 = vsel %vm1126_vm3, %v5203_v48, %v5205_v35  ;;  %v4696_v34 = vmul.f32 %v12942_v56, %v12918_v0 }
 0x6eb   : > { %v5281_v38 = vsel %vm1207_vm2, %v5278_v36, %v5280_v37 }
 0x6ec   : > { %v13307_v35 = vadd.f32 %v12960_v19, %v4696_v34 }
 0x6ed   : > { %5912 = vrot.lane.b32.xlu1 %v5201_v58, %s16714_s19 }
 0x6ee   : > { %6000 = vrot.lane.b32.xlu0 %v5274_v44, %s16715_s14  ;;  %16873 = vst [vmem:[#allocation47_spill] sm:$0xff] %v13307_v35  ;;  %v4971_v0 = vadd.f32 %v13121_v15, %v13307_v35  ;;  %v16875_v15 = vld [vmem:[#allocation125_spill] sm:$0xff] }
 0x6f0   : > { %v5040_v60 = vrot.slane %v4971_v0, 7 }
 0x6f1   : > { %5356 = vrot.lane.b32.xlu1 %v5199_v29, %s16852_s16  ;;  %v13251_v29 = vpop.permute.xlu0 %4923 }
 0x6f2   : > { %5634 = vrot.lane.b32.xlu0 %v5201_v58, %s16712_s27  ;;  %16870 = vst [vmem:[#allocation56_spill] sm:$0xff] %v13251_v29  ;;  %v13334_v37 = vsel %vm960_vm1, 0.0, %v5040_v60 }
 0x6f5   : > { %5728 = vrot.lane.b32.xlu1 %v5274_v44, %s16713_s22  ;;  %v13258_v51 = vpop.permute.xlu0 %4927 }
 0x6f6   : > { %6002 = vrot.lane.b32.xlu0 %v5276_v50, %s16715_s14  ;;  %16872 = vst [vmem:[#allocation164_spill] sm:$0xff] %v13258_v51  ;;  %v5279_v51 = vsel %vm1207_vm2, %v5277_v39, %v5278_v36  ;;  %v13312_v39 = vadd.f32 %v12960_v19, %v4697_v30 }
 0x6f8   : > { %16874 = vst [vmem:[#allocation175_spill] sm:$0xff] %v13312_v39 }
 0x6f9   : > { %5358 = vrot.lane.b32.xlu1 %v5201_v58, %s16852_s16 }
 0x6fa   : > { %5446 = vrot.lane.b32.xlu0 %v5274_v44, %s16747_s24 }
 0x6fb   : > { %v5525_v59 = vpop.permute.xlu1 %5524 }
 0x6fc   : > { %v6142_v35 = vsel %vm2134_vm7, %v16875_v15, %v5525_v59 }
 0x6fd   : > { %5730 = vrot.lane.b32.xlu1 %v5276_v50, %s16713_s22 }
 0x6fe   : > { %5824 = vrot.lane.b32.xlu0 %v13261_v42, %s16855_s3 }
 0x700   : > { %v13269_v12 = vpop.permute.xlu0 %5526  ;;  %v13271_v58 = vpop.f32.mrb[38].mxu0 }
 0x701   : > { %5448 = vrot.lane.b32.xlu1 %v5276_v50, %s16747_s24  ;;  %v13274_v44 = vpop.f32.mrb[39].mxu0 }
 0x702   : > { %5540 = vrot.lane.b32.xlu0 %v13261_v42, %s16856_s0 }
 0x703   : > { %v5621_v13 = vpop.permute.xlu1 %5620 }
 0x704   : > { %v13280_v8 = vpop.permute.xlu0 %5344 }
 0x705   : > { %5826 = vrot.lane.b32.xlu1 %v13267_v61, %s16855_s3 }
 0x706   : > { %5914 = vrot.lane.b32.xlu0 %v5204_v1, %s16714_s19 }
 0x707   : > { %v5623_v50 = vpop.permute.xlu1 %5622 }
 0x708   : > { %v5717_v27 = vpop.permute.xlu0 %5716 }
 0x709   : > { %5542 = vrot.lane.b32.xlu1 %v13267_v61, %s16856_s0 }
 0x70a   : > { %5636 = vrot.lane.b32.xlu0 %v5204_v1, %s16712_s27 }
 0x70b   : > { %v13291_v31 = vpop.permute.xlu1 %5346 }
 0x70c   : > { %v13294_v11 = vpop.permute.xlu0 %5434 }
 0x70d   : > { %5916 = vrot.lane.b32.xlu1 %v5206_v43, %s16714_s19 }
 0x70e   : > { %6004 = vrot.lane.b32.xlu0 %v5279_v51, %s16715_s14 }
 0x70f   : > { %v5719_v29 = vpop.permute.xlu1 %5718 }
 0x710   : > { %v5813_v53 = vpop.permute.xlu0 %5812 }
 0x711   : > { %5360 = vrot.lane.b32.xlu1 %v5204_v1, %s16852_s16  ;;  %v4972_v1 = vadd.f32 %v13123_v24, %v13312_v39  ;;  %v6174_v24 = vsel %vm2167_vm8, %v6142_v35, %v5621_v13 }
 0x712   : > { %5638 = vrot.lane.b32.xlu0 %v5206_v43, %s16712_s27 }
 0x713   : > { %v13309_v48 = vpop.permute.xlu1 %5436  ;;  %v5041_v30 = vrot.slane %v4972_v1, 7 }
 0x714   : > { %v13314_v6 = vpop.permute.xlu0 %5528 }
 0x715   : > { %5732 = vrot.lane.b32.xlu1 %v5279_v51, %s16713_s22  ;;  %v13344_v59 = vsel %vm960_vm1, %v5040_v60, %v5041_v30  ;;  %v5207_v60 = vrot.slane %v13334_v37, 1 }
 0x716   : > { %6006 = vrot.lane.b32.xlu0 %v5281_v38, %s16715_s14  ;;  %16878 = vst [vmem:[#allocation57_spill] sm:$0xff] %v13344_v59  ;;  %v5208_v35 = vrot.slane %v13344_v59, 1 }
 0x717   : > { %v5815_v34 = vpop.permute.xlu1 %5814 }
 0x718   : > { %v5903_v46 = vpop.permute.xlu0 %5902 }
 0x719   : > { %5362 = vrot.lane.b32.xlu1 %v5206_v43, %s16852_s16 }
 0x71a   : > { %5450 = vrot.lane.b32.xlu0 %v5279_v51, %s16747_s24  ;;  %v6206_v51 = vsel %vm2200_vm9, %v6174_v24, %v5717_v27  ;;  %v5209_v24 = vsel %vm1126_vm3, %v5207_v60, %v5208_v35 }
 0x71b   : > { %v13325_v5 = vpop.permute.xlu1 %5530  ;;  %v6238_v0 = vsel %vm2233_vm10, %v6206_v51, %v5813_v53  ;;  %v6143_v53 = vsel %vm2134_vm7, %v10753_v52, %v13269_v12 }
 0x71c   : > { %v13329_v18 = vpop.permute.xlu0 %5624  ;;  %v13331_v36 = vpop.f32.mrb[40].mxu0  ;;  %v6270_v15 = vsel %vm2266_vm11, %v6238_v0, %v5903_v46 }
 0x71d   : > { %16876 = vst [vmem:[#allocation188_spill] sm:$0xff] %v13331_v36  ;;  %5734 = vrot.lane.b32.xlu1 %v5281_v38, %s16713_s22  ;;  %v13338_v43 = vpop.f32.mrb[41].mxu0 }
 0x71e   : > { %16877 = vst [vmem:[#allocation157_spill] sm:$0xff] %v13338_v43  ;;  %5828 = vrot.lane.b32.xlu0 %v13334_v37, %s16855_s3 }
 0x71f   : > { %v5905_v1 = vpop.permute.xlu1 %5904 }
 0x720   : > { %v5993_v39 = vpop.permute.xlu0 %5992 }
 0x721   : > { %v6302_v13 = vsel %vm495_vm0, %v6270_v15, %v5993_v39  ;;  %5452 = vrot.lane.b32.xlu1 %v5281_v38, %s16747_s24  ;;  %v5141_v39 = vsel %vm960_vm1, %v5041_v30, 0.0  ;;  %v6175_v38 = vsel %vm2167_vm8, %v6143_v53, %v5623_v50  ;;  %v5283_v50 = vrot.slane %v13344_v59, 2 }
 0x722   : > { %5544 = vrot.lane.b32.xlu0 %v13334_v37, %s16856_s0  ;;  %8571 = vmatprep.mubr.msk.f32.mxu1 %vm2336_vm12, %v6302_v13  ;;  %v6207_v51 = vsel %vm2200_vm9, %v6175_v38, %v5719_v29  ;;  %v5210_v13 = vrot.slane %v5141_v39, 1  ;;  %v4698_v38 = vmul.f32 %v12942_v56, %v12937_v25 }
 0x723   : > { %v13354_v27 = vpop.permute.xlu1 %5348  ;;  %v6239_v0 = vsel %vm2233_vm10, %v6207_v51, %v5815_v34  ;;  %v5282_v34 = vrot.slane %v13334_v37, 2 }
 0x724   : > { %v13360_v46 = vpop.permute.xlu0 %5626  ;;  %v6271_v52 = vsel %vm2266_vm11, %v6239_v0, %v5905_v1  ;;  %v5211_v1 = vsel %vm1126_vm3, %v5208_v35, %v5210_v13  ;;  %v4699_v0 = vmul.f32 %v12933_v21, %v12942_v56  ;;  %v13393_v35 = vadd.f32 %v12960_v19, %v4698_v38 }
 0x725   : > { %5830 = vrot.lane.b32.xlu1 %v13344_v59, %s16855_s3  ;;  %v5284_v53 = vsel %vm1207_vm2, %v5282_v34, %v5283_v50 }
 0x726   : > { %5918 = vrot.lane.b32.xlu0 %v5209_v24, %s16714_s19  ;;  %16879 = vst [vmem:[#allocation91_spill] sm:$0xff] %v13393_v35  ;;  %v4973_v25 = vadd.f32 %v13131_v45, %v13393_v35  ;;  %v6082_v45 = vsel %vm2068_vm5, %v12998_v22, %v13280_v8 }
 0x727   : > { %v5721_v15 = vpop.permute.xlu1 %5720 }
 0x728   : > { %v5995_v12 = vpop.permute.xlu0 %5994 }
 0x729   : > { %v6303_v30 = vsel %vm495_vm0, %v6271_v52, %v5995_v12  ;;  %5546 = vrot.lane.b32.xlu1 %v13344_v59, %s16856_s0  ;;  %v5285_v12 = vrot.slane %v5141_v39, 2 }
 0x72a   : > { %5640 = vrot.lane.b32.xlu0 %v5209_v24, %s16712_s27  ;;  %8572 = vmatmul.mubr.msk.f32.vlgmr.msra.gmra.mrb[48].mxu1 %vm2336_vm12, %v6303_v30  ;;  %v13398_v30 = vadd.f32 %v12960_v19, %v4699_v0  ;;  %v5043_v0 = vrot.slane %v4973_v25, 7 }
 0x72b   : > { %v13377_v29 = vpop.permute.xlu1 %5350  ;;  %v5286_v21 = vsel %vm1207_vm2, %v5283_v50, %v5285_v12 }
 0x72c   : > { %v13380_v60 = vpop.permute.xlu0 %5438  ;;  %v4974_v39 = vadd.f32 %v13136_v23, %v13398_v30  ;;  %v6112_v23 = vsel %vm2101_vm6, %v6082_v45, %v13294_v11 }
 0x72d   : > { %5920 = vrot.lane.b32.xlu1 %v5211_v1, %s16714_s19  ;;  %v6144_v12 = vsel %vm2134_vm7, %v6112_v23, %v13314_v6 }
 0x72e   : > { %6008 = vrot.lane.b32.xlu0 %v5284_v53, %s16715_s14  ;;  %v5044_v59 = vrot.slane %v4974_v39, 7  ;;  %v6176_v39 = vsel %vm2167_vm8, %v6144_v12, %v13329_v18 }
 0x72f   : > { %v5723_v51 = vpop.permute.xlu1 %5722  ;;  %v6208_v8 = vsel %vm2200_vm9, %v6176_v39, %v5721_v15  ;;  %v6083_v15 = vsel %vm2068_vm5, %v13006_v14, %v13291_v31 }
 0x730   : > { %v5817_v52 = vpop.permute.xlu0 %5816  ;;  %v13436_v11 = vsel %vm960_vm1, %v5043_v0, %v5044_v59  ;;  %v5142_v39 = vsel %vm960_vm1, %v5044_v59, 0.0 }
 0x731   : > { %5364 = vrot.lane.b32.xlu1 %v5209_v24, %s16852_s16  ;;  %v6240_v6 = vsel %vm2233_vm10, %v6208_v8, %v5817_v52  ;;  %v5213_v18 = vrot.slane %v13436_v11, 1  ;;  %v6113_v52 = vsel %vm2101_vm6, %v6083_v15, %v13309_v48 }
 0x732   : > { %5642 = vrot.lane.b32.xlu0 %v5211_v1, %s16712_s27 }
 0x733   : > { %v13395_v13 = vpop.permute.xlu1 %5440 }
 0x734   : > { %v13400_v34 = vpop.permute.xlu0 %5532 }
 0x735   : > { %5736 = vrot.lane.b32.xlu1 %v5284_v53, %s16713_s22 }
 0x736   : > { %6010 = vrot.lane.b32.xlu0 %v5286_v21, %s16715_s14 }
 0x737   : > { %v5819_v24 = vpop.permute.xlu1 %5818 }
 0x738   : > { %v5907_v38 = vpop.permute.xlu0 %5906  ;;  %v13409_v36 = vpop.f32.mrb[42].mxu0 }
 0x739   : > { %5366 = vrot.lane.b32.xlu1 %v5211_v1, %s16852_s16  ;;  %v13412_v43 = vpop.f32.mrb[43].mxu0  ;;  %v13427_v1 = vsel %vm960_vm1, 0.0, %v5043_v0 }
 0x73a   : > { %5454 = vrot.lane.b32.xlu0 %v5284_v53, %s16747_s24  ;;  %v6272_v53 = vsel %vm2266_vm11, %v6240_v6, %v5907_v38  ;;  %v5212_v0 = vrot.slane %v13427_v1, 1 }
 0x73b   : > { %v13420_v50 = vpop.permute.xlu1 %5534 }
 0x73c   : > { %v13424_v25 = vpop.permute.xlu0 %5628  ;;  %v5214_v14 = vsel %vm1126_vm3, %v5212_v0, %v5213_v18 }
 0x73d   : > { %5738 = vrot.lane.b32.xlu1 %v5286_v21, %s16713_s22 }
 0x73e   : > { %5832 = vrot.lane.b32.xlu0 %v13427_v1, %s16855_s3 }
 0x73f   : > { %v5909_v22 = vpop.permute.xlu1 %5908 }
 0x740   : > { %v5997_v45 = vpop.permute.xlu0 %5996 }
 0x741   : > { %v6304_v23 = vsel %vm495_vm0, %v6272_v53, %v5997_v45  ;;  %5456 = vrot.lane.b32.xlu1 %v5286_v21, %s16747_s24  ;;  %v6145_v21 = vsel %vm2134_vm7, %v6113_v52, %v13325_v5  ;;  %v5215_v5 = vrot.slane %v5142_v39, 1  ;;  %v4700_v52 = vmul.f32 %v12942_v56, %v13021_v26 }
 0x742   : > { %5548 = vrot.lane.b32.xlu0 %v13427_v1, %s16856_s0  ;;  %8574 = vmatprep.mubr.msk.f32.mxu1 %vm2336_vm12, %v6304_v23  ;;  %v6177_v31 = vsel %vm2167_vm8, %v6145_v21, %v13360_v46  ;;  %v5288_v46 = vrot.slane %v13436_v11, 2  ;;  %v4701_v21 = vmul.f32 %v13018_v55, %v12942_v56 }
 0x743   : > { %v13451_v38 = vpop.permute.xlu1 %5352  ;;  %v6209_v48 = vsel %vm2200_vm9, %v6177_v31, %v5723_v51 }
 0x744   : > { %v13456_v12 = vpop.permute.xlu0 %5630  ;;  %v6241_v8 = vsel %vm2233_vm10, %v6209_v48, %v5819_v24  ;;  %v5287_v24 = vrot.slane %v13427_v1, 2  ;;  %v5290_v48 = vrot.slane %v5142_v39, 2 }
 0x745   : > { %5834 = vrot.lane.b32.xlu1 %v13436_v11, %s16855_s3  ;;  %v6273_v53 = vsel %vm2266_vm11, %v6241_v8, %v5909_v22  ;;  %v5216_v22 = vsel %vm1126_vm3, %v5213_v18, %v5215_v5  ;;  %v13490_v18 = vadd.f32 %v12960_v19, %v4700_v52  ;;  %v13495_v5 = vadd.f32 %v12960_v19, %v4701_v21 }
 0x746   : > { %5922 = vrot.lane.b32.xlu0 %v5214_v14, %s16714_s19  ;;  %v5289_v15 = vsel %vm1207_vm2, %v5287_v24, %v5288_v46 }
 0x747   : > { %v5725_v6 = vpop.permute.xlu1 %5724  ;;  %16880 = vst [vmem:[#allocation165_spill] sm:$0xff] %v13490_v18  ;;  %16881 = vst [vmem:[#allocation46_spill] sm:$0xff] %v13495_v5  ;;  %v4975_v55 = vadd.f32 %v13147_v2, %v13490_v18  ;;  %v6084_v2 = vsel %vm2068_vm5, %v13041_v33, %v13354_v27 }
 0x748   : > { %v5999_v45 = vpop.permute.xlu0 %5998 }
 0x749   : > { %v6305_v59 = vsel %vm495_vm0, %v6273_v53, %v5999_v45  ;;  %5550 = vrot.lane.b32.xlu1 %v13436_v11, %s16856_s0  ;;  %v4976_v45 = vadd.f32 %v13150_v4, %v13495_v5  ;;  %v5046_v52 = vrot.slane %v4975_v55, 7 }
 0x74a   : > { %5644 = vrot.lane.b32.xlu0 %v5214_v14, %s16712_s27  ;;  %8575 = vmatmul.mubr.msk.f32.gmra.mrb[50].mxu1 %vm2336_vm12, %v6305_v59 }
 0x74b   : > { %v13474_v51 = vpop.permute.xlu1 %5354  ;;  %v5047_v21 = vrot.slane %v4976_v45, 7 }
 0x74c   : > { %v13477_v23 = vpop.permute.xlu0 %5442 }
 0x74d   : > { %5924 = vrot.lane.b32.xlu1 %v5216_v22, %s16714_s19 }
 0x74e   : > { %6012 = vrot.lane.b32.xlu0 %v5289_v15, %s16715_s14 }
 0x74f   : > { %v5727_v0 = vpop.permute.xlu1 %5726 }
 0x750   : > { %v5821_v31 = vpop.permute.xlu0 %5820 }
 0x751   : > { %5368 = vrot.lane.b32.xlu1 %v5214_v14, %s16852_s16  ;;  %v5291_v14 = vsel %vm1207_vm2, %v5288_v46, %v5290_v48  ;;  %v6114_v46 = vsel %vm2101_vm6, %v6084_v2, %v13380_v60 }
 0x752   : > { %5646 = vrot.lane.b32.xlu0 %v5216_v22, %s16712_s27  ;;  %v6146_v4 = vsel %vm2134_vm7, %v6114_v46, %v13400_v34  ;;  %v13537_v34 = vsel %vm960_vm1, %v5046_v52, %v5047_v21 }
 0x753   : > { %v13492_v8 = vpop.permute.xlu1 %5444  ;;  %v6178_v33 = vsel %vm2167_vm8, %v6146_v4, %v13424_v25  ;;  %v5218_v4 = vrot.slane %v13537_v34, 1 }
 0x754   : > { %v13497_v53 = vpop.permute.xlu0 %5536  ;;  %v13499_v26 = vpop.f32.mrb[44].mxu0  ;;  %v6210_v60 = vsel %vm2200_vm9, %v6178_v33, %v5725_v6  ;;  %v6085_v6 = vsel %vm2068_vm5, %v13047_v57, %v13377_v29 }
 0x755   : > { %5740 = vrot.lane.b32.xlu1 %v5289_v15, %s16713_s22  ;;  %v13504_v39 = vpop.f32.mrb[45].mxu0 }
 0x756   : > { %6014 = vrot.lane.b32.xlu0 %v5291_v14, %s16715_s14 }
 0x757   : > { %v5823_v59 = vpop.permute.xlu1 %5822 }
 0x758   : > { %v5911_v24 = vpop.permute.xlu0 %5910 }
 0x759   : > { %5370 = vrot.lane.b32.xlu1 %v5216_v22, %s16852_s16  ;;  %v13526_v22 = vsel %vm960_vm1, 0.0, %v5046_v52 }
 0x75a   : > { %5458 = vrot.lane.b32.xlu0 %v5289_v15, %s16747_s24  ;;  %v6242_v15 = vsel %vm2233_vm10, %v6210_v60, %v5821_v31  ;;  %v6115_v31 = vsel %vm2101_vm6, %v6085_v6, %v13395_v13  ;;  %v5217_v52 = vrot.slane %v13526_v22, 1  ;;  %v5143_v60 = vsel %vm960_vm1, %v5047_v21, 0.0 }
 0x75b   : > { %v13517_v48 = vpop.permute.xlu1 %5538  ;;  %v6274_v2 = vsel %vm2266_vm11, %v6242_v15, %v5911_v24 }
 0x75c   : > { %v13521_v5 = vpop.f32.mrb[46].mxu0  ;;  %v13523_v55 = vpop.permute.xlu0 %5632  ;;  %v5219_v29 = vsel %vm1126_vm3, %v5217_v52, %v5218_v4 }
 0x75d   : > { %v13530_v27 = vpop.f32.mrb[47].mxu0  ;;  %5742 = vrot.lane.b32.xlu1 %v5291_v14, %s16713_s22 }
 0x75e   : > { %5836 = vrot.lane.b32.xlu0 %v13526_v22, %s16855_s3 }
 0x75f   : > { %v5913_v45 = vpop.permute.xlu1 %5912 }
 0x760   : > { %v6001_v46 = vpop.permute.xlu0 %6000 }
 0x761   : > { %v6306_v25 = vsel %vm495_vm0, %v6274_v2, %v6001_v46  ;;  %5460 = vrot.lane.b32.xlu1 %v5291_v14, %s16747_s24  ;;  %v6147_v14 = vsel %vm2134_vm7, %v6115_v31, %v13420_v50  ;;  %v5220_v50 = vrot.slane %v5143_v60, 1  ;;  %v4702_v31 = vmul.f32 %v12942_v56, %v13084_v10 }
 0x762   : > { %5552 = vrot.lane.b32.xlu0 %v13526_v22, %s16856_s0  ;;  %8577 = vmatprep.mubr.msk.f32.mxu1 %vm2336_vm12, %v6306_v25  ;;  %v6179_v57 = vsel %vm2167_vm8, %v6147_v14, %v13456_v12  ;;  %v5293_v12 = vrot.slane %v13537_v34, 2  ;;  %v4703_v14 = vmul.f32 %v13080_v7, %v12942_v56 }
 0x763   : > { %v13552_v24 = vpop.permute.xlu1 %5356  ;;  %v6211_v13 = vsel %vm2200_vm9, %v6179_v57, %v5727_v0 }
 0x764   : > { %v13557_v33 = vpop.permute.xlu0 %5634  ;;  %v6243_v15 = vsel %vm2233_vm10, %v6211_v13, %v5823_v59  ;;  %v5292_v59 = vrot.slane %v13526_v22, 2 }
 0x765   : > { %5838 = vrot.lane.b32.xlu1 %v13537_v34, %s16855_s3  ;;  %v6275_v46 = vsel %vm2266_vm11, %v6243_v15, %v5913_v45  ;;  %v5221_v45 = vsel %vm1126_vm3, %v5218_v4, %v5220_v50  ;;  %v5295_v15 = vrot.slane %v5143_v60, 2  ;;  %v13593_v4 = vadd.f32 %v12960_v19, %v4703_v14 }
 0x766   : > { %5926 = vrot.lane.b32.xlu0 %v5219_v29, %s16714_s19  ;;  %v5294_v52 = vsel %vm1207_vm2, %v5292_v59, %v5293_v12  ;;  %v6086_v59 = vsel %vm2068_vm5, %v13113_v47, %v13451_v38 }
 0x767   : > { %v5729_v2 = vpop.permute.xlu1 %5728  ;;  %v5296_v7 = vsel %vm1207_vm2, %v5293_v12, %v5295_v15  ;;  %v4978_v60 = vadd.f32 %v13163_v63, %v13593_v4 }
 0x768   : > { %v6003_v25 = vpop.permute.xlu0 %6002 }
 0x769   : > { %v6307_v21 = vsel %vm495_vm0, %v6275_v46, %v6003_v25  ;;  %5554 = vrot.lane.b32.xlu1 %v13537_v34, %s16856_s0  ;;  %v13589_v46 = vadd.f32 %v12960_v19, %v4702_v31 }
 0x76a   : > { %5648 = vrot.lane.b32.xlu0 %v5219_v29, %s16712_s27  ;;  %8578 = vmatmul.mubr.msk.f32.gmra.mrb[52].mxu1 %vm2336_vm12, %v6307_v21  ;;  %v5050_v21 = vrot.slane %v4978_v60, 7  ;;  %v6087_v60 = vsel %vm2068_vm5, %v13119_v41, %v13474_v51 }
 0x76b   : > { %v13575_v0 = vpop.permute.xlu1 %5358  ;;  %16882 = vst [vmem:[#allocation176_spill] sm:$0xff] %v13589_v46  ;;  %v4977_v56 = vadd.f32 %v13160_v62, %v13589_v46  ;;  %v6116_v62 = vsel %vm2101_vm6, %v6086_v59, %v13477_v23 }
 0x76c   : > { %v13578_v6 = vpop.permute.xlu0 %5446  ;;  %v6148_v63 = vsel %vm2134_vm7, %v6116_v62, %v13497_v53  ;;  %v5144_v51 = vsel %vm960_vm1, %v5050_v21, 0.0 }
 0x76d   : > { %5928 = vrot.lane.b32.xlu1 %v5221_v45, %s16714_s19  ;;  %v5049_v25 = vrot.slane %v4977_v56, 7 }
 0x76e   : > { %6016 = vrot.lane.b32.xlu0 %v5294_v52, %s16715_s14 }
 0x76f   : > { %v5731_v57 = vpop.permute.xlu1 %5730  ;;  %v13624_v14 = vsel %vm960_vm1, 0.0, %v5049_v25  ;;  %v13630_v38 = vsel %vm960_vm1, %v5049_v25, %v5050_v21 }
 0x770   : > { %v5825_v13 = vpop.permute.xlu0 %5824  ;;  %v5222_v56 = vrot.slane %v13624_v14, 1  ;;  %v5298_v21 = vrot.slane %v13630_v38, 2 }
 0x771   : > { %5372 = vrot.lane.b32.xlu1 %v5219_v29, %s16852_s16 }
 0x772   : > { %5650 = vrot.lane.b32.xlu0 %v5221_v45, %s16712_s27 }
 0x773   : > { %v13596_v10 = vpop.permute.xlu1 %5448 }
 0x774   : > { %v13598_v50 = vpop.permute.xlu0 %5540 }
 0x775   : > { %5744 = vrot.lane.b32.xlu1 %v5294_v52, %s16713_s22 }
 0x776   : > { %6018 = vrot.lane.b32.xlu0 %v5296_v7, %s16715_s14 }
 0x777   : > { %v5827_v19 = vpop.permute.xlu1 %5826 }
 0x778   : > { %v5915_v29 = vpop.permute.xlu0 %5914 }
 0x779   : > { %5374 = vrot.lane.b32.xlu1 %v5221_v45, %s16852_s16  ;;  %v6180_v45 = vsel %vm2167_vm8, %v6148_v63, %v13523_v55 }
 0x77a   : > { %5462 = vrot.lane.b32.xlu0 %v5294_v52, %s16747_s24  ;;  %v6212_v47 = vsel %vm2200_vm9, %v6180_v45, %v5729_v2  ;;  %v5223_v2 = vrot.slane %v13630_v38, 1 }
 0x77b   : > { %v13614_v12 = vpop.permute.xlu1 %5542  ;;  %v6244_v23 = vsel %vm2233_vm10, %v6212_v47, %v5825_v13  ;;  %v6117_v13 = vsel %vm2101_vm6, %v6087_v60, %v13492_v8  ;;  %v5225_v47 = vrot.slane %v5144_v51, 1 }
 0x77c   : > { %v13618_v31 = vpop.permute.xlu0 %5636  ;;  %v6276_v52 = vsel %vm2266_vm11, %v6244_v23, %v5915_v29  ;;  %v5224_v41 = vsel %vm1126_vm3, %v5222_v56, %v5223_v2  ;;  %v5297_v23 = vrot.slane %v13624_v14, 2 }
 0x77d   : > { %5746 = vrot.lane.b32.xlu1 %v5296_v7, %s16713_s22 }
 0x77e   : > { %5840 = vrot.lane.b32.xlu0 %v13624_v14, %s16855_s3 }
 0x77f   : > { %v5917_v53 = vpop.permute.xlu1 %5916 }
 0x780   : > { %v6005_v15 = vpop.permute.xlu0 %6004 }
 0x781   : > { %v6308_v55 = vsel %vm495_vm0, %v6276_v52, %v6005_v15  ;;  %5464 = vrot.lane.b32.xlu1 %v5296_v7, %s16747_s24  ;;  %v6149_v7 = vsel %vm2134_vm7, %v6117_v13, %v13517_v48  ;;  %v13677_v52 = vld [vmem:[%s15783_s5 + $0x1] ss:$0 sm:$0xff] }
 0x782   : > { %5556 = vrot.lane.b32.xlu0 %v13624_v14, %s16856_s0  ;;  %8580 = vmatprep.mubr.msk.f32.mxu1 %vm2336_vm12, %v6308_v55  ;;  %v6181_v59 = vsel %vm2167_vm8, %v6149_v7, %v13557_v33  ;;  %v4704_v15 = vmul.f32 %v13677_v52, %v13144_v32  ;;  %v5299_v55 = vsel %vm1207_vm2, %v5297_v23, %v5298_v21  ;;  %v5300_v32 = vrot.slane %v5144_v51, 2 }
 0x783   : > { %v13646_v29 = vpop.permute.xlu1 %5360  ;;  %v6213_v62 = vsel %vm2200_vm9, %v6181_v59, %v5731_v57  ;;  %v4705_v56 = vmul.f32 %v13677_v52, %v13139_v17  ;;  %v6088_v23 = vsel %vm2068_vm5, %v13184_v49, %v13552_v24 }
 0x784   : > { %v13650_v25 = vpop.permute.xlu0 %5638  ;;  %v6245_v8 = vsel %vm2233_vm10, %v6213_v62, %v5827_v19 }
 0x785   : > { %5842 = vrot.lane.b32.xlu1 %v13630_v38, %s16855_s3  ;;  %v6277_v48 = vsel %vm2266_vm11, %v6245_v8, %v5917_v53  ;;  %v5226_v53 = vsel %vm1126_vm3, %v5223_v2, %v5225_v47  ;;  %v13689_v2 = vld [vmem:[%s15784_s6 + $0x1] ss:$0 sm:$0xff] }
 0x786   : > { %5930 = vrot.lane.b32.xlu0 %v5224_v41, %s16714_s19  ;;  %v13692_v7 = vadd.f32 %v13689_v2, %v4704_v15  ;;  %v13696_v59 = vadd.f32 %v13689_v2, %v4705_v56 }
 0x787   : > { %v5733_v63 = vpop.permute.xlu1 %5732 }
 0x788   : > { %v6007_v45 = vpop.permute.xlu0 %6006  ;;  %v4979_v8 = vadd.f32 %v13177_v28, %v13692_v7  ;;  %v6118_v28 = vsel %vm2101_vm6, %v6088_v23, %v13578_v6 }
 0x789   : > { %v6309_v33 = vsel %vm495_vm0, %v6277_v48, %v6007_v45  ;;  %5558 = vrot.lane.b32.xlu1 %v13630_v38, %s16856_s0  ;;  %v5301_v48 = vsel %vm1207_vm2, %v5298_v21, %v5300_v32 }
 0x78a   : > { %5652 = vrot.lane.b32.xlu0 %v5224_v41, %s16712_s27  ;;  %8581 = vmatmul.mubr.msk.f32.gmra.mrb[54].mxu1 %vm2336_vm12, %v6309_v33  ;;  %v5052_v47 = vrot.slane %v4979_v8, 7 }
 0x78b   : > { %v13669_v57 = vpop.permute.xlu1 %5362 }
 0x78c   : > { %v13671_v19 = vpop.permute.xlu0 %5450  ;;  %v13727_v56 = vsel %vm960_vm1, 0.0, %v5052_v47 }
 0x78d   : > { %5932 = vrot.lane.b32.xlu1 %v5226_v53, %s16714_s19  ;;  %v5227_v8 = vrot.slane %v13727_v56, 1 }
 0x78e   : > { %6020 = vrot.lane.b32.xlu0 %v5299_v55, %s16715_s14 }
 0x78f   : > { %v5735_v60 = vpop.permute.xlu1 %5734 }
 0x790   : > { %v5829_v13 = vpop.permute.xlu0 %5828 }
 0x791   : > { %5376 = vrot.lane.b32.xlu1 %v5224_v41, %s16852_s16  ;;  %v4980_v41 = vadd.f32 %v13179_v9, %v13696_v59  ;;  %v6150_v9 = vsel %vm2134_vm7, %v6118_v28, %v13598_v50 }
 0x792   : > { %5654 = vrot.lane.b32.xlu0 %v5226_v53, %s16712_s27 }
 0x793   : > { %v13699_v17 = vpop.permute.xlu1 %5452  ;;  %v5053_v33 = vrot.slane %v4980_v41, 7  ;;  %v6089_v41 = vsel %vm2068_vm5, %v13194_v20, %v13575_v0 }
 0x794   : > { %v13701_v62 = vpop.permute.xlu0 %5544 }
 0x795   : > { %5748 = vrot.lane.b32.xlu1 %v5299_v55, %s16713_s22  ;;  %v13733_v24 = vsel %vm960_vm1, %v5052_v47, %v5053_v33  ;;  %v5145_v0 = vsel %vm960_vm1, %v5053_v33, 0.0 }
 0x796   : > { %6022 = vrot.lane.b32.xlu0 %v5301_v48, %s16715_s14  ;;  %v5303_v33 = vrot.slane %v13733_v24, 2 }
 0x797   : > { %v5831_v51 = vpop.permute.xlu1 %5830 }
 0x798   : > { %v5919_v45 = vpop.permute.xlu0 %5918 }
 0x799   : > { %5378 = vrot.lane.b32.xlu1 %v5226_v53, %s16852_s16  ;;  %v6182_v53 = vsel %vm2167_vm8, %v6150_v9, %v13618_v31 }
 0x79a   : > { %5466 = vrot.lane.b32.xlu0 %v5299_v55, %s16747_s24  ;;  %v6214_v49 = vsel %vm2200_vm9, %v6182_v53, %v5733_v63  ;;  %v5228_v63 = vrot.slane %v13733_v24, 1 }
 0x79b   : > { %v13717_v21 = vpop.permute.xlu1 %5546  ;;  %v6246_v6 = vsel %vm2233_vm10, %v6214_v49, %v5829_v13  ;;  %v6119_v13 = vsel %vm2101_vm6, %v6089_v41, %v13596_v10  ;;  %v5230_v49 = vrot.slane %v5145_v0, 1 }
 0x79c   : > { %v13721_v15 = vpop.permute.xlu0 %5640  ;;  %v6278_v55 = vsel %vm2266_vm11, %v6246_v6, %v5919_v45  ;;  %v5229_v20 = vsel %vm1126_vm3, %v5227_v8, %v5228_v63  ;;  %v5302_v6 = vrot.slane %v13727_v56, 2 }
 0x79d   : > { %5750 = vrot.lane.b32.xlu1 %v5301_v48, %s16713_s22 }
 0x79e   : > { %5844 = vrot.lane.b32.xlu0 %v13727_v56, %s16855_s3 }
 0x79f   : > { %v5921_v50 = vpop.permute.xlu1 %5920 }
 0x7a0   : > { %v6009_v32 = vpop.permute.xlu0 %6008 }
 0x7a1   : > { %v6310_v31 = vsel %vm495_vm0, %v6278_v55, %v6009_v32  ;;  %5468 = vrot.lane.b32.xlu1 %v5301_v48, %s16747_s24  ;;  %v6151_v48 = vsel %vm2134_vm7, %v6119_v13, %v13614_v12  ;;  %v4706_v55 = vmul.f32 %v13677_v52, %v13210_v40  ;;  %v5304_v32 = vsel %vm1207_vm2, %v5302_v6, %v5303_v33 }
 0x7a2   : > { %5560 = vrot.lane.b32.xlu0 %v13727_v56, %s16856_s0  ;;  %8583 = vmatprep.mubr.msk.f32.mxu1 %vm2336_vm12, %v6310_v31  ;;  %v6183_v23 = vsel %vm2167_vm8, %v6151_v48, %v13650_v25  ;;  %v4707_v31 = vmul.f32 %v13677_v52, %v13205_v3 }
 0x7a3   : > { %v13749_v45 = vpop.permute.xlu1 %5364  ;;  %v6215_v28 = vsel %vm2200_vm9, %v6183_v23, %v5735_v60  ;;  %v13785_v13 = vadd.f32 %v13689_v2, %v4706_v55 }
 0x7a4   : > { %v13753_v47 = vpop.permute.xlu0 %5642  ;;  %v6247_v10 = vsel %vm2233_vm10, %v6215_v28, %v5831_v51  ;;  %v13789_v48 = vadd.f32 %v13689_v2, %v4707_v31 }
 0x7a5   : > { %5846 = vrot.lane.b32.xlu1 %v13733_v24, %s16855_s3  ;;  %v6279_v12 = vsel %vm2266_vm11, %v6247_v10, %v5921_v50  ;;  %v5231_v50 = vsel %vm1126_vm3, %v5228_v63, %v5230_v49  ;;  %16883 = vst [vmem:[#allocation189_spill] sm:$0xff] %v13785_v13  ;;  %v5305_v63 = vrot.slane %v5145_v0, 2  ;;  %v4981_v3 = vadd.f32 %v13186_v54, %v13785_v13 }
 0x7a6   : > { %5934 = vrot.lane.b32.xlu0 %v5229_v20, %s16714_s19  ;;  %16884 = vst [vmem:[#allocation181_spill] sm:$0xff] %v13789_v48  ;;  %v6090_v49 = vsel %vm2068_vm5, %v13261_v42, %v13646_v29 }
 0x7a7   : > { %v5737_v9 = vpop.permute.xlu1 %5736  ;;  %v5306_v28 = vsel %vm1207_vm2, %v5303_v33, %v5305_v63  ;;  %v6120_v54 = vsel %vm2101_vm6, %v6090_v49, %v13671_v19  ;;  %v6091_v63 = vsel %vm2068_vm5, %v13267_v61, %v13669_v57 }
 0x7a8   : > { %v6011_v53 = vpop.permute.xlu0 %6010 }
 0x7a9   : > { %v6311_v25 = vsel %vm495_vm0, %v6279_v12, %v6011_v53  ;;  %5562 = vrot.lane.b32.xlu1 %v13733_v24, %s16856_s0  ;;  %v5055_v12 = vrot.slane %v4981_v3, 7 }
 0x7aa   : > { %5656 = vrot.lane.b32.xlu0 %v5229_v20, %s16712_s27  ;;  %8584 = vmatmul.mubr.msk.f32.gmra.mrb[56].mxu1 %vm2336_vm12, %v6311_v25 }
 0x7ab   : > { %v13772_v60 = vpop.permute.xlu1 %5366 }
 0x7ac   : > { %v13774_v51 = vpop.permute.xlu0 %5454 }
 0x7ad   : > { %5936 = vrot.lane.b32.xlu1 %v5231_v50, %s16714_s19 }
 0x7ae   : > { %6024 = vrot.lane.b32.xlu0 %v5304_v32, %s16715_s14 }
 0x7af   : > { %v5739_v8 = vpop.permute.xlu1 %5738 }
 0x7b0   : > { %v5833_v41 = vpop.permute.xlu0 %5832 }
 0x7b1   : > { %5380 = vrot.lane.b32.xlu1 %v5229_v20, %s16852_s16  ;;  %v4982_v20 = vadd.f32 %v13189_v16, %v13789_v48  ;;  %v6152_v16 = vsel %vm2134_vm7, %v6120_v54, %v13701_v62 }
 0x7b2   : > { %5658 = vrot.lane.b32.xlu0 %v5231_v50, %s16712_s27  ;;  %v6184_v33 = vsel %vm2167_vm8, %v6152_v16, %v13721_v15 }
 0x7b3   : > { %v13792_v40 = vpop.permute.xlu1 %5456  ;;  %v5056_v53 = vrot.slane %v4982_v20, 7  ;;  %v6216_v42 = vsel %vm2200_vm9, %v6184_v33, %v5737_v9 }
 0x7b4   : > { %v13794_v23 = vpop.permute.xlu0 %5548  ;;  %v6248_v19 = vsel %vm2233_vm10, %v6216_v42, %v5833_v41  ;;  %v6121_v41 = vsel %vm2101_vm6, %v6091_v63, %v13699_v17 }
 0x7b5   : > { %5752 = vrot.lane.b32.xlu1 %v5304_v32, %s16713_s22  ;;  %v13826_v29 = vsel %vm960_vm1, %v5055_v12, %v5056_v53  ;;  %v5146_v57 = vsel %vm960_vm1, %v5056_v53, 0.0 }
 0x7b6   : > { %6026 = vrot.lane.b32.xlu0 %v5306_v28, %s16715_s14  ;;  %v5233_v9 = vrot.slane %v13826_v29, 1  ;;  %v5235_v16 = vrot.slane %v5146_v57, 1  ;;  %v5308_v53 = vrot.slane %v13826_v29, 2 }
 0x7b7   : > { %v5835_v0 = vpop.permute.xlu1 %5834 }
 0x7b8   : > { %v5923_v10 = vpop.permute.xlu0 %5922  ;;  %v5236_v42 = vsel %vm1126_vm3, %v5233_v9, %v5235_v16  ;;  %v6092_v16 = vsel %vm2068_vm5, %v13334_v37, %v13749_v45 }
 0x7b9   : > { %5382 = vrot.lane.b32.xlu1 %v5231_v50, %s16852_s16  ;;  %v13820_v50 = vsel %vm960_vm1, 0.0, %v5055_v12  ;;  %v6280_v55 = vsel %vm2266_vm11, %v6248_v19, %v5923_v10  ;;  %v4708_v19 = vmul.f32 %v13677_v52, %v13274_v44 }
 0x7ba   : > { %5470 = vrot.lane.b32.xlu0 %v5304_v32, %s16747_s24  ;;  %v5232_v31 = vrot.slane %v13820_v50, 1  ;;  %v5307_v33 = vrot.slane %v13820_v50, 2 }
 0x7bb   : > { %v13810_v25 = vpop.permute.xlu1 %5550 }
 0x7bc   : > { %v13814_v6 = vpop.permute.xlu0 %5644  ;;  %v5234_v61 = vsel %vm1126_vm3, %v5232_v31, %v5233_v9  ;;  %v13878_v31 = vadd.f32 %v13689_v2, %v4708_v19  ;;  %v5310_v9 = vrot.slane %v5146_v57, 2 }
 0x7bd   : > { %5754 = vrot.lane.b32.xlu1 %v5306_v28, %s16713_s22 }
 0x7be   : > { %5848 = vrot.lane.b32.xlu0 %v13820_v50, %s16855_s3  ;;  %16885 = vst [vmem:[#allocation84_spill] sm:$0xff] %v13878_v31 }
 0x7bf   : > { %v5925_v62 = vpop.permute.xlu1 %5924 }
 0x7c0   : > { %v6013_v32 = vpop.permute.xlu0 %6012 }
 0x7c1   : > { %v6312_v15 = vsel %vm495_vm0, %v6280_v55, %v6013_v32  ;;  %5472 = vrot.lane.b32.xlu1 %v5306_v28, %s16747_s24  ;;  %v6153_v28 = vsel %vm2134_vm7, %v6121_v41, %v13717_v21  ;;  %v4709_v55 = vmul.f32 %v13677_v52, %v13271_v58  ;;  %v16887_v58 = vld [vmem:[#allocation168_spill] sm:$0xff] }
 0x7c2   : > { %5564 = vrot.lane.b32.xlu0 %v13820_v50, %s16856_s0  ;;  %8586 = vmatprep.mubr.msk.f32.mxu1 %vm2336_vm12, %v6312_v15  ;;  %v6185_v10 = vsel %vm2167_vm8, %v6153_v28, %v13753_v47  ;;  %v4983_v28 = vadd.f32 %v16887_v58, %v13878_v31 }
 0x7c3   : > { %v13842_v3 = vpop.permute.xlu1 %5368  ;;  %v6217_v12 = vsel %vm2200_vm9, %v6185_v10, %v5739_v8  ;;  %v13882_v63 = vadd.f32 %v13689_v2, %v4709_v55  ;;  %v5311_v10 = vsel %vm1207_vm2, %v5308_v53, %v5310_v9 }
 0x7c4   : > { %v13846_v20 = vpop.permute.xlu0 %5646  ;;  %v6249_v17 = vsel %vm2233_vm10, %v6217_v12, %v5835_v0  ;;  %v16888_v12 = vld [vmem:[#allocation128_spill] sm:$0xff] }
 0x7c5   : > { %5850 = vrot.lane.b32.xlu1 %v13826_v29, %s16855_s3  ;;  %v6281_v21 = vsel %vm2266_vm11, %v6249_v17, %v5925_v62  ;;  %v5309_v62 = vsel %vm1207_vm2, %v5307_v33, %v5308_v53  ;;  %16886 = vst [vmem:[#allocation90_spill] sm:$0xff] %v13882_v63 }
 0x7c6   : > { %5938 = vrot.lane.b32.xlu0 %v5234_v61, %s16714_s19 }
 0x7c7   : > { %v5741_v49 = vpop.permute.xlu1 %5740 }
 0x7c8   : > { %v6015_v54 = vpop.permute.xlu0 %6014 }
 0x7c9   : > { %v6313_v47 = vsel %vm495_vm0, %v6281_v21, %v6015_v54  ;;  %5566 = vrot.lane.b32.xlu1 %v13826_v29, %s16856_s0  ;;  %v5058_v21 = vrot.slane %v4983_v28, 7  ;;  %v16889_v28 = vld [vmem:[#allocation57_spill] sm:$0xff] }
 0x7ca   : > { %5660 = vrot.lane.b32.xlu0 %v5234_v61, %s16712_s27  ;;  %8587 = vmatmul.mubr.msk.f32.gmra.mrb[58].mxu1 %vm2336_vm12, %v6313_v47  ;;  %v6122_v47 = vsel %vm2101_vm6, %v6092_v16, %v13774_v51 }
 0x7cb   : > { %v13865_v8 = vpop.permute.xlu1 %5370  ;;  %v6154_v53 = vsel %vm2134_vm7, %v6122_v47, %v13794_v23  ;;  %v13913_v55 = vsel %vm960_vm1, 0.0, %v5058_v21 }
 0x7cc   : > { %v13867_v0 = vpop.permute.xlu0 %5458  ;;  %v5237_v58 = vrot.slane %v13913_v55, 1 }
 0x7cd   : > { %5940 = vrot.lane.b32.xlu1 %v5236_v42, %s16714_s19 }
 0x7ce   : > { %6028 = vrot.lane.b32.xlu0 %v5309_v62, %s16715_s14 }
 0x7cf   : > { %v5743_v32 = vpop.permute.xlu1 %5742 }
 0x7d0   : > { %v5837_v15 = vpop.permute.xlu0 %5836 }
 0x7d1   : > { %5384 = vrot.lane.b32.xlu1 %v5234_v61, %s16852_s16  ;;  %v4984_v61 = vadd.f32 %v16888_v12, %v13882_v63  ;;  %v6093_v12 = vsel %vm2068_vm5, %v16889_v28, %v13772_v60 }
 0x7d2   : > { %5662 = vrot.lane.b32.xlu0 %v5236_v42, %s16712_s27 }
 0x7d3   : > { %v13885_v44 = vpop.permute.xlu1 %5460  ;;  %v5059_v54 = vrot.slane %v4984_v61, 7 }
 0x7d4   : > { %v13887_v41 = vpop.permute.xlu0 %5552 }
 0x7d5   : > { %5756 = vrot.lane.b32.xlu1 %v5309_v62, %s16713_s22  ;;  %v13919_v45 = vsel %vm960_vm1, %v5058_v21, %v5059_v54  ;;  %v5147_v16 = vsel %vm960_vm1, %v5059_v54, 0.0 }
 0x7d6   : > { %6030 = vrot.lane.b32.xlu0 %v5311_v10, %s16715_s14  ;;  %v5313_v54 = vrot.slane %v13919_v45, 2 }
 0x7d7   : > { %v5839_v57 = vpop.permute.xlu1 %5838 }
 0x7d8   : > { %v5927_v17 = vpop.permute.xlu0 %5926 }
 0x7d9   : > { %5386 = vrot.lane.b32.xlu1 %v5236_v42, %s16852_s16  ;;  %v6186_v42 = vsel %vm2167_vm8, %v6154_v53, %v13814_v6 }
 0x7da   : > { %5474 = vrot.lane.b32.xlu0 %v5309_v62, %s16747_s24  ;;  %v6218_v37 = vsel %vm2200_vm9, %v6186_v42, %v5741_v49  ;;  %v5238_v49 = vrot.slane %v13919_v45, 1 }
 0x7db   : > { %v13903_v33 = vpop.permute.xlu1 %5554  ;;  %v6250_v51 = vsel %vm2233_vm10, %v6218_v37, %v5837_v15  ;;  %v6123_v15 = vsel %vm2101_vm6, %v6093_v12, %v13792_v40  ;;  %v5240_v37 = vrot.slane %v5147_v16, 1 }
 0x7dc   : > { %v13907_v19 = vpop.permute.xlu0 %5648  ;;  %v6282_v62 = vsel %vm2266_vm11, %v6250_v51, %v5927_v17  ;;  %v5239_v60 = vsel %vm1126_vm3, %v5237_v58, %v5238_v49  ;;  %v5312_v51 = vrot.slane %v13913_v55, 2  ;;  %v16891_v58 = vld [vmem:[#allocation188_spill] sm:$0xff] }
 0x7dd   : > { %5758 = vrot.lane.b32.xlu1 %v5311_v10, %s16713_s22  ;;  %v4711_v28 = vmul.f32 %v13677_v52, %v16891_v58  ;;  %v6094_v58 = vsel %vm2068_vm5, %v13427_v1, %v13842_v3 }
 0x7de   : > { %5852 = vrot.lane.b32.xlu0 %v13913_v55, %s16855_s3 }
 0x7df   : > { %v5929_v23 = vpop.permute.xlu1 %5928 }
 0x7e0   : > { %v6017_v9 = vpop.permute.xlu0 %6016 }
 0x7e1   : > { %v6314_v6 = vsel %vm495_vm0, %v6282_v62, %v6017_v9  ;;  %5476 = vrot.lane.b32.xlu1 %v5311_v10, %s16747_s24  ;;  %v6155_v10 = vsel %vm2134_vm7, %v6123_v15, %v13810_v25  ;;  %v16890_v62 = vld [vmem:[#allocation157_spill] sm:$0xff] }
 0x7e2   : > { %5568 = vrot.lane.b32.xlu0 %v13913_v55, %s16856_s0  ;;  %8589 = vmatprep.mubr.msk.f32.mxu1 %vm2336_vm12, %v6314_v6  ;;  %v6187_v21 = vsel %vm2167_vm8, %v6155_v10, %v13846_v20  ;;  %v4710_v9 = vmul.f32 %v13677_v52, %v16890_v62  ;;  %v5314_v6 = vsel %vm1207_vm2, %v5312_v51, %v5313_v54 }
 0x7e3   : > { %v13935_v61 = vpop.permute.xlu1 %5372  ;;  %v6219_v47 = vsel %vm2200_vm9, %v6187_v21, %v5743_v32  ;;  %v13975_v21 = vadd.f32 %v13689_v2, %v4711_v28 }
 0x7e4   : > { %v13939_v17 = vpop.permute.xlu0 %5650  ;;  %v6251_v40 = vsel %vm2233_vm10, %v6219_v47, %v5839_v57  ;;  %v13971_v10 = vadd.f32 %v13689_v2, %v4710_v9 }
 0x7e5   : > { %5854 = vrot.lane.b32.xlu1 %v13919_v45, %s16855_s3  ;;  %v6283_v25 = vsel %vm2266_vm11, %v6251_v40, %v5929_v23  ;;  %v5241_v23 = vsel %vm1126_vm3, %v5238_v49, %v5240_v37  ;;  %v5315_v49 = vrot.slane %v5147_v16, 2  ;;  %16893 = vst [vmem:[#allocation65_spill] sm:$0xff] %v13975_v21 }
 0x7e6   : > { %5942 = vrot.lane.b32.xlu0 %v5239_v60, %s16714_s19  ;;  %16892 = vst [vmem:[#allocation184_spill] sm:$0xff] %v13971_v10 }
 0x7e7   : > { %v5745_v53 = vpop.permute.xlu1 %5744  ;;  %v5316_v37 = vsel %vm1207_vm2, %v5313_v54, %v5315_v49  ;;  %v6124_v54 = vsel %vm2101_vm6, %v6094_v58, %v13867_v0 }
 0x7e8   : > { %v6019_v42 = vpop.permute.xlu0 %6018  ;;  %v6156_v49 = vsel %vm2134_vm7, %v6124_v54, %v13887_v41 }
 0x7e9   : > { %v6315_v20 = vsel %vm495_vm0, %v6283_v25, %v6019_v42  ;;  %5570 = vrot.lane.b32.xlu1 %v13919_v45, %s16856_s0  ;;  %v16894_v25 = vld [vmem:[#allocation43_spill] sm:$0xff] }
 0x7ea   : > { %5664 = vrot.lane.b32.xlu0 %v5239_v60, %s16712_s27  ;;  %8590 = vmatmul.mubr.msk.f32.gmra.mrb[60].mxu1 %vm2336_vm12, %v6315_v20  ;;  %v4985_v42 = vadd.f32 %v16894_v25, %v13971_v10  ;;  %v16895_v20 = vld [vmem:[#allocation68_spill] sm:$0xff] }
 0x7eb   : > { %v13958_v32 = vpop.permute.xlu1 %5374 }
 0x7ec   : > { %v13960_v57 = vpop.permute.xlu0 %5462  ;;  %v5061_v62 = vrot.slane %v4985_v42, 7 }
 0x7ed   : > { %5944 = vrot.lane.b32.xlu1 %v5241_v23, %s16714_s19 }
 0x7ee   : > { %6032 = vrot.lane.b32.xlu0 %v5314_v6, %s16715_s14  ;;  %v14008_v1 = vsel %vm960_vm1, 0.0, %v5061_v62 }
 0x7ef   : > { %v5747_v12 = vpop.permute.xlu1 %5746 }
 0x7f0   : > { %v5841_v15 = vpop.permute.xlu0 %5840 }
 0x7f1   : > { %5388 = vrot.lane.b32.xlu1 %v5239_v60, %s16852_s16  ;;  %v4986_v60 = vadd.f32 %v16895_v20, %v13975_v21  ;;  %v6096_v21 = vsel %vm2068_vm5, %v13526_v22, %v13935_v61 }
 0x7f2   : > { %5666 = vrot.lane.b32.xlu0 %v5241_v23, %s16712_s27 }
 0x7f3   : > { %v13978_v47 = vpop.permute.xlu1 %5464  ;;  %v5062_v9 = vrot.slane %v4986_v60, 7 }
 0x7f4   : > { %v13980_v40 = vpop.permute.xlu0 %5556 }
 0x7f5   : > { %5760 = vrot.lane.b32.xlu1 %v5314_v6, %s16713_s22  ;;  %v14016_v41 = vsel %vm960_vm1, %v5061_v62, %v5062_v9 }
 0x7f6   : > { %6034 = vrot.lane.b32.xlu0 %v5316_v37, %s16715_s14  ;;  %v5243_v54 = vrot.slane %v14016_v41, 1 }
 0x7f7   : > { %v5843_v16 = vpop.permute.xlu1 %5842 }
 0x7f8   : > { %v5931_v51 = vpop.permute.xlu0 %5930 }
 0x7f9   : > { %5390 = vrot.lane.b32.xlu1 %v5241_v23, %s16852_s16  ;;  %v6188_v23 = vsel %vm2167_vm8, %v6156_v49, %v13907_v19  ;;  %v6095_v49 = vsel %vm2068_vm5, %v13436_v11, %v13865_v8  ;;  %v5148_v8 = vsel %vm960_vm1, %v5062_v9, 0.0  ;;  %v5318_v9 = vrot.slane %v14016_v41, 2 }
 0x7fa   : > { %5478 = vrot.lane.b32.xlu0 %v5314_v6, %s16747_s24  ;;  %v6220_v3 = vsel %vm2200_vm9, %v6188_v23, %v5745_v53  ;;  %v5242_v53 = vrot.slane %v14008_v1, 1 }
 0x7fb   : > { %v13996_v28 = vpop.permute.xlu1 %5558  ;;  %v6252_v6 = vsel %vm2233_vm10, %v6220_v3, %v5841_v15  ;;  %v6125_v15 = vsel %vm2101_vm6, %v6095_v49, %v13885_v44 }
 0x7fc   : > { %v14000_v25 = vpop.permute.xlu0 %5652  ;;  %v6284_v20 = vsel %vm2266_vm11, %v6252_v6, %v5931_v51  ;;  %v5244_v11 = vsel %vm1126_vm3, %v5242_v53, %v5243_v54  ;;  %v4712_v53 = vmul.f32 %v13677_v52, %v13412_v43 }
 0x7fd   : > { %5762 = vrot.lane.b32.xlu1 %v5316_v37, %s16713_s22  ;;  %v14005_v42 = vpop.f32.mrb[48].mxu1 }
 0x7fe   : > { %v14011_v0 = vpop.f32.mrb[49].mxu1  ;;  %5856 = vrot.lane.b32.xlu0 %v14008_v1, %s16855_s3 }
 0x7ff   : > { %v5933_v19 = vpop.permute.xlu1 %5932 }
 0x800   : > { %v6021_v60 = vpop.permute.xlu0 %6020 }
 0x801   : > { %v6316_v58 = vsel %vm495_vm0, %v6284_v20, %v6021_v60  ;;  %5480 = vrot.lane.b32.xlu1 %v5316_v37, %s16747_s24  ;;  %v6157_v37 = vsel %vm2134_vm7, %v6125_v15, %v13903_v33  ;;  %v5245_v60 = vrot.slane %v5148_v8, 1  ;;  %v4713_v15 = vmul.f32 %v13677_v52, %v13409_v36  ;;  %v16898_v36 = vld [vmem:[#allocation137_spill] sm:$0xff] }
 0x802   : > { %5572 = vrot.lane.b32.xlu0 %v14008_v1, %s16856_s0  ;;  %8592 = vmatprep.mubr.msk.f32.mxu1 %vm2336_vm12, %v6316_v58  ;;  %v6189_v23 = vsel %vm2167_vm8, %v6157_v37, %v13939_v17  ;;  %v5317_v58 = vrot.slane %v14008_v1, 2 }
 0x803   : > { %v14032_v51 = vpop.permute.xlu1 %5376  ;;  %v6221_v3 = vsel %vm2200_vm9, %v6189_v23, %v5747_v12 }
 0x804   : > { %v14036_v62 = vpop.permute.xlu0 %5654  ;;  %v6253_v44 = vsel %vm2233_vm10, %v6221_v3, %v5843_v16  ;;  %v5319_v49 = vsel %vm1207_vm2, %v5317_v58, %v5318_v9  ;;  %v14068_v3 = vadd.f32 %v13689_v2, %v4712_v53 }
 0x805   : > { %5858 = vrot.lane.b32.xlu1 %v14016_v41, %s16855_s3  ;;  %v6285_v33 = vsel %vm2266_vm11, %v6253_v44, %v5933_v19  ;;  %v5246_v19 = vsel %vm1126_vm3, %v5243_v54, %v5245_v60  ;;  %v5320_v54 = vrot.slane %v5148_v8, 2  ;;  %v14072_v44 = vadd.f32 %v13689_v2, %v4713_v15 }
 0x806   : > { %5946 = vrot.lane.b32.xlu0 %v5244_v11, %s16714_s19  ;;  %16896 = vst [vmem:[#allocation194_spill] sm:$0xff] %v14068_v3 }
 0x807   : > { %v5749_v6 = vpop.permute.xlu1 %5748  ;;  %16897 = vst [vmem:[#allocation204_spill] sm:$0xff] %v14072_v44  ;;  %v5321_v60 = vsel %vm1207_vm2, %v5318_v9, %v5320_v54  ;;  %v6126_v9 = vsel %vm2101_vm6, %v6096_v21, %v13960_v57 }
 0x808   : > { %v6023_v20 = vpop.permute.xlu0 %6022 }
 0x809   : > { %v6317_v17 = vsel %vm495_vm0, %v6285_v33, %v6023_v20  ;;  %5574 = vrot.lane.b32.xlu1 %v14016_v41, %s16856_s0  ;;  %v4987_v20 = vadd.f32 %v16898_v36, %v14068_v3  ;;  %v6158_v36 = vsel %vm2134_vm7, %v6126_v9, %v13980_v40  ;;  %v6098_v3 = vsel %vm2068_vm5, %v13624_v14, %v14032_v51 }
 0x80a   : > { %5668 = vrot.lane.b32.xlu0 %v5244_v11, %s16712_s27  ;;  %8593 = vmatmul.mubr.msk.f32.gmra.mrb[62].mxu1 %vm2336_vm12, %v6317_v17  ;;  %v16899_v17 = vld [vmem:[#allocation34_spill] sm:$0xff] }
 0x80b   : > { %v14055_v12 = vpop.permute.xlu1 %5378  ;;  %v5064_v53 = vrot.slane %v4987_v20, 7 }
 0x80c   : > { %v14057_v16 = vpop.permute.xlu0 %5466 }
 0x80d   : > { %5948 = vrot.lane.b32.xlu1 %v5246_v19, %s16714_s19  ;;  %v14105_v22 = vsel %vm960_vm1, 0.0, %v5064_v53 }
 0x80e   : > { %6036 = vrot.lane.b32.xlu0 %v5319_v49, %s16715_s14 }
 0x80f   : > { %v5751_v37 = vpop.permute.xlu1 %5750 }
 0x810   : > { %v5845_v23 = vpop.permute.xlu0 %5844 }
 0x811   : > { %5392 = vrot.lane.b32.xlu1 %v5244_v11, %s16852_s16  ;;  %v4988_v11 = vadd.f32 %v16899_v17, %v14072_v44 }
 0x812   : > { %5670 = vrot.lane.b32.xlu0 %v5246_v19, %s16712_s27 }
 0x813   : > { %v14075_v43 = vpop.permute.xlu1 %5468  ;;  %v5065_v15 = vrot.slane %v4988_v11, 7 }
 0x814   : > { %v14077_v33 = vpop.permute.xlu0 %5560 }
 0x815   : > { %5764 = vrot.lane.b32.xlu1 %v5319_v49, %s16713_s22  ;;  %v14113_v21 = vsel %vm960_vm1, %v5064_v53, %v5065_v15 }
 0x816   : > { %6038 = vrot.lane.b32.xlu0 %v5321_v60, %s16715_s14 }
 0x817   : > { %v5847_v8 = vpop.permute.xlu1 %5846 }
 0x818   : > { %v5935_v58 = vpop.permute.xlu0 %5934 }
 0x819   : > { %5394 = vrot.lane.b32.xlu1 %v5246_v19, %s16852_s16  ;;  %v6190_v19 = vsel %vm2167_vm8, %v6158_v36, %v14000_v25  ;;  %v5248_v36 = vrot.slane %v14113_v21, 1 }
 0x81a   : > { %5482 = vrot.lane.b32.xlu0 %v5319_v49, %s16747_s24  ;;  %v6222_v61 = vsel %vm2200_vm9, %v6190_v19, %v5749_v6  ;;  %v5247_v6 = vrot.slane %v14105_v22, 1  ;;  %v6097_v19 = vsel %vm2068_vm5, %v13537_v34, %v13958_v32  ;;  %v5149_v32 = vsel %vm960_vm1, %v5065_v15, 0.0 }
 0x81b   : > { %v14093_v54 = vpop.permute.xlu1 %5562  ;;  %v6254_v40 = vsel %vm2233_vm10, %v6222_v61, %v5845_v23  ;;  %v6127_v23 = vsel %vm2101_vm6, %v6097_v19, %v13978_v47  ;;  %v5323_v15 = vrot.slane %v14113_v21, 2  ;;  %v4714_v19 = vmul.f32 %v13677_v52, %v13504_v39 }
 0x81c   : > { %v14097_v17 = vpop.permute.xlu0 %5656  ;;  %v6286_v49 = vsel %vm2266_vm11, %v6254_v40, %v5935_v58  ;;  %v5249_v34 = vsel %vm1126_vm3, %v5247_v6, %v5248_v36  ;;  %v5322_v6 = vrot.slane %v14105_v22, 2 }
 0x81d   : > { %5766 = vrot.lane.b32.xlu1 %v5321_v60, %s16713_s22  ;;  %v14102_v20 = vpop.f32.mrb[50].mxu1 }
 0x81e   : > { %v14108_v57 = vpop.f32.mrb[51].mxu1  ;;  %5860 = vrot.lane.b32.xlu0 %v14105_v22, %s16855_s3 }
 0x81f   : > { %v5937_v25 = vpop.permute.xlu1 %5936 }
 0x820   : > { %v6025_v11 = vpop.permute.xlu0 %6024 }
 0x821   : > { %v6318_v9 = vsel %vm495_vm0, %v6286_v49, %v6025_v11  ;;  %5484 = vrot.lane.b32.xlu1 %v5321_v60, %s16747_s24  ;;  %v6159_v60 = vsel %vm2134_vm7, %v6127_v23, %v13996_v28  ;;  %v5324_v23 = vsel %vm1207_vm2, %v5322_v6, %v5323_v15  ;;  %v16903_v6 = vld [vmem:[#allocation56_spill] sm:$0xff] }
 0x822   : > { %5576 = vrot.lane.b32.xlu0 %v14105_v22, %s16856_s0  ;;  %8595 = vmatprep.mubr.msk.f32.mxu1 %vm2336_vm12, %v6318_v9  ;;  %v6191_v61 = vsel %vm2167_vm8, %v6159_v60, %v14036_v62  ;;  %v5250_v9 = vrot.slane %v5149_v32, 1  ;;  %v4715_v60 = vmul.f32 %v13677_v52, %v13499_v26  ;;  %v16902_v26 = vld [vmem:[#allocation158_spill] sm:$0xff] }
 0x823   : > { %v14129_v58 = vpop.permute.xlu1 %5380  ;;  %v6223_v40 = vsel %vm2200_vm9, %v6191_v61, %v5751_v37 }
 0x824   : > { %v14133_v53 = vpop.permute.xlu0 %5658  ;;  %v6255_v47 = vsel %vm2233_vm10, %v6223_v40, %v5847_v8 }
 0x825   : > { %5862 = vrot.lane.b32.xlu1 %v14113_v21, %s16855_s3  ;;  %v6287_v28 = vsel %vm2266_vm11, %v6255_v47, %v5937_v25  ;;  %v5251_v25 = vsel %vm1126_vm3, %v5248_v36, %v5250_v9  ;;  %v14165_v47 = vadd.f32 %v13689_v2, %v4714_v19  ;;  %v5325_v36 = vrot.slane %v5149_v32, 2 }
 0x826   : > { %5950 = vrot.lane.b32.xlu0 %v5249_v34, %s16714_s19 }
 0x827   : > { %v5753_v49 = vpop.permute.xlu1 %5752  ;;  %16900 = vst [vmem:[#allocation180_spill] sm:$0xff] %v14165_v47  ;;  %v4989_v9 = vadd.f32 %v16902_v26, %v14165_v47 }
 0x828   : > { %v6027_v11 = vpop.permute.xlu0 %6026 }
 0x829   : > { %v6319_v62 = vsel %vm495_vm0, %v6287_v28, %v6027_v11  ;;  %5578 = vrot.lane.b32.xlu1 %v14113_v21, %s16856_s0  ;;  %v14169_v28 = vadd.f32 %v13689_v2, %v4715_v60  ;;  %v5067_v60 = vrot.slane %v4989_v9, 7 }
 0x82a   : > { %5672 = vrot.lane.b32.xlu0 %v5249_v34, %s16712_s27  ;;  %8596 = vmatmul.mubr.msk.f32.gmra.mrb[64].mxu1 %vm2336_vm12, %v6319_v62  ;;  %v5326_v62 = vsel %vm1207_vm2, %v5323_v15, %v5325_v36  ;;  %v6128_v15 = vsel %vm2101_vm6, %v6098_v3, %v14057_v16 }
 0x82b   : > { %v14152_v37 = vpop.permute.xlu1 %5382  ;;  %16901 = vst [vmem:[#allocation85_spill] sm:$0xff] %v14169_v28  ;;  %v6160_v26 = vsel %vm2134_vm7, %v6128_v15, %v14077_v33  ;;  %v14202_v14 = vsel %vm960_vm1, 0.0, %v5067_v60 }
 0x82c   : > { %v14154_v8 = vpop.permute.xlu0 %5470 }
 0x82d   : > { %5952 = vrot.lane.b32.xlu1 %v5251_v25, %s16714_s19 }
 0x82e   : > { %6040 = vrot.lane.b32.xlu0 %v5324_v23, %s16715_s14 }
 0x82f   : > { %v5755_v61 = vpop.permute.xlu1 %5754 }
 0x830   : > { %v5849_v40 = vpop.permute.xlu0 %5848 }
 0x831   : > { %5396 = vrot.lane.b32.xlu1 %v5249_v34, %s16852_s16  ;;  %v4990_v34 = vadd.f32 %v16903_v6, %v14169_v28 }
 0x832   : > { %5674 = vrot.lane.b32.xlu0 %v5251_v25, %s16712_s27 }
 0x833   : > { %v14172_v39 = vpop.permute.xlu1 %5472  ;;  %v5068_v44 = vrot.slane %v4990_v34, 7 }
 0x834   : > { %v14174_v11 = vpop.permute.xlu0 %5564 }
 0x835   : > { %5768 = vrot.lane.b32.xlu1 %v5324_v23, %s16713_s22  ;;  %v14210_v3 = vsel %vm960_vm1, %v5067_v60, %v5068_v44 }
 0x836   : > { %6042 = vrot.lane.b32.xlu0 %v5326_v62, %s16715_s14 }
 0x837   : > { %v5851_v32 = vpop.permute.xlu1 %5850 }
 0x838   : > { %v5939_v19 = vpop.permute.xlu0 %5938 }
 0x839   : > { %5398 = vrot.lane.b32.xlu1 %v5251_v25, %s16852_s16  ;;  %v6192_v25 = vsel %vm2167_vm8, %v6160_v26, %v14097_v17  ;;  %v5253_v26 = vrot.slane %v14210_v3, 1 }
 0x83a   : > { %5486 = vrot.lane.b32.xlu0 %v5324_v23, %s16747_s24  ;;  %v6224_v51 = vsel %vm2200_vm9, %v6192_v25, %v5753_v49  ;;  %v5252_v49 = vrot.slane %v14202_v14, 1  ;;  %v6099_v25 = vsel %vm2068_vm5, %v13630_v38, %v14055_v12  ;;  %v5150_v12 = vsel %vm960_vm1, %v5068_v44, 0.0 }
 0x83b   : > { %v14190_v36 = vpop.permute.xlu1 %5566  ;;  %v6256_v33 = vsel %vm2233_vm10, %v6224_v51, %v5849_v40  ;;  %v6129_v40 = vsel %vm2101_vm6, %v6099_v25, %v14075_v43  ;;  %v5328_v44 = vrot.slane %v14210_v3, 2  ;;  %v4716_v25 = vmul.f32 %v13677_v52, %v13530_v27 }
 0x83c   : > { %v14194_v6 = vpop.permute.xlu0 %5660  ;;  %v6288_v23 = vsel %vm2266_vm11, %v6256_v33, %v5939_v19  ;;  %v5254_v38 = vsel %vm1126_vm3, %v5252_v49, %v5253_v26  ;;  %v5327_v49 = vrot.slane %v14202_v14, 2 }
 0x83d   : > { %5770 = vrot.lane.b32.xlu1 %v5326_v62, %s16713_s22  ;;  %v14199_v9 = vpop.f32.mrb[52].mxu1 }
 0x83e   : > { %v14205_v16 = vpop.f32.mrb[53].mxu1  ;;  %5864 = vrot.lane.b32.xlu0 %v14202_v14, %s16855_s3 }
 0x83f   : > { %v5941_v17 = vpop.permute.xlu1 %5940 }
 0x840   : > { %v6029_v34 = vpop.permute.xlu0 %6028 }
 0x841   : > { %v6320_v15 = vsel %vm495_vm0, %v6288_v23, %v6029_v34  ;;  %5488 = vrot.lane.b32.xlu1 %v5326_v62, %s16747_s24  ;;  %v6161_v62 = vsel %vm2134_vm7, %v6129_v40, %v14093_v54  ;;  %v5329_v40 = vsel %vm1207_vm2, %v5327_v49, %v5328_v44 }
 0x842   : > { %5580 = vrot.lane.b32.xlu0 %v14202_v14, %s16856_s0  ;;  %8598 = vmatprep.mubr.msk.f32.mxu1 %vm2336_vm12, %v6320_v15  ;;  %v6193_v51 = vsel %vm2167_vm8, %v6161_v62, %v14133_v53  ;;  %v5255_v15 = vrot.slane %v5150_v12, 1  ;;  %v4717_v62 = vmul.f32 %v13677_v52, %v13521_v5  ;;  %v16906_v52 = vld [vmem:[#allocation69_spill] sm:$0xff] }
 0x843   : > { %v14226_v19 = vpop.permute.xlu1 %5384  ;;  %v6225_v33 = vsel %vm2200_vm9, %v6193_v51, %v5755_v61 }
 0x844   : > { %v14230_v60 = vpop.permute.xlu0 %5662  ;;  %v6257_v43 = vsel %vm2233_vm10, %v6225_v33, %v5851_v32 }
 0x845   : > { %5866 = vrot.lane.b32.xlu1 %v14210_v3, %s16855_s3  ;;  %v6289_v54 = vsel %vm2266_vm11, %v6257_v43, %v5941_v17  ;;  %v5256_v17 = vsel %vm1126_vm3, %v5253_v26, %v5255_v15  ;;  %v14262_v43 = vadd.f32 %v13689_v2, %v4716_v25  ;;  %v5330_v26 = vrot.slane %v5150_v12, 2 }
 0x846   : > { %5954 = vrot.lane.b32.xlu0 %v5254_v38, %s16714_s19 }
 0x847   : > { %v5757_v23 = vpop.permute.xlu1 %5756  ;;  %16904 = vst [vmem:[#allocation98_spill] sm:$0xff] %v14262_v43  ;;  %v5331_v5 = vsel %vm1207_vm2, %v5328_v44, %v5330_v26  ;;  %v4991_v15 = vadd.f32 %v16906_v52, %v14262_v43 }
 0x848   : > { %v6031_v34 = vpop.permute.xlu0 %6030 }
 0x849   : > { %v6321_v53 = vsel %vm495_vm0, %v6289_v54, %v6031_v34  ;;  %5582 = vrot.lane.b32.xlu1 %v14210_v3, %s16856_s0  ;;  %v14266_v54 = vadd.f32 %v13689_v2, %v4717_v62  ;;  %v5070_v49 = vrot.slane %v4991_v15, 7  ;;  %v6100_v62 = vsel %vm2068_vm5, %v13727_v56, %v14129_v58 }
 0x84a   : > { %5676 = vrot.lane.b32.xlu0 %v5254_v38, %s16712_s27  ;;  %8599 = vmatmul.mubr.msk.f32.gmra.mrb[66].mxu1 %vm2336_vm12, %v6321_v53  ;;  %v16907_v53 = vld [vmem:[#allocation164_spill] sm:$0xff]  ;;  %v6130_v44 = vsel %vm2101_vm6, %v6100_v62, %v14154_v8 }
 0x84b   : > { %v14249_v61 = vpop.permute.xlu1 %5386  ;;  %16905 = vst [vmem:[#allocation185_spill] sm:$0xff] %v14266_v54  ;;  %v6162_v52 = vsel %vm2134_vm7, %v6130_v44, %v14174_v11  ;;  %v5135_v56 = vsel %vm960_vm1, 0.0, %v5070_v49 }
 0x84c   : > { %v14251_v32 = vpop.permute.xlu0 %5474  ;;  %v5334_v44 = vrot.slane %v5135_v56, 1 }
 0x84d   : > { %5956 = vrot.lane.b32.xlu1 %v5256_v17, %s16714_s19 }
 0x84e   : > { %6044 = vrot.lane.b32.xlu0 %v5329_v40, %s16715_s14 }
 0x84f   : > { %v5759_v51 = vpop.permute.xlu1 %5758 }
 0x850   : > { %v5853_v33 = vpop.permute.xlu0 %5852 }
 0x851   : > { %5400 = vrot.lane.b32.xlu1 %v5254_v38, %s16852_s16  ;;  %v4992_v38 = vadd.f32 %v16907_v53, %v14266_v54 }
 0x852   : > { %5678 = vrot.lane.b32.xlu0 %v5256_v17, %s16712_s27 }
 0x853   : > { %v14269_v27 = vpop.permute.xlu1 %5476  ;;  %v5071_v25 = vrot.slane %v4992_v38, 7 }
 0x854   : > { %v14271_v34 = vpop.permute.xlu0 %5568 }
 0x855   : > { %5772 = vrot.lane.b32.xlu1 %v5329_v40, %s16713_s22  ;;  %v5072_v8 = vsel %vm960_vm1, %v5070_v49, %v5071_v25 }
 0x856   : > { %6046 = vrot.lane.b32.xlu0 %v5331_v5, %s16715_s14  ;;  %v5335_v54 = vrot.slane %v5072_v8, 1 }
 0x857   : > { %v5855_v2 = vpop.permute.xlu1 %5854 }
 0x858   : > { %v5943_v12 = vpop.permute.xlu0 %5942 }
 0x859   : > { %5402 = vrot.lane.b32.xlu1 %v5256_v17, %s16852_s16  ;;  %v6194_v17 = vsel %vm2167_vm8, %v6162_v52, %v14194_v6 }
 0x85a   : > { %5490 = vrot.lane.b32.xlu0 %v5329_v40, %s16747_s24  ;;  %v6226_v58 = vsel %vm2200_vm9, %v6194_v17, %v5757_v23  ;;  %v6101_v23 = vsel %vm2068_vm5, %v13733_v24, %v14152_v37  ;;  %v5336_v24 = vsel %vm1126_vm3, %v5334_v44, %v5335_v54  ;;  %v5151_v37 = vsel %vm960_vm1, %v5071_v25, 0.0 }
 0x85b   : > { %v14287_v26 = vpop.permute.xlu1 %5570  ;;  %v6258_v11 = vsel %vm2233_vm10, %v6226_v58, %v5853_v33  ;;  %v6131_v33 = vsel %vm2101_vm6, %v6101_v23, %v14172_v39  ;;  %v5340_v23 = vrot.slane %v5072_v8, 2 }
 0x85c   : > { %v14291_v53 = vpop.permute.xlu0 %5664  ;;  %v6290_v62 = vsel %vm2266_vm11, %v6258_v11, %v5943_v12  ;;  %v6163_v12 = vsel %vm2134_vm7, %v6131_v33, %v14190_v36  ;;  %v5342_v33 = vrot.slane %v5151_v37, 2 }
 0x85d   : > { %5774 = vrot.lane.b32.xlu1 %v5331_v5, %s16713_s22  ;;  %v14296_v15 = vpop.f32.mrb[54].mxu1 }
 0x85e   : > { %v14300_v40 = vpop.f32.mrb[55].mxu1  ;;  %5868 = vrot.lane.b32.xlu0 %v5135_v56, %s16855_s3 }
 0x85f   : > { %v5945_v38 = vpop.permute.xlu1 %5944 }
 0x860   : > { %v6033_v6 = vpop.permute.xlu0 %6032 }
 0x861   : > { %v6322_v52 = vsel %vm495_vm0, %v6290_v62, %v6033_v6  ;;  %5492 = vrot.lane.b32.xlu1 %v5331_v5, %s16747_s24  ;;  %v6195_v5 = vsel %vm2167_vm8, %v6163_v12, %v14230_v60  ;;  %v5337_v6 = vrot.slane %v5151_v37, 1 }
 0x862   : > { %5584 = vrot.lane.b32.xlu0 %v5135_v56, %s16856_s0  ;;  %8601 = vmatprep.mubr.msk.f32.mxu1 %vm2336_vm12, %v6322_v52  ;;  %v6227_v58 = vsel %vm2200_vm9, %v6195_v5, %v5759_v51  ;;  %v5339_v52 = vrot.slane %v5135_v56, 2  ;;  %v5343_v5 = vsel %vm1207_vm2, %v5340_v23, %v5342_v33 }
 0x863   : > { %v14315_v49 = vpop.permute.xlu1 %5388  ;;  %v6259_v39 = vsel %vm2233_vm10, %v6227_v58, %v5855_v2  ;;  %v5338_v2 = vsel %vm1126_vm3, %v5335_v54, %v5337_v6  ;;  %v6102_v58 = vsel %vm2068_vm5, %v13820_v50, %v14226_v19 }
 0x864   : > { %v5667_v17 = vpop.permute.xlu0 %5666  ;;  %v6291_v62 = vsel %vm2266_vm11, %v6259_v39, %v5945_v38  ;;  %v5341_v38 = vsel %vm1207_vm2, %v5339_v52, %v5340_v23  ;;  %v6132_v37 = vsel %vm2101_vm6, %v6102_v58, %v14251_v32 }
 0x865   : > { %5870 = vrot.lane.b32.xlu1 %v5072_v8, %s16855_s3 }
 0x866   : > { %5958 = vrot.lane.b32.xlu0 %v5336_v24, %s16714_s19 }
 0x867   : > { %v5761_v11 = vpop.permute.xlu1 %5760 }
 0x868   : > { %v6035_v36 = vpop.permute.xlu0 %6034 }
 0x869   : > { %v6323_v60 = vsel %vm495_vm0, %v6291_v62, %v6035_v36  ;;  %5586 = vrot.lane.b32.xlu1 %v5072_v8, %s16856_s0  ;;  %v6164_v62 = vsel %vm2134_vm7, %v6132_v37, %v14271_v34  ;;  %v6103_v34 = vsel %vm2068_vm5, %v13826_v29, %v14249_v61 }
 0x86a   : > { %5680 = vrot.lane.b32.xlu0 %v5336_v24, %s16712_s27  ;;  %8602 = vmatmul.mubr.msk.f32.gmra.mrb[68].mxu1 %vm2336_vm12, %v6323_v60  ;;  %v6196_v6 = vsel %vm2167_vm8, %v6164_v62, %v14291_v53  ;;  %v6133_v53 = vsel %vm2101_vm6, %v6103_v34, %v14269_v27 }
 0x86b   : > { %v14332_v51 = vpop.permute.xlu1 %5390  ;;  %v6228_v23 = vsel %vm2200_vm9, %v6196_v6, %v5761_v11  ;;  %v6165_v33 = vsel %vm2134_vm7, %v6133_v53, %v14287_v26 }
 0x86c   : > { %v5479_v25 = vpop.permute.xlu0 %5478 }
 0x86d   : > { %5960 = vrot.lane.b32.xlu1 %v5338_v2, %s16714_s19  ;;  %s8207_s19 = sshll.u32 %s9058_s29, 12  ;;  %s7913_s29 = scalar_lea.sflag [#allocation4], %s9141_s30 }
 0x86e   : > { %6048 = vrot.lane.b32.xlu0 %v5341_v38, %s16715_s14  ;;  %s15727_s1 = scalar_lea.hbm %s15791_s13, %s8207_s19 }
 0x86f   : > { %v5763_v56 = vpop.permute.xlu1 %5762 }
 0x870   : > { %v5857_v44 = vpop.permute.xlu0 %5856 }
 0x871   : > { %5682 = vrot.lane.b32.xlu1 %v5338_v2, %s16712_s27  ;;  %v6260_v2 = vsel %vm2233_vm10, %v6228_v23, %v5857_v44  ;;  %s17035_s27 = sshll.u32 %s9141_s30, 8 }
 0x872   : > { %5776 = vrot.lane.b32.xlu0 %v5341_v38, %s16713_s22 }
 0x873   : > { %v5481_v8 = vpop.permute.xlu1 %5480 }
 0x874   : > { %v5573_v12 = vpop.permute.xlu0 %5572 }
 0x875   : > { %6050 = vrot.lane.b32.xlu1 %v5343_v5, %s16715_s14 }
 0x876   : > { %5778 = vrot.lane.b32.xlu0 %v5343_v5, %s16713_s22  ;;  %v6197_v5 = vsel %vm2167_vm8, %v6165_v33, %v5667_v17  ;;  %s15570_s22 = scalar_lea.vmem [#allocation5], %s17035_s27 }
 0x877   : > { %v5859_v54 = vpop.permute.xlu1 %5858  ;;  %s7926_s14 = sshll.u32 %s15570_s22, 4  ;;  %s15729_s14 = int_to_ptr.vmem [resolvable:$true] %s7926_s14 }
 0x878   : > { %v5947_v24 = vpop.permute.xlu0 %5946  ;;  %s8882_s2 = scalar_lea.vmem %s15729_s14, 4096 }
 0x879   : > { %v6292_v19 = vsel %vm2266_vm11, %v6260_v2, %v5947_v24  ;;  %v6229_v24 = vsel %vm2200_vm9, %v6197_v5, %v5763_v56  ;;  %v6104_v56 = vsel %vm2068_vm5, %v13913_v55, %v14315_v49  ;;  %p8883_p6 = scmp.ne.s32.totalorder %s15729_s14, %s8882_s2 }
 0x87a   : > { %v6261_v58 = vsel %vm2233_vm10, %v6229_v24, %v5859_v54  ;;  %v6134_v54 = vsel %vm2101_vm6, %v6104_v56, %v5479_v25  ;;  %v6105_v25 = vsel %vm2068_vm5, %v13919_v45, %v14332_v51 }
 0x87b   : > { %v5575_v39 = vpop.permute.xlu1 %5574  ;;  %p8884_p12 = pnand %p8883_p6, %p17036_p11 }
 0x87c   : > { %v5669_v36 = vpop.permute.xlu0 %5668 }
 0x87d   : > { %v14352_v52 = vpop.f32.mrb[56].mxu1  ;;  %p8885_p13 = pneg %p8884_p12 }
 0x87e   : > { %v14355_v60 = vpop.f32.mrb[57].mxu1 }
 0x87f   : > { %v5949_v50 = vpop.permute.xlu1 %5948 }
 0x880   : > { %v6037_v32 = vpop.permute.xlu0 %6036  ;;  %v6293_v62 = vsel %vm2266_vm11, %v6261_v58, %v5949_v50 }
 0x881   : > { %v6324_v38 = vsel %vm495_vm0, %v6292_v19, %v6037_v32 }
 0x882   : > { %8604 = vmatprep.mubr.msk.f32.mxu1 %vm2336_vm12, %v6324_v38  ;;  %v6166_v38 = vsel %vm2134_vm7, %v6134_v54, %v5573_v12  ;;  %v6135_v12 = vsel %vm2101_vm6, %v6105_v25, %v5481_v8 }
 0x883   : > { %v5393_v11 = vpop.permute.xlu1 %5392  ;;  %v6198_v53 = vsel %vm2167_vm8, %v6166_v38, %v5669_v36 }
 0x884   : > { %v5671_v44 = vpop.permute.xlu0 %5670 }
 0x887   : > { %v5765_v37 = vpop.permute.xlu1 %5764 }
 0x888   : > { %v6039_v29 = vpop.permute.xlu0 %6038  ;;  %v6230_v5 = vsel %vm2200_vm9, %v6198_v53, %v5765_v37  ;;  %v6167_v37 = vsel %vm2134_vm7, %v6135_v12, %v5575_v39 }
 0x889   : > { %v6325_v61 = vsel %vm495_vm0, %v6293_v62, %v6039_v29 }
 0x88a   : > { %8605 = vmatmul.mubr.msk.f32.gmra.mrb[70].mxu1 %vm2336_vm12, %v6325_v61 }
 0x88b   : > { %v5395_v27 = vpop.permute.xlu1 %5394 }
 0x88c   : > { %v5483_v6 = vpop.permute.xlu0 %5482 }
 0x88f   : > { %v5767_v23 = vpop.permute.xlu1 %5766 }
 0x890   : > { %v5861_v2 = vpop.permute.xlu0 %5860 }
 0x891   : > { %v6262_v58 = vsel %vm2233_vm10, %v6230_v5, %v5861_v2  ;;  %v6199_v2 = vsel %vm2167_vm8, %v6167_v37, %v5671_v44 }
 0x892   : > { %v6231_v56 = vsel %vm2200_vm9, %v6199_v2, %v5767_v23  ;;  %v6106_v23 = vsel %vm2068_vm5, %v14008_v1, %v5393_v11 }
 0x893   : > { %v5485_v26 = vpop.permute.xlu1 %5484 }
 0x894   : > { %v5577_v19 = vpop.permute.xlu0 %5576 }
 0x897   : > { %v5863_v32 = vpop.permute.xlu1 %5862 }
 0x898   : > { %v5951_v17 = vpop.permute.xlu0 %5950 }
 0x899   : > { %v6294_v29 = vsel %vm2266_vm11, %v6262_v58, %v5951_v17  ;;  %v6263_v17 = vsel %vm2233_vm10, %v6231_v56, %v5863_v32  ;;  %v6136_v32 = vsel %vm2101_vm6, %v6106_v23, %v5483_v6  ;;  %v6107_v6 = vsel %vm2068_vm5, %v14016_v41, %v5395_v27 }
 0x89b   : > { %v5579_v50 = vpop.permute.xlu1 %5578 }
 0x89c   : > { %v5673_v34 = vpop.permute.xlu0 %5672 }
 0x89d   : > { %v14380_v33 = vpop.f32.mrb[58].mxu1 }
 0x89e   : > { %v14383_v24 = vpop.f32.mrb[59].mxu1 }
 0x89f   : > { %v5953_v62 = vpop.permute.xlu1 %5952 }
 0x8a0   : > { %v6041_v55 = vpop.permute.xlu0 %6040  ;;  %v6295_v38 = vsel %vm2266_vm11, %v6263_v17, %v5953_v62  ;;  %v6168_v62 = vsel %vm2134_vm7, %v6136_v32, %v5577_v19  ;;  %v6137_v19 = vsel %vm2101_vm6, %v6107_v6, %v5485_v26 }
 0x8a1   : > { %v6326_v49 = vsel %vm495_vm0, %v6294_v29, %v6041_v55  ;;  %v6200_v12 = vsel %vm2167_vm8, %v6168_v62, %v5673_v34 }
 0x8a2   : > { %8607 = vmatprep.mubr.msk.f32.mxu1 %vm2336_vm12, %v6326_v49 }
 0x8a3   : > { %v5397_v36 = vpop.permute.xlu1 %5396 }
 0x8a4   : > { %v5675_v61 = vpop.permute.xlu0 %5674 }
 0x8a7   : > { %v5769_v54 = vpop.permute.xlu1 %5768 }
 0x8a8   : > { %v6043_v53 = vpop.permute.xlu0 %6042  ;;  %v6232_v2 = vsel %vm2200_vm9, %v6200_v12, %v5769_v54  ;;  %v6169_v54 = vsel %vm2134_vm7, %v6137_v19, %v5579_v50 }
 0x8a9   : > { %v6327_v45 = vsel %vm495_vm0, %v6295_v38, %v6043_v53  ;;  %v6201_v23 = vsel %vm2167_vm8, %v6169_v54, %v5675_v61 }
 0x8aa   : > { %8608 = vmatmul.mubr.msk.f32.gmra.mrb[72].mxu1 %vm2336_vm12, %v6327_v45 }
 0x8ab   : > { %v5399_v51 = vpop.permute.xlu1 %5398 }
 0x8ac   : > { %v5487_v8 = vpop.permute.xlu0 %5486 }
 0x8af   : > { %v5771_v5 = vpop.permute.xlu1 %5770 }
 0x8b0   : > { %v5865_v58 = vpop.permute.xlu0 %5864 }
 0x8b1   : > { %v6264_v17 = vsel %vm2233_vm10, %v6232_v2, %v5865_v58  ;;  %v6233_v58 = vsel %vm2200_vm9, %v6201_v23, %v5771_v5  ;;  %v6108_v5 = vsel %vm2068_vm5, %v14105_v22, %v5397_v36  ;;  %v6109_v36 = vsel %vm2068_vm5, %v14113_v21, %v5399_v51 }
 0x8b3   : > { %v5489_v39 = vpop.permute.xlu1 %5488 }
 0x8b4   : > { %v5581_v29 = vpop.permute.xlu0 %5580 }
 0x8b7   : > { %v5867_v55 = vpop.permute.xlu1 %5866 }
 0x8b8   : > { %v5955_v44 = vpop.permute.xlu0 %5954 }
 0x8b9   : > { %v6296_v53 = vsel %vm2266_vm11, %v6264_v17, %v5955_v44  ;;  %v6265_v44 = vsel %vm2233_vm10, %v6233_v58, %v5867_v55  ;;  %v6138_v55 = vsel %vm2101_vm6, %v6108_v5, %v5487_v8 }
 0x8bb   : > { %v5583_v49 = vpop.permute.xlu1 %5582 }
 0x8bc   : > { %v5677_v25 = vpop.permute.xlu0 %5676 }
 0x8bd   : > { %v14405_v37 = vpop.f32.mrb[60].mxu1 }
 0x8be   : > { %v14408_v56 = vpop.f32.mrb[61].mxu1 }
 0x8bf   : > { %v5957_v38 = vpop.permute.xlu1 %5956 }
 0x8c0   : > { %v6045_v1 = vpop.permute.xlu0 %6044  ;;  %v6297_v62 = vsel %vm2266_vm11, %v6265_v44, %v5957_v38  ;;  %v6170_v38 = vsel %vm2134_vm7, %v6138_v55, %v5581_v29 }
 0x8c1   : > { %v6328_v11 = vsel %vm495_vm0, %v6296_v53, %v6045_v1  ;;  %v6202_v19 = vsel %vm2167_vm8, %v6170_v38, %v5677_v25  ;;  %v6139_v25 = vsel %vm2101_vm6, %v6109_v36, %v5489_v39  ;;  %v16913_v36 = vld [vmem:[#allocation58_spill] sm:$0xff] }
 0x8c2   : > { %8610 = vmatprep.mubr.msk.f32.mxu1 %vm2336_vm12, %v6328_v11 }
 0x8c3   : > { %v5401_v34 = vpop.permute.xlu1 %5400 }
 0x8c4   : > { %v5679_v45 = vpop.permute.xlu0 %5678  ;;  %v6110_v8 = vsel %vm2068_vm5, %v14202_v14, %v5401_v34 }
 0x8c7   : > { %v5773_v32 = vpop.permute.xlu1 %5772 }
 0x8c8   : > { %v6047_v12 = vpop.permute.xlu0 %6046  ;;  %v6234_v23 = vsel %vm2200_vm9, %v6202_v19, %v5773_v32  ;;  %v16909_v19 = vld [vmem:[#allocation149_spill] sm:$0xff] }
 0x8c9   : > { %v6329_v41 = vsel %vm495_vm0, %v6297_v62, %v6047_v12 }
 0x8ca   : > { %8611 = vmatmul.mubr.msk.f32.gmra.mrb[74].mxu1 %vm2336_vm12, %v6329_v41  ;;  %v6171_v41 = vsel %vm2134_vm7, %v6139_v25, %v5583_v49  ;;  %v16908_v49 = vld [vmem:[#allocation150_spill] sm:$0xff] }
 0x8cb   : > { %v5403_v27 = vpop.permute.xlu1 %5402  ;;  %v6203_v5 = vsel %vm2167_vm8, %v6171_v41, %v5679_v45 }
 0x8cc   : > { %v5491_v26 = vpop.permute.xlu0 %5490  ;;  %v6111_v14 = vsel %vm2068_vm5, %v14210_v3, %v5403_v27 }
 0x8cd   : > { %v6140_v32 = vsel %vm2101_vm6, %v6110_v8, %v5491_v26 }
 0x8cf   : > { %v5775_v2 = vpop.permute.xlu1 %5774 }
 0x8d0   : > { %v5869_v17 = vpop.permute.xlu0 %5868  ;;  %v6235_v34 = vsel %vm2200_vm9, %v6203_v5, %v5775_v2  ;;  %v14489_v5 = vld [vmem:[%s15785_s7 + $0x8] sm:$0xff] }
 0x8d1   : > { %v6266_v44 = vsel %vm2233_vm10, %v6234_v23, %v5869_v17 }
 0x8d3   : > { %v5493_v50 = vpop.permute.xlu1 %5492 }
 0x8d4   : > { %v5585_v53 = vpop.permute.xlu0 %5584  ;;  %v6141_v26 = vsel %vm2101_vm6, %v6111_v14, %v5493_v50 }
 0x8d5   : > { %v6172_v17 = vsel %vm2134_vm7, %v6140_v32, %v5585_v53 }
 0x8d7   : > { %v5871_v1 = vpop.permute.xlu1 %5870 }
 0x8d8   : > { %v5959_v61 = vpop.permute.xlu0 %5958  ;;  %v6267_v55 = vsel %vm2233_vm10, %v6235_v34, %v5871_v1  ;;  %v16917_v34 = vld [vmem:[#allocation123_spill] sm:$0xff] }
 0x8d9   : > { %v6298_v12 = vsel %vm2266_vm11, %v6266_v44, %v5959_v61  ;;  %v16910_v44 = vld [vmem:[#allocation81_spill] sm:$0xff] }
 0x8db   : > { %v5587_v11 = vpop.permute.xlu1 %5586 }
 0x8dc   : > { %v5681_v6 = vpop.permute.xlu0 %5680  ;;  %v6173_v38 = vsel %vm2134_vm7, %v6141_v26, %v5587_v11  ;;  %v14503_v26 = vld [vmem:[%s15785_s7 + $0x10] sm:$0xff] }
 0x8dd   : > { %v14429_v54 = vpop.f32.mrb[62].mxu1  ;;  %v6204_v21 = vsel %vm2167_vm8, %v6172_v17, %v5681_v6 }
 0x8de   : > { %v14432_v58 = vpop.f32.mrb[63].mxu1 }
 0x8df   : > { %v5961_v62 = vpop.permute.xlu1 %5960 }
 0x8e0   : > { %v6049_v22 = vpop.permute.xlu0 %6048  ;;  %v6299_v45 = vsel %vm2266_vm11, %v6267_v55, %v5961_v62  ;;  %v16912_v62 = vld [vmem:[#allocation54_spill] sm:$0xff]  ;;  %v16918_v55 = vld [vmem:[#allocation87_spill] sm:$0xff] }
 0x8e1   : > { %v6330_v29 = vsel %vm495_vm0, %v6298_v12, %v6049_v22  ;;  %v16911_v12 = vld [vmem:[#allocation55_spill] sm:$0xff] }
 0x8e2   : > { %8613 = vmatprep.mubr.msk.f32.mxu1 %vm2336_vm12, %v6330_v29 }
 0x8e3   : > { %v5683_v61 = vpop.permute.xlu1 %5682 }
 0x8e4   : > { %v5777_v51 = vpop.permute.xlu0 %5776  ;;  %v6205_v3 = vsel %vm2167_vm8, %v6173_v38, %v5683_v61 }
 0x8e5   : > { %v6236_v39 = vsel %vm2200_vm9, %v6204_v21, %v5777_v51  ;;  %v14494_v21 = vld [vmem:[%s15785_s7] sm:$0xff]  ;;  %v16916_v51 = vld [vmem:[#allocation144_spill] sm:$0xff] }
 0x8e6   : > { %v6268_v53 = vsel %vm2233_vm10, %v6236_v39, %v16908_v49  ;;  %v4759_v14 = vmul.f32 %v16916_v51, %v14489_v5  ;;  %v4758_v39 = vmul.f32 %v16917_v34, %v14494_v21  ;;  %v2773_v49 = vmul.f32 %v14489_v5, %v16918_v55  ;;  %v16931_v34 = vld [vmem:[#allocation15_spill] sm:$0xff] }
 0x8e7   : > { %v6051_v6 = vpop.permute.xlu1 %6050  ;;  %v6300_v23 = vsel %vm2266_vm11, %v6268_v53, %v16909_v19  ;;  %v16919_v53 = vld [vmem:[#allocation177_spill] sm:$0xff] }
 0x8e8   : > { %v6331_v27 = vsel %vm495_vm0, %v6299_v45, %v6051_v6  ;;  %v5779_v2 = vpop.permute.xlu0 %5778  ;;  %v6332_v50 = vsel %vm495_vm0, %v6300_v23, %v16910_v44  ;;  %v2772_v38 = vmul.f32 %v14494_v21, %v16919_v53  ;;  %v16920_v45 = vld [vmem:[#allocation129_spill] sm:$0xff]  ;;  %v4791_v19 = vsel %vm2068_vm5, %v4759_v14, 0.0 }
 0x8e9   : > { %v6237_v1 = vsel %vm2200_vm9, %v6205_v3, %v5779_v2  ;;  %8614 = vmatmul.mubr.msk.f32.gmra.mrb[76].mxu1 %vm2336_vm12, %v6331_v27  ;;  %v4760_v6 = vmul.f32 %v16920_v45, %v14503_v26  ;;  %v4790_v23 = vsel %vm2068_vm5, %v4758_v39, 0.0  ;;  %v16921_v3 = vld [vmem:[#allocation80_spill] sm:$0xff]  ;;  %v2805_v2 = vsel %vm2068_vm5, %v2773_v49, 0.0  ;;  %v16930_v45 = vld [vmem:[#allocation67_spill] sm:$0xff] }
 0x8ea   : > { %v6269_v11 = vsel %vm2233_vm10, %v6237_v1, %v16911_v12  ;;  %8616 = vmatprep.mubr.msk.f32.mxu1 %vm2336_vm12, %v6332_v50  ;;  %v2774_v27 = vmul.f32 %v14503_v26, %v16921_v3  ;;  %v2804_v44 = vsel %vm2068_vm5, %v2772_v38, 0.0  ;;  %v4792_v1 = vadd.f32 %v4791_v19, %v4790_v23  ;;  %v14521_v12 = vld [vmem:[%s15785_s7 + $0x18] sm:$0xff]  ;;  %v16924_v38 = vld [vmem:[#allocation59_spill] sm:$0xff] }
 0x8eb   : > { %v6301_v22 = vsel %vm2266_vm11, %v6269_v11, %v16912_v62  ;;  %v4793_v50 = vsel %vm2068_vm5, %v4760_v6, 0.0  ;;  %v14526_v11 = vld [vmem:[%s15785_s7 + $0x20] sm:$0xff]  ;;  %v16922_v62 = vld [vmem:[#allocation42_spill] sm:$0xff]  ;;  %v2806_v39 = vadd.f32 %v2805_v2, %v2804_v44  ;;  %v2775_v6 = vmul.f32 %v14521_v12, %v16924_v38  ;;  %v16925_v19 = vld [vmem:[#allocation20_spill] sm:$0xff] }
 0x8ec   : > { %v6333_v8 = vsel %vm495_vm0, %v6301_v22, %v16913_v36  ;;  %v4761_v22 = vmul.f32 %v16922_v62, %v14521_v12  ;;  %v2807_v36 = vsel %vm2068_vm5, %v2774_v27, 0.0  ;;  %v4794_v49 = vadd.f32 %v4793_v50, %v4792_v1  ;;  %v14543_v27 = vld [vmem:[%s15785_s7 + $0x28] sm:$0xff]  ;;  %v14549_v2 = vld [vmem:[%s15785_s7 + $0x30] sm:$0xff] }
 0x8ed   : > { %8617 = vmatmul.mubr.msk.f32.gmra.mrb[78].mxu1 %vm2336_vm12, %v6333_v8  ;;  %v16923_v8 = vld [vmem:[#allocation60_spill] sm:$0xff]  ;;  %v2776_v23 = vmul.f32 %v14526_v11, %v16925_v19  ;;  %v2808_v3 = vadd.f32 %v2807_v36, %v2806_v39  ;;  %v2809_v1 = vsel %vm2068_vm5, %v2775_v6, 0.0  ;;  %v16929_v19 = vld [vmem:[#allocation35_spill] sm:$0xff] }
 0x8ee   : > { %v4762_v14 = vmul.f32 %v16923_v8, %v14526_v11  ;;  %v4795_v55 = vsel %vm2068_vm5, %v4761_v22, 0.0  ;;  %v16928_v36 = vld [vmem:[#allocation136_spill] sm:$0xff]  ;;  %v4764_v38 = vmul.f32 %v16929_v19, %v14549_v2 }
 0x8ef   : > { %v4796_v50 = vadd.f32 %v4795_v55, %v4794_v49  ;;  %v4763_v22 = vmul.f32 %v16928_v36, %v14543_v27  ;;  %v2811_v39 = vsel %vm2068_vm5, %v2776_v23, 0.0  ;;  %v2810_v62 = vadd.f32 %v2809_v1, %v2808_v3  ;;  %v14566_v55 = vld [vmem:[%s15783_s5 + $0x2] ss:$0 sm:$0xff]  ;;  %v14572_v23 = vld [vmem:[%s15785_s7 + $0x38] sm:$0xff] }
 0x8f0   : > { %v4797_v8 = vsel %vm2068_vm5, %v4762_v14, 0.0  ;;  %v2777_v14 = vmul.f32 %v14543_v27, %v16930_v45  ;;  %v4801_v45 = vsel %vm2068_vm5, %v4764_v38, 0.0  ;;  %v14580_v1 = vld [vmem:[%s15785_s7 + $0x40] sm:$0xff]  ;;  %v16933_v38 = vld [vmem:[#allocation152_spill] sm:$0xff] }
 0x8f1   : > { %v4798_v51 = vadd.f32 %v4797_v8, %v4796_v50  ;;  %v2812_v49 = vadd.f32 %v2811_v39, %v2810_v62  ;;  %v4799_v6 = vsel %vm2068_vm5, %v4763_v22, 0.0  ;;  %v6673_v62 = vmul.f32 %v14005_v42, %v14566_v55  ;;  %v16932_v39 = vld [vmem:[#allocation151_spill] sm:$0xff] }
 0x8f2   : > { %v2813_v3 = vsel %vm2068_vm5, %v2777_v14, 0.0  ;;  %v6672_v22 = vmul.f32 %v14566_v55, %v14011_v0  ;;  %v4766_v14 = vmul.f32 %v16933_v38, %v14580_v1  ;;  %v6674_v42 = vmul.f32 %v14566_v55, %v14108_v57  ;;  %v14602_v0 = vld [vmem:[%s15785_s7 + $0x48] sm:$0xff]  ;;  %v14617_v57 = vld [vmem:[%s15785_s7 + $0x50] sm:$0xff] }
 0x8f3   : > { %v4800_v50 = vadd.f32 %v4799_v6, %v4798_v51  ;;  %v14593_v51 = vld [vmem:[%s15784_s6 + $0x2] ss:$0 sm:$0xff]  ;;  %v2814_v19 = vadd.f32 %v2813_v3, %v2812_v49 }
 0x8f4   : > { %v14607_v28 = vadd.f32 %v14593_v51, %v6673_v62  ;;  %v4805_v49 = vsel %vm2068_vm5, %v4766_v14, 0.0  ;;  %v14623_v62 = vadd.f32 %v14593_v51, %v6674_v42  ;;  %v16939_v14 = vld [vmem:[#allocation47_spill] sm:$0xff]  ;;  %v6675_v42 = vmul.f32 %v14102_v20, %v14566_v55  ;;  %v14653_v20 = vld [vmem:[%s15785_s7 + $0x60] sm:$0xff] }
 0x8f5   : > { %v4802_v36 = vadd.f32 %v4801_v45, %v4800_v50  ;;  %v16936_v50 = vld [vmem:[#allocation73_spill] sm:$0xff] }
 0x8f6   : > { %16937 = vst [vmem:[#allocation114_spill] sm:$0xff] %v14623_v62 }
 0x8fd   : > { %v14474_v29 = vpop.f32.mrb[64].mxu1 }
 0x8fe   : > { %v14476_v25 = vpop.f32.mrb[65].mxu1 }
 0x91d   : > { %v14478_v32 = vpop.f32.mrb[66].mxu1 }
 0x91e   : > { %v14480_v41 = vpop.f32.mrb[67].mxu1 }
 0x93d   : > { %v14482_v17 = vpop.f32.mrb[68].mxu1 }
 0x93e   : > { %16914 = vst [vmem:[#allocation64_spill] sm:$0xff] %v14482_v17  ;;  %v14484_v61 = vpop.f32.mrb[69].mxu1 }
 0x93f   : > { %16915 = vst [vmem:[#allocation195_spill] sm:$0xff] %v14484_v61  ;;  %v16940_v61 = vld [vmem:[#allocation66_spill] sm:$0xff] }
 0x95d   : > { %v14537_v53 = vpop.f32.mrb[70].mxu1 }
 0x95e   : > { %16926 = vst [vmem:[#allocation205_spill] sm:$0xff] %v14537_v53  ;;  %v14551_v44 = vpop.f32.mrb[71].mxu1  ;;  %v2778_v53 = vmul.f32 %v14549_v2, %v16931_v34  ;;  %v4765_v34 = vmul.f32 %v16932_v39, %v14572_v23  ;;  %v16935_v39 = vld [vmem:[#allocation88_spill] sm:$0xff] }
 0x95f   : > { %16927 = vst [vmem:[#allocation199_spill] sm:$0xff] %v14551_v44  ;;  %v2780_v38 = vmul.f32 %v14580_v1, %v16935_v39  ;;  %v14610_v44 = vadd.f32 %v14593_v51, %v6672_v22  ;;  %v16938_v22 = vld [vmem:[#allocation169_spill] sm:$0xff] }
 0x960   : > { %v2815_v8 = vsel %vm2068_vm5, %v2778_v53, 0.0  ;;  %v16934_v53 = vld [vmem:[#allocation86_spill] sm:$0xff]  ;;  %v4803_v45 = vsel %vm2068_vm5, %v4765_v34, 0.0  ;;  %v4767_v39 = vmul.f32 %v16938_v22, %v14602_v0 }
 0x961   : > { %v2779_v6 = vmul.f32 %v14572_v23, %v16934_v53  ;;  %v2816_v43 = vadd.f32 %v2815_v8, %v2814_v19  ;;  %v2781_v19 = vmul.f32 %v14602_v0, %v16936_v50  ;;  %v4804_v8 = vadd.f32 %v4803_v45, %v4802_v36 }
 0x962   : > { %v2819_v34 = vsel %vm2068_vm5, %v2780_v38, 0.0  ;;  %v4768_v53 = vmul.f32 %v16939_v14, %v14617_v57  ;;  %v6745_v50 = vmul.f32 %v14607_v28, %v14489_v5  ;;  %v6744_v36 = vmul.f32 %v14610_v44, %v14494_v21  ;;  %v14647_v5 = vld [vmem:[%s15785_s7 + $0x58] sm:$0xff]  ;;  %v16942_v14 = vld [vmem:[#allocation110_spill] sm:$0xff] }
 0x963   : > { %v2817_v3 = vsel %vm2068_vm5, %v2779_v6, 0.0  ;;  %v4806_v47 = vadd.f32 %v4805_v49, %v4804_v8  ;;  %v2782_v6 = vmul.f32 %v14617_v57, %v16940_v61  ;;  %v6676_v38 = vmul.f32 %v14566_v55, %v14205_v16  ;;  %v16941_v16 = vld [vmem:[#allocation175_spill] sm:$0xff] }
 0x964   : > { %v2818_v17 = vadd.f32 %v2817_v3, %v2816_v43  ;;  %v6746_v43 = vmul.f32 %v14623_v62, %v14503_v26  ;;  %v2821_v49 = vsel %vm2068_vm5, %v2781_v19, 0.0  ;;  %v4807_v3 = vsel %vm2068_vm5, %v4767_v39, 0.0 }
 0x965   : > { %v4809_v21 = vsel %vm2068_vm5, %v4768_v53, 0.0  ;;  %v2823_v26 = vsel %vm2068_vm5, %v2782_v6, 0.0  ;;  %v4808_v19 = vadd.f32 %v4807_v3, %v4806_v47  ;;  %v4770_v39 = vmul.f32 %v13393_v35, %v14653_v20  ;;  %v16943_v6 = vld [vmem:[#allocation72_spill] sm:$0xff] }
 0x966   : > { %v2820_v45 = vadd.f32 %v2819_v34, %v2818_v17  ;;  %v4769_v17 = vmul.f32 %v16941_v16, %v14647_v5  ;;  %v6777_v8 = vsel %vm2068_vm5, %v6745_v50, 0.0  ;;  %v6776_v34 = vsel %vm2068_vm5, %v6744_v36, 0.0 }
 0x967   : > { %v14663_v53 = vadd.f32 %v14593_v51, %v6675_v42  ;;  %v14666_v61 = vadd.f32 %v14593_v51, %v6676_v38  ;;  %v2783_v22 = vmul.f32 %v14647_v5, %v16942_v14  ;;  %v4810_v62 = vadd.f32 %v4809_v21, %v4808_v19 }
 0x968   : > { %v2822_v16 = vadd.f32 %v2821_v49, %v2820_v45  ;;  %v2784_v47 = vmul.f32 %v14653_v20, %v16943_v6  ;;  %v6779_v3 = vsel %vm2068_vm5, %v6746_v43, 0.0  ;;  %v6677_v50 = vmul.f32 %v14199_v9, %v14566_v55  ;;  %v14685_v43 = vld [vmem:[%s15785_s7 + $0x68] sm:$0xff] }
 0x969   : > { %v6678_v36 = vmul.f32 %v14566_v55, %v14300_v40  ;;  %v6778_v42 = vadd.f32 %v6777_v8, %v6776_v34  ;;  %v6747_v38 = vmul.f32 %v14663_v53, %v14521_v12  ;;  %v6748_v45 = vmul.f32 %v14666_v61, %v14526_v11  ;;  %v14691_v40 = vld [vmem:[%s15785_s7 + $0x70] sm:$0xff]  ;;  %v16944_v8 = vld [vmem:[#allocation14_spill] sm:$0xff] }
 0x96a   : > { %v2824_v35 = vadd.f32 %v2823_v26, %v2822_v16  ;;  %v4811_v49 = vsel %vm2068_vm5, %v4769_v17, 0.0  ;;  %v4813_v9 = vsel %vm2068_vm5, %v4770_v39, 0.0  ;;  %v2825_v12 = vsel %vm2068_vm5, %v2783_v22, 0.0 }
 0x96b   : > { %v6780_v21 = vadd.f32 %v6779_v3, %v6778_v42  ;;  %v2827_v16 = vsel %vm2068_vm5, %v2784_v47, 0.0  ;;  %v4812_v11 = vadd.f32 %v4811_v49, %v4810_v62  ;;  %v14696_v17 = vadd.f32 %v14593_v51, %v6677_v50  ;;  %v16945_v42 = vld [vmem:[#allocation97_spill] sm:$0xff] }
 0x96c   : > { %v14699_v26 = vadd.f32 %v14593_v51, %v6678_v36  ;;  %v4771_v19 = vmul.f32 %v13398_v30, %v14685_v43  ;;  %v4772_v39 = vmul.f32 %v13490_v18, %v14691_v40  ;;  %v2785_v34 = vmul.f32 %v14685_v43, %v16944_v8 }
 0x96d   : > { %v2826_v3 = vadd.f32 %v2825_v12, %v2824_v35  ;;  %v4814_v22 = vadd.f32 %v4813_v9, %v4812_v11  ;;  %v2786_v62 = vmul.f32 %v14691_v40, %v16945_v42  ;;  %v6781_v47 = vsel %vm2068_vm5, %v6747_v38, 0.0  ;;  %v14723_v38 = vld [vmem:[%s15785_s7 + $0x78] sm:$0xff] }
 0x96e   : > { %v6783_v50 = vsel %vm2068_vm5, %v6748_v45, 0.0  ;;  %v6679_v36 = vmul.f32 %v14296_v15, %v14566_v55  ;;  %v6680_v49 = vmul.f32 %v14566_v55, %v14355_v60  ;;  %v6782_v6 = vadd.f32 %v6781_v47, %v6780_v21  ;;  %v14729_v60 = vld [vmem:[%s15785_s7 + $0x80] sm:$0xff] }
 0x96f   : > { %v2828_v14 = vadd.f32 %v2827_v16, %v2826_v3  ;;  %v6749_v8 = vmul.f32 %v14696_v17, %v14543_v27  ;;  %v6750_v35 = vmul.f32 %v14699_v26, %v14549_v2  ;;  %v4815_v9 = vsel %vm2068_vm5, %v4771_v19, 0.0  ;;  %v16946_v19 = vld [vmem:[#allocation46_spill] sm:$0xff] }
 0x970   : > { %v4817_v15 = vsel %vm2068_vm5, %v4772_v39, 0.0  ;;  %v6784_v45 = vadd.f32 %v6783_v50, %v6782_v6  ;;  %v2829_v27 = vsel %vm2068_vm5, %v2785_v34, 0.0  ;;  %v2831_v21 = vsel %vm2068_vm5, %v2786_v62, 0.0  ;;  %v16947_v34 = vld [vmem:[#allocation111_spill] sm:$0xff]  ;;  %v16948_v50 = vld [vmem:[#allocation102_spill] sm:$0xff] }
 0x971   : > { %v4816_v2 = vadd.f32 %v4815_v9, %v4814_v22  ;;  %v14736_v16 = vadd.f32 %v14593_v51, %v6679_v36  ;;  %v14739_v11 = vadd.f32 %v14593_v51, %v6680_v49  ;;  %v4773_v39 = vmul.f32 %v16946_v19, %v14723_v38 }
 0x972   : > { %v4774_v3 = vmul.f32 %v13589_v46, %v14729_v60  ;;  %v2787_v62 = vmul.f32 %v14723_v38, %v16947_v34  ;;  %v2830_v22 = vadd.f32 %v2829_v27, %v2828_v14  ;;  %v2788_v36 = vmul.f32 %v14729_v60, %v16948_v50 }
 0x973   : > { %v4818_v47 = vadd.f32 %v4817_v15, %v4816_v2  ;;  %v6785_v9 = vsel %vm2068_vm5, %v6749_v8, 0.0  ;;  %v6787_v49 = vsel %vm2068_vm5, %v6750_v35, 0.0  ;;  %v6681_v42 = vmul.f32 %v14352_v52, %v14566_v55  ;;  %v14765_v8 = vld [vmem:[%s15785_s7 + $0x88] sm:$0xff] }
 0x974   : > { %v6682_v46 = vmul.f32 %v14566_v55, %v14383_v24  ;;  %v6786_v18 = vadd.f32 %v6785_v9, %v6784_v45  ;;  %v2832_v19 = vadd.f32 %v2831_v21, %v2830_v22  ;;  %v6751_v34 = vmul.f32 %v14736_v16, %v14572_v23  ;;  %v14771_v24 = vld [vmem:[%s15785_s7 + $0x90] sm:$0xff] }
 0x975   : > { %v6752_v14 = vmul.f32 %v14739_v11, %v14580_v1  ;;  %v4819_v15 = vsel %vm2068_vm5, %v4773_v39, 0.0  ;;  %v4821_v52 = vsel %vm2068_vm5, %v4774_v3, 0.0  ;;  %v2833_v23 = vsel %vm2068_vm5, %v2787_v62, 0.0  ;;  %v16949_v3 = vld [vmem:[#allocation117_spill] sm:$0xff]  ;;  %v16950_v9 = vld [vmem:[#allocation103_spill] sm:$0xff] }
 0x976   : > { %v6788_v35 = vadd.f32 %v6787_v49, %v6786_v18  ;;  %v2835_v45 = vsel %vm2068_vm5, %v2788_v36, 0.0  ;;  %v4820_v1 = vadd.f32 %v4819_v15, %v4818_v47  ;;  %v14776_v27 = vadd.f32 %v14593_v51, %v6681_v42 }
 0x977   : > { %v14779_v21 = vadd.f32 %v14593_v51, %v6682_v46  ;;  %v4775_v2 = vmul.f32 %v13593_v4, %v14765_v8  ;;  %v4776_v39 = vmul.f32 %v13692_v7, %v14771_v24  ;;  %v2789_v18 = vmul.f32 %v14765_v8, %v16949_v3 }
 0x978   : > { %v2834_v22 = vadd.f32 %v2833_v23, %v2832_v19  ;;  %v4822_v62 = vadd.f32 %v4821_v52, %v4820_v1  ;;  %v2790_v47 = vmul.f32 %v14771_v24, %v16950_v9  ;;  %v6789_v42 = vsel %vm2068_vm5, %v6751_v34, 0.0  ;;  %v14803_v34 = vld [vmem:[%s15785_s7 + $0x98] sm:$0xff] }
 0x979   : > { %v6791_v36 = vsel %vm2068_vm5, %v6752_v14, 0.0  ;;  %v6683_v46 = vmul.f32 %v14380_v33, %v14566_v55  ;;  %v6684_v49 = vmul.f32 %v14566_v55, %v14408_v56  ;;  %v6790_v15 = vadd.f32 %v6789_v42, %v6788_v35  ;;  %v14809_v56 = vld [vmem:[%s15785_s7 + $0xa0] sm:$0xff] }
 0x97a   : > { %v2836_v50 = vadd.f32 %v2835_v45, %v2834_v22  ;;  %v6753_v3 = vmul.f32 %v14776_v27, %v14602_v0  ;;  %v6754_v19 = vmul.f32 %v14779_v21, %v14617_v57  ;;  %v4823_v52 = vsel %vm2068_vm5, %v4775_v2, 0.0 }
 0x97b   : > { %v4825_v33 = vsel %vm2068_vm5, %v4776_v39, 0.0  ;;  %v6792_v14 = vadd.f32 %v6791_v36, %v6790_v15  ;;  %v2837_v0 = vsel %vm2068_vm5, %v2789_v18, 0.0  ;;  %v2839_v35 = vsel %vm2068_vm5, %v2790_v47, 0.0  ;;  %v16951_v39 = vld [vmem:[#allocation145_spill] sm:$0xff]  ;;  %v16952_v36 = vld [vmem:[#allocation166_spill] sm:$0xff] }
 0x97c   : > { %v4824_v57 = vadd.f32 %v4823_v52, %v4822_v62  ;;  %v14814_v23 = vadd.f32 %v14593_v51, %v6683_v46  ;;  %v14817_v45 = vadd.f32 %v14593_v51, %v6684_v49  ;;  %v4777_v1 = vmul.f32 %v13696_v59, %v14803_v34 }
 0x97d   : > { %v14733_v12 = vpop.f32.mrb[72].mxu1  ;;  %v4778_v2 = vmul.f32 %v13785_v13, %v14809_v56  ;;  %v2791_v22 = vmul.f32 %v14803_v34, %v16951_v39  ;;  %v2838_v42 = vadd.f32 %v2837_v0, %v2836_v50  ;;  %v2792_v62 = vmul.f32 %v14809_v56, %v16952_v36  ;;  %v16968_v13 = vld [vmem:[#allocation199_spill] sm:$0xff] }
 0x97e   : > { %v14745_v6 = vpop.f32.mrb[73].mxu1  ;;  %v4826_v18 = vadd.f32 %v4825_v33, %v4824_v57  ;;  %v6793_v47 = vsel %vm2068_vm5, %v6753_v3, 0.0  ;;  %v6795_v46 = vsel %vm2068_vm5, %v6754_v19, 0.0  ;;  %v6685_v49 = vmul.f32 %v14405_v37, %v14566_v55  ;;  %v14841_v3 = vld [vmem:[%s15785_s7 + $0xa8] sm:$0xff] }
 0x97f   : > { %v6686_v15 = vmul.f32 %v14566_v55, %v14432_v58  ;;  %v6794_v52 = vadd.f32 %v6793_v47, %v6792_v14  ;;  %v2840_v9 = vadd.f32 %v2839_v35, %v2838_v42  ;;  %v6755_v39 = vmul.f32 %v14814_v23, %v14647_v5  ;;  %v14847_v58 = vld [vmem:[%s15785_s7 + $0xb0] sm:$0xff] }
 0x980   : > { %v6756_v50 = vmul.f32 %v14817_v45, %v14653_v20  ;;  %v4827_v33 = vsel %vm2068_vm5, %v4777_v1, 0.0  ;;  %v4829_v37 = vsel %vm2068_vm5, %v4778_v2, 0.0  ;;  %v2841_v5 = vsel %vm2068_vm5, %v2791_v22, 0.0  ;;  %v16953_v2 = vld [vmem:[#allocation147_spill] sm:$0xff] }
 0x981   : > { %v6796_v19 = vadd.f32 %v6795_v46, %v6794_v52  ;;  %v2843_v14 = vsel %vm2068_vm5, %v2792_v62, 0.0  ;;  %v4828_v20 = vadd.f32 %v4827_v33, %v4826_v18  ;;  %v14852_v0 = vadd.f32 %v14593_v51, %v6685_v49  ;;  %v16954_v46 = vld [vmem:[#allocation172_spill] sm:$0xff] }
 0x982   : > { %v14855_v35 = vadd.f32 %v14593_v51, %v6686_v15  ;;  %v4779_v57 = vmul.f32 %v13789_v48, %v14841_v3  ;;  %v4780_v1 = vmul.f32 %v13878_v31, %v14847_v58  ;;  %v2793_v42 = vmul.f32 %v14841_v3, %v16953_v2  ;;  %v16965_v31 = vld [vmem:[#allocation178_spill] sm:$0xff] }
 0x983   : > { %v2842_v47 = vadd.f32 %v2841_v5, %v2840_v9  ;;  %v4830_v22 = vadd.f32 %v4829_v37, %v4828_v20  ;;  %v2794_v18 = vmul.f32 %v14847_v58, %v16954_v46  ;;  %v6797_v62 = vsel %vm2068_vm5, %v6755_v39, 0.0  ;;  %v14879_v39 = vld [vmem:[%s15785_s7 + $0xb8] sm:$0xff] }
 0x984   : > { %v6799_v49 = vsel %vm2068_vm5, %v6756_v50, 0.0  ;;  %v6687_v15 = vmul.f32 %v14429_v54, %v14566_v55  ;;  %v6688_v52 = vmul.f32 %v14566_v55, %v14476_v25  ;;  %v6798_v33 = vadd.f32 %v6797_v62, %v6796_v19  ;;  %v14885_v25 = vld [vmem:[%s15785_s7 + $0xc0] sm:$0xff] }
 0x985   : > { %v2844_v36 = vadd.f32 %v2843_v14, %v2842_v47  ;;  %v6757_v2 = vmul.f32 %v14852_v0, %v14685_v43  ;;  %v6758_v9 = vmul.f32 %v14855_v35, %v14691_v40  ;;  %v4831_v37 = vsel %vm2068_vm5, %v4779_v57, 0.0 }
 0x986   : > { %v4833_v54 = vsel %vm2068_vm5, %v4780_v1, 0.0  ;;  %v6800_v50 = vadd.f32 %v6799_v49, %v6798_v33  ;;  %v2845_v43 = vsel %vm2068_vm5, %v2793_v42, 0.0  ;;  %v2847_v19 = vsel %vm2068_vm5, %v2794_v18, 0.0  ;;  %v16955_v1 = vld [vmem:[#allocation154_spill] sm:$0xff] }
 0x987   : > { %v4832_v40 = vadd.f32 %v4831_v37, %v4830_v22  ;;  %v14890_v5 = vadd.f32 %v14593_v51, %v6687_v15  ;;  %v14893_v14 = vadd.f32 %v14593_v51, %v6688_v52  ;;  %v4781_v20 = vmul.f32 %v13882_v63, %v14879_v39  ;;  %v16956_v49 = vld [vmem:[#allocation174_spill] sm:$0xff]  ;;  %v16966_v63 = vld [vmem:[#allocation207_spill] sm:$0xff] }
 0x988   : > { %v4782_v57 = vmul.f32 %v13971_v10, %v14885_v25  ;;  %v2795_v47 = vmul.f32 %v14879_v39, %v16955_v1  ;;  %v2846_v62 = vadd.f32 %v2845_v43, %v2844_v36  ;;  %v2796_v22 = vmul.f32 %v14885_v25, %v16956_v49  ;;  %v16961_v10 = vld [vmem:[#allocation195_spill] sm:$0xff] }
 0x989   : > { %v4834_v42 = vadd.f32 %v4833_v54, %v4832_v40  ;;  %v6801_v18 = vsel %vm2068_vm5, %v6757_v2, 0.0  ;;  %v6803_v15 = vsel %vm2068_vm5, %v6758_v9, 0.0  ;;  %v6689_v52 = vmul.f32 %v14474_v29, %v14566_v55  ;;  %v14917_v2 = vld [vmem:[%s15785_s7 + $0xc8] sm:$0xff]  ;;  %v16957_v40 = vld [vmem:[#allocation65_spill] sm:$0xff] }
 0x98a   : > { %v6690_v33 = vmul.f32 %v14566_v55, %v14480_v41  ;;  %v6802_v37 = vadd.f32 %v6801_v18, %v6800_v50  ;;  %v2848_v46 = vadd.f32 %v2847_v19, %v2846_v62  ;;  %v6759_v1 = vmul.f32 %v14890_v5, %v14723_v38  ;;  %v14923_v41 = vld [vmem:[%s15785_s7 + $0xd0] sm:$0xff]  ;;  %v16959_v18 = vld [vmem:[#allocation162_spill] sm:$0xff] }
 0x98b   : > { %v6760_v36 = vmul.f32 %v14893_v14, %v14729_v60  ;;  %v4835_v54 = vsel %vm2068_vm5, %v4781_v20, 0.0  ;;  %v4837_v29 = vsel %vm2068_vm5, %v4782_v57, 0.0  ;;  %v2849_v38 = vsel %vm2068_vm5, %v2795_v47, 0.0  ;;  %v16958_v57 = vld [vmem:[#allocation194_spill] sm:$0xff] }
 0x98c   : > { %v6804_v9 = vadd.f32 %v6803_v15, %v6802_v37  ;;  %v2851_v50 = vsel %vm2068_vm5, %v2796_v22, 0.0  ;;  %v4836_v60 = vadd.f32 %v4835_v54, %v4834_v42  ;;  %v14928_v43 = vadd.f32 %v14593_v51, %v6689_v52  ;;  %v16960_v42 = vld [vmem:[#allocation183_spill] sm:$0xff] }
 0x98d   : > { %v14931_v19 = vadd.f32 %v14593_v51, %v6690_v33  ;;  %v4783_v20 = vmul.f32 %v16957_v40, %v14917_v2  ;;  %v4784_v62 = vmul.f32 %v16958_v57, %v14923_v41  ;;  %v2797_v15 = vmul.f32 %v14917_v2, %v16959_v18 }
 0x98e   : > { %v2850_v37 = vadd.f32 %v2849_v38, %v2848_v46  ;;  %v4838_v47 = vadd.f32 %v4837_v29, %v4836_v60  ;;  %v2798_v22 = vmul.f32 %v14923_v41, %v16960_v42  ;;  %v6805_v52 = vsel %vm2068_vm5, %v6759_v1, 0.0 }
 0x98f   : > { %v6807_v33 = vsel %vm2068_vm5, %v6760_v36, 0.0  ;;  %v6691_v54 = vmul.f32 %v14478_v32, %v14566_v55  ;;  %v6692_v57 = vmul.f32 %v14566_v55, %v16961_v10  ;;  %v6806_v18 = vadd.f32 %v6805_v52, %v6804_v9  ;;  %v14959_v36 = vld [vmem:[%s15785_s7 + $0xd8] sm:$0xff]  ;;  %v14965_v10 = vld [vmem:[%s15785_s7 + $0xe0] sm:$0xff] }
 0x990   : > { %v2852_v46 = vadd.f32 %v2851_v50, %v2850_v37  ;;  %v6761_v29 = vmul.f32 %v14928_v43, %v14765_v8  ;;  %v6762_v38 = vmul.f32 %v14931_v19, %v14771_v24  ;;  %v4839_v1 = vsel %vm2068_vm5, %v4783_v20, 0.0  ;;  %v16963_v37 = vld [vmem:[#allocation204_spill] sm:$0xff] }
 0x991   : > { %v4841_v32 = vsel %vm2068_vm5, %v4784_v62, 0.0  ;;  %v6808_v9 = vadd.f32 %v6807_v33, %v6806_v18  ;;  %v2853_v8 = vsel %vm2068_vm5, %v2797_v15, 0.0  ;;  %v2855_v50 = vsel %vm2068_vm5, %v2798_v22, 0.0  ;;  %v16964_v52 = vld [vmem:[#allocation180_spill] sm:$0xff] }
 0x992   : > { %v4840_v24 = vadd.f32 %v4839_v1, %v4838_v47  ;;  %v14970_v60 = vadd.f32 %v14593_v51, %v6691_v54  ;;  %v14973_v20 = vadd.f32 %v14593_v51, %v6692_v57  ;;  %v4785_v62 = vmul.f32 %v16963_v37, %v14959_v36  ;;  %v16967_v57 = vld [vmem:[#allocation64_spill] sm:$0xff] }
 0x993   : > { %v4786_v42 = vmul.f32 %v16964_v52, %v14965_v10  ;;  %v2799_v18 = vmul.f32 %v14959_v36, %v16965_v31  ;;  %v2854_v33 = vadd.f32 %v2853_v8, %v2852_v46  ;;  %v2800_v47 = vmul.f32 %v14965_v10, %v16966_v63  ;;  %v16972_v63 = vld [vmem:[#allocation107_spill] sm:$0xff] }
 0x994   : > { %16962 = vst [vmem:[#allocation99_spill] sm:$0xff] %v14973_v20  ;;  %v4842_v15 = vadd.f32 %v4841_v32, %v4840_v24  ;;  %v6809_v22 = vsel %vm2068_vm5, %v6761_v29, 0.0  ;;  %v6811_v54 = vsel %vm2068_vm5, %v6762_v38, 0.0  ;;  %v6693_v1 = vmul.f32 %v16967_v57, %v14566_v55  ;;  %v14997_v29 = vld [vmem:[%s15785_s7 + $0xe8] sm:$0xff]  ;;  %v16971_v57 = vld [vmem:[#allocation201_spill] sm:$0xff] }
 0x995   : > { %v6694_v37 = vmul.f32 %v14566_v55, %v16968_v13  ;;  %v6810_v48 = vadd.f32 %v6809_v22, %v6808_v9  ;;  %v2856_v52 = vadd.f32 %v2855_v50, %v2854_v33  ;;  %v6763_v31 = vmul.f32 %v14970_v60, %v14803_v34  ;;  %v15003_v13 = vld [vmem:[%s15785_s7 + $0xf0] sm:$0xff]  ;;  %v16970_v33 = vld [vmem:[#allocation98_spill] sm:$0xff] }
 0x996   : > { %v6764_v46 = vmul.f32 %v14973_v20, %v14809_v56  ;;  %v4843_v32 = vsel %vm2068_vm5, %v4785_v62, 0.0  ;;  %v4845_v38 = vsel %vm2068_vm5, %v4786_v42, 0.0  ;;  %v2857_v34 = vsel %vm2068_vm5, %v2799_v18, 0.0  ;;  %v16969_v62 = vld [vmem:[#allocation85_spill] sm:$0xff] }
 0x997   : > { %v6812_v9 = vadd.f32 %v6811_v54, %v6810_v48  ;;  %v2859_v8 = vsel %vm2068_vm5, %v2800_v47, 0.0  ;;  %v4844_v56 = vadd.f32 %v4843_v32, %v4842_v15  ;;  %v15008_v50 = vadd.f32 %v14593_v51, %v6693_v1 }
 0x998   : > { %v15011_v24 = vadd.f32 %v14593_v51, %v6694_v37  ;;  %v4787_v42 = vmul.f32 %v16969_v62, %v14997_v29  ;;  %v4788_v22 = vmul.f32 %v16970_v33, %v15003_v13  ;;  %v2801_v48 = vmul.f32 %v14997_v29, %v16971_v57  ;;  %v16973_v37 = vld [vmem:[#allocation205_spill] sm:$0xff] }
 0x999   : > { %v2858_v54 = vadd.f32 %v2857_v34, %v2856_v52  ;;  %v4846_v18 = vadd.f32 %v4845_v38, %v4844_v56  ;;  %v2802_v15 = vmul.f32 %v15003_v13, %v16972_v63  ;;  %v6813_v47 = vsel %vm2068_vm5, %v6763_v31, 0.0  ;;  %v15035_v31 = vld [vmem:[%s15785_s7 + $0xf8] sm:$0xff] }
 0x99a   : > { %v6815_v1 = vsel %vm2068_vm5, %v6764_v46, 0.0  ;;  %v6695_v32 = vmul.f32 %v16973_v37, %v14566_v55  ;;  %v6696_v62 = vmul.f32 %v14566_v55, %v14745_v6  ;;  %v6814_v20 = vadd.f32 %v6813_v47, %v6812_v9 }
 0x99b   : > { %v2860_v33 = vadd.f32 %v2859_v8, %v2858_v54  ;;  %v6765_v57 = vmul.f32 %v15008_v50, %v14841_v3  ;;  %v6766_v52 = vmul.f32 %v15011_v24, %v14847_v58  ;;  %v4847_v38 = vsel %vm2068_vm5, %v4787_v42, 0.0  ;;  %v16974_v8 = vld [vmem:[#allocation25_spill] sm:$0xff] }
 0x99c   : > { %v4849_v46 = vsel %vm2068_vm5, %v4788_v22, 0.0  ;;  %v6816_v34 = vadd.f32 %v6815_v1, %v6814_v20  ;;  %v4848_v56 = vadd.f32 %v4847_v38, %v4846_v18  ;;  %v15039_v6 = vadd.f32 %v14593_v51, %v6695_v32  ;;  %v16975_v54 = vld [vmem:[#allocation185_spill] sm:$0xff] }
 0x99d   : > { %v14939_v49 = vpop.f32.mrb[74].mxu1  ;;  %v15042_v9 = vadd.f32 %v14593_v51, %v6696_v62  ;;  %v2861_v3 = vsel %vm2068_vm5, %v2801_v48, 0.0  ;;  %v2863_v58 = vsel %vm2068_vm5, %v2802_v15, 0.0  ;;  %v2803_v42 = vmul.f32 %v15035_v31, %v16974_v8 }
 0x99e   : > { %v14949_v40 = vpop.f32.mrb[75].mxu1  ;;  %v4789_v47 = vmul.f32 %v16975_v54, %v15035_v31  ;;  %v2862_v37 = vadd.f32 %v2861_v3, %v2860_v33  ;;  %v4850_v22 = vadd.f32 %v4849_v46, %v4848_v56  ;;  %v6817_v20 = vsel %vm2068_vm5, %v6765_v57, 0.0 }
 0x99f   : > { %v6819_v18 = vsel %vm2068_vm5, %v6766_v52, 0.0  ;;  %v6697_v62 = vmul.f32 %v14733_v12, %v14566_v55  ;;  %v6698_v48 = vmul.f32 %v14566_v55, %v14949_v40  ;;  %v6818_v1 = vadd.f32 %v6817_v20, %v6816_v34 }
 0x9a0   : > { %v2864_v15 = vadd.f32 %v2863_v58, %v2862_v37  ;;  %v6767_v32 = vmul.f32 %v15039_v6, %v14879_v39  ;;  %v6768_v38 = vmul.f32 %v15042_v9, %v14885_v25  ;;  %v4851_v46 = vsel %vm2068_vm5, %v4789_v47, 0.0 }
 0x9a1   : > { %v6820_v33 = vadd.f32 %v6819_v18, %v6818_v1  ;;  %v15062_v57 = vadd.f32 %v14593_v51, %v6697_v62  ;;  %v15065_v52 = vadd.f32 %v14593_v51, %v6698_v48  ;;  %v2865_v12 = vsel %vm2068_vm5, %v2803_v42, 0.0 }
 0x9a2   : > { %v4852_v40 = vadd.f32 %v4851_v46, %v4850_v22  ;;  %v2866_v34 = vadd.f32 %v2865_v12, %v2864_v15  ;;  %v6821_v56 = vsel %vm2068_vm5, %v6767_v32, 0.0  ;;  %v6823_v39 = vsel %vm2068_vm5, %v6768_v38, 0.0 }
 0x9a3   : > { %v6699_v25 = vmul.f32 %v14939_v49, %v14566_v55  ;;  %v6822_v3 = vadd.f32 %v6821_v56, %v6820_v33  ;;  %v6769_v58 = vmul.f32 %v15062_v57, %v14917_v2  ;;  %v6770_v47 = vmul.f32 %v15065_v52, %v14923_v41 }
 0x9a4   : > { %v4853_v37 = vrot.slane %v4852_v40, 4  ;;  %v2867_v18 = vrot.slane %v2866_v34, 4 }
 0x9a5   : > { %v6824_v20 = vadd.f32 %v6823_v39, %v6822_v3  ;;  %v15077_v42 = vadd.f32 %v14593_v51, %v6699_v25  ;;  %v6825_v22 = vsel %vm2068_vm5, %v6769_v58, 0.0  ;;  %v6827_v62 = vsel %vm2068_vm5, %v6770_v47, 0.0 }
 0x9a6   : > { %v4854_v1 = vadd.f32 %v4853_v37, %v4852_v40  ;;  %v2868_v2 = vadd.f32 %v2867_v18, %v2866_v34 }
 0x9a7   : > { %v6826_v49 = vadd.f32 %v6825_v22, %v6824_v20  ;;  %v6771_v41 = vmul.f32 %v15077_v42, %v14959_v36 }
 0x9a8   : > { %v4855_v39 = vrot.slane %v4854_v1, 2  ;;  %v2869_v25 = vrot.slane %v2868_v2, 2 }
 0x9a9   : > { %v6828_v33 = vadd.f32 %v6827_v62, %v6826_v49  ;;  %v6829_v34 = vsel %vm2068_vm5, %v6771_v41, 0.0 }
 0x9aa   : > { %v4856_v22 = vadd.f32 %v4855_v39, %v4854_v1 }
 0x9ab   : > { %v6830_v37 = vadd.f32 %v6829_v34, %v6828_v33 }
 0x9bc   : > { %v8615_v48 = vpop.f32.mrb[76].mxu1 }
 0x9bd   : > { %v6701_v15 = vmul.f32 %v8615_v48, %v14566_v55  ;;  %v6645_v32 = vpop.f32.mrb[77].mxu1 }
 0x9be   : > { %v6700_v38 = vmul.f32 %v14566_v55, %v6645_v32  ;;  %v4857_v32 = vrot.slane %v4856_v22, 1 }
 0x9bf   : > { %v15086_v46 = vadd.f32 %v14593_v51, %v6701_v15  ;;  %v2870_v15 = vadd.f32 %v2869_v25, %v2868_v2 }
 0x9c0   : > { %v15089_v12 = vadd.f32 %v14593_v51, %v6700_v38  ;;  %v8618_v56 = vpop.f32.mrb[78].mxu1 }
 0x9c1   : > { %v6703_v40 = vmul.f32 %v8618_v56, %v14566_v55  ;;  %v6655_v3 = vpop.f32.mrb[79].mxu1  ;;  %v6773_v36 = vmul.f32 %v15086_v46, %v14997_v29  ;;  %v2871_v33 = vrot.slane %v2870_v15, 1  ;;  %v4858_v56 = vadd.f32 %v4857_v32, %v4856_v22 }
 0x9c2   : > { %v6772_v58 = vmul.f32 %v15089_v12, %v14965_v10  ;;  %v6702_v47 = vmul.f32 %v14566_v55, %v6655_v3 }
 0x9c3   : > { %v15099_v20 = vadd.f32 %v14593_v51, %v6703_v40  ;;  %v6833_v49 = vsel %vm2068_vm5, %v6773_v36, 0.0  ;;  %v2872_v40 = vadd.f32 %v2871_v33, %v2870_v15  ;;  %v8120_v34 = vmul.f32 -1.442695, %v4858_v56 }
 0x9c4   : > { %v6831_v18 = vsel %vm2068_vm5, %v6772_v58, 0.0  ;;  %v15103_v62 = vadd.f32 %v14593_v51, %v6702_v47 }
 0x9c5   : > { %v6832_v48 = vadd.f32 %v6831_v18, %v6830_v37  ;;  %v6775_v29 = vmul.f32 %v15099_v20, %v15035_v31  ;;  %v8077_v31 = vmul.f32 -1.442695, %v2872_v40  ;;  %8799 = vpow2.f32 %v8120_v34 }
 0x9c6   : > { %v6774_v55 = vmul.f32 %v15103_v62, %v15003_v13 }
 0x9c7   : > { %v6834_v10 = vadd.f32 %v6833_v49, %v6832_v48  ;;  %v6837_v1 = vsel %vm2068_vm5, %v6775_v29, 0.0  ;;  %8801 = vpow2.f32 %v8077_v31 }
 0x9c8   : > { %v6835_v41 = vsel %vm2068_vm5, %v6774_v55, 0.0 }
 0x9c9   : > { %v6836_v38 = vadd.f32 %v6835_v41, %v6834_v10 }
 0x9cb   : > { %v6838_v51 = vadd.f32 %v6837_v1, %v6836_v38 }
 0x9cd   : > { %v6839_v39 = vrot.slane %v6838_v51, 4 }
 0x9cf   : > { %v6840_v3 = vadd.f32 %v6839_v39, %v6838_v51  ;;  %v8800_v47 = vpop.eup %8799 }
 0x9d0   : > { %v4862_v18 = vadd.f32 1.0, %v8800_v47 }
 0x9d1   : > { %v6841_v36 = vrot.slane %v6840_v3, 2  ;;  %v8802_v37 = vpop.eup %8801 }
 0x9d2   : > { %v2876_v48 = vadd.f32 1.0, %v8802_v37  ;;  %v6874_v37 = vlaneseq }
 0x9d3   : > { %v6842_v2 = vadd.f32 %v6841_v36, %v6840_v3 }
 0x9d5   : > { %v6843_v25 = vrot.slane %v6842_v2, 1 }
 0x9d7   : > { %v6844_v13 = vadd.f32 %v6843_v25, %v6842_v2 }
 0x9d9   : > { %v8163_v58 = vmul.f32 -1.442695, %v6844_v13 }
 0x9db   : > { %8803 = vpow2.f32 %v8163_v58 }
 0x9dc   : > { %8805 = vrcp.f32 %v4862_v18  ;;  %v6875_v18 = vshrl.u32 %v6874_v37, 7 }
 0x9dd   : > { %8807 = vrcp.f32 %v2876_v48 }
 0x9de   : > { %v6876_v48 = vsub.s32 0, %v6875_v18 }
 0x9e5   : > { %v8804_v49 = vpop.eup %8803 }
 0x9e6   : > { %v6848_v22 = vadd.f32 1.0, %v8804_v49  ;;  %v8806_v29 = vpop.eup %8805  ;;  %v6912_v49 = vsub.s32 1, %v6875_v18 }
 0x9e7   : > { %v8808_v15 = vpop.eup %8807 }
 0x9e8   : > { %8809 = vrcp.f32 %v6848_v22  ;;  %v6851_v10 = vsel %vm960_vm1, %v8808_v15, %v8806_v29  ;;  %vm8704_vm1 = vmpackc.low %vm2433_vm4, %vm8964_vm15 }
 0x9f2   : > { %v8810_v55 = vpop.eup %8809 }
 0x9f3   : > { %v6853_v32 = vsel %vm6852_vm13, %v6851_v10, %v8810_v55  ;;  %v6948_v10 = vsub.s32 2, %v6875_v18 }
 0x9f4   : > { %v6855_v41 = vsel %vm6854_vm14, %v6853_v32, -inf }
 0x9f5   : > { %v6856_v38 = vrot.slane %v6855_v41, 4 }
 0x9f7   : > { %v6857_v1 = vmax.f32 %v6855_v41, %v6856_v38  ;;  %v16977_v38 = vld [vmem:[#allocation144_spill] sm:$0xff] }
 0x9f9   : > { %v6858_v33 = vrot.slane %v6857_v1, 2 }
 0x9fb   : > { %v6859_v51 = vmax.f32 %v6857_v1, %v6858_v33 }
 0x9fd   : > { %v6860_v56 = vrot.slane %v6859_v51, 1 }
 0x9ff   : > { %v6861_v39 = vmax.f32 %v6859_v51, %v6860_v56 }
 0xa01   : > { %v6862_v40 = vsub.f32 %v6853_v32, %v6861_v39  ;;  %v16976_v32 = vld [vmem:[#allocation123_spill] sm:$0xff]  ;;  %v16978_v39 = vld [vmem:[#allocation42_spill] sm:$0xff] }
 0xa03   : > { %v6863_v3 = vmul.f32 1.442695, %v6862_v40 }
 0xa05   : > { %8811 = vpow2.f32 %v6863_v3  ;;  %v16979_v3 = vld [vmem:[#allocation129_spill] sm:$0xff] }
 0xa0f   : > { %v8812_v34 = vpop.eup %8811 }
 0xa10   : > { %v6865_v36 = vsel %vm6854_vm14, %v8812_v34, 0.0 }
 0xa11   : > { %v6866_v31 = vrot.slane %v6865_v36, 4 }
 0xa13   : > { %v6867_v2 = vadd.f32 %v6866_v31, %v6865_v36  ;;  %v7412_v36 = vld [vmem:[%s15788_s10] sm:$0xff] }
 0xa15   : > { %v6868_v25 = vrot.slane %v6867_v2, 2 }
 0xa17   : > { %v6869_v13 = vadd.f32 %v6868_v25, %v6867_v2  ;;  %v16980_v2 = vld [vmem:[#allocation114_spill] sm:$0xff] }
 0xa19   : > { %v6870_v58 = vrot.slane %v6869_v13, 1 }
 0xa1b   : > { %v6871_v47 = vadd.f32 %v6870_v58, %v6869_v13  ;;  %v16981_v13 = vld [vmem:[#allocation136_spill] sm:$0xff] }
 0xa1d   : > { %8813 = vrcp.f32 %v6871_v47  ;;  %v16982_v47 = vld [vmem:[#allocation60_spill] sm:$0xff] }
 0xa27   : > { %v8814_v22 = vpop.eup %8813 }
 0xa28   : > { %v6873_v29 = vmul.f32 %v8814_v22, %v8812_v34  ;;  %v16984_v22 = vld [vmem:[#allocation35_spill] sm:$0xff] }
 0xa2a   : > { %v15113_v15 = vrot.slane %v6873_v29, %v6876_v48  ;;  %v15115_v55 = vrot.slane %v6873_v29, %v6912_v49  ;;  %v15123_v33 = vrot.slane %v6873_v29, %v6948_v10  ;;  %v16983_v48 = vld [vmem:[#allocation151_spill] sm:$0xff]  ;;  %v16985_v10 = vld [vmem:[#allocation169_spill] sm:$0xff] }
 0xa2c   : > { %v6914_v41 = vmul.f32 %v15115_v55, %v16976_v32  ;;  %v6915_v1 = vmul.f32 %v15115_v55, %v16977_v38  ;;  %v6951_v51 = vmul.f32 %v15123_v33, %v14607_v28  ;;  %v6950_v56 = vmul.f32 %v15123_v33, %v14610_v44  ;;  %v7413_v28 = vld [vmem:[%s15788_s10 + $0x8] sm:$0xf] }
 0xa2d   : > { %v6917_v40 = vmul.f32 %v15115_v55, %v16978_v39  ;;  %v6916_v34 = vmul.f32 %v15115_v55, %v16979_v3  ;;  %v6953_v44 = vmul.f32 %v15123_v33, %v14663_v53  ;;  %v8703_v31 = vpack.c.bf16 %v7413_v28, %v7412_v36  ;;  %v16989_v3 = vld [vmem:[#allocation91_spill] sm:$0xff]  ;;  %v16990_v36 = vld [vmem:[#allocation46_spill] sm:$0xff]  ;;  %v16991_v28 = vld [vmem:[#allocation165_spill] sm:$0xff] }
 0xa2e   : > { %7016 = vrot.lane.b32.xlu0 %v6915_v1, %s16852_s16  ;;  %7014 = vrot.lane.b32.xlu1 %v6914_v41, %s16852_s16  ;;  %v6952_v25 = vmul.f32 %v15123_v33, %v16980_v2  ;;  %v6919_v58 = vmul.f32 %v15115_v55, %v16981_v13  ;;  %v6918_v37 = vmul.f32 %v15115_v55, %v16982_v47  ;;  %v16986_v41 = vld [vmem:[#allocation152_spill] sm:$0xff]  ;;  %v16987_v1 = vld [vmem:[#allocation175_spill] sm:$0xff]  ;;  %v16994_v47 = vld [vmem:[#allocation189_spill] sm:$0xff] }
 0xa2f   : > { %8705 = vmatprep.subr.msk.bf16.mxu0 %vm8704_vm1, %v8703_v31  ;;  %v6955_v53 = vmul.f32 %v15123_v33, %v14696_v17  ;;  %v6954_v18 = vmul.f32 %v15123_v33, %v14666_v61  ;;  %v6921_v49 = vmul.f32 %v15115_v55, %v16983_v48  ;;  %v6920_v29 = vmul.f32 %v15115_v55, %v16984_v22  ;;  %v16992_v2 = vld [vmem:[#allocation176_spill] sm:$0xff] }
 0xa30   : > { %8708 = vmatpush3.bf16.msk.msra.mxu0 %vm8704_vm1, %v8703_v31  ;;  %v6957_v17 = vmul.f32 %v15123_v33, %v14736_v16  ;;  %v6956_v61 = vmul.f32 %v15123_v33, %v14699_v26  ;;  %v6923_v32 = vmul.f32 %v15115_v55, %v16985_v10  ;;  %v6922_v38 = vmul.f32 %v15115_v55, %v16986_v41  ;;  %v16997_v48 = vld [vmem:[#allocation84_spill] sm:$0xff] }
 0xa31   : > { %v6959_v16 = vmul.f32 %v15123_v33, %v14776_v27  ;;  %v6958_v26 = vmul.f32 %v15123_v33, %v14739_v11  ;;  %v6961_v27 = vmul.f32 %v15123_v33, %v14814_v23  ;;  %v6960_v11 = vmul.f32 %v15123_v33, %v14779_v21 }
 0xa32   : > { %7144 = vrot.lane.b32.xlu0 %v6951_v51, %s16747_s24  ;;  %7142 = vrot.lane.b32.xlu1 %v6950_v56, %s16747_s24  ;;  %v6925_v51 = vmul.f32 %v15115_v55, %v16987_v1  ;;  %v16988_v56 = vld [vmem:[#allocation47_spill] sm:$0xff]  ;;  %v6963_v23 = vmul.f32 %v15123_v33, %v14852_v0  ;;  %v6962_v21 = vmul.f32 %v15123_v33, %v14817_v45 }
 0xa33   : > { %v6924_v39 = vmul.f32 %v15115_v55, %v16988_v56  ;;  %v6965_v0 = vmul.f32 %v15123_v33, %v14890_v5  ;;  %v6964_v45 = vmul.f32 %v15123_v33, %v14855_v35  ;;  %v6931_v31 = vmul.f32 %v15115_v55, %v13593_v4 }
 0xa34   : > { %v6967_v5 = vmul.f32 %v15123_v33, %v14928_v43  ;;  %v6966_v35 = vmul.f32 %v15123_v33, %v14893_v14  ;;  %v6933_v4 = vmul.f32 %v15115_v55, %v13696_v59  ;;  %v6932_v13 = vmul.f32 %v15115_v55, %v13692_v7 }
 0xa35   : > { %v6969_v43 = vmul.f32 %v15123_v33, %v14970_v60  ;;  %v6968_v14 = vmul.f32 %v15123_v33, %v14931_v19  ;;  %v6934_v7 = vmul.f32 %v15115_v55, %v16994_v47  ;;  %v6971_v60 = vmul.f32 %v15123_v33, %v15008_v50  ;;  %v17008_v47 = vld [vmem:[#allocation80_spill] sm:$0xff] }
 0xa36   : > { %7020 = vrot.lane.b32.xlu0 %v6917_v40, %s16852_s16  ;;  %7018 = vrot.lane.b32.xlu1 %v6916_v34, %s16852_s16  ;;  %v6927_v40 = vmul.f32 %v15115_v55, %v13398_v30  ;;  %v6926_v34 = vmul.f32 %v15115_v55, %v16989_v3  ;;  %v6929_v30 = vmul.f32 %v15115_v55, %v16990_v36  ;;  %v17005_v3 = vld [vmem:[#allocation177_spill] sm:$0xff]  ;;  %v17006_v36 = vld [vmem:[#allocation98_spill] sm:$0xff] }
 0xa37   : > { %v6973_v50 = vmul.f32 %v15123_v33, %v15039_v6  ;;  %v6972_v22 = vmul.f32 %v15123_v33, %v15011_v24  ;;  %v6975_v6 = vmul.f32 %v15123_v33, %v15062_v57  ;;  %v6974_v24 = vmul.f32 %v15123_v33, %v15042_v9 }
 0xa38   : > { %v6977_v57 = vmul.f32 %v15123_v33, %v15077_v42  ;;  %v6976_v9 = vmul.f32 %v15123_v33, %v15065_v52  ;;  %v6979_v42 = vmul.f32 %v15123_v33, %v15086_v46  ;;  %v6978_v52 = vmul.f32 %v15123_v33, %v15089_v12 }
 0xa39   : > { %v6945_v46 = vmul.f32 %v15115_v55, %v16975_v54 }
 0xa3a   : > { %7148 = vrot.lane.b32.xlu0 %v6953_v44, %s16747_s24  ;;  %7146 = vrot.lane.b32.xlu1 %v6952_v25, %s16747_s24  ;;  %v6928_v44 = vmul.f32 %v15115_v55, %v16991_v28  ;;  %v6930_v25 = vmul.f32 %v15115_v55, %v16992_v2 }
 0xa3e   : > { %7024 = vrot.lane.b32.xlu0 %v6919_v58, %s16852_s16  ;;  %7022 = vrot.lane.b32.xlu1 %v6918_v37, %s16852_s16  ;;  %v16993_v58 = vld [vmem:[#allocation181_spill] sm:$0xff]  ;;  %v16995_v37 = vld [vmem:[#allocation99_spill] sm:$0xff] }
 0xa3f   : > { %v6935_v59 = vmul.f32 %v15115_v55, %v16993_v58  ;;  %v6970_v19 = vmul.f32 %v15123_v33, %v16995_v37 }
 0xa42   : > { %7152 = vrot.lane.b32.xlu0 %v6955_v53, %s16747_s24  ;;  %7150 = vrot.lane.b32.xlu1 %v6954_v18, %s16747_s24  ;;  %v16996_v53 = vld [vmem:[#allocation90_spill] sm:$0xff] }
 0xa43   : > { %v6937_v18 = vmul.f32 %v15115_v55, %v16996_v53 }
 0xa46   : > { %7028 = vrot.lane.b32.xlu0 %v6921_v49, %s16852_s16  ;;  %7026 = vrot.lane.b32.xlu1 %v6920_v29, %s16852_s16  ;;  %v6936_v49 = vmul.f32 %v15115_v55, %v16997_v48  ;;  %v16998_v29 = vld [vmem:[#allocation65_spill] sm:$0xff] }
 0xa4a   : > { %7156 = vrot.lane.b32.xlu0 %v6957_v17, %s16747_s24  ;;  %7154 = vrot.lane.b32.xlu1 %v6956_v61, %s16747_s24  ;;  %v6939_v17 = vmul.f32 %v15115_v55, %v16998_v29  ;;  %v16999_v61 = vld [vmem:[#allocation184_spill] sm:$0xff] }
 0xa4b   : > { %v6938_v10 = vmul.f32 %v15115_v55, %v16999_v61 }
 0xa4e   : > { %7032 = vrot.lane.b32.xlu0 %v6923_v32, %s16852_s16  ;;  %7030 = vrot.lane.b32.xlu1 %v6922_v38, %s16852_s16  ;;  %v17000_v32 = vld [vmem:[#allocation204_spill] sm:$0xff]  ;;  %v17001_v38 = vld [vmem:[#allocation194_spill] sm:$0xff] }
 0xa4f   : > { %v6941_v41 = vmul.f32 %v15115_v55, %v17000_v32 }
 0xa52   : > { %7160 = vrot.lane.b32.xlu0 %v6959_v16, %s16747_s24  ;;  %7158 = vrot.lane.b32.xlu1 %v6958_v26, %s16747_s24  ;;  %v6940_v16 = vmul.f32 %v15115_v55, %v17001_v38  ;;  %v17002_v26 = vld [vmem:[#allocation85_spill] sm:$0xff] }
 0xa53   : > { %v6943_v1 = vmul.f32 %v15115_v55, %v17002_v26 }
 0xa56   : > { %7036 = vrot.lane.b32.xlu0 %v6925_v51, %s16852_s16  ;;  %7034 = vrot.lane.b32.xlu1 %v6924_v39, %s16852_s16  ;;  %v17003_v51 = vld [vmem:[#allocation180_spill] sm:$0xff] }
 0xa57   : > { %v6942_v56 = vmul.f32 %v15115_v55, %v17003_v51 }
 0xa5a   : > { %7164 = vrot.lane.b32.xlu0 %v6961_v27, %s16747_s24  ;;  %7162 = vrot.lane.b32.xlu1 %v6960_v11, %s16747_s24  ;;  %v17004_v11 = vld [vmem:[#allocation87_spill] sm:$0xff] }
 0xa5e   : > { %7040 = vrot.lane.b32.xlu0 %v6927_v40, %s16852_s16  ;;  %7038 = vrot.lane.b32.xlu1 %v6926_v34, %s16852_s16  ;;  %v6879_v40 = vmul.f32 %v15113_v15, %v17004_v11  ;;  %v6878_v34 = vmul.f32 %v15113_v15, %v17005_v3  ;;  %v17012_v3 = vld [vmem:[#allocation15_spill] sm:$0xff] }
 0xa62   : > { %7168 = vrot.lane.b32.xlu0 %v6963_v23, %s16747_s24  ;;  %7166 = vrot.lane.b32.xlu1 %v6962_v21, %s16747_s24  ;;  %v15313_v23 = vld [vmem:[%s15786_s8] ss:$0 sm:$0xff] }
 0xa66   : > { %7044 = vrot.lane.b32.xlu0 %v6929_v30, %s16852_s16  ;;  %7042 = vrot.lane.b32.xlu1 %v6928_v44, %s16852_s16  ;;  %v6944_v30 = vmul.f32 %v15115_v55, %v17006_v36  ;;  %v15324_v44 = vld [vmem:[%s15787_s9] ss:$0 sm:$0xff]  ;;  %v6981_v55 = vmul.f32 %v15123_v33, %v15099_v20 }
 0xa6a   : > { %7172 = vrot.lane.b32.xlu0 %v6965_v0, %s16747_s24  ;;  %7170 = vrot.lane.b32.xlu1 %v6964_v45, %s16747_s24 }
 0xa6e   : > { %7048 = vrot.lane.b32.xlu0 %v6931_v31, %s16852_s16  ;;  %7046 = vrot.lane.b32.xlu1 %v6930_v25, %s16852_s16 }
 0xa72   : > { %7176 = vrot.lane.b32.xlu0 %v6967_v5, %s16747_s24  ;;  %7174 = vrot.lane.b32.xlu1 %v6966_v35, %s16747_s24  ;;  %v6980_v35 = vmul.f32 %v15123_v33, %v15103_v62 }
 0xa76   : > { %7052 = vrot.lane.b32.xlu0 %v6933_v4, %s16852_s16  ;;  %7050 = vrot.lane.b32.xlu1 %v6932_v13, %s16852_s16 }
 0xa7a   : > { %7180 = vrot.lane.b32.xlu0 %v6969_v43, %s16747_s24  ;;  %7178 = vrot.lane.b32.xlu1 %v6968_v14, %s16747_s24  ;;  %v17007_v14 = vld [vmem:[#allocation59_spill] sm:$0xff] }
 0xa7b   : > { %v6881_v58 = vmul.f32 %v15113_v15, %v17007_v14 }
 0xa7e   : > { %7056 = vrot.lane.b32.xlu0 %v6935_v59, %s16852_s16  ;;  %7054 = vrot.lane.b32.xlu1 %v6934_v7, %s16852_s16  ;;  %v6880_v7 = vmul.f32 %v15113_v15, %v17008_v47 }
 0xa82   : > { %7184 = vrot.lane.b32.xlu0 %v6971_v60, %s16747_s24  ;;  %7182 = vrot.lane.b32.xlu1 %v6970_v19, %s16747_s24 }
 0xa86   : > { %7060 = vrot.lane.b32.xlu0 %v6937_v18, %s16852_s16  ;;  %7058 = vrot.lane.b32.xlu1 %v6936_v49, %s16852_s16 }
 0xa8a   : > { %7188 = vrot.lane.b32.xlu0 %v6973_v50, %s16747_s24  ;;  %7186 = vrot.lane.b32.xlu1 %v6972_v22, %s16747_s24 }
 0xa8e   : > { %7064 = vrot.lane.b32.xlu0 %v6939_v17, %s16852_s16  ;;  %7062 = vrot.lane.b32.xlu1 %v6938_v10, %s16852_s16  ;;  %v17009_v17 = vld [vmem:[#allocation67_spill] sm:$0xff] }
 0xa8f   : > { %v6883_v61 = vmul.f32 %v15113_v15, %v17009_v17 }
 0xa92   : > { %7192 = vrot.lane.b32.xlu0 %v6975_v6, %s16747_s24  ;;  %7190 = vrot.lane.b32.xlu1 %v6974_v24, %s16747_s24  ;;  %v17010_v6 = vld [vmem:[#allocation20_spill] sm:$0xff] }
 0xa93   : > { %v6882_v24 = vmul.f32 %v15113_v15, %v17010_v6 }
 0xa96   : > { %7068 = vrot.lane.b32.xlu0 %v6941_v41, %s16852_s16  ;;  %7066 = vrot.lane.b32.xlu1 %v6940_v16, %s16852_s16 }
 0xa9a   : > { %7196 = vrot.lane.b32.xlu0 %v6977_v57, %s16747_s24  ;;  %7194 = vrot.lane.b32.xlu1 %v6976_v9, %s16747_s24 }
 0xa9e   : > { %7072 = vrot.lane.b32.xlu0 %v6943_v1, %s16852_s16  ;;  %7070 = vrot.lane.b32.xlu1 %v6942_v56, %s16852_s16 }
 0xaa0   : > { %v7017_v39 = vpop.permute.xlu0 %7016  ;;  %v7015_v27 = vpop.permute.xlu1 %7014 }
 0xaa1   : > { %v7239_v12 = vsel %vm2068_vm5, %v6879_v40, %v7017_v39  ;;  %v7238_v28 = vsel %vm2068_vm5, %v6878_v34, %v7015_v27  ;;  %v6884_v34 = vmul.f32 %v15113_v15, %v17012_v3 }
 0xaa2   : > { %7200 = vrot.lane.b32.xlu0 %v6979_v42, %s16747_s24  ;;  %7198 = vrot.lane.b32.xlu1 %v6978_v52, %s16747_s24  ;;  %v17011_v52 = vld [vmem:[#allocation86_spill] sm:$0xff] }
 0xaa3   : > { %v6885_v11 = vmul.f32 %v15113_v15, %v17011_v52 }
 0xaa4   : > { %v7145_v21 = vpop.permute.xlu0 %7144  ;;  %v7143_v45 = vpop.permute.xlu1 %7142 }
 0xaa5   : > { %v7271_v0 = vsel %vm2101_vm6, %v7239_v12, %v7145_v21  ;;  %v7270_v54 = vsel %vm2101_vm6, %v7238_v28, %v7143_v45 }
 0xaa6   : > { %v7310_v31 = vmul.f32 %v15313_v23, %v7271_v0  ;;  %7076 = vrot.lane.b32.xlu0 %v6945_v46, %s16852_s16  ;;  %v7309_v2 = vmul.f32 %v15313_v23, %v7270_v54  ;;  %7074 = vrot.lane.b32.xlu1 %v6944_v30, %s16852_s16 }
 0xaa8   : > { %v7349_v25 = vadd.f32 %v15324_v44, %v7310_v31  ;;  %v7021_v5 = vpop.permute.xlu0 %7020  ;;  %v7348_v4 = vadd.f32 %v15324_v44, %v7309_v2  ;;  %v7019_v13 = vpop.permute.xlu1 %7018 }
 0xaa9   : > { %v7241_v20 = vsel %vm2068_vm5, %v6881_v58, %v7021_v5  ;;  %v7240_v62 = vsel %vm2068_vm5, %v6880_v7, %v7019_v13  ;;  %v17013_v5 = vld [vmem:[#allocation73_spill] sm:$0xff]  ;;  %v17014_v13 = vld [vmem:[#allocation88_spill] sm:$0xff] }
 0xaaa   : > { %v7381_v43 = vmax.f32 %v7349_v25, 0.0  ;;  %7204 = vrot.lane.b32.xlu0 %v6981_v55, %s16747_s24  ;;  %v7380_v59 = vmax.f32 %v7348_v4, 0.0  ;;  %7202 = vrot.lane.b32.xlu1 %v6980_v35, %s16747_s24  ;;  %v6887_v35 = vmul.f32 %v15113_v15, %v17013_v5 }
 0xaac   : > { %v7149_v60 = vpop.permute.xlu0 %7148  ;;  %v7147_v37 = vpop.permute.xlu1 %7146  ;;  %8623 = vmatprep.mubr.msk.f32.mxu0 %vm2134_vm7, %v7380_v59 }
 0xaad   : > { %v7273_v33 = vsel %vm2101_vm6, %v7241_v20, %v7149_v60  ;;  %v7272_v53 = vsel %vm2101_vm6, %v7240_v62, %v7147_v37  ;;  %8624 = vmatmul.mubr.msk.f32.vlgmr.msra.gmra.mrb[48].mxu0 %vm2134_vm7, %v7381_v43  ;;  %v6886_v43 = vmul.f32 %v15113_v15, %v17014_v13 }
 0xaae   : > { %v7312_v19 = vmul.f32 %v15313_v23, %v7273_v33  ;;  %v7311_v18 = vmul.f32 %v15313_v23, %v7272_v53 }
 0xab0   : > { %v7351_v48 = vadd.f32 %v15324_v44, %v7312_v19  ;;  %v7025_v49 = vpop.permute.xlu0 %7024  ;;  %v7350_v50 = vadd.f32 %v15324_v44, %v7311_v18  ;;  %v7023_v22 = vpop.permute.xlu1 %7022 }
 0xab1   : > { %v7243_v32 = vsel %vm2068_vm5, %v6883_v61, %v7025_v49  ;;  %v7242_v38 = vsel %vm2068_vm5, %v6882_v24, %v7023_v22  ;;  %v17016_v22 = vld [vmem:[#allocation66_spill] sm:$0xff] }
 0xab2   : > { %v7383_v29 = vmax.f32 %v7351_v48, 0.0  ;;  %v7382_v10 = vmax.f32 %v7350_v50, 0.0  ;;  %v17015_v48 = vld [vmem:[#allocation110_spill] sm:$0xff] }
 0xab3   : > { %v6889_v49 = vmul.f32 %v15113_v15, %v17015_v48 }
 0xab4   : > { %v7153_v41 = vpop.permute.xlu0 %7152  ;;  %v7151_v57 = vpop.permute.xlu1 %7150  ;;  %8626 = vmatprep.mubr.msk.f32.mxu0 %vm2134_vm7, %v7382_v10 }
 0xab5   : > { %v7275_v16 = vsel %vm2101_vm6, %v7243_v32, %v7153_v41  ;;  %v7274_v26 = vsel %vm2101_vm6, %v7242_v38, %v7151_v57  ;;  %8627 = vmatmul.mubr.msk.f32.gmra.mrb[50].mxu0 %vm2134_vm7, %v7383_v29  ;;  %v6888_v29 = vmul.f32 %v15113_v15, %v17016_v22 }
 0xab6   : > { %v7314_v9 = vmul.f32 %v15313_v23, %v7275_v16  ;;  %v7313_v1 = vmul.f32 %v15313_v23, %v7274_v26 }
 0xab8   : > { %v7353_v51 = vadd.f32 %v15324_v44, %v7314_v9  ;;  %v7029_v56 = vpop.permute.xlu0 %7028  ;;  %v7352_v39 = vadd.f32 %v15324_v44, %v7313_v1  ;;  %v7027_v27 = vpop.permute.xlu1 %7026 }
 0xab9   : > { %v7245_v46 = vsel %vm2068_vm5, %v6885_v11, %v7029_v56  ;;  %v7244_v21 = vsel %vm2068_vm5, %v6884_v34, %v7027_v27  ;;  %v17018_v27 = vld [vmem:[#allocation72_spill] sm:$0xff] }
 0xaba   : > { %v7385_v42 = vmax.f32 %v7353_v51, 0.0  ;;  %v7384_v40 = vmax.f32 %v7352_v39, 0.0  ;;  %v17017_v51 = vld [vmem:[#allocation14_spill] sm:$0xff] }
 0xabb   : > { %v6891_v56 = vmul.f32 %v15113_v15, %v17017_v51 }
 0xabc   : > { %v7157_v12 = vpop.permute.xlu0 %7156  ;;  %v7155_v30 = vpop.permute.xlu1 %7154  ;;  %8629 = vmatprep.mubr.msk.f32.mxu0 %vm2134_vm7, %v7384_v40 }
 0xabd   : > { %v7277_v36 = vsel %vm2101_vm6, %v7245_v46, %v7157_v12  ;;  %v7276_v0 = vsel %vm2101_vm6, %v7244_v21, %v7155_v30  ;;  %8630 = vmatmul.mubr.msk.f32.gmra.mrb[52].mxu0 %vm2134_vm7, %v7385_v42  ;;  %v6890_v42 = vmul.f32 %v15113_v15, %v17018_v27 }
 0xabe   : > { %v7316_v28 = vmul.f32 %v15313_v23, %v7277_v36  ;;  %v7315_v45 = vmul.f32 %v15313_v23, %v7276_v0 }
 0xac0   : > { %v7355_v31 = vadd.f32 %v15324_v44, %v7316_v28  ;;  %v7033_v54 = vpop.permute.xlu0 %7032  ;;  %v7354_v2 = vadd.f32 %v15324_v44, %v7315_v45  ;;  %v7031_v55 = vpop.permute.xlu1 %7030 }
 0xac1   : > { %v7247_v14 = vsel %vm2068_vm5, %v6887_v35, %v7033_v54  ;;  %v7246_v59 = vsel %vm2068_vm5, %v6886_v43, %v7031_v55  ;;  %v17020_v55 = vld [vmem:[#allocation97_spill] sm:$0xff] }
 0xac2   : > { %v7387_v25 = vmax.f32 %v7355_v31, 0.0  ;;  %v7386_v4 = vmax.f32 %v7354_v2, 0.0  ;;  %v17019_v31 = vld [vmem:[#allocation111_spill] sm:$0xff] }
 0xac3   : > { %v6893_v54 = vmul.f32 %v15113_v15, %v17019_v31 }
 0xac4   : > { %v7161_v58 = vpop.permute.xlu0 %7160  ;;  %v7159_v7 = vpop.permute.xlu1 %7158  ;;  %8632 = vmatprep.mubr.msk.f32.mxu0 %vm2134_vm7, %v7386_v4 }
 0xac5   : > { %v7279_v47 = vsel %vm2101_vm6, %v7247_v14, %v7161_v58  ;;  %v7278_v60 = vsel %vm2101_vm6, %v7246_v59, %v7159_v7  ;;  %8633 = vmatmul.mubr.msk.f32.gmra.mrb[54].mxu0 %vm2134_vm7, %v7387_v25  ;;  %v6892_v25 = vmul.f32 %v15113_v15, %v17020_v55 }
 0xac6   : > { %v7318_v20 = vmul.f32 %v15313_v23, %v7279_v47  ;;  %v7317_v62 = vmul.f32 %v15313_v23, %v7278_v60 }
 0xac8   : > { %v7357_v33 = vadd.f32 %v15324_v44, %v7318_v20  ;;  %v7037_v37 = vpop.permute.xlu0 %7036  ;;  %v7356_v19 = vadd.f32 %v15324_v44, %v7317_v62  ;;  %v7035_v53 = vpop.permute.xlu1 %7034 }
 0xac9   : > { %v7249_v17 = vsel %vm2068_vm5, %v6889_v49, %v7037_v37  ;;  %v7248_v10 = vsel %vm2068_vm5, %v6888_v29, %v7035_v53  ;;  %v17022_v53 = vld [vmem:[#allocation102_spill] sm:$0xff] }
 0xaca   : > { %v7389_v18 = vmax.f32 %v7357_v33, 0.0  ;;  %v7388_v50 = vmax.f32 %v7356_v19, 0.0  ;;  %v17021_v33 = vld [vmem:[#allocation117_spill] sm:$0xff] }
 0xacb   : > { %v6895_v37 = vmul.f32 %v15113_v15, %v17021_v33 }
 0xacc   : > { %v7165_v61 = vpop.permute.xlu0 %7164  ;;  %v7163_v24 = vpop.permute.xlu1 %7162  ;;  %8635 = vmatprep.mubr.msk.f32.mxu0 %vm2134_vm7, %v7388_v50 }
 0xacd   : > { %v7281_v6 = vsel %vm2101_vm6, %v7249_v17, %v7165_v61  ;;  %v7280_v41 = vsel %vm2101_vm6, %v7248_v10, %v7163_v24  ;;  %8636 = vmatmul.mubr.msk.f32.gmra.mrb[56].mxu0 %vm2134_vm7, %v7389_v18  ;;  %v6894_v18 = vmul.f32 %v15113_v15, %v17022_v53 }
 0xace   : > { %v7320_v32 = vmul.f32 %v15313_v23, %v7281_v6  ;;  %v7319_v38 = vmul.f32 %v15313_v23, %v7280_v41 }
 0xad0   : > { %v7359_v16 = vadd.f32 %v15324_v44, %v7320_v32  ;;  %v7041_v57 = vpop.permute.xlu0 %7040  ;;  %v7358_v9 = vadd.f32 %v15324_v44, %v7319_v38  ;;  %v7039_v26 = vpop.permute.xlu1 %7038 }
 0xad1   : > { %v7251_v52 = vsel %vm2068_vm5, %v6891_v56, %v7041_v57  ;;  %v7250_v40 = vsel %vm2068_vm5, %v6890_v42, %v7039_v26  ;;  %v17024_v26 = vld [vmem:[#allocation103_spill] sm:$0xff] }
 0xad2   : > { %v7391_v1 = vmax.f32 %v7359_v16, 0.0  ;;  %v7390_v39 = vmax.f32 %v7358_v9, 0.0  ;;  %v17023_v16 = vld [vmem:[#allocation145_spill] sm:$0xff] }
 0xad3   : > { %v6897_v57 = vmul.f32 %v15113_v15, %v17023_v16 }
 0xad4   : > { %v7169_v11 = vpop.permute.xlu0 %7168  ;;  %v7167_v34 = vpop.permute.xlu1 %7166  ;;  %8638 = vmatprep.mubr.msk.f32.mxu0 %vm2134_vm7, %v7390_v39 }
 0xad5   : > { %v7283_v3 = vsel %vm2101_vm6, %v7251_v52, %v7169_v11  ;;  %v7282_v12 = vsel %vm2101_vm6, %v7250_v40, %v7167_v34  ;;  %8639 = vmatmul.mubr.msk.f32.gmra.mrb[58].mxu0 %vm2134_vm7, %v7391_v1  ;;  %v6896_v1 = vmul.f32 %v15113_v15, %v17024_v26 }
 0xad6   : > { %v7322_v46 = vmul.f32 %v15313_v23, %v7283_v3  ;;  %v7321_v21 = vmul.f32 %v15313_v23, %v7282_v12 }
 0xad8   : > { %v7361_v36 = vadd.f32 %v15324_v44, %v7322_v46  ;;  %v7045_v30 = vpop.permute.xlu0 %7044  ;;  %v7360_v28 = vadd.f32 %v15324_v44, %v7321_v21  ;;  %v7043_v0 = vpop.permute.xlu1 %7042 }
 0xad9   : > { %v7253_v5 = vsel %vm2068_vm5, %v6893_v54, %v7045_v30  ;;  %v7252_v4 = vsel %vm2068_vm5, %v6892_v25, %v7043_v0  ;;  %v17026_v0 = vld [vmem:[#allocation166_spill] sm:$0xff] }
 0xada   : > { %v7393_v45 = vmax.f32 %v7361_v36, 0.0  ;;  %v7392_v2 = vmax.f32 %v7360_v28, 0.0  ;;  %v17025_v36 = vld [vmem:[#allocation147_spill] sm:$0xff] }
 0xadb   : > { %v6899_v30 = vmul.f32 %v15113_v15, %v17025_v36 }
 0xadc   : > { %v7173_v35 = vpop.permute.xlu0 %7172  ;;  %v7171_v43 = vpop.permute.xlu1 %7170  ;;  %8641 = vmatprep.mubr.msk.f32.mxu0 %vm2134_vm7, %v7392_v2 }
 0xadd   : > { %v7285_v13 = vsel %vm2101_vm6, %v7253_v5, %v7173_v35  ;;  %v7284_v58 = vsel %vm2101_vm6, %v7252_v4, %v7171_v43  ;;  %8642 = vmatmul.mubr.msk.f32.gmra.mrb[60].mxu0 %vm2134_vm7, %v7393_v45  ;;  %v6898_v45 = vmul.f32 %v15113_v15, %v17026_v0 }
 0xade   : > { %v7324_v14 = vmul.f32 %v15313_v23, %v7285_v13  ;;  %v7323_v59 = vmul.f32 %v15313_v23, %v7284_v58 }
 0xae0   : > { %v7363_v47 = vadd.f32 %v15324_v44, %v7324_v14  ;;  %v7049_v7 = vpop.permute.xlu0 %7048  ;;  %v7362_v20 = vadd.f32 %v15324_v44, %v7323_v59  ;;  %v7047_v60 = vpop.permute.xlu1 %7046 }
 0xae1   : > { %v7255_v48 = vsel %vm2068_vm5, %v6895_v37, %v7049_v7  ;;  %v7254_v50 = vsel %vm2068_vm5, %v6894_v18, %v7047_v60  ;;  %v17028_v60 = vld [vmem:[#allocation172_spill] sm:$0xff] }
 0xae2   : > { %v7395_v62 = vmax.f32 %v7363_v47, 0.0  ;;  %v7394_v19 = vmax.f32 %v7362_v20, 0.0  ;;  %v17027_v47 = vld [vmem:[#allocation154_spill] sm:$0xff] }
 0xae3   : > { %v6901_v7 = vmul.f32 %v15113_v15, %v17027_v47 }
 0xae4   : > { %v7177_v49 = vpop.permute.xlu0 %7176  ;;  %v7175_v29 = vpop.permute.xlu1 %7174  ;;  %8644 = vmatprep.mubr.msk.f32.mxu0 %vm2134_vm7, %v7394_v19 }
 0xae5   : > { %v7287_v22 = vsel %vm2101_vm6, %v7255_v48, %v7177_v49  ;;  %v7286_v61 = vsel %vm2101_vm6, %v7254_v50, %v7175_v29  ;;  %8645 = vmatmul.mubr.msk.f32.gmra.mrb[62].mxu0 %vm2134_vm7, %v7395_v62  ;;  %v6900_v62 = vmul.f32 %v15113_v15, %v17028_v60 }
 0xae6   : > { %v7326_v17 = vmul.f32 %v15313_v23, %v7287_v22  ;;  %v7325_v10 = vmul.f32 %v15313_v23, %v7286_v61 }
 0xae8   : > { %v7365_v6 = vadd.f32 %v15324_v44, %v7326_v17  ;;  %v7053_v24 = vpop.permute.xlu0 %7052  ;;  %v7364_v32 = vadd.f32 %v15324_v44, %v7325_v10  ;;  %v7051_v41 = vpop.permute.xlu1 %7050 }
 0xae9   : > { %v7257_v51 = vsel %vm2068_vm5, %v6897_v57, %v7053_v24  ;;  %v7256_v39 = vsel %vm2068_vm5, %v6896_v1, %v7051_v41  ;;  %v17030_v41 = vld [vmem:[#allocation174_spill] sm:$0xff] }
 0xaea   : > { %v7397_v38 = vmax.f32 %v7365_v6, 0.0  ;;  %v7396_v9 = vmax.f32 %v7364_v32, 0.0  ;;  %v17029_v6 = vld [vmem:[#allocation162_spill] sm:$0xff] }
 0xaeb   : > { %v6903_v24 = vmul.f32 %v15113_v15, %v17029_v6 }
 0xaec   : > { %v7181_v56 = vpop.permute.xlu0 %7180  ;;  %v7179_v42 = vpop.permute.xlu1 %7178  ;;  %8647 = vmatprep.mubr.msk.f32.mxu0 %vm2134_vm7, %v7396_v9 }
 0xaed   : > { %v7289_v27 = vsel %vm2101_vm6, %v7257_v51, %v7181_v56  ;;  %v7288_v11 = vsel %vm2101_vm6, %v7256_v39, %v7179_v42  ;;  %8648 = vmatmul.mubr.msk.f32.gmra.mrb[64].mxu0 %vm2134_vm7, %v7397_v38  ;;  %v6902_v38 = vmul.f32 %v15113_v15, %v17030_v41 }
 0xaee   : > { %v7328_v52 = vmul.f32 %v15313_v23, %v7289_v27  ;;  %v7327_v40 = vmul.f32 %v15313_v23, %v7288_v11 }
 0xaf0   : > { %v7367_v3 = vadd.f32 %v15324_v44, %v7328_v52  ;;  %v7057_v34 = vpop.permute.xlu0 %7056  ;;  %v7366_v46 = vadd.f32 %v15324_v44, %v7327_v40  ;;  %v7055_v12 = vpop.permute.xlu1 %7054 }
 0xaf1   : > { %v7259_v31 = vsel %vm2068_vm5, %v6899_v30, %v7057_v34  ;;  %v7258_v2 = vsel %vm2068_vm5, %v6898_v45, %v7055_v12  ;;  %v17032_v12 = vld [vmem:[#allocation183_spill] sm:$0xff] }
 0xaf2   : > { %v7399_v21 = vmax.f32 %v7367_v3, 0.0  ;;  %v7398_v28 = vmax.f32 %v7366_v46, 0.0  ;;  %v17031_v3 = vld [vmem:[#allocation178_spill] sm:$0xff] }
 0xaf3   : > { %v6905_v34 = vmul.f32 %v15113_v15, %v17031_v3 }
 0xaf4   : > { %v7185_v54 = vpop.permute.xlu0 %7184  ;;  %v7183_v25 = vpop.permute.xlu1 %7182  ;;  %8650 = vmatprep.mubr.msk.f32.mxu0 %vm2134_vm7, %v7398_v28 }
 0xaf5   : > { %v7291_v55 = vsel %vm2101_vm6, %v7259_v31, %v7185_v54  ;;  %v7290_v35 = vsel %vm2101_vm6, %v7258_v2, %v7183_v25  ;;  %8651 = vmatmul.mubr.msk.f32.gmra.mrb[66].mxu0 %vm2134_vm7, %v7399_v21  ;;  %v6904_v21 = vmul.f32 %v15113_v15, %v17032_v12 }
 0xaf6   : > { %v7330_v5 = vmul.f32 %v15313_v23, %v7291_v55  ;;  %v7329_v4 = vmul.f32 %v15313_v23, %v7290_v35 }
 0xaf8   : > { %v7369_v13 = vadd.f32 %v15324_v44, %v7330_v5  ;;  %v7061_v43 = vpop.permute.xlu0 %7060  ;;  %v7368_v14 = vadd.f32 %v15324_v44, %v7329_v4  ;;  %v7059_v58 = vpop.permute.xlu1 %7058 }
 0xaf9   : > { %v7261_v33 = vsel %vm2068_vm5, %v6901_v7, %v7061_v43  ;;  %v7260_v19 = vsel %vm2068_vm5, %v6900_v62, %v7059_v58  ;;  %v17034_v58 = vld [vmem:[#allocation207_spill] sm:$0xff] }
 0xafa   : > { %v7401_v59 = vmax.f32 %v7369_v13, 0.0  ;;  %v7400_v20 = vmax.f32 %v7368_v14, 0.0  ;;  %v17033_v13 = vld [vmem:[#allocation201_spill] sm:$0xff] }
 0xafb   : > { %v6907_v43 = vmul.f32 %v15113_v15, %v17033_v13 }
 0xafc   : > { %v7189_v37 = vpop.permute.xlu0 %7188  ;;  %v7187_v18 = vpop.permute.xlu1 %7186  ;;  %8653 = vmatprep.mubr.msk.f32.mxu0 %vm2134_vm7, %v7400_v20 }
 0xafd   : > { %v7293_v53 = vsel %vm2101_vm6, %v7261_v33, %v7189_v37  ;;  %v7292_v49 = vsel %vm2101_vm6, %v7260_v19, %v7187_v18  ;;  %8654 = vmatmul.mubr.msk.f32.gmra.mrb[68].mxu0 %vm2134_vm7, %v7401_v59  ;;  %v6906_v59 = vmul.f32 %v15113_v15, %v17034_v58  ;;  %v8825_v58 = vld [vmem:[%s9147_s18 + $0x20] sm:$0xff] }
 0xafe   : > { %v7332_v48 = vmul.f32 %v15313_v23, %v7293_v53  ;;  %v7331_v50 = vmul.f32 %v15313_v23, %v7292_v49 }
 0xb00   : > { %v7371_v22 = vadd.f32 %v15324_v44, %v7332_v48  ;;  %v7065_v29 = vpop.permute.xlu0 %7064  ;;  %v7370_v17 = vadd.f32 %v15324_v44, %v7331_v50  ;;  %v7063_v61 = vpop.permute.xlu1 %7062 }
 0xb01   : > { %v7263_v16 = vsel %vm2068_vm5, %v6903_v24, %v7065_v29  ;;  %v7262_v9 = vsel %vm2068_vm5, %v6902_v38, %v7063_v61 }
 0xb02   : > { %v7403_v10 = vmax.f32 %v7371_v22, 0.0  ;;  %v7402_v32 = vmax.f32 %v7370_v17, 0.0  ;;  %v6909_v22 = vmul.f32 %v15113_v15, %v16974_v8  ;;  %v6908_v17 = vmul.f32 %v15113_v15, %v16972_v63 }
 0xb04   : > { %v7193_v57 = vpop.permute.xlu0 %7192  ;;  %v7191_v1 = vpop.permute.xlu1 %7190  ;;  %8656 = vmatprep.mubr.msk.f32.mxu0 %vm2134_vm7, %v7402_v32 }
 0xb05   : > { %v7295_v26 = vsel %vm2101_vm6, %v7263_v16, %v7193_v57  ;;  %v7294_v56 = vsel %vm2101_vm6, %v7262_v9, %v7191_v1  ;;  %8657 = vmatmul.mubr.msk.f32.gmra.mrb[70].mxu0 %vm2134_vm7, %v7403_v10  ;;  %v15555_v9 = vld [vmem:[%s15789_s11] ss:$0 sm:$0xff] }
 0xb06   : > { %v7334_v51 = vmul.f32 %v15313_v23, %v7295_v26  ;;  %v7333_v39 = vmul.f32 %v15313_v23, %v7294_v56 }
 0xb08   : > { %v7373_v27 = vadd.f32 %v15324_v44, %v7334_v51  ;;  %v7069_v42 = vpop.permute.xlu0 %7068  ;;  %v7372_v52 = vadd.f32 %v15324_v44, %v7333_v39  ;;  %v7067_v11 = vpop.permute.xlu1 %7066 }
 0xb09   : > { %v7265_v36 = vsel %vm2068_vm5, %v6905_v34, %v7069_v42  ;;  %v7264_v28 = vsel %vm2068_vm5, %v6904_v21, %v7067_v11 }
 0xb0a   : > { %v7405_v40 = vmax.f32 %v7373_v27, 0.0  ;;  %v7404_v46 = vmax.f32 %v7372_v52, 0.0  ;;  %v8820_v27 = vld [vmem:[%s9147_s18 + $0x8] sm:$0xff]  ;;  %v8821_v52 = vld [vmem:[%s9147_s18] sm:$0xff] }
 0xb0c   : > { %v7197_v30 = vpop.permute.xlu0 %7196  ;;  %v7195_v45 = vpop.permute.xlu1 %7194  ;;  %8659 = vmatprep.mubr.msk.f32.mxu0 %vm2134_vm7, %v7404_v46 }
 0xb0d   : > { %v7297_v0 = vsel %vm2101_vm6, %v7265_v36, %v7197_v30  ;;  %v7296_v54 = vsel %vm2101_vm6, %v7264_v28, %v7195_v45  ;;  %8660 = vmatmul.mubr.msk.f32.gmra.mrb[72].mxu0 %vm2134_vm7, %v7405_v40  ;;  %v8822_v28 = vld [vmem:[%s9147_s18 + $0x18] sm:$0xff]  ;;  %v8823_v45 = vld [vmem:[%s9147_s18 + $0x10] sm:$0xff] }
 0xb0e   : > { %v7336_v31 = vmul.f32 %v15313_v23, %v7297_v0  ;;  %v7335_v2 = vmul.f32 %v15313_v23, %v7296_v54 }
 0xb10   : > { %v7375_v55 = vadd.f32 %v15324_v44, %v7336_v31  ;;  %v7073_v25 = vpop.permute.xlu0 %7072  ;;  %v7374_v5 = vadd.f32 %v15324_v44, %v7335_v2  ;;  %v7071_v35 = vpop.permute.xlu1 %7070 }
 0xb11   : > { %v7267_v47 = vsel %vm2068_vm5, %v6907_v43, %v7073_v25  ;;  %v7266_v20 = vsel %vm2068_vm5, %v6906_v59, %v7071_v35  ;;  %v8824_v43 = vld [vmem:[%s9147_s18 + $0x28] sm:$0xff] }
 0xb12   : > { %v7407_v4 = vmax.f32 %v7375_v55, 0.0  ;;  %v7406_v14 = vmax.f32 %v7374_v5, 0.0 }
 0xb14   : > { %v7201_v7 = vpop.permute.xlu0 %7200  ;;  %v7199_v62 = vpop.permute.xlu1 %7198  ;;  %8662 = vmatprep.mubr.msk.f32.mxu0 %vm2134_vm7, %v7406_v14 }
 0xb15   : > { %v7299_v60 = vsel %vm2101_vm6, %v7267_v47, %v7201_v7  ;;  %v7298_v37 = vsel %vm2101_vm6, %v7266_v20, %v7199_v62  ;;  %8663 = vmatmul.mubr.msk.f32.gmra.mrb[74].mxu0 %vm2134_vm7, %v7407_v4 }
 0xb16   : > { %v7338_v33 = vmul.f32 %v15313_v23, %v7299_v60  ;;  %v7337_v19 = vmul.f32 %v15313_v23, %v7298_v37 }
 0xb18   : > { %v7377_v53 = vadd.f32 %v15324_v44, %v7338_v33  ;;  %v7077_v18 = vpop.permute.xlu0 %7076  ;;  %v7376_v48 = vadd.f32 %v15324_v44, %v7337_v19  ;;  %v7075_v49 = vpop.permute.xlu1 %7074 }
 0xb19   : > { %v7269_v61 = vsel %vm2068_vm5, %v6909_v22, %v7077_v18  ;;  %v7268_v6 = vsel %vm2068_vm5, %v6908_v17, %v7075_v49 }
 0xb1a   : > { %v7409_v50 = vmax.f32 %v7377_v53, 0.0  ;;  %v7408_v29 = vmax.f32 %v7376_v48, 0.0  ;;  %v8826_v53 = vld [vmem:[%s9147_s18 + $0x38] sm:$0xff]  ;;  %v8827_v48 = vld [vmem:[%s9147_s18 + $0x30] sm:$0xff] }
 0xb1c   : > { %v7205_v10 = vpop.permute.xlu0 %7204  ;;  %v7203_v32 = vpop.permute.xlu1 %7202  ;;  %8665 = vmatprep.mubr.msk.f32.mxu0 %vm2134_vm7, %v7408_v29 }
 0xb1d   : > { %v7301_v24 = vsel %vm2101_vm6, %v7269_v61, %v7205_v10  ;;  %v7300_v38 = vsel %vm2101_vm6, %v7268_v6, %v7203_v32  ;;  %8666 = vmatmul.mubr.msk.f32.gmra.mrb[76].mxu0 %vm2134_vm7, %v7409_v50  ;;  %v8828_v32 = vld [vmem:[%s9147_s18 + $0x48] sm:$0xff] }
 0xb1e   : > { %v7340_v41 = vmul.f32 %v15313_v23, %v7301_v24  ;;  %v7339_v8 = vmul.f32 %v15313_v23, %v7300_v38  ;;  %v15560_v23 = vld [vmem:[%s15790_s12] ss:$0 sm:$0xff] }
 0xb1f   : > { %v8829_v38 = vld [vmem:[%s9147_s18 + $0x40] sm:$0xff] }
 0xb20   : > { %v7379_v63 = vadd.f32 %v15324_v44, %v7340_v41  ;;  %v7378_v15 = vadd.f32 %v15324_v44, %v7339_v8 }
 0xb22   : > { %v7411_v16 = vmax.f32 %v7379_v63, 0.0  ;;  %v7410_v57 = vmax.f32 %v7378_v15, 0.0 }
 0xb24   : > { %8668 = vmatprep.mubr.msk.f32.mxu0 %vm2134_vm7, %v7410_v57 }
 0xb25   : > { %8669 = vmatmul.mubr.msk.f32.gmra.mrb[78].mxu0 %vm2134_vm7, %v7411_v16 }
 0xb80   : > { %v8625_v26 = vpop.f32.mrb[48].mxu0 }
 0xb81   : > { %v7746_v44 = vmul.f32 %v8625_v26, %v15555_v9  ;;  %v7579_v1 = vpop.f32.mrb[49].mxu0 }
 0xb82   : > { %v7745_v51 = vmul.f32 %v15555_v9, %v7579_v1 }
 0xb83   : > { %v7785_v56 = vadd.f32 %v15560_v23, %v7746_v44 }
 0xb84   : > { %v7784_v39 = vadd.f32 %v15560_v23, %v7745_v51 }
 0xb85   : > { %v7817_v42 = vadd.f32 %v8820_v27, %v7785_v56  ;;  %v8830_v56 = vld [vmem:[%s9147_s18 + $0x58] sm:$0xff]  ;;  %v8831_v27 = vld [vmem:[%s9147_s18 + $0x50] sm:$0xff] }
 0xb86   : > { %v7816_v11 = vadd.f32 %v8821_v52, %v7784_v39 }
 0xb87   : > { %v7849_v40 = vmax.f32 %v7817_v42, 0.0 }
 0xb88   : > { %v7848_v3 = vmax.f32 %v7816_v11, 0.0  ;;  %v8628_v34 = vpop.f32.mrb[50].mxu0 }
 0xb89   : > { %7881 = vst.msk [vmem:[%s15570_s22 + $0x8] sm:$0xff] %vm495_vm0, %v7849_v40  ;;  %v7748_v46 = vmul.f32 %v8628_v34, %v15555_v9  ;;  %v7589_v12 = vpop.f32.mrb[51].mxu0 }
 0xb8a   : > { %7880 = vst.msk [vmem:[%s15570_s22] sm:$0xff] %vm495_vm0, %v7848_v3  ;;  %v7747_v21 = vmul.f32 %v15555_v9, %v7589_v12 }
 0xb8b   : > { %v7787_v36 = vadd.f32 %v15560_v23, %v7748_v46 }
 0xb8c   : > { %v7786_v30 = vadd.f32 %v15560_v23, %v7747_v21 }
 0xb8d   : > { %v7819_v0 = vadd.f32 %v8822_v28, %v7787_v36  ;;  %v8832_v36 = vld [vmem:[%s9147_s18 + $0x68] sm:$0xff]  ;;  %v8833_v28 = vld [vmem:[%s9147_s18 + $0x60] sm:$0xff] }
 0xb8e   : > { %v7818_v31 = vadd.f32 %v8823_v45, %v7786_v30 }
 0xb8f   : > { %v7851_v54 = vmax.f32 %v7819_v0, 0.0 }
 0xb90   : > { %v7850_v2 = vmax.f32 %v7818_v31, 0.0  ;;  %v8631_v55 = vpop.f32.mrb[52].mxu0 }
 0xb91   : > { %7883 = vst.msk [vmem:[%s15570_s22 + $0x18] sm:$0xff] %vm495_vm0, %v7851_v54  ;;  %v7750_v25 = vmul.f32 %v8631_v55, %v15555_v9  ;;  %v7599_v5 = vpop.f32.mrb[53].mxu0 }
 0xb92   : > { %7882 = vst.msk [vmem:[%s15570_s22 + $0x10] sm:$0xff] %vm495_vm0, %v7850_v2  ;;  %v7749_v35 = vmul.f32 %v15555_v9, %v7599_v5 }
 0xb93   : > { %v7789_v4 = vadd.f32 %v15560_v23, %v7750_v25 }
 0xb94   : > { %v7788_v13 = vadd.f32 %v15560_v23, %v7749_v35 }
 0xb95   : > { %v7821_v14 = vadd.f32 %v8824_v43, %v7789_v4  ;;  %v8834_v4 = vld [vmem:[%s9147_s18 + $0x78] sm:$0xff]  ;;  %v8835_v43 = vld [vmem:[%s9147_s18 + $0x70] sm:$0xff] }
 0xb96   : > { %v7820_v59 = vadd.f32 %v8825_v58, %v7788_v13 }
 0xb97   : > { %v7853_v47 = vmax.f32 %v7821_v14, 0.0 }
 0xb98   : > { %v7852_v7 = vmax.f32 %v7820_v59, 0.0  ;;  %v8634_v20 = vpop.f32.mrb[54].mxu0 }
 0xb99   : > { %7885 = vst.msk [vmem:[%s15570_s22 + $0x28] sm:$0xff] %vm495_vm0, %v7853_v47  ;;  %v7752_v60 = vmul.f32 %v8634_v20, %v15555_v9  ;;  %v7609_v62 = vpop.f32.mrb[55].mxu0 }
 0xb9a   : > { %7884 = vst.msk [vmem:[%s15570_s22 + $0x20] sm:$0xff] %vm495_vm0, %v7852_v7  ;;  %v7751_v33 = vmul.f32 %v15555_v9, %v7609_v62 }
 0xb9b   : > { %v7791_v37 = vadd.f32 %v15560_v23, %v7752_v60 }
 0xb9c   : > { %v7790_v19 = vadd.f32 %v15560_v23, %v7751_v33 }
 0xb9d   : > { %v7823_v18 = vadd.f32 %v8826_v53, %v7791_v37  ;;  %v8836_v37 = vld [vmem:[%s9147_s18 + $0x88] sm:$0xff]  ;;  %v8837_v53 = vld [vmem:[%s9147_s18 + $0x80] sm:$0xff] }
 0xb9e   : > { %v7822_v49 = vadd.f32 %v8827_v48, %v7790_v19 }
 0xb9f   : > { %v7855_v50 = vmax.f32 %v7823_v18, 0.0 }
 0xba0   : > { %v7854_v22 = vmax.f32 %v7822_v49, 0.0  ;;  %v8637_v29 = vpop.f32.mrb[56].mxu0 }
 0xba1   : > { %7887 = vst.msk [vmem:[%s15570_s22 + $0x38] sm:$0xff] %vm495_vm0, %v7855_v50  ;;  %v7754_v17 = vmul.f32 %v8637_v29, %v15555_v9  ;;  %v7619_v61 = vpop.f32.mrb[57].mxu0 }
 0xba2   : > { %7886 = vst.msk [vmem:[%s15570_s22 + $0x30] sm:$0xff] %vm495_vm0, %v7854_v22  ;;  %v7753_v10 = vmul.f32 %v15555_v9, %v7619_v61 }
 0xba3   : > { %v7793_v6 = vadd.f32 %v15560_v23, %v7754_v17 }
 0xba4   : > { %v7792_v24 = vadd.f32 %v15560_v23, %v7753_v10 }
 0xba5   : > { %v7825_v41 = vadd.f32 %v8828_v32, %v7793_v6  ;;  %v8838_v6 = vld [vmem:[%s9147_s18 + $0x98] sm:$0xff]  ;;  %v8839_v32 = vld [vmem:[%s9147_s18 + $0x90] sm:$0xff] }
 0xba6   : > { %v7824_v8 = vadd.f32 %v8829_v38, %v7792_v24 }
 0xba7   : > { %v7857_v63 = vmax.f32 %v7825_v41, 0.0 }
 0xba8   : > { %v7856_v15 = vmax.f32 %v7824_v8, 0.0  ;;  %v8640_v16 = vpop.f32.mrb[58].mxu0 }
 0xba9   : > { %7889 = vst.msk [vmem:[%s15570_s22 + $0x48] sm:$0xff] %vm495_vm0, %v7857_v63  ;;  %v7756_v57 = vmul.f32 %v8640_v16, %v15555_v9  ;;  %v7629_v26 = vpop.f32.mrb[59].mxu0 }
 0xbaa   : > { %7888 = vst.msk [vmem:[%s15570_s22 + $0x40] sm:$0xff] %vm495_vm0, %v7856_v15  ;;  %v7755_v44 = vmul.f32 %v15555_v9, %v7629_v26 }
 0xbab   : > { %v7795_v1 = vadd.f32 %v15560_v23, %v7756_v57 }
 0xbac   : > { %v7794_v51 = vadd.f32 %v15560_v23, %v7755_v44 }
 0xbad   : > { %v7827_v39 = vadd.f32 %v8830_v56, %v7795_v1  ;;  %v8840_v1 = vld [vmem:[%s9147_s18 + $0xa8] sm:$0xff]  ;;  %v8841_v56 = vld [vmem:[%s9147_s18 + $0xa0] sm:$0xff] }
 0xbae   : > { %v7826_v42 = vadd.f32 %v8831_v27, %v7794_v51 }
 0xbaf   : > { %v7859_v52 = vmax.f32 %v7827_v39, 0.0 }
 0xbb0   : > { %v7858_v11 = vmax.f32 %v7826_v42, 0.0  ;;  %v8643_v40 = vpop.f32.mrb[60].mxu0 }
 0xbb1   : > { %7891 = vst.msk [vmem:[%s15570_s22 + $0x58] sm:$0xff] %vm495_vm0, %v7859_v52  ;;  %v7758_v3 = vmul.f32 %v8643_v40, %v15555_v9  ;;  %v7639_v34 = vpop.f32.mrb[61].mxu0 }
 0xbb2   : > { %7890 = vst.msk [vmem:[%s15570_s22 + $0x50] sm:$0xff] %vm495_vm0, %v7858_v11  ;;  %v7757_v46 = vmul.f32 %v15555_v9, %v7639_v34 }
 0xbb3   : > { %v7797_v12 = vadd.f32 %v15560_v23, %v7758_v3 }
 0xbb4   : > { %v7796_v21 = vadd.f32 %v15560_v23, %v7757_v46 }
 0xbb5   : > { %v7829_v30 = vadd.f32 %v8832_v36, %v7797_v12  ;;  %v8842_v12 = vld [vmem:[%s9147_s18 + $0xb8] sm:$0xff]  ;;  %v8843_v36 = vld [vmem:[%s9147_s18 + $0xb0] sm:$0xff] }
 0xbb6   : > { %v7828_v0 = vadd.f32 %v8833_v28, %v7796_v21 }
 0xbb7   : > { %v7861_v45 = vmax.f32 %v7829_v30, 0.0 }
 0xbb8   : > { %v7860_v31 = vmax.f32 %v7828_v0, 0.0  ;;  %v8646_v54 = vpop.f32.mrb[62].mxu0 }
 0xbb9   : > { %7893 = vst.msk [vmem:[%s15570_s22 + $0x68] sm:$0xff] %vm495_vm0, %v7861_v45  ;;  %v7760_v2 = vmul.f32 %v8646_v54, %v15555_v9  ;;  %v7649_v55 = vpop.f32.mrb[63].mxu0 }
 0xbba   : > { %7892 = vst.msk [vmem:[%s15570_s22 + $0x60] sm:$0xff] %vm495_vm0, %v7860_v31  ;;  %v7759_v25 = vmul.f32 %v15555_v9, %v7649_v55 }
 0xbbb   : > { %v7799_v5 = vadd.f32 %v15560_v23, %v7760_v2 }
 0xbbc   : > { %v7798_v35 = vadd.f32 %v15560_v23, %v7759_v25 }
 0xbbd   : > { %v7831_v13 = vadd.f32 %v8834_v4, %v7799_v5  ;;  %v8844_v5 = vld [vmem:[%s9147_s18 + $0xc8] sm:$0xff]  ;;  %v8845_v4 = vld [vmem:[%s9147_s18 + $0xc0] sm:$0xff] }
 0xbbe   : > { %v7830_v14 = vadd.f32 %v8835_v43, %v7798_v35 }
 0xbbf   : > { %v7863_v58 = vmax.f32 %v7831_v13, 0.0 }
 0xbc0   : > { %v7862_v59 = vmax.f32 %v7830_v14, 0.0  ;;  %v8649_v47 = vpop.f32.mrb[64].mxu0 }
 0xbc1   : > { %7895 = vst.msk [vmem:[%s15570_s22 + $0x78] sm:$0xff] %vm495_vm0, %v7863_v58  ;;  %v7762_v7 = vmul.f32 %v8649_v47, %v15555_v9  ;;  %v7659_v20 = vpop.f32.mrb[65].mxu0 }
 0xbc2   : > { %7894 = vst.msk [vmem:[%s15570_s22 + $0x70] sm:$0xff] %vm495_vm0, %v7862_v59  ;;  %v7761_v60 = vmul.f32 %v15555_v9, %v7659_v20 }
 0xbc3   : > { %v7801_v62 = vadd.f32 %v15560_v23, %v7762_v7 }
 0xbc4   : > { %v7800_v33 = vadd.f32 %v15560_v23, %v7761_v60 }
 0xbc5   : > { %v7833_v19 = vadd.f32 %v8836_v37, %v7801_v62  ;;  %v8846_v62 = vld [vmem:[%s9147_s18 + $0xd8] sm:$0xff]  ;;  %v8847_v37 = vld [vmem:[%s9147_s18 + $0xd0] sm:$0xff] }
 0xbc6   : > { %v7832_v18 = vadd.f32 %v8837_v53, %v7800_v33 }
 0xbc7   : > { %v7865_v48 = vmax.f32 %v7833_v19, 0.0 }
 0xbc8   : > { %v7864_v49 = vmax.f32 %v7832_v18, 0.0  ;;  %v8652_v50 = vpop.f32.mrb[66].mxu0 }
 0xbc9   : > { %7897 = vst.msk [vmem:[%s15570_s22 + $0x88] sm:$0xff] %vm495_vm0, %v7865_v48  ;;  %v7764_v22 = vmul.f32 %v8652_v50, %v15555_v9  ;;  %v7669_v29 = vpop.f32.mrb[67].mxu0 }
 0xbca   : > { %7896 = vst.msk [vmem:[%s15570_s22 + $0x80] sm:$0xff] %vm495_vm0, %v7864_v49  ;;  %v7763_v17 = vmul.f32 %v15555_v9, %v7669_v29 }
 0xbcb   : > { %v7803_v61 = vadd.f32 %v15560_v23, %v7764_v22 }
 0xbcc   : > { %v7802_v10 = vadd.f32 %v15560_v23, %v7763_v17 }
 0xbcd   : > { %v7835_v24 = vadd.f32 %v8838_v6, %v7803_v61  ;;  %v8848_v61 = vld [vmem:[%s9147_s18 + $0xe8] sm:$0xff]  ;;  %v8849_v6 = vld [vmem:[%s9147_s18 + $0xe0] sm:$0xff] }
 0xbce   : > { %v7834_v41 = vadd.f32 %v8839_v32, %v7802_v10 }
 0xbcf   : > { %v7867_v38 = vmax.f32 %v7835_v24, 0.0 }
 0xbd0   : > { %v7866_v8 = vmax.f32 %v7834_v41, 0.0  ;;  %v8655_v63 = vpop.f32.mrb[68].mxu0 }
 0xbd1   : > { %7899 = vst.msk [vmem:[%s15570_s22 + $0x98] sm:$0xff] %vm495_vm0, %v7867_v38  ;;  %v7766_v15 = vmul.f32 %v8655_v63, %v15555_v9  ;;  %v7679_v16 = vpop.f32.mrb[69].mxu0 }
 0xbd2   : > { %7898 = vst.msk [vmem:[%s15570_s22 + $0x90] sm:$0xff] %vm495_vm0, %v7866_v8  ;;  %v7765_v57 = vmul.f32 %v15555_v9, %v7679_v16 }
 0xbd3   : > { %v7805_v26 = vadd.f32 %v15560_v23, %v7766_v15 }
 0xbd4   : > { %v7804_v44 = vadd.f32 %v15560_v23, %v7765_v57 }
 0xbd5   : > { %v7837_v51 = vadd.f32 %v8840_v1, %v7805_v26  ;;  %v8850_v26 = vld [vmem:[%s9147_s18 + $0xf8] sm:$0xff]  ;;  %v8851_v1 = vld [vmem:[%s9147_s18 + $0xf0] sm:$0xff]  ;;  %s8965_s18 = smov [#allocation5]  }
 0xbd6   : > { %v7836_v39 = vadd.f32 %v8841_v56, %v7804_v44  ;;  %s8886_s26 = sshll.u32 %s8965_s18, 4  ;;  %s8887_s26 = int_to_ptr.vmem [resolvable:$false] %s8886_s26 }
 0xbd7   : > { %v7869_v27 = vmax.f32 %v7837_v51, 0.0  ;;  %s8888_s15 = scalar_lea.vmem %s8887_s26, 8192  ;;  %p8889_p8 = scmp.lt.s32.totalorder %s15729_s14, %s8887_s26 }
 0xbd8   : > { %v7868_v42 = vmax.f32 %v7836_v39, 0.0  ;;  %v8658_v52 = vpop.f32.mrb[70].mxu0  ;;  %p8890_p10 = scmp.lt.s32.totalorder %s8888_s15, %s8882_s2 }
 0xbd9   : > { %7901 = vst.msk [vmem:[%s15570_s22 + $0xa8] sm:$0xff] %vm495_vm0, %v7869_v27  ;;  %v7768_v11 = vmul.f32 %v8658_v52, %v15555_v9  ;;  %v7689_v40 = vpop.f32.mrb[71].mxu0 }
 0xbda   : > { %7900 = vst.msk [vmem:[%s15570_s22 + $0xa0] sm:$0xff] %vm495_vm0, %v7868_v42  ;;  %v7767_v3 = vmul.f32 %v15555_v9, %v7689_v40  ;;  %p8891_p0 = por %p8890_p10, %p8889_p8 }
 0xbdb   : > { %v7807_v34 = vadd.f32 %v15560_v23, %v7768_v11 }
 0xbdc   : > { %v7806_v46 = vadd.f32 %v15560_v23, %v7767_v3  ;;  %p8892_p2 = pnand %p8891_p0, %p8885_p13 }
 0xbdd   : > { %v7839_v21 = vadd.f32 %v8842_v12, %v7807_v34 }
 0xbde   : > { %v7838_v30 = vadd.f32 %v8843_v36, %v7806_v46 }
 0xbdf   : > { %v7871_v28 = vmax.f32 %v7839_v21, 0.0 }
 0xbe0   : > { %v7870_v0 = vmax.f32 %v7838_v30, 0.0  ;;  %v8661_v45 = vpop.f32.mrb[72].mxu0 }
 0xbe1   : > { %7903 = vst.msk [vmem:[%s15570_s22 + $0xb8] sm:$0xff] %vm495_vm0, %v7871_v28  ;;  %v7770_v31 = vmul.f32 %v8661_v45, %v15555_v9  ;;  %v7699_v54 = vpop.f32.mrb[73].mxu0 }
 0xbe2   : > { %7902 = vst.msk [vmem:[%s15570_s22 + $0xb0] sm:$0xff] %vm495_vm0, %v7870_v0  ;;  %v7769_v2 = vmul.f32 %v15555_v9, %v7699_v54 }
 0xbe3   : > { %v7809_v55 = vadd.f32 %v15560_v23, %v7770_v31 }
 0xbe4   : > { %v7808_v25 = vadd.f32 %v15560_v23, %v7769_v2 }
 0xbe5   : > { %v7841_v35 = vadd.f32 %v8844_v5, %v7809_v55 }
 0xbe6   : > { %v7840_v13 = vadd.f32 %v8845_v4, %v7808_v25 }
 0xbe7   : > { %v7873_v43 = vmax.f32 %v7841_v35, 0.0 }
 0xbe8   : > { %v7872_v14 = vmax.f32 %v7840_v13, 0.0  ;;  %v8664_v58 = vpop.f32.mrb[74].mxu0 }
 0xbe9   : > { %7905 = vst.msk [vmem:[%s15570_s22 + $0xc8] sm:$0xff] %vm495_vm0, %v7873_v43  ;;  %v7772_v59 = vmul.f32 %v8664_v58, %v15555_v9  ;;  %v7709_v47 = vpop.f32.mrb[75].mxu0 }
 0xbea   : > { %7904 = vst.msk [vmem:[%s15570_s22 + $0xc0] sm:$0xff] %vm495_vm0, %v7872_v14  ;;  %v7771_v7 = vmul.f32 %v15555_v9, %v7709_v47 }
 0xbeb   : > { %v7811_v20 = vadd.f32 %v15560_v23, %v7772_v59 }
 0xbec   : > { %v7810_v60 = vadd.f32 %v15560_v23, %v7771_v7 }
 0xbed   : > { %v7843_v33 = vadd.f32 %v8846_v62, %v7811_v20 }
 0xbee   : > { %v7842_v19 = vadd.f32 %v8847_v37, %v7810_v60 }
 0xbef   : > { %v7875_v53 = vmax.f32 %v7843_v33, 0.0 }
 0xbf0   : > { %v7874_v18 = vmax.f32 %v7842_v19, 0.0  ;;  %v8667_v48 = vpop.f32.mrb[76].mxu0 }
 0xbf1   : > { %7907 = vst.msk [vmem:[%s15570_s22 + $0xd8] sm:$0xff] %vm495_vm0, %v7875_v53  ;;  %v7774_v49 = vmul.f32 %v8667_v48, %v15555_v9  ;;  %v7719_v50 = vpop.f32.mrb[77].mxu0 }
 0xbf2   : > { %7906 = vst.msk [vmem:[%s15570_s22 + $0xd0] sm:$0xff] %vm495_vm0, %v7874_v18  ;;  %v7773_v22 = vmul.f32 %v15555_v9, %v7719_v50 }
 0xbf3   : > { %v7813_v29 = vadd.f32 %v15560_v23, %v7774_v49 }
 0xbf4   : > { %v7812_v17 = vadd.f32 %v15560_v23, %v7773_v22 }
 0xbf5   : > { %v7845_v10 = vadd.f32 %v8848_v61, %v7813_v29 }
 0xbf6   : > { %v7844_v24 = vadd.f32 %v8849_v6, %v7812_v17 }
 0xbf7   : > { %v7877_v32 = vmax.f32 %v7845_v10, 0.0 }
 0xbf8   : > { %v7876_v41 = vmax.f32 %v7844_v24, 0.0  ;;  %v8670_v38 = vpop.f32.mrb[78].mxu0 }
 0xbf9   : > { %7909 = vst.msk [vmem:[%s15570_s22 + $0xe8] sm:$0xff] %vm495_vm0, %v7877_v32  ;;  %v7776_v8 = vmul.f32 %v8670_v38, %v15555_v9  ;;  %v7729_v63 = vpop.f32.mrb[79].mxu0 }
 0xbfa   : > { %7908 = vst.msk [vmem:[%s15570_s22 + $0xe0] sm:$0xff] %vm495_vm0, %v7876_v41  ;;  %v7775_v15 = vmul.f32 %v15555_v9, %v7729_v63 }
 0xbfb   : > { %v7815_v16 = vadd.f32 %v15560_v23, %v7776_v8 }
 0xbfc   : > { %v7814_v57 = vadd.f32 %v15560_v23, %v7775_v15 }
 0xbfd   : > { %v7847_v44 = vadd.f32 %v8850_v26, %v7815_v16 }
 0xbfe   : > { %v7846_v51 = vadd.f32 %v8851_v1, %v7814_v57 }
 0xbff   : > { %v7879_v56 = vmax.f32 %v7847_v44, 0.0 }
 0xc00   : > { %v7878_v39 = vmax.f32 %v7846_v51, 0.0 }
 0xc01   : > { %7911 = vst.msk [vmem:[%s15570_s22 + $0xf8] sm:$0xff] %vm495_vm0, %v7879_v56 }
 0xc02   : > { %7910 = vst.msk [vmem:[%s15570_s22 + $0xf0] sm:$0xff] %vm495_vm0, %v7878_v39 }
 0xc03   : > { %8895 = shalt.err (!%p8892_p2)
}
 0xc04   : > { %s8896_s16 = scalar_lea.hbm %s15727_s1, 4096  ;;  %s8900_s3 = scalar_lea.hbm %s15791_s13, 8192 }
 0xc05   : > { %p8897_p4 = scmp.ne.s32.totalorder %s15727_s1, %s8896_s16  ;;  %p8901_p9 = scmp.lt.u32.totalorder %s15727_s1, %s15791_s13 }
 0xc06   : > { %p8902_p1 = scmp.lt.u32.totalorder %s8900_s3, %s8896_s16  ;;  %p8904_p6 = scmp.lt.u32.totalorder %s8896_s16, %s15727_s1 }
 0xc07   : > { %p8898_p5 = pnand %p8897_p4, %p17036_p11 }
 0xc08   : > { %p8903_p3 = por %p8902_p1, %p8901_p9 }
 0xc09   : > { %p8899_p7 = pneg %p8898_p5 }
 0xc0a   : > { %p8905_p12 = por %p8904_p6, %p8903_p3 }
 0xc0c   : > { %p8906_p13 = pnand %p8905_p12, %p8899_p7 }
 0xc0e   : > { %8909 = shalt.err (!%p8906_p13)
}
 0xc0f   : > { %s8966_s19 = smov 128  }
 0xc10   : > { %8715 = dma.vmem_to_hbm [thread:$0]  (%p17036_p11), %s15729_s14, 4096, %s15727_s1, %s7913_s29, %s8966_s19, %s8966_s19, %s16747_s24  }
 0xc11 PF: > { %s17037_s25 = sld [smem:[#allocation8_spill]]  ;;  %p17038_p8 = scmp.ne.s32.totalorder %s16145_s21, 0 }
 0xc12   : > { %p17039_p10 = scmp.ge.s32.totalorder %s8948_s28, 2 }
 0xc14   : > { %p8722_p0 = pnand %p17039_p10, %p17038_p8 }
 0xc17   : > { %s7941_s0 = sand.u32 1, %s17037_s25  }
 0xc18   : > { %s7942_s2 = scalar_lea.sflag [#allocation4], %s7941_s0 }
 0xc19   : > { %8931 = dma.done.wait (!%p8722_p0), %s7942_s2, 4096  }
 0xc1a   : > { %8933 = vsyncadd (!%p8722_p0), %s7942_s2, 4294963200  ;;  %s17040_s28 = sld [smem:[#allocation11_spill]]  ;;  %s17041_s25 = sld [smem:[#allocation9_spill]] }
 0xc1b   : > { %s17042_s26 = sld [smem:[#allocation10_spill]]  ;;  %s17043_s27 = sld [smem:[#allocation12_spill]] }
 0xc20   : > { %p26_p2 = scmp.ge.s32.totalorder %s17040_s28, 4  }
 0xc22   :  { %28 = sbr.rel (!%p26_p2) target bundleno = 10 (0xa), region = 123 }
 0xc29   :  { %7947 = vsyncpa [#allocation3], 1 }
 0xc2a   :  { %7949 = vsyncpa [#allocation3 + $0x1], 1 }
 0xc2b   :  { %7950 = vsyncpa [#allocation4], 1 }
 0xc2c   :  { %7952 = vsyncpa [#allocation4 + $0x1], 1 }

</bundles_post_ra>
